<compile_context>
chip_gen: v7x
topology: tpu7x:2x2x1
jax: 0.10.0
libtpu: 0.0.40
codegen_flags: <defaults>
</compile_context>

<pallas_src>
import functools

import numpy as np

import jax
import jax.numpy as jnp
from jax import lax
from jax.experimental import pallas as pl
from jax.experimental.pallas import tpu as pltpu

NGF = 8    # the PyTorch script's global `ngf`
NZ = 50    # channels fed to self.main (first ConvTranspose2d has in_channels=50)
EPS = 1e-5

_COMPILER_PARAMS = pltpu.CompilerParams(vmem_limit_bytes=32 * 1024 * 1024)


# ----------------------------------------------------------------------------
# Pallas kernels
# ----------------------------------------------------------------------------
def _l1_kernel(z_ref, w_ref, o_ref):
    # Layer 1: ConvTranspose2d(NZ, 4*ngf, (12,10), 1, 0) on a 1x1 input == GEMM.
    o_ref[...] = jnp.dot(z_ref[...].astype(jnp.bfloat16), w_ref[...],
                         preferred_element_type=jnp.float32)


def l1_matmul(z, w1mat):
    b, _ = z.shape
    n = w1mat.shape[1]
    return pl.pallas_call(
        _l1_kernel,
        out_shape=jax.ShapeDtypeStruct((b, n), jnp.float32),
        compiler_params=_COMPILER_PARAMS,
    )(z, w1mat)


def _bn_relu_mm_kernel(x_ref, g_ref, b_ref, w_ref, o_ref, *, eps):
    # BatchNorm (batch stats over rows, biased var) + ReLU fused into the
    # following ConvTranspose2d(k=2, s=2) per-pixel matmul.
    x = x_ref[...]                                   # (rows, Cin) f32
    mean = jnp.mean(x, axis=0, keepdims=True)
    d = x - mean
    var = jnp.mean(d * d, axis=0, keepdims=True)
    scale = g_ref[...] * lax.rsqrt(var + eps)
    shift = b_ref[...] - mean * scale
    xn = jnp.maximum(x * scale + shift, 0.0)
    o_ref[...] = jnp.dot(xn.astype(jnp.bfloat16), w_ref[...],
                         preferred_element_type=jnp.float32)


def bn_relu_matmul(x, gamma, beta, wmat):
    rows, _ = x.shape
    n = wmat.shape[1]
    return pl.pallas_call(
        functools.partial(_bn_relu_mm_kernel, eps=EPS),
        out_shape=jax.ShapeDtypeStruct((rows, n), jnp.float32),
        compiler_params=_COMPILER_PARAMS,
    )(x, gamma, beta, wmat)


def _final_kernel(x_ref, g_ref, b_ref, gsum_ref, gexp_ref, w0_ref, w1_ref,
                  o_ref, xpad_ref, *, eps, batch, h, w, c, wimg):
    # Fused: BN3 + ReLU + ConvTranspose2d(c, 1, 4, 2, 1) + tanh + nearest 2x.
    #   x_ref    : (batch*h, w*c) f32, rows=(b,row), cols=(col, ch)
    #   gsum_ref : (w*c, c)  one-hot "group by channel" matrix
    #   gexp_ref : (c, w*c)  its transpose (broadcast per-channel -> lanes)
    #   w0/w1    : (3*w*c, wimg) banded deconv weights for output-row parity 0/1
    #              (width parity interleave + 2x width upsample folded in)
    #   o_ref    : (batch, h, 4*wimg) -- cols = (q, x) with q in {P0,P0,P1,P1}
    #   xpad_ref : (batch, h+2, w*c) VMEM scratch, zero padded in H.
    x = x_ref[...]
    cnt = float(batch * h * w)

    # --- BN3 statistics per channel (channel = lane index mod c) ------------
    s = jnp.sum(x, axis=0, keepdims=True)                                  # (1, w*c)
    mean_c = jnp.dot(s, gsum_ref[...], preferred_element_type=jnp.float32) / cnt
    mean_l = jnp.dot(mean_c, gexp_ref[...], preferred_element_type=jnp.float32)
    d = x - mean_l
    ssq = jnp.sum(d * d, axis=0, keepdims=True)
    var_c = jnp.dot(ssq, gsum_ref[...], preferred_element_type=jnp.float32) / cnt
    scale_c = g_ref[...] * lax.rsqrt(var_c + eps)
    shift_c = b_ref[...] - mean_c * scale_c
    scale_l = jnp.dot(scale_c, gexp_ref[...], preferred_element_type=jnp.float32)
    shift_l = jnp.dot(shift_c, gexp_ref[...], preferred_element_type=jnp.float32)
    xn = jnp.maximum(x * scale_l + shift_l, 0.0)                           # (B*h, w*c)

    # --- zero-pad in H (conv padding of the *normalized* activation) --------
    xpad_ref[...] = jnp.zeros_like(xpad_ref)
    for b_ in range(batch):
        xpad_ref[b_, 1:h + 1, :] = xn[b_ * h:(b_ + 1) * h, :]

    # --- deconv as 3 shifted row-window matmuls + tanh + row interleave -----
    wc = w * c
    for b_ in range(batch):
        acc0 = jnp.zeros((h, wimg), jnp.float32)
        acc1 = jnp.zeros((h, wimg), jnp.float32)
        for di in range(3):                          # dh = di - 1
            xs = xpad_ref[b_, di:di + h, :].astype(jnp.bfloat16)
            acc0 = acc0 + jnp.dot(xs, w0_ref[di * wc:(di + 1) * wc, :],
                                  preferred_element_type=jnp.float32)
            acc1 = acc1 + jnp.dot(xs, w1_ref[di * wc:(di + 1) * wc, :],
                                  preferred_element_type=jnp.float32)
        p0 = jnp.tanh(acc0)                          # conv rows 2m   (a=0), 2x wide
        p1 = jnp.tanh(acc1)                          # conv rows 2m+1 (a=1), 2x wide
        # final image rows per m: [4m, 4m+1, 4m+2, 4m+3] = [p0, p0, p1, p1]
        o_ref[b_, :, 0 * wimg:1 * wimg] = p0
        o_ref[b_, :, 1 * wimg:2 * wimg] = p0
        o_ref[b_, :, 2 * wimg:3 * wimg] = p1
        o_ref[b_, :, 3 * wimg:4 * wimg] = p1


def final_layer(x3, gamma, beta, gsum, gexp, w0, w1, *, batch, h=48, w=40, c=NGF):
    wimg = 4 * w                                     # 160 = final image width
    return pl.pallas_call(
        functools.partial(_final_kernel, eps=EPS, batch=batch, h=h, w=w, c=c,
                          wimg=wimg),
        out_shape=jax.ShapeDtypeStruct((batch, h, 4 * wimg), jnp.float32),
        scratch_shapes=[pltpu.VMEM((batch, h + 2, w * c), jnp.float32)],
        compiler_params=_COMPILER_PARAMS,
    )(x3, gamma, beta, gsum, gexp, w0, w1)


# ----------------------------------------------------------------------------
# One-time weight repacking (hoisted out of the jitted forward)
# ----------------------------------------------------------------------------
def _build_final_weights(w4, w_in=40):
    """Banded weights for ConvTranspose2d(c, 1, 4, stride=2, pad=1) + 2x width
    upsample.  Output column c_out in [0, 4*w_in): v = c_out//2 is the 80-wide
    conv column, parity b = v%2, base input column n0 = v//2.  Tap table
    (k = o - 2i + 1): parity 0 -> (d=0,k=1),(d=-1,k=3); parity 1 -> (d=1,k=0),(d=0,k=2).
    K axis ordered (dh in {-1,0,1}, n, ch)."""
    c = w4.shape[0]
    taps = {0: ((0, 1), (-1, 3)), 1: ((1, 0), (0, 2))}
    wimg = 4 * w_in
    wp = np.zeros((2, 3 * w_in * c, wimg), np.float32)
    for a in (0, 1):
        for col in range(wimg):
            v = col // 2
            bb = v % 2
            n0 = v // 2
            for (dh, kh) in taps[a]:
                for (dw, kw) in taps[bb]:
                    n = n0 + dw
                    if 0 <= n < w_in:
                        base = (dh + 1) * w_in * c + n * c
                        wp[a, base:base + c, col] += w4[:, 0, kh, kw]
    return wp[0], wp[1]


def prepare_params(params):
    c1, c2, c3 = NGF * 4, NGF * 2, NGF

    w1 = np.asarray(params["w1"], np.float32)                 # (NZ, c1, 12, 10)
    w1mat = np.transpose(w1, (0, 2, 3, 1)).reshape(NZ, 12 * 10 * c1)   # cols (h,w,c)

    w2 = np.asarray(params["w2"], np.float32)                 # (c1, c2, 2, 2)
    w2mat = np.transpose(w2, (0, 2, 3, 1)).reshape(c1, 4 * c2)         # cols (kh,kw,o)

    w3 = np.asarray(params["w3"], np.float32)
    w3mat = np.transpose(w3, (0, 2, 3, 1)).reshape(c2, 4 * c3)

    w4 = np.asarray(params["w4"], np.float32)                 # (c3, 1, 4, 4)
    w4a0, w4a1 = _build_final_weights(w4, w_in=40)

    gsum = np.zeros((40 * c3, c3), np.float32)                # group lanes by channel
    for n in range(40):
        for ch in range(c3):
            gsum[n * c3 + ch, ch] = 1.0
    gexp = np.ascontiguousarray(gsum.T)

    def vec(name):
        return jnp.asarray(np.asarray(params[name], np.float32).reshape(1, -1))

    return {
        "w1mat": jnp.asarray(w1mat, jnp.bfloat16),
        "w2mat": jnp.asarray(w2mat, jnp.bfloat16),
        "w3mat": jnp.asarray(w3mat, jnp.bfloat16),
        "w4a0": jnp.asarray(w4a0, jnp.bfloat16),
        "w4a1": jnp.asarray(w4a1, jnp.bfloat16),
        "gsum": jnp.asarray(gsum, jnp.float32),
        "gexp": jnp.asarray(gexp, jnp.float32),
        "g1": vec("g1"), "b1": vec("b1"),
        "g2": vec("g2"), "b2": vec("b2"),
        "g3": vec("g3"), "b3": vec("b3"),
    }


def init_params(key):
    c1, c2, c3 = NGF * 4, NGF * 2, NGF
    ks = jax.random.split(key, 10)

    def nrm(k, shape, scale=0.02):
        return scale * jax.random.normal(k, shape, jnp.float32)

    # nn.ConvTranspose2d weight shape is (in_channels, out_channels, kH, kW).
    # self.MLP / self.mixer exist in __init__ but are unused by forward().
    return {
        "w1": nrm(ks[0], (NZ, c1, 12, 10)),
        "g1": 1.0 + 0.1 * jax.random.normal(ks[1], (c1,), jnp.float32),
        "b1": 0.1 * jax.random.normal(ks[2], (c1,), jnp.float32),
        "w2": nrm(ks[3], (c1, c2, 2, 2)),
        "g2": 1.0 + 0.1 * jax.random.normal(ks[4], (c2,), jnp.float32),
        "b2": 0.1 * jax.random.normal(ks[5], (c2,), jnp.float32),
        "w3": nrm(ks[6], (c2, c3, 2, 2)),
        "g3": 1.0 + 0.1 * jax.random.normal(ks[7], (c3,), jnp.float32),
        "b3": 0.1 * jax.random.normal(ks[8], (c3,), jnp.float32),
        "w4": nrm(ks[9], (c3, 1, 4, 4)),
    }


# ----------------------------------------------------------------------------
# Forward pass
# ----------------------------------------------------------------------------
def conditional_generator_forward(pp, z, label):
    del label                              # unused by the PyTorch forward()
    B = z.shape[0]
    c1, c2, c3 = NGF * 4, NGF * 2, NGF

    # z.squeeze().unsqueeze(-1).unsqueeze(-1) -> (B, NZ, 1, 1); 1x1 spatial input
    # makes the first ConvTranspose2d a GEMM.
    zc = z.reshape(B, NZ)
    x1 = l1_matmul(zc, pp["w1mat"])                                # (B, 12*10*c1)
    x1 = x1.reshape(B * 12 * 10, c1)                               # rows=(b,h,w)

    # BN1 + ReLU + ConvTranspose2d(c1, c2, 2, 2)  (k==s -> per-pixel matmul)
    h2 = bn_relu_matmul(x1, pp["g1"], pp["b1"], pp["w2mat"])       # (240, 4*c2)
    x2 = (h2.reshape(B, 12, 10, 2, 2, c2)
            .transpose(0, 1, 3, 2, 4, 5)
            .reshape(B * 24 * 20, c2))                             # depth-to-space

    # BN2 + ReLU + ConvTranspose2d(c2, c3, 2, 2)
    h3 = bn_relu_matmul(x2, pp["g2"], pp["b2"], pp["w3mat"])       # (960, 4*c3)
    x3 = (h3.reshape(B, 24, 20, 2, 2, c3)
            .transpose(0, 1, 3, 2, 4, 5)
            .reshape(B * 48, 40 * c3))                             # rows=(b,h), cols=(w,ch)

    # BN3 + ReLU + ConvTranspose2d(c3, 1, 4, 2, 1) + tanh + nearest 2x upsample
    out = final_layer(x3, pp["g3"], pp["b3"], pp["gsum"], pp["gexp"],
                      pp["w4a0"], pp["w4a1"], batch=B)             # (B, 48, 640)
    img = out.reshape(B, 192, 160)                                 # free reshape
    return img[:, None, :, :]                                      # NCHW


if __name__ == "__main__":
    key = jax.random.PRNGKey(0)
    kp, kz, kl = jax.random.split(key, 3)
    raw_params = init_params(kp)
    packed = prepare_params(raw_params)        # one-time weight repacking

    B = 2
    z = jax.random.normal(kz, (B, NZ, 1, 1), jnp.float32)
    label = jax.random.randint(kl, (B,), 0, 10)     # unused by forward

    fwd = jax.jit(conditional_generator_forward)
    img = jax.block_until_ready(fwd(packed, z, label))

    assert img.shape == (B, 1, 192, 160), img.shape
    assert img.dtype == jnp.float32
    assert bool(jnp.all(jnp.isfinite(img)))
    assert bool(jnp.all(jnp.abs(img) <= 1.0))       # tanh range
    print("KERNEL_OK")
</pallas_src>

<mosaic_0001>
module attributes {stable_mosaic.version = 11 : i64} {
  func.func @_l1_kernel(%arg0: memref<2x50xf32, #tpu.memory_space<vmem>>, %arg1: memref<50x3840xbf16, #tpu.memory_space<vmem>>, %arg2: memref<2x3840xf32, #tpu.memory_space<vmem>>) attributes {dimension_semantics = [], scalar_prefetch = 0 : i64, scratch_operands = 0 : i64, tpu.core_type = #tpu.core_type<tc>} {
    %c0 = arith.constant 0 : index
    %c0_0 = arith.constant 0 : index
    %0 = vector.load %arg0[%c0, %c0_0] : memref<2x50xf32, #tpu.memory_space<vmem>>, vector<2x50xf32>
    %1 = arith.truncf %0 : vector<2x50xf32> to vector<2x50xbf16>
    %c0_1 = arith.constant 0 : index
    %c0_2 = arith.constant 0 : index
    %2 = vector.load %arg1[%c0_1, %c0_2] : memref<50x3840xbf16, #tpu.memory_space<vmem>>, vector<50x3840xbf16>
    %cst = arith.constant dense<0.000000e+00> : vector<2x3840xf32>
    %3 = tpu.matmul %1, %2, %cst {dimension_numbers = #tpu.dot_dimension_numbers<[1], [0], [0], [1], [0, 0, 1, 1], [], []>} : vector<2x50xbf16>, vector<50x3840xbf16>, vector<2x3840xf32> -> vector<2x3840xf32>
    %c0_3 = arith.constant 0 : index
    %c0_4 = arith.constant 0 : index
    %4 = vector.load %arg2[%c0_3, %c0_4] : memref<2x3840xf32, #tpu.memory_space<vmem>>, vector<2x3840xf32>
    tpu.vector_store %arg2[%c0_3, %c0_4], %3 {strides = array<i32>} : memref<2x3840xf32, #tpu.memory_space<vmem>>, vector<2x3840xf32>,
    return
  }
}

module attributes {stable_mosaic.version = 11 : i64} {
  func.func @_bn_relu_mm_kernel(%arg0: memref<240x32xf32, #tpu.memory_space<vmem>>, %arg1: memref<1x32xf32, #tpu.memory_space<vmem>>, %arg2: memref<1x32xf32, #tpu.memory_space<vmem>>, %arg3: memref<32x64xbf16, #tpu.memory_space<vmem>>, %arg4: memref<240x64xf32, #tpu.memory_space<vmem>>) attributes {dimension_semantics = [], scalar_prefetch = 0 : i64, scratch_operands = 0 : i64, tpu.core_type = #tpu.core_type<tc>} {
    %c0 = arith.constant 0 : index
    %c0_0 = arith.constant 0 : index
    %0 = vector.load %arg0[%c0, %c0_0] : memref<240x32xf32, #tpu.memory_space<vmem>>, vector<240x32xf32>
    %cst = arith.constant dense<0.000000e+00> : vector<32xf32>
    %1 = vector.multi_reduction <add>, %0, %cst [0] : vector<240x32xf32> to vector<32xf32>
    %2 = vector.shape_cast %1 : vector<32xf32> to vector<1x32xf32>
    %cst_1 = arith.constant 2.400000e+02 : f32
    %3 = vector.broadcast %cst_1 : f32 to vector<1x32xf32>
    %4 = arith.divf %2, %3 : vector<1x32xf32>
    %5 = vector.broadcast %4 : vector<1x32xf32> to vector<240x32xf32>
    %6 = arith.subf %0, %5 : vector<240x32xf32>
    %7 = arith.mulf %6, %6 : vector<240x32xf32>
    %cst_2 = arith.constant dense<0.000000e+00> : vector<32xf32>
    %8 = vector.multi_reduction <add>, %7, %cst_2 [0] : vector<240x32xf32> to vector<32xf32>
    %9 = vector.shape_cast %8 : vector<32xf32> to vector<1x32xf32>
    %cst_3 = arith.constant 2.400000e+02 : f32
    %10 = vector.broadcast %cst_3 : f32 to vector<1x32xf32>
    %11 = arith.divf %9, %10 : vector<1x32xf32>
    %c0_4 = arith.constant 0 : index
    %c0_5 = arith.constant 0 : index
    %12 = vector.load %arg1[%c0_4, %c0_5] : memref<1x32xf32, #tpu.memory_space<vmem>>, vector<1x32xf32>
    %cst_6 = arith.constant 9.99999974E-6 : f32
    %13 = vector.broadcast %cst_6 : f32 to vector<1x32xf32>
    %14 = arith.addf %11, %13 : vector<1x32xf32>
    %15 = math.rsqrt %14 : vector<1x32xf32>
    %16 = arith.mulf %12, %15 : vector<1x32xf32>
    %c0_7 = arith.constant 0 : index
    %c0_8 = arith.constant 0 : index
    %17 = vector.load %arg2[%c0_7, %c0_8] : memref<1x32xf32, #tpu.memory_space<vmem>>, vector<1x32xf32>
    %18 = arith.mulf %4, %16 : vector<1x32xf32>
    %19 = arith.subf %17, %18 : vector<1x32xf32>
    %20 = vector.broadcast %16 : vector<1x32xf32> to vector<240x32xf32>
    %21 = arith.mulf %0, %20 : vector<240x32xf32>
    %22 = vector.broadcast %19 : vector<1x32xf32> to vector<240x32xf32>
    %23 = arith.addf %21, %22 : vector<240x32xf32>
    %cst_9 = arith.constant 0.000000e+00 : f32
    %24 = vector.broadcast %cst_9 : f32 to vector<240x32xf32>
    %25 = arith.maximumf %23, %24 : vector<240x32xf32>
    %26 = arith.truncf %25 : vector<240x32xf32> to vector<240x32xbf16>
    %c0_10 = arith.constant 0 : index
    %c0_11 = arith.constant 0 : index
    %27 = vector.load %arg3[%c0_10, %c0_11] : memref<32x64xbf16, #tpu.memory_space<vmem>>, vector<32x64xbf16>
    %cst_12 = arith.constant dense<0.000000e+00> : vector<240x64xf32>
    %28 = tpu.matmul %26, %27, %cst_12 {dimension_numbers = #tpu.dot_dimension_numbers<[1], [0], [0], [1], [0, 0, 1, 1], [], []>} : vector<240x32xbf16>, vector<32x64xbf16>, vector<240x64xf32> -> vector<240x64xf32>
    %c0_13 = arith.constant 0 : index
    %c0_14 = arith.constant 0 : index
    %29 = vector.load %arg4[%c0_13, %c0_14] : memref<240x64xf32, #tpu.memory_space<vmem>>, vector<240x64xf32>
    tpu.vector_store %arg4[%c0_13, %c0_14], %28 {strides = array<i32>} : memref<240x64xf32, #tpu.memory_space<vmem>>, vector<240x64xf32>,
    return
  }
}

module attributes {stable_mosaic.version = 11 : i64} {
  func.func @_bn_relu_mm_kernel(%arg0: memref<960x16xf32, #tpu.memory_space<vmem>>, %arg1: memref<1x16xf32, #tpu.memory_space<vmem>>, %arg2: memref<1x16xf32, #tpu.memory_space<vmem>>, %arg3: memref<16x32xbf16, #tpu.memory_space<vmem>>, %arg4: memref<960x32xf32, #tpu.memory_space<vmem>>) attributes {dimension_semantics = [], scalar_prefetch = 0 : i64, scratch_operands = 0 : i64, tpu.core_type = #tpu.core_type<tc>} {
    %c0 = arith.constant 0 : index
    %c0_0 = arith.constant 0 : index
    %0 = vector.load %arg0[%c0, %c0_0] : memref<960x16xf32, #tpu.memory_space<vmem>>, vector<960x16xf32>
    %cst = arith.constant dense<0.000000e+00> : vector<16xf32>
    %1 = vector.multi_reduction <add>, %0, %cst [0] : vector<960x16xf32> to vector<16xf32>
    %2 = vector.shape_cast %1 : vector<16xf32> to vector<1x16xf32>
    %cst_1 = arith.constant 9.600000e+02 : f32
    %3 = vector.broadcast %cst_1 : f32 to vector<1x16xf32>
    %4 = arith.divf %2, %3 : vector<1x16xf32>
    %5 = vector.broadcast %4 : vector<1x16xf32> to vector<960x16xf32>
    %6 = arith.subf %0, %5 : vector<960x16xf32>
    %7 = arith.mulf %6, %6 : vector<960x16xf32>
    %cst_2 = arith.constant dense<0.000000e+00> : vector<16xf32>
    %8 = vector.multi_reduction <add>, %7, %cst_2 [0] : vector<960x16xf32> to vector<16xf32>
    %9 = vector.shape_cast %8 : vector<16xf32> to vector<1x16xf32>
    %cst_3 = arith.constant 9.600000e+02 : f32
    %10 = vector.broadcast %cst_3 : f32 to vector<1x16xf32>
    %11 = arith.divf %9, %10 : vector<1x16xf32>
    %c0_4 = arith.constant 0 : index
    %c0_5 = arith.constant 0 : index
    %12 = vector.load %arg1[%c0_4, %c0_5] : memref<1x16xf32, #tpu.memory_space<vmem>>, vector<1x16xf32>
    %cst_6 = arith.constant 9.99999974E-6 : f32
    %13 = vector.broadcast %cst_6 : f32 to vector<1x16xf32>
    %14 = arith.addf %11, %13 : vector<1x16xf32>
    %15 = math.rsqrt %14 : vector<1x16xf32>
    %16 = arith.mulf %12, %15 : vector<1x16xf32>
    %c0_7 = arith.constant 0 : index
    %c0_8 = arith.constant 0 : index
    %17 = vector.load %arg2[%c0_7, %c0_8] : memref<1x16xf32, #tpu.memory_space<vmem>>, vector<1x16xf32>
    %18 = arith.mulf %4, %16 : vector<1x16xf32>
    %19 = arith.subf %17, %18 : vector<1x16xf32>
    %20 = vector.broadcast %16 : vector<1x16xf32> to vector<960x16xf32>
    %21 = arith.mulf %0, %20 : vector<960x16xf32>
    %22 = vector.broadcast %19 : vector<1x16xf32> to vector<960x16xf32>
    %23 = arith.addf %21, %22 : vector<960x16xf32>
    %cst_9 = arith.constant 0.000000e+00 : f32
    %24 = vector.broadcast %cst_9 : f32 to vector<960x16xf32>
    %25 = arith.maximumf %23, %24 : vector<960x16xf32>
    %26 = arith.truncf %25 : vector<960x16xf32> to vector<960x16xbf16>
    %c0_10 = arith.constant 0 : index
    %c0_11 = arith.constant 0 : index
    %27 = vector.load %arg3[%c0_10, %c0_11] : memref<16x32xbf16, #tpu.memory_space<vmem>>, vector<16x32xbf16>
    %cst_12 = arith.constant dense<0.000000e+00> : vector<960x32xf32>
    %28 = tpu.matmul %26, %27, %cst_12 {dimension_numbers = #tpu.dot_dimension_numbers<[1], [0], [0], [1], [0, 0, 1, 1], [], []>} : vector<960x16xbf16>, vector<16x32xbf16>, vector<960x32xf32> -> vector<960x32xf32>
    %c0_13 = arith.constant 0 : index
    %c0_14 = arith.constant 0 : index
    %29 = vector.load %arg4[%c0_13, %c0_14] : memref<960x32xf32, #tpu.memory_space<vmem>>, vector<960x32xf32>
    tpu.vector_store %arg4[%c0_13, %c0_14], %28 {strides = array<i32>} : memref<960x32xf32, #tpu.memory_space<vmem>>, vector<960x32xf32>,
    return
  }
}

module attributes {stable_mosaic.version = 11 : i64} {
  func.func @_final_kernel(%arg0: memref<96x320xf32, #tpu.memory_space<vmem>>, %arg1: memref<1x8xf32, #tpu.memory_space<vmem>>, %arg2: memref<1x8xf32, #tpu.memory_space<vmem>>, %arg3: memref<320x8xf32, #tpu.memory_space<vmem>>, %arg4: memref<8x320xf32, #tpu.memory_space<vmem>>, %arg5: memref<960x160xbf16, #tpu.memory_space<vmem>>, %arg6: memref<960x160xbf16, #tpu.memory_space<vmem>>, %arg7: memref<2x48x640xf32, #tpu.memory_space<vmem>>, %arg8: memref<2x50x320xf32, #tpu.memory_space<vmem>>) attributes {dimension_semantics = [], scalar_prefetch = 0 : i64, scratch_operands = 1 : i64, tpu.core_type = #tpu.core_type<tc>} {
    %c0 = arith.constant 0 : index
    %c0_0 = arith.constant 0 : index
    %0 = vector.load %arg0[%c0, %c0_0] : memref<96x320xf32, #tpu.memory_space<vmem>>, vector<96x320xf32>
    %cst = arith.constant dense<0.000000e+00> : vector<320xf32>
    %1 = vector.multi_reduction <add>, %0, %cst [0] : vector<96x320xf32> to vector<320xf32>
    %2 = vector.shape_cast %1 : vector<320xf32> to vector<1x320xf32>
    %c0_1 = arith.constant 0 : index
    %c0_2 = arith.constant 0 : index
    %3 = vector.load %arg3[%c0_1, %c0_2] : memref<320x8xf32, #tpu.memory_space<vmem>>, vector<320x8xf32>
    %cst_3 = arith.constant dense<0.000000e+00> : vector<1x8xf32>
    %4 = tpu.matmul %2, %3, %cst_3 {dimension_numbers = #tpu.dot_dimension_numbers<[1], [0], [0], [1], [0, 0, 1, 1], [], []>} : vector<1x320xf32>, vector<320x8xf32>, vector<1x8xf32> -> vector<1x8xf32>
    %cst_4 = arith.constant 3.840000e+03 : f32
    %5 = vector.broadcast %cst_4 : f32 to vector<1x8xf32>
    %6 = arith.divf %4, %5 : vector<1x8xf32>
    %c0_5 = arith.constant 0 : index
    %c0_6 = arith.constant 0 : index
    %7 = vector.load %arg4[%c0_5, %c0_6] : memref<8x320xf32, #tpu.memory_space<vmem>>, vector<8x320xf32>
    %cst_7 = arith.constant dense<0.000000e+00> : vector<1x320xf32>
    %8 = tpu.matmul %6, %7, %cst_7 {dimension_numbers = #tpu.dot_dimension_numbers<[1], [0], [0], [1], [0, 0, 1, 1], [], []>} : vector<1x8xf32>, vector<8x320xf32>, vector<1x320xf32> -> vector<1x320xf32>
    %9 = vector.broadcast %8 : vector<1x320xf32> to vector<96x320xf32>
    %10 = arith.subf %0, %9 : vector<96x320xf32>
    %11 = arith.mulf %10, %10 : vector<96x320xf32>
    %cst_8 = arith.constant dense<0.000000e+00> : vector<320xf32>
    %12 = vector.multi_reduction <add>, %11, %cst_8 [0] : vector<96x320xf32> to vector<320xf32>
    %13 = vector.shape_cast %12 : vector<320xf32> to vector<1x320xf32>
    %c0_9 = arith.constant 0 : index
    %c0_10 = arith.constant 0 : index
    %14 = vector.load %arg3[%c0_9, %c0_10] : memref<320x8xf32, #tpu.memory_space<vmem>>, vector<320x8xf32>
    %cst_11 = arith.constant dense<0.000000e+00> : vector<1x8xf32>
    %15 = tpu.matmul %13, %14, %cst_11 {dimension_numbers = #tpu.dot_dimension_numbers<[1], [0], [0], [1], [0, 0, 1, 1], [], []>} : vector<1x320xf32>, vector<320x8xf32>, vector<1x8xf32> -> vector<1x8xf32>
    %cst_12 = arith.constant 3.840000e+03 : f32
    %16 = vector.broadcast %cst_12 : f32 to vector<1x8xf32>
    %17 = arith.divf %15, %16 : vector<1x8xf32>
    %c0_13 = arith.constant 0 : index
    %c0_14 = arith.constant 0 : index
    %18 = vector.load %arg1[%c0_13, %c0_14] : memref<1x8xf32, #tpu.memory_space<vmem>>, vector<1x8xf32>
    %cst_15 = arith.constant 9.99999974E-6 : f32
    %19 = vector.broadcast %cst_15 : f32 to vector<1x8xf32>
    %20 = arith.addf %17, %19 : vector<1x8xf32>
    %21 = math.rsqrt %20 : vector<1x8xf32>
    %22 = arith.mulf %18, %21 : vector<1x8xf32>
    %c0_16 = arith.constant 0 : index
    %c0_17 = arith.constant 0 : index
    %23 = vector.load %arg2[%c0_16, %c0_17] : memref<1x8xf32, #tpu.memory_space<vmem>>, vector<1x8xf32>
    %24 = arith.mulf %6, %22 : vector<1x8xf32>
    %25 = arith.subf %23, %24 : vector<1x8xf32>
    %c0_18 = arith.constant 0 : index
    %c0_19 = arith.constant 0 : index
    %26 = vector.load %arg4[%c0_18, %c0_19] : memref<8x320xf32, #tpu.memory_space<vmem>>, vector<8x320xf32>
    %cst_20 = arith.constant dense<0.000000e+00> : vector<1x320xf32>
    %27 = tpu.matmul %22, %26, %cst_20 {dimension_numbers = #tpu.dot_dimension_numbers<[1], [0], [0], [1], [0, 0, 1, 1], [], []>} : vector<1x8xf32>, vector<8x320xf32>, vector<1x320xf32> -> vector<1x320xf32>
    %c0_21 = arith.constant 0 : index
    %c0_22 = arith.constant 0 : index
    %28 = vector.load %arg4[%c0_21, %c0_22] : memref<8x320xf32, #tpu.memory_space<vmem>>, vector<8x320xf32>
    %cst_23 = arith.constant dense<0.000000e+00> : vector<1x320xf32>
    %29 = tpu.matmul %25, %28, %cst_23 {dimension_numbers = #tpu.dot_dimension_numbers<[1], [0], [0], [1], [0, 0, 1, 1], [], []>} : vector<1x8xf32>, vector<8x320xf32>, vector<1x320xf32> -> vector<1x320xf32>
    %30 = vector.broadcast %27 : vector<1x320xf32> to vector<96x320xf32>
    %31 = arith.mulf %0, %30 : vector<96x320xf32>
    %32 = vector.broadcast %29 : vector<1x320xf32> to vector<96x320xf32>
    %33 = arith.addf %31, %32 : vector<96x320xf32>
    %cst_24 = arith.constant 0.000000e+00 : f32
    %34 = vector.broadcast %cst_24 : f32 to vector<96x320xf32>
    %35 = arith.maximumf %33, %34 : vector<96x320xf32>
    %cst_25 = arith.constant 0.000000e+00 : f32
    %36 = vector.broadcast %cst_25 : f32 to vector<2x50x320xf32>
    %c0_26 = arith.constant 0 : index
    %c0_27 = arith.constant 0 : index
    %c0_28 = arith.constant 0 : index
    %37 = vector.load %arg8[%c0_26, %c0_27, %c0_28] : memref<2x50x320xf32, #tpu.memory_space<vmem>>, vector<2x50x320xf32>
    tpu.vector_store %arg8[%c0_26, %c0_27, %c0_28], %36 {strides = array<i32>} : memref<2x50x320xf32, #tpu.memory_space<vmem>>, vector<2x50x320xf32>,
    %38 = vector.extract_strided_slice %35 {offsets = [0, 0], sizes = [48, 320], strides = [1, 1]} : vector<96x320xf32> to vector<48x320xf32>
    %c0_29 = arith.constant 0 : index
    %c1 = arith.constant 1 : index
    %c0_30 = arith.constant 0 : index
    %39 = vector.load %arg8[%c0_29, %c1, %c0_30] : memref<2x50x320xf32, #tpu.memory_space<vmem>>, vector<1x48x320xf32>
    %40 = vector.shape_cast %39 : vector<1x48x320xf32> to vector<48x320xf32>
    %41 = vector.shape_cast %38 : vector<48x320xf32> to vector<1x48x320xf32>
    tpu.vector_store %arg8[%c0_29, %c1, %c0_30], %41 {strides = array<i32>} : memref<2x50x320xf32, #tpu.memory_space<vmem>>, vector<1x48x320xf32>,
    %42 = vector.extract_strided_slice %35 {offsets = [48, 0], sizes = [48, 320], strides = [1, 1]} : vector<96x320xf32> to vector<48x320xf32>
    %c1_31 = arith.constant 1 : index
    %c1_32 = arith.constant 1 : index
    %c0_33 = arith.constant 0 : index
    %43 = vector.load %arg8[%c1_31, %c1_32, %c0_33] : memref<2x50x320xf32, #tpu.memory_space<vmem>>, vector<1x48x320xf32>
    %44 = vector.shape_cast %43 : vector<1x48x320xf32> to vector<48x320xf32>
    %45 = vector.shape_cast %42 : vector<48x320xf32> to vector<1x48x320xf32>
    tpu.vector_store %arg8[%c1_31, %c1_32, %c0_33], %45 {strides = array<i32>} : memref<2x50x320xf32, #tpu.memory_space<vmem>>, vector<1x48x320xf32>,
    %cst_34 = arith.constant 0.000000e+00 : f32
    %46 = vector.broadcast %cst_34 : f32 to vector<48x160xf32>
    %cst_35 = arith.constant 0.000000e+00 : f32
    %47 = vector.broadcast %cst_35 : f32 to vector<48x160xf32>
    %c0_36 = arith.constant 0 : index
    %c0_37 = arith.constant 0 : index
    %c0_38 = arith.constant 0 : index
    %48 = vector.load %arg8[%c0_36, %c0_37, %c0_38] : memref<2x50x320xf32, #tpu.memory_space<vmem>>, vector<1x48x320xf32>
    %49 = vector.shape_cast %48 : vector<1x48x320xf32> to vector<48x320xf32>
    %50 = arith.truncf %49 : vector<48x320xf32> to vector<48x320xbf16>
    %c0_39 = arith.constant 0 : index
    %c0_40 = arith.constant 0 : index
    %51 = vector.load %arg5[%c0_39, %c0_40] : memref<960x160xbf16, #tpu.memory_space<vmem>>, vector<320x160xbf16>
    %cst_41 = arith.constant dense<0.000000e+00> : vector<48x160xf32>
    %52 = tpu.matmul %50, %51, %cst_41 {dimension_numbers = #tpu.dot_dimension_numbers<[1], [0], [0], [1], [0, 0, 1, 1], [], []>} : vector<48x320xbf16>, vector<320x160xbf16>, vector<48x160xf32> -> vector<48x160xf32>
    %53 = arith.addf %46, %52 : vector<48x160xf32>
    %c0_42 = arith.constant 0 : index
    %c0_43 = arith.constant 0 : index
    %54 = vector.load %arg6[%c0_42, %c0_43] : memref<960x160xbf16, #tpu.memory_space<vmem>>, vector<320x160xbf16>
    %cst_44 = arith.constant dense<0.000000e+00> : vector<48x160xf32>
    %55 = tpu.matmul %50, %54, %cst_44 {dimension_numbers = #tpu.dot_dimension_numbers<[1], [0], [0], [1], [0, 0, 1, 1], [], []>} : vector<48x320xbf16>, vector<320x160xbf16>, vector<48x160xf32> -> vector<48x160xf32>
    %56 = arith.addf %47, %55 : vector<48x160xf32>
    %c0_45 = arith.constant 0 : index
    %c1_46 = arith.constant 1 : index
    %c0_47 = arith.constant 0 : index
    %57 = vector.load %arg8[%c0_45, %c1_46, %c0_47] : memref<2x50x320xf32, #tpu.memory_space<vmem>>, vector<1x48x320xf32>
    %58 = vector.shape_cast %57 : vector<1x48x320xf32> to vector<48x320xf32>
    %59 = arith.truncf %58 : vector<48x320xf32> to vector<48x320xbf16>
    %c320 = arith.constant 320 : index
    %c0_48 = arith.constant 0 : index
    %60 = vector.load %arg5[%c320, %c0_48] : memref<960x160xbf16, #tpu.memory_space<vmem>>, vector<320x160xbf16>
    %cst_49 = arith.constant dense<0.000000e+00> : vector<48x160xf32>
    %61 = tpu.matmul %59, %60, %cst_49 {dimension_numbers = #tpu.dot_dimension_numbers<[1], [0], [0], [1], [0, 0, 1, 1], [], []>} : vector<48x320xbf16>, vector<320x160xbf16>, vector<48x160xf32> -> vector<48x160xf32>
    %62 = arith.addf %53, %61 : vector<48x160xf32>
    %c320_50 = arith.constant 320 : index
    %c0_51 = arith.constant 0 : index
    %63 = vector.load %arg6[%c320_50, %c0_51] : memref<960x160xbf16, #tpu.memory_space<vmem>>, vector<320x160xbf16>
    %cst_52 = arith.constant dense<0.000000e+00> : vector<48x160xf32>
    %64 = tpu.matmul %59, %63, %cst_52 {dimension_numbers = #tpu.dot_dimension_numbers<[1], [0], [0], [1], [0, 0, 1, 1], [], []>} : vector<48x320xbf16>, vector<320x160xbf16>, vector<48x160xf32> -> vector<48x160xf32>
    %65 = arith.addf %56, %64 : vector<48x160xf32>
    %c0_53 = arith.constant 0 : index
    %c2 = arith.constant 2 : index
    %c0_54 = arith.constant 0 : index
    %66 = vector.load %arg8[%c0_53, %c2, %c0_54] : memref<2x50x320xf32, #tpu.memory_space<vmem>>, vector<1x48x320xf32>
    %67 = vector.shape_cast %66 : vector<1x48x320xf32> to vector<48x320xf32>
    %68 = arith.truncf %67 : vector<48x320xf32> to vector<48x320xbf16>
    %c640 = arith.constant 640 : index
    %c0_55 = arith.constant 0 : index
    %69 = vector.load %arg5[%c640, %c0_55] : memref<960x160xbf16, #tpu.memory_space<vmem>>, vector<320x160xbf16>
    %cst_56 = arith.constant dense<0.000000e+00> : vector<48x160xf32>
    %70 = tpu.matmul %68, %69, %cst_56 {dimension_numbers = #tpu.dot_dimension_numbers<[1], [0], [0], [1], [0, 0, 1, 1], [], []>} : vector<48x320xbf16>, vector<320x160xbf16>, vector<48x160xf32> -> vector<48x160xf32>
    %71 = arith.addf %62, %70 : vector<48x160xf32>
    %c640_57 = arith.constant 640 : index
    %c0_58 = arith.constant 0 : index
    %72 = vector.load %arg6[%c640_57, %c0_58] : memref<960x160xbf16, #tpu.memory_space<vmem>>, vector<320x160xbf16>
    %cst_59 = arith.constant dense<0.000000e+00> : vector<48x160xf32>
    %73 = tpu.matmul %68, %72, %cst_59 {dimension_numbers = #tpu.dot_dimension_numbers<[1], [0], [0], [1], [0, 0, 1, 1], [], []>} : vector<48x320xbf16>, vector<320x160xbf16>, vector<48x160xf32> -> vector<48x160xf32>
    %74 = arith.addf %65, %73 : vector<48x160xf32>
    %75 = math.tanh %71 : vector<48x160xf32>
    %76 = math.tanh %74 : vector<48x160xf32>
    %c0_60 = arith.constant 0 : index
    %c0_61 = arith.constant 0 : index
    %c0_62 = arith.constant 0 : index
    %77 = vector.load %arg7[%c0_60, %c0_61, %c0_62] : memref<2x48x640xf32, #tpu.memory_space<vmem>>, vector<1x48x160xf32>
    %78 = vector.shape_cast %77 : vector<1x48x160xf32> to vector<48x160xf32>
    %79 = vector.shape_cast %75 : vector<48x160xf32> to vector<1x48x160xf32>
    tpu.vector_store %arg7[%c0_60, %c0_61, %c0_62], %79 {strides = array<i32>} : memref<2x48x640xf32, #tpu.memory_space<vmem>>, vector<1x48x160xf32>,
    %c0_63 = arith.constant 0 : index
    %c0_64 = arith.constant 0 : index
    %c160 = arith.constant 160 : index
    %80 = vector.load %arg7[%c0_63, %c0_64, %c160] : memref<2x48x640xf32, #tpu.memory_space<vmem>>, vector<1x48x160xf32>
    %81 = vector.shape_cast %80 : vector<1x48x160xf32> to vector<48x160xf32>
    %82 = vector.shape_cast %75 : vector<48x160xf32> to vector<1x48x160xf32>
    tpu.vector_store %arg7[%c0_63, %c0_64, %c160], %82 {strides = array<i32>} : memref<2x48x640xf32, #tpu.memory_space<vmem>>, vector<1x48x160xf32>,
    %c0_65 = arith.constant 0 : index
    %c0_66 = arith.constant 0 : index
    %c320_67 = arith.constant 320 : index
    %83 = vector.load %arg7[%c0_65, %c0_66, %c320_67] : memref<2x48x640xf32, #tpu.memory_space<vmem>>, vector<1x48x160xf32>
    %84 = vector.shape_cast %83 : vector<1x48x160xf32> to vector<48x160xf32>
    %85 = vector.shape_cast %76 : vector<48x160xf32> to vector<1x48x160xf32>
    tpu.vector_store %arg7[%c0_65, %c0_66, %c320_67], %85 {strides = array<i32>} : memref<2x48x640xf32, #tpu.memory_space<vmem>>, vector<1x48x160xf32>,
    %c0_68 = arith.constant 0 : index
    %c0_69 = arith.constant 0 : index
    %c480 = arith.constant 480 : index
    %86 = vector.load %arg7[%c0_68, %c0_69, %c480] : memref<2x48x640xf32, #tpu.memory_space<vmem>>, vector<1x48x160xf32>
    %87 = vector.shape_cast %86 : vector<1x48x160xf32> to vector<48x160xf32>
    %88 = vector.shape_cast %76 : vector<48x160xf32> to vector<1x48x160xf32>
    tpu.vector_store %arg7[%c0_68, %c0_69, %c480], %88 {strides = array<i32>} : memref<2x48x640xf32, #tpu.memory_space<vmem>>, vector<1x48x160xf32>,
    %cst_70 = arith.constant 0.000000e+00 : f32
    %89 = vector.broadcast %cst_70 : f32 to vector<48x160xf32>
    %cst_71 = arith.constant 0.000000e+00 : f32
    %90 = vector.broadcast %cst_71 : f32 to vector<48x160xf32>
    %c1_72 = arith.constant 1 : index
    %c0_73 = arith.constant 0 : index
    %c0_74 = arith.constant 0 : index
    %91 = vector.load %arg8[%c1_72, %c0_73, %c0_74] : memref<2x50x320xf32, #tpu.memory_space<vmem>>, vector<1x48x320xf32>
    %92 = vector.shape_cast %91 : vector<1x48x320xf32> to vector<48x320xf32>
    %93 = arith.truncf %92 : vector<48x320xf32> to vector<48x320xbf16>
    %c0_75 = arith.constant 0 : index
    %c0_76 = arith.constant 0 : index
    %94 = vector.load %arg5[%c0_75, %c0_76] : memref<960x160xbf16, #tpu.memory_space<vmem>>, vector<320x160xbf16>
    %cst_77 = arith.constant dense<0.000000e+00> : vector<48x160xf32>
    %95 = tpu.matmul %93, %94, %cst_77 {dimension_numbers = #tpu.dot_dimension_numbers<[1], [0], [0], [1], [0, 0, 1, 1], [], []>} : vector<48x320xbf16>, vector<320x160xbf16>, vector<48x160xf32> -> vector<48x160xf32>
    %96 = arith.addf %89, %95 : vector<48x160xf32>
    %c0_78 = arith.constant 0 : index
    %c0_79 = arith.constant 0 : index
    %97 = vector.load %arg6[%c0_78, %c0_79] : memref<960x160xbf16, #tpu.memory_space<vmem>>, vector<320x160xbf16>
    %cst_80 = arith.constant dense<0.000000e+00> : vector<48x160xf32>
    %98 = tpu.matmul %93, %97, %cst_80 {dimension_numbers = #tpu.dot_dimension_numbers<[1], [0], [0], [1], [0, 0, 1, 1], [], []>} : vector<48x320xbf16>, vector<320x160xbf16>, vector<48x160xf32> -> vector<48x160xf32>
    %99 = arith.addf %90, %98 : vector<48x160xf32>
    %c1_81 = arith.constant 1 : index
    %c1_82 = arith.constant 1 : index
    %c0_83 = arith.constant 0 : index
    %100 = vector.load %arg8[%c1_81, %c1_82, %c0_83] : memref<2x50x320xf32, #tpu.memory_space<vmem>>, vector<1x48x320xf32>
    %101 = vector.shape_cast %100 : vector<1x48x320xf32> to vector<48x320xf32>
    %102 = arith.truncf %101 : vector<48x320xf32> to vector<48x320xbf16>
    %c320_84 = arith.constant 320 : index
    %c0_85 = arith.constant 0 : index
    %103 = vector.load %arg5[%c320_84, %c0_85] : memref<960x160xbf16, #tpu.memory_space<vmem>>, vector<320x160xbf16>
    %cst_86 = arith.constant dense<0.000000e+00> : vector<48x160xf32>
    %104 = tpu.matmul %102, %103, %cst_86 {dimension_numbers = #tpu.dot_dimension_numbers<[1], [0], [0], [1], [0, 0, 1, 1], [], []>} : vector<48x320xbf16>, vector<320x160xbf16>, vector<48x160xf32> -> vector<48x160xf32>
    %105 = arith.addf %96, %104 : vector<48x160xf32>
    %c320_87 = arith.constant 320 : index
    %c0_88 = arith.constant 0 : index
    %106 = vector.load %arg6[%c320_87, %c0_88] : memref<960x160xbf16, #tpu.memory_space<vmem>>, vector<320x160xbf16>
    %cst_89 = arith.constant dense<0.000000e+00> : vector<48x160xf32>
    %107 = tpu.matmul %102, %106, %cst_89 {dimension_numbers = #tpu.dot_dimension_numbers<[1], [0], [0], [1], [0, 0, 1, 1], [], []>} : vector<48x320xbf16>, vector<320x160xbf16>, vector<48x160xf32> -> vector<48x160xf32>
    %108 = arith.addf %99, %107 : vector<48x160xf32>
    %c1_90 = arith.constant 1 : index
    %c2_91 = arith.constant 2 : index
    %c0_92 = arith.constant 0 : index
    %109 = vector.load %arg8[%c1_90, %c2_91, %c0_92] : memref<2x50x320xf32, #tpu.memory_space<vmem>>, vector<1x48x320xf32>
    %110 = vector.shape_cast %109 : vector<1x48x320xf32> to vector<48x320xf32>
    %111 = arith.truncf %110 : vector<48x320xf32> to vector<48x320xbf16>
    %c640_93 = arith.constant 640 : index
    %c0_94 = arith.constant 0 : index
    %112 = vector.load %arg5[%c640_93, %c0_94] : memref<960x160xbf16, #tpu.memory_space<vmem>>, vector<320x160xbf16>
    %cst_95 = arith.constant dense<0.000000e+00> : vector<48x160xf32>
    %113 = tpu.matmul %111, %112, %cst_95 {dimension_numbers = #tpu.dot_dimension_numbers<[1], [0], [0], [1], [0, 0, 1, 1], [], []>} : vector<48x320xbf16>, vector<320x160xbf16>, vector<48x160xf32> -> vector<48x160xf32>
    %114 = arith.addf %105, %113 : vector<48x160xf32>
    %c640_96 = arith.constant 640 : index
    %c0_97 = arith.constant 0 : index
    %115 = vector.load %arg6[%c640_96, %c0_97] : memref<960x160xbf16, #tpu.memory_space<vmem>>, vector<320x160xbf16>
    %cst_98 = arith.constant dense<0.000000e+00> : vector<48x160xf32>
    %116 = tpu.matmul %111, %115, %cst_98 {dimension_numbers = #tpu.dot_dimension_numbers<[1], [0], [0], [1], [0, 0, 1, 1], [], []>} : vector<48x320xbf16>, vector<320x160xbf16>, vector<48x160xf32> -> vector<48x160xf32>
    %117 = arith.addf %108, %116 : vector<48x160xf32>
    %118 = math.tanh %114 : vector<48x160xf32>
    %119 = math.tanh %117 : vector<48x160xf32>
    %c1_99 = arith.constant 1 : index
    %c0_100 = arith.constant 0 : index
    %c0_101 = arith.constant 0 : index
    %120 = vector.load %arg7[%c1_99, %c0_100, %c0_101] : memref<2x48x640xf32, #tpu.memory_space<vmem>>, vector<1x48x160xf32>
    %121 = vector.shape_cast %120 : vector<1x48x160xf32> to vector<48x160xf32>
    %122 = vector.shape_cast %118 : vector<48x160xf32> to vector<1x48x160xf32>
    tpu.vector_store %arg7[%c1_99, %c0_100, %c0_101], %122 {strides = array<i32>} : memref<2x48x640xf32, #tpu.memory_space<vmem>>, vector<1x48x160xf32>,
    %c1_102 = arith.constant 1 : index
    %c0_103 = arith.constant 0 : index
    %c160_104 = arith.constant 160 : index
    %123 = vector.load %arg7[%c1_102, %c0_103, %c160_104] : memref<2x48x640xf32, #tpu.memory_space<vmem>>, vector<1x48x160xf32>
    %124 = vector.shape_cast %123 : vector<1x48x160xf32> to vector<48x160xf32>
    %125 = vector.shape_cast %118 : vector<48x160xf32> to vector<1x48x160xf32>
    tpu.vector_store %arg7[%c1_102, %c0_103, %c160_104], %125 {strides = array<i32>} : memref<2x48x640xf32, #tpu.memory_space<vmem>>, vector<1x48x160xf32>,
    %c1_105 = arith.constant 1 : index
    %c0_106 = arith.constant 0 : index
    %c320_107 = arith.constant 320 : index
    %126 = vector.load %arg7[%c1_105, %c0_106, %c320_107] : memref<2x48x640xf32, #tpu.memory_space<vmem>>, vector<1x48x160xf32>
    %127 = vector.shape_cast %126 : vector<1x48x160xf32> to vector<48x160xf32>
    %128 = vector.shape_cast %119 : vector<48x160xf32> to vector<1x48x160xf32>
    tpu.vector_store %arg7[%c1_105, %c0_106, %c320_107], %128 {strides = array<i32>} : memref<2x48x640xf32, #tpu.memory_space<vmem>>, vector<1x48x160xf32>,
    %c1_108 = arith.constant 1 : index
    %c0_109 = arith.constant 0 : index
    %c480_110 = arith.constant 480 : index
    %129 = vector.load %arg7[%c1_108, %c0_109, %c480_110] : memref<2x48x640xf32, #tpu.memory_space<vmem>>, vector<1x48x160xf32>
    %130 = vector.shape_cast %129 : vector<1x48x160xf32> to vector<48x160xf32>
    %131 = vector.shape_cast %119 : vector<48x160xf32> to vector<1x48x160xf32>
    tpu.vector_store %arg7[%c1_108, %c0_109, %c480_110], %131 {strides = array<i32>} : memref<2x48x640xf32, #tpu.memory_space<vmem>>, vector<1x48x160xf32>,
    return
  }
}

</mosaic_0001>

<bundles_post_ra>
// kernel: conditional_generator_forward.5
= control target key start
LH: loop header
LB: loop body
LE: loop exit
PB: predicated region body
PF: predicated region fallthrough
CT: control target
= control target key end

     0   :  { %9 = vsyncpa [#allocation3], 0  ;;  %s1471_s0 = inlined_call_operand.vmem [shape: f32[240,32], index: 0, kind: input, shape index: {}]   ;;  %s1472_s1 = inlined_call_operand.hbm [shape: f32[1,32], index: 1, kind: input, shape index: {}]   ;;  %s1473_s2 = inlined_call_operand.hbm [shape: f32[1,32], index: 2, kind: input, shape index: {}]   ;;  %s1474_s3 = inlined_call_operand.hbm [shape: bf16[32,64], index: 3, kind: input, shape index: {}]   ;;  %s1475_s4 = inlined_call_operand.vmem [shape: f32[240,64], index: 4, kind: output, shape index: {}]  }
   0x1   :  { %10 = vsyncpa [#allocation5], 0  ;;  %s837_s15 = smov [#allocation4]   ;;  %s838_s17 = smov [#allocation2]  }
   0x2   :  { %s29_s16 = sshll.u32 %s837_s15, 4  ;;  %s19_s18 = sshll.u32 %s838_s17, 4  ;;  %s30_s16 = int_to_ptr.vmem [resolvable:$true] %s29_s16  ;;  %s20_s18 = int_to_ptr.vmem [resolvable:$true] %s19_s18 }
   0x3   :  { %s767_s21 = scalar_lea.hbm %s1473_s2, 16 }
   0x4   :  { %p768_p0 = scmp.ne.s32.totalorder %s1473_s2, %s767_s21  ;;  %p771_p1 = scmp.lt.u32.totalorder %s767_s21, %s1473_s2 }
   0x6   :  { %p773_p2 = pnand %p771_p1, %p768_p0 }
   0x8   :  { %776 = shalt.err (!%p773_p2)
}
   0x9   :  { %s777_s26 = scalar_lea.vmem %s30_s16, 16  ;;  %s781_s27 = scalar_lea.vmem %s30_s16, 32 }
   0xa   :  { %p778_p3 = scmp.ne.s32.totalorder %s30_s16, %s777_s26  ;;  %p782_p4 = scmp.lt.s32.totalorder %s30_s16, %s30_s16 }
   0xb   :  { %p783_p5 = scmp.lt.s32.totalorder %s781_s27, %s777_s26 }
   0xd   :  { %p784_p6 = por %p783_p5, %p782_p4 }
   0xf   :  { %p785_p7 = pnand %p784_p6, %p778_p3 }
  0x11   :  { %788 = shalt.err (!%p785_p7)
}
  0x12   :  { %32 = dma.hbm_to_vmem [thread:$0]  %s1473_s2, 16, %s30_s16, [#allocation5]  }
  0x13   :  { %s789_s6 = scalar_lea.hbm %s1472_s1, 16 }
  0x14   :  { %p790_p8 = scmp.ne.s32.totalorder %s1472_s1, %s789_s6  ;;  %p793_p9 = scmp.lt.u32.totalorder %s789_s6, %s1472_s1 }
  0x16   :  { %p795_p10 = pnand %p793_p9, %p790_p8 }
  0x18   :  { %798 = shalt.err (!%p795_p10)
}
  0x19   :  { %s799_s11 = scalar_lea.vmem %s20_s18, 16  ;;  %s803_s12 = scalar_lea.vmem %s20_s18, 32 }
  0x1a   :  { %p800_p11 = scmp.ne.s32.totalorder %s20_s18, %s799_s11  ;;  %p804_p12 = scmp.lt.s32.totalorder %s20_s18, %s20_s18 }
  0x1b   :  { %p805_p13 = scmp.lt.s32.totalorder %s803_s12, %s799_s11 }
  0x1d   :  { %p806_p0 = por %p805_p13, %p804_p12 }
  0x1f   :  { %p807_p1 = pnand %p806_p0, %p800_p11 }
  0x21   :  { %810 = shalt.err (!%p807_p1)
}
  0x22   :  { %22 = dma.hbm_to_vmem [thread:$0]  %s1472_s1, 16, %s20_s18, [#allocation3]  }
  0x23   :  { %s839_s14 = smov [#allocation6]   ;;  %s811_s19 = scalar_lea.hbm %s1474_s3, 256 }
  0x24   :  { %s38_s15 = sshll.u32 %s839_s14, 4  ;;  %p812_p2 = scmp.ne.s32.totalorder %s1474_s3, %s811_s19  ;;  %s39_s15 = int_to_ptr.vmem [resolvable:$true] %s38_s15 }
  0x25   :  { %p815_p3 = scmp.lt.u32.totalorder %s811_s19, %s1474_s3 }
  0x27   :  { %p817_p4 = pnand %p815_p3, %p812_p2 }
  0x29   :  { %820 = shalt.err (!%p817_p4)
}
  0x2a   :  { %s821_s24 = scalar_lea.vmem %s39_s15, 256  ;;  %p826_p6 = scmp.lt.s32.totalorder %s39_s15, %s39_s15 }
  0x2b   :  { %p822_p5 = scmp.ne.s32.totalorder %s39_s15, %s821_s24  ;;  %p827_p7 = scmp.lt.s32.totalorder %s821_s24, %s821_s24 }
  0x2d   :  { %p828_p8 = por %p827_p7, %p826_p6 }
  0x2f   :  { %p829_p9 = pnand %p828_p8, %p822_p5 }
  0x31   :  { %832 = shalt.err (!%p829_p9)
}
  0x32   :  { %s840_s1 = smov 64   ;;  %s841_s18 = smov 4  }
  0x33   :  { %44 = dma.hbm_to_vmem [thread:$0]  %s1474_s3, 256, %s39_s15, [#allocation5], %s840_s1, %s840_s1, %s841_s18  }
  0x34   :  { %833 = dma.done.wait [#allocation3], 16  }
  0x35   :  { %834 = vsyncadd [#allocation3], 4294967280 }
  0x36   :  { %835 = dma.done.wait [#allocation5], 272  }
  0x37   :  { %836 = vsyncadd [#allocation5], 4294967024  ;;  %v842_v0 = vmov 0.0   ;;  %vm843_vm0 = vmmov 0   ;;  %v763_v1 = vld [vmem:[#allocation6] sm:$0xff]   ;;  %vm85_vm1 = vcmask 261120  }
  0x38   :  { %688 = vmatprep.subr.bf16.mxu0 %v842_v0  ;;  %752 = vmatprep.subr.bf16.mxu1 %v842_v0  ;;  %v764_v2 = vld [vmem:[#allocation6 + $0x8] sm:$0xff]   ;;  %v914_v3 = vld [vmem:[%s1471_s0] sm:$0xff]  ;;  %v930_v6 = vld [vmem:[%s1471_s0 + $0x18] sm:$0xff]  ;;  %vm617_vm2 = vcmask 523264  }
  0x39   :  { %692 = vmatprep.mubr.msk.bf16.mxu0 %vm843_vm0, %v842_v0  ;;  %724 = vmatprep.mubr.msk.bf16.mxu1 %vm843_vm0, %v842_v0  ;;  %v919_v4 = vld [vmem:[%s1471_s0 + $0x8] sm:$0xff]  ;;  %v924_v5 = vld [vmem:[%s1471_s0 + $0x10] sm:$0xff]  ;;  %v86_v7 = vsel %vm85_vm1, %v914_v3, 0.0  ;;  %v942_v10 = vld [vmem:[%s1471_s0 + $0x20] sm:$0xff]  ;;  %v91_v12 = vsel %vm85_vm1, %v930_v6, 0.0 }
  0x3a   :  { %689 = vmatpush3.bf16.msra.mxu0 %v763_v1  ;;  %754 = vmatpush3.bf16.msra.mxu1 %v763_v1  ;;  %v87_v8 = vsel %vm85_vm1, %v919_v4, 0.0  ;;  %v89_v9 = vsel %vm85_vm1, %v924_v5, 0.0  ;;  %v949_v13 = vld [vmem:[%s1471_s0 + $0x28] sm:$0xff]  ;;  %v93_v15 = vsel %vm85_vm1, %v942_v10, 0.0  ;;  %v956_v16 = vld [vmem:[%s1471_s0 + $0x30] sm:$0xff]  ;;  %v963_v19 = vld [vmem:[%s1471_s0 + $0x38] sm:$0xff] }
  0x3b   :  { %690 = vmatprep.subr.bf16.mxu0 %v842_v0  ;;  %753 = vmatprep.subr.bf16.mxu1 %v842_v0  ;;  %v88_v11 = vadd.f32 %v87_v8, %v86_v7  ;;  %v95_v18 = vsel %vm85_vm1, %v949_v13, 0.0  ;;  %v97_v21 = vsel %vm85_vm1, %v956_v16, 0.0  ;;  %v970_v22 = vld [vmem:[%s1471_s0 + $0x40] sm:$0xff]  ;;  %v99_v24 = vsel %vm85_vm1, %v963_v19, 0.0  ;;  %v977_v25 = vld [vmem:[%s1471_s0 + $0x48] sm:$0xff]  ;;  %v984_v28 = vld [vmem:[%s1471_s0 + $0x50] sm:$0xff] }
  0x3c   :  { %v101_v27 = vsel %vm85_vm1, %v970_v22, 0.0  ;;  %v103_v30 = vsel %vm85_vm1, %v977_v25, 0.0  ;;  %v991_v31 = vld [vmem:[%s1471_s0 + $0x58] sm:$0xff]  ;;  %v105_v33 = vsel %vm85_vm1, %v984_v28, 0.0  ;;  %v998_v34 = vld [vmem:[%s1471_s0 + $0x60] sm:$0xff]  ;;  %v1005_v37 = vld [vmem:[%s1471_s0 + $0x68] sm:$0xff] }
  0x3d   :  { %v90_v14 = vadd.f32 %v89_v9, %v88_v11  ;;  %v107_v36 = vsel %vm85_vm1, %v991_v31, 0.0  ;;  %v109_v39 = vsel %vm85_vm1, %v998_v34, 0.0  ;;  %v1012_v40 = vld [vmem:[%s1471_s0 + $0x70] sm:$0xff]  ;;  %v111_v42 = vsel %vm85_vm1, %v1005_v37, 0.0  ;;  %v1019_v43 = vld [vmem:[%s1471_s0 + $0x78] sm:$0xff]  ;;  %v1026_v46 = vld [vmem:[%s1471_s0 + $0x80] sm:$0xff] }
  0x3e   :  { %691 = vmatpush3.bf16.msra.mxu0 %v764_v2  ;;  %755 = vmatpush3.bf16.msra.mxu1 %v764_v2  ;;  %v113_v45 = vsel %vm85_vm1, %v1012_v40, 0.0  ;;  %v115_v48 = vsel %vm85_vm1, %v1019_v43, 0.0  ;;  %v1033_v49 = vld [vmem:[%s1471_s0 + $0x88] sm:$0xff]  ;;  %v117_v51 = vsel %vm85_vm1, %v1026_v46, 0.0  ;;  %v1040_v52 = vld [vmem:[%s1471_s0 + $0x90] sm:$0xff]  ;;  %v1047_v55 = vld [vmem:[%s1471_s0 + $0x98] sm:$0xff] }
  0x3f   :  { %v92_v17 = vadd.f32 %v91_v12, %v90_v14  ;;  %v119_v54 = vsel %vm85_vm1, %v1033_v49, 0.0  ;;  %v121_v57 = vsel %vm85_vm1, %v1040_v52, 0.0  ;;  %v1054_v58 = vld [vmem:[%s1471_s0 + $0xa0] sm:$0xff]  ;;  %v123_v60 = vsel %vm85_vm1, %v1047_v55, 0.0  ;;  %v1061_v61 = vld [vmem:[%s1471_s0 + $0xa8] sm:$0xff]  ;;  %v1068_v1 = vld [vmem:[%s1471_s0 + $0xb0] sm:$0xff] }
  0x40   :  { %v125_v63 = vsel %vm85_vm1, %v1054_v58, 0.0  ;;  %v127_v7 = vsel %vm85_vm1, %v1061_v61, 0.0  ;;  %v1075_v8 = vld [vmem:[%s1471_s0 + $0xb8] sm:$0xff]  ;;  %v129_v11 = vsel %vm85_vm1, %v1068_v1, 0.0  ;;  %v1082_v12 = vld [vmem:[%s1471_s0 + $0xc0] sm:$0xff] }
  0x41   :  { %v94_v20 = vadd.f32 %v93_v15, %v92_v17  ;;  %v131_v15 = vsel %vm85_vm1, %v1075_v8, 0.0  ;;  %v1089_v17 = vld [vmem:[%s1471_s0 + $0xc8] sm:$0xff] }
  0x43   :  { %v96_v23 = vadd.f32 %v95_v18, %v94_v20  ;;  %v133_v20 = vsel %vm85_vm1, %v1082_v12, 0.0 }
  0x45   :  { %v98_v26 = vadd.f32 %v97_v21, %v96_v23  ;;  %v1096_v21 = vld [vmem:[%s1471_s0 + $0xd0] sm:$0xff] }
  0x47   :  { %v100_v29 = vadd.f32 %v99_v24, %v98_v26  ;;  %v135_v24 = vsel %vm85_vm1, %v1089_v17, 0.0  ;;  %v1103_v26 = vld [vmem:[%s1471_s0 + $0xd8] sm:$0xff] }
  0x49   :  { %v102_v32 = vadd.f32 %v101_v27, %v100_v29  ;;  %v137_v29 = vsel %vm85_vm1, %v1096_v21, 0.0 }
  0x4b   :  { %v104_v35 = vadd.f32 %v103_v30, %v102_v32  ;;  %v1110_v30 = vld [vmem:[%s1471_s0 + $0xe0] sm:$0xff] }
  0x4d   :  { %v106_v38 = vadd.f32 %v105_v33, %v104_v35  ;;  %v139_v33 = vsel %vm85_vm1, %v1103_v26, 0.0  ;;  %v1117_v35 = vld [vmem:[%s1471_s0 + $0xe8] sm:$0xff] }
  0x4f   :  { %v108_v41 = vadd.f32 %v107_v36, %v106_v38  ;;  %v141_v38 = vsel %vm85_vm1, %v1110_v30, 0.0 }
  0x51   :  { %v110_v44 = vadd.f32 %v109_v39, %v108_v41  ;;  %v143_v41 = vsel %vm85_vm1, %v1117_v35, 0.0 }
  0x53   :  { %v112_v47 = vadd.f32 %v111_v42, %v110_v44 }
  0x55   :  { %v114_v50 = vadd.f32 %v113_v45, %v112_v47 }
  0x57   :  { %v116_v53 = vadd.f32 %v115_v48, %v114_v50 }
  0x59   :  { %v118_v56 = vadd.f32 %v117_v51, %v116_v53 }
  0x5b   :  { %v120_v59 = vadd.f32 %v119_v54, %v118_v56 }
  0x5d   :  { %v122_v62 = vadd.f32 %v121_v57, %v120_v59 }
  0x5f   :  { %v124_v2 = vadd.f32 %v123_v60, %v122_v62 }
  0x61   :  { %v126_v9 = vadd.f32 %v125_v63, %v124_v2 }
  0x63   :  { %v128_v14 = vadd.f32 %v127_v7, %v126_v9 }
  0x65   :  { %v130_v18 = vadd.f32 %v129_v11, %v128_v14 }
  0x67   :  { %v132_v23 = vadd.f32 %v131_v15, %v130_v18 }
  0x69   :  { %v134_v27 = vadd.f32 %v133_v20, %v132_v23 }
  0x6b   :  { %v136_v32 = vadd.f32 %v135_v24, %v134_v27 }
  0x6d   :  { %v138_v36 = vadd.f32 %v137_v29, %v136_v32 }
  0x6f   :  { %v140_v39 = vadd.f32 %v139_v33, %v138_v36 }
  0x71   :  { %v142_v42 = vadd.f32 %v141_v38, %v140_v39 }
  0x73   :  { %v144_v44 = vadd.f32 %v143_v41, %v142_v42 }
  0x75   :  { %v145_v45 = vrot.slane %v144_v44, 4 }
  0x77   :  { %v146_v47 = vadd.f32 %v145_v45, %v144_v44 }
  0x79   :  { %v147_v48 = vrot.slane %v146_v47, 2 }
  0x7b   :  { %v148_v50 = vadd.f32 %v147_v48, %v146_v47 }
  0x7d   :  { %v149_v51 = vrot.slane %v148_v50, 1 }
  0x7f   :  { %v150_v53 = vadd.f32 %v149_v51, %v148_v50 }
  0x81   :  { %v1123_v54 = vmul.f32 0.004166667, %v150_v53 }
  0x83   :  { %v153_v56 = vsub.f32 %v914_v3, %v1123_v54  ;;  %v154_v57 = vsub.f32 %v919_v4, %v1123_v54  ;;  %v155_v59 = vsub.f32 %v924_v5, %v1123_v54  ;;  %v156_v60 = vsub.f32 %v930_v6, %v1123_v54 }
  0x84   :  { %v157_v62 = vsub.f32 %v942_v10, %v1123_v54  ;;  %v158_v9 = vsub.f32 %v949_v13, %v1123_v54  ;;  %v159_v14 = vsub.f32 %v956_v16, %v1123_v54  ;;  %v160_v27 = vsub.f32 %v963_v19, %v1123_v54 }
  0x85   :  { %v183_v63 = vmul.f32 %v153_v56, %v153_v56  ;;  %v184_v2 = vmul.f32 %v154_v57, %v154_v57  ;;  %v185_v7 = vmul.f32 %v155_v59, %v155_v59  ;;  %v186_v11 = vmul.f32 %v156_v60, %v156_v60 }
  0x86   :  { %v187_v15 = vmul.f32 %v157_v62, %v157_v62  ;;  %v188_v29 = vmul.f32 %v158_v9, %v158_v9  ;;  %v161_v36 = vsub.f32 %v970_v22, %v1123_v54  ;;  %v189_v38 = vmul.f32 %v159_v14, %v159_v14 }
  0x87   :  { %v213_v18 = vsel %vm85_vm1, %v183_v63, 0.0  ;;  %v214_v20 = vsel %vm85_vm1, %v184_v2, 0.0  ;;  %v216_v23 = vsel %vm85_vm1, %v185_v7, 0.0  ;;  %v218_v32 = vsel %vm85_vm1, %v186_v11, 0.0 }
  0x88   :  { %v215_v24 = vadd.f32 %v214_v20, %v213_v18  ;;  %v220_v39 = vsel %vm85_vm1, %v187_v15, 0.0  ;;  %v162_v42 = vsub.f32 %v977_v25, %v1123_v54  ;;  %v190_v44 = vmul.f32 %v160_v27, %v160_v27 }
  0x89   :  { %v222_v45 = vsel %vm85_vm1, %v188_v29, 0.0  ;;  %v163_v48 = vsub.f32 %v984_v28, %v1123_v54  ;;  %v191_v50 = vmul.f32 %v161_v36, %v161_v36  ;;  %v224_v51 = vsel %vm85_vm1, %v189_v38, 0.0 }
  0x8a   :  { %v217_v33 = vadd.f32 %v216_v23, %v215_v24  ;;  %v164_v56 = vsub.f32 %v991_v31, %v1123_v54  ;;  %v192_v57 = vmul.f32 %v162_v42, %v162_v42  ;;  %v226_v59 = vsel %vm85_vm1, %v190_v44, 0.0 }
  0x8b   :  { %v165_v62 = vsub.f32 %v998_v34, %v1123_v54  ;;  %v193_v63 = vmul.f32 %v163_v48, %v163_v48  ;;  %v228_v2 = vsel %vm85_vm1, %v191_v50, 0.0  ;;  %v166_v9 = vsub.f32 %v1005_v37, %v1123_v54 }
  0x8c   :  { %v219_v41 = vadd.f32 %v218_v32, %v217_v33  ;;  %v194_v11 = vmul.f32 %v164_v56, %v164_v56  ;;  %v230_v14 = vsel %vm85_vm1, %v192_v57, 0.0  ;;  %v167_v18 = vsub.f32 %v1012_v40, %v1123_v54 }
  0x8d   :  { %v195_v20 = vmul.f32 %v165_v62, %v165_v62  ;;  %v232_v23 = vsel %vm85_vm1, %v193_v63, 0.0  ;;  %v168_v27 = vsub.f32 %v1019_v43, %v1123_v54  ;;  %v196_v29 = vmul.f32 %v166_v9, %v166_v9 }
  0x8e   :  { %v221_v47 = vadd.f32 %v220_v39, %v219_v41  ;;  %v234_v32 = vsel %vm85_vm1, %v194_v11, 0.0  ;;  %v169_v36 = vsub.f32 %v1026_v46, %v1123_v54  ;;  %v197_v38 = vmul.f32 %v167_v18, %v167_v18 }
  0x8f   :  { %v236_v39 = vsel %vm85_vm1, %v195_v20, 0.0  ;;  %v170_v42 = vsub.f32 %v1033_v49, %v1123_v54  ;;  %v198_v44 = vmul.f32 %v168_v27, %v168_v27  ;;  %v171_v48 = vsub.f32 %v1040_v52, %v1123_v54 }
  0x90   :  { %v223_v53 = vadd.f32 %v222_v45, %v221_v47  ;;  %v238_v45 = vsel %vm85_vm1, %v196_v29, 0.0  ;;  %v199_v50 = vmul.f32 %v169_v36, %v169_v36  ;;  %v172_v56 = vsub.f32 %v1047_v55, %v1123_v54 }
  0x91   :  { %v200_v57 = vmul.f32 %v170_v42, %v170_v42  ;;  %v173_v62 = vsub.f32 %v1054_v58, %v1123_v54  ;;  %v201_v63 = vmul.f32 %v171_v48, %v171_v48  ;;  %v174_v9 = vsub.f32 %v1061_v61, %v1123_v54 }
  0x92   :  { %v225_v60 = vadd.f32 %v224_v51, %v223_v53  ;;  %v240_v51 = vsel %vm85_vm1, %v197_v38, 0.0  ;;  %v202_v11 = vmul.f32 %v172_v56, %v172_v56  ;;  %v175_v18 = vsub.f32 %v1068_v1, %v1123_v54 }
  0x93   :  { %v203_v20 = vmul.f32 %v173_v62, %v173_v62  ;;  %v176_v27 = vsub.f32 %v1075_v8, %v1123_v54  ;;  %v204_v29 = vmul.f32 %v174_v9, %v174_v9  ;;  %v177_v36 = vsub.f32 %v1082_v12, %v1123_v54 }
  0x94   :  { %v227_v7 = vadd.f32 %v226_v59, %v225_v60  ;;  %v242_v59 = vsel %vm85_vm1, %v198_v44, 0.0  ;;  %v205_v38 = vmul.f32 %v175_v18, %v175_v18  ;;  %v178_v42 = vsub.f32 %v1089_v17, %v1123_v54 }
  0x95   :  { %v206_v44 = vmul.f32 %v176_v27, %v176_v27  ;;  %v179_v48 = vsub.f32 %v1096_v21, %v1123_v54  ;;  %v180_v56 = vsub.f32 %v1103_v26, %v1123_v54  ;;  %v181_v62 = vsub.f32 %v1110_v30, %v1123_v54 }
  0x96   :  { %v229_v15 = vadd.f32 %v228_v2, %v227_v7  ;;  %v244_v2 = vsel %vm85_vm1, %v199_v50, 0.0  ;;  %v207_v50 = vmul.f32 %v177_v36, %v177_v36  ;;  %v182_v9 = vsub.f32 %v1117_v35, %v1123_v54 }
  0x97   :  { %v211_v18 = vmul.f32 %v181_v62, %v181_v62 }
  0x98   :  { %v231_v24 = vadd.f32 %v230_v14, %v229_v15  ;;  %v246_v14 = vsel %vm85_vm1, %v200_v57, 0.0  ;;  %v208_v57 = vmul.f32 %v178_v42, %v178_v42 }
  0x9a   :  { %v233_v33 = vadd.f32 %v232_v23, %v231_v24  ;;  %v248_v23 = vsel %vm85_vm1, %v201_v63, 0.0  ;;  %v209_v63 = vmul.f32 %v179_v48, %v179_v48 }
  0x9c   :  { %v235_v41 = vadd.f32 %v234_v32, %v233_v33  ;;  %v250_v32 = vsel %vm85_vm1, %v202_v11, 0.0  ;;  %v210_v11 = vmul.f32 %v180_v56, %v180_v56 }
  0x9e   :  { %v237_v47 = vadd.f32 %v236_v39, %v235_v41  ;;  %v252_v39 = vsel %vm85_vm1, %v203_v20, 0.0  ;;  %v264_v20 = vsel %vm85_vm1, %v209_v63, 0.0  ;;  %v266_v27 = vsel %vm85_vm1, %v210_v11, 0.0  ;;  %v283_v63 = vld [vmem:[#allocation4] sm:$0x1] }
  0xa0   :  { %v239_v53 = vadd.f32 %v238_v45, %v237_v47  ;;  %v254_v45 = vsel %vm85_vm1, %v204_v29, 0.0 }
  0xa2   :  { %v241_v60 = vadd.f32 %v240_v51, %v239_v53  ;;  %v256_v51 = vsel %vm85_vm1, %v205_v38, 0.0 }
  0xa4   :  { %v243_v7 = vadd.f32 %v242_v59, %v241_v60  ;;  %v258_v59 = vsel %vm85_vm1, %v206_v44, 0.0 }
  0xa6   :  { %v245_v15 = vadd.f32 %v244_v2, %v243_v7  ;;  %v260_v2 = vsel %vm85_vm1, %v207_v50, 0.0 }
  0xa8   :  { %v247_v24 = vadd.f32 %v246_v14, %v245_v15  ;;  %v262_v14 = vsel %vm85_vm1, %v208_v57, 0.0  ;;  %v279_v57 = vld [vmem:[#allocation2] sm:$0x1] }
  0xaa   :  { %v249_v33 = vadd.f32 %v248_v23, %v247_v24  ;;  %v212_v24 = vmul.f32 %v182_v9, %v182_v9 }
  0xac   :  { %v251_v41 = vadd.f32 %v250_v32, %v249_v33  ;;  %v268_v32 = vsel %vm85_vm1, %v211_v18, 0.0  ;;  %v270_v36 = vsel %vm85_vm1, %v212_v24, 0.0 }
  0xae   :  { %v253_v47 = vadd.f32 %v252_v39, %v251_v41 }
  0xb0   :  { %v255_v53 = vadd.f32 %v254_v45, %v253_v47 }
  0xb2   :  { %v257_v60 = vadd.f32 %v256_v51, %v255_v53  ;;  %v287_v53 = vlaneseq }
  0xb4   :  { %v259_v7 = vadd.f32 %v258_v59, %v257_v60  ;;  %v288_v56 = vshrl.u32 %v287_v53, 7 }
  0xb6   :  { %v261_v15 = vadd.f32 %v260_v2, %v259_v7  ;;  %v289_v59 = vsub.s32 0, %v288_v56 }
  0xb8   :  { %v263_v23 = vadd.f32 %v262_v14, %v261_v15 }
  0xba   :  { %v265_v29 = vadd.f32 %v264_v20, %v263_v23 }
  0xbc   :  { %v267_v33 = vadd.f32 %v266_v27, %v265_v29 }
  0xbe   :  { %v269_v38 = vadd.f32 %v268_v32, %v267_v33 }
  0xc0   :  { %v271_v39 = vadd.f32 %v270_v36, %v269_v38 }
  0xc2   :  { %v272_v41 = vrot.slane %v271_v39, 4 }
  0xc4   :  { %v273_v42 = vadd.f32 %v272_v41, %v271_v39 }
  0xc6   :  { %v274_v44 = vrot.slane %v273_v42, 2 }
  0xc8   :  { %v275_v45 = vadd.f32 %v274_v44, %v273_v42 }
  0xca   :  { %v276_v47 = vrot.slane %v275_v45, 1 }
  0xcc   :  { %v277_v48 = vadd.f32 %v276_v47, %v275_v45 }
  0xce   :  { %v278_v50 = vmul.f32 0.004166667, %v277_v48 }
  0xd0   :  { %v280_v51 = vadd.f32 1e-05, %v278_v50 }
  0xd2   :  { %765 = vrsqrt.f32 %v280_v51 }
  0xdc   :  { %v766_v60 = vpop.eup %765 }
  0xdd   :  { %v282_v62 = vmul.f32 %v766_v60, %v279_v57 }
  0xdf   :  { %v284_v2 = vmul.f32 %v282_v62, %v1123_v54  ;;  %v1216_v7 = vrot.slane %v282_v62, %v289_v59 }
  0xe1   :  { %v285_v9 = vsub.f32 %v283_v63, %v284_v2  ;;  %v292_v11 = vmul.f32 %v1216_v7, %v914_v3  ;;  %v293_v14 = vmul.f32 %v1216_v7, %v919_v4  ;;  %v308_v15 = vmul.f32 %v1216_v7, %v1026_v46 }
  0xe2   :  { %v309_v18 = vmul.f32 %v1216_v7, %v1033_v49  ;;  %v294_v20 = vmul.f32 %v1216_v7, %v924_v5  ;;  %v295_v54 = vmul.f32 %v1216_v7, %v930_v6  ;;  %v310_v23 = vmul.f32 %v1216_v7, %v1040_v52 }
  0xe3   :  { %v1232_v24 = vrot.slane %v285_v9, %v289_v59  ;;  %v311_v3 = vmul.f32 %v1216_v7, %v1047_v55  ;;  %v296_v41 = vmul.f32 %v1216_v7, %v942_v10  ;;  %v297_v42 = vmul.f32 %v1216_v7, %v949_v13 }
  0xe4   :  { %v312_v44 = vmul.f32 %v1216_v7, %v1054_v58  ;;  %v313_v45 = vmul.f32 %v1216_v7, %v1061_v61  ;;  %v298_v60 = vmul.f32 %v1216_v7, %v956_v16  ;;  %v299_v62 = vmul.f32 %v1216_v7, %v963_v19 }
  0xe5   :  { %v328_v4 = vadd.f32 %v1232_v24, %v292_v11  ;;  %v329_v46 = vadd.f32 %v1232_v24, %v293_v14  ;;  %v344_v49 = vadd.f32 %v1232_v24, %v308_v15  ;;  %v345_v27 = vadd.f32 %v1232_v24, %v309_v18 }
  0xe6   :  { %v330_v5 = vadd.f32 %v1232_v24, %v294_v20  ;;  %v331_v6 = vadd.f32 %v1232_v24, %v295_v54  ;;  %v346_v29 = vadd.f32 %v1232_v24, %v310_v23  ;;  %v347_v52 = vadd.f32 %v1232_v24, %v311_v3 }
  0xe7   :  { %v358_v32 = vmax.f32 %v328_v4, 0.0  ;;  %v359_v33 = vmax.f32 %v329_v46, 0.0  ;;  %v374_v36 = vmax.f32 %v344_v49, 0.0  ;;  %v375_v55 = vmax.f32 %v345_v27, 0.0 }
  0xe8   :  { %v360_v47 = vmax.f32 %v330_v5, 0.0  ;;  %v361_v48 = vmax.f32 %v331_v6, 0.0  ;;  %v376_v50 = vmax.f32 %v346_v29, 0.0  ;;  %v377_v51 = vmax.f32 %v347_v52, 0.0 }
  0xe9   :  { %v388_v38 = vpack.c.bf16 %v359_v33, %v358_v32  ;;  %v396_v39 = vpack.c.bf16 %v375_v55, %v374_v36  ;;  %v332_v10 = vadd.f32 %v1232_v24, %v296_v41  ;;  %v333_v13 = vadd.f32 %v1232_v24, %v297_v42 }
  0xea   :  { %v389_v58 = vpack.c.bf16 %v361_v48, %v360_v47  ;;  %v397_v61 = vpack.c.bf16 %v377_v51, %v376_v50  ;;  %v348_v53 = vadd.f32 %v1232_v24, %v312_v44  ;;  %v349_v56 = vadd.f32 %v1232_v24, %v313_v45 }
  0xeb   :  { %693 = vmatmul.mubr.msk.bf16.vlgmr.msra.gmra.mrb[0].mxu0 %vm85_vm1, %v388_v38  ;;  %725 = vmatmul.mubr.msk.bf16.vlgmr.msra.gmra.mrb[0].mxu1 %vm85_vm1, %v396_v39  ;;  %v362_v57 = vmax.f32 %v332_v10, 0.0  ;;  %v363_v59 = vmax.f32 %v333_v13, 0.0  ;;  %v314_v9 = vmul.f32 %v1216_v7, %v1068_v1  ;;  %v315_v11 = vmul.f32 %v1216_v7, %v1075_v8 }
  0xec   :  { %696 = vmatprep.mubr.msk.bf16.mxu0 %vm843_vm0, %v842_v0  ;;  %728 = vmatprep.mubr.msk.bf16.mxu1 %vm843_vm0, %v842_v0  ;;  %v378_v63 = vmax.f32 %v348_v53, 0.0  ;;  %v379_v2 = vmax.f32 %v349_v56, 0.0  ;;  %v334_v16 = vadd.f32 %v1232_v24, %v298_v60  ;;  %v335_v19 = vadd.f32 %v1232_v24, %v299_v62 }
  0xed   :  { %v390_v14 = vpack.c.bf16 %v363_v59, %v362_v57  ;;  %v350_v18 = vadd.f32 %v1232_v24, %v314_v9  ;;  %v351_v20 = vadd.f32 %v1232_v24, %v315_v11  ;;  %v300_v8 = vmul.f32 %v1216_v7, %v970_v22 }
  0xee   :  { %v398_v15 = vpack.c.bf16 %v379_v2, %v378_v63  ;;  %v364_v1 = vmax.f32 %v334_v16, 0.0  ;;  %v365_v54 = vmax.f32 %v335_v19, 0.0  ;;  %v301_v23 = vmul.f32 %v1216_v7, %v977_v25 }
  0xef   :  { %v380_v3 = vmax.f32 %v350_v18, 0.0  ;;  %v381_v4 = vmax.f32 %v351_v20, 0.0  ;;  %v316_v46 = vmul.f32 %v1216_v7, %v1082_v12  ;;  %v317_v49 = vmul.f32 %v1216_v7, %v1089_v17 }
  0xf0   :  { %v336_v22 = vadd.f32 %v1232_v24, %v300_v8  ;;  %v337_v25 = vadd.f32 %v1232_v24, %v301_v23  ;;  %v391_v27 = vpack.c.bf16 %v365_v54, %v364_v1  ;;  %v302_v17 = vmul.f32 %v1216_v7, %v984_v28 }
  0xf1   :  { %v399_v5 = vpack.c.bf16 %v381_v4, %v380_v3  ;;  %v352_v6 = vadd.f32 %v1232_v24, %v316_v46  ;;  %v353_v29 = vadd.f32 %v1232_v24, %v317_v49  ;;  %v303_v32 = vmul.f32 %v1216_v7, %v991_v31 }
  0xf2   :  { %v366_v12 = vmax.f32 %v336_v22, 0.0  ;;  %v367_v52 = vmax.f32 %v337_v25, 0.0  ;;  %v318_v55 = vmul.f32 %v1216_v7, %v1096_v21  ;;  %v319_v38 = vmul.f32 %v1216_v7, %v1103_v26 }
  0xf3   :  { %697 = vmatmul.mubr.msk.bf16.gmra.mrb[4].mxu0 %vm85_vm1, %v389_v58  ;;  %729 = vmatmul.mubr.msk.bf16.gmra.mrb[4].mxu1 %vm85_vm1, %v397_v61  ;;  %v382_v33 = vmax.f32 %v352_v6, 0.0  ;;  %v383_v36 = vmax.f32 %v353_v29, 0.0  ;;  %v338_v28 = vadd.f32 %v1232_v24, %v302_v17  ;;  %v339_v31 = vadd.f32 %v1232_v24, %v303_v32 }
  0xf4   :  { %700 = vmatprep.mubr.msk.bf16.mxu0 %vm843_vm0, %v842_v0  ;;  %732 = vmatprep.mubr.msk.bf16.mxu1 %vm843_vm0, %v842_v0  ;;  %v392_v39 = vpack.c.bf16 %v367_v52, %v366_v12  ;;  %v354_v42 = vadd.f32 %v1232_v24, %v318_v55  ;;  %v355_v44 = vadd.f32 %v1232_v24, %v319_v38 }
  0xf5   :  { %v400_v41 = vpack.c.bf16 %v383_v36, %v382_v33  ;;  %v368_v21 = vmax.f32 %v338_v28, 0.0  ;;  %v369_v45 = vmax.f32 %v339_v31, 0.0  ;;  %v304_v26 = vmul.f32 %v1216_v7, %v998_v34 }
  0xf6   :  { %v305_v47 = vmul.f32 %v1216_v7, %v1005_v37  ;;  %v384_v48 = vmax.f32 %v354_v42, 0.0  ;;  %v385_v50 = vmax.f32 %v355_v44, 0.0  ;;  %v320_v51 = vmul.f32 %v1216_v7, %v1110_v30 }
  0xf7   :  { %v321_v10 = vmul.f32 %v1216_v7, %v1117_v35  ;;  %v393_v34 = vpack.c.bf16 %v369_v45, %v368_v21  ;;  %v340_v37 = vadd.f32 %v1232_v24, %v304_v26  ;;  %v306_v35 = vmul.f32 %v1216_v7, %v1012_v40 }
  0xf8   :  { %v401_v13 = vpack.c.bf16 %v385_v50, %v384_v48  ;;  %v341_v58 = vadd.f32 %v1232_v24, %v305_v47  ;;  %v356_v61 = vadd.f32 %v1232_v24, %v320_v51  ;;  %v307_v60 = vmul.f32 %v1216_v7, %v1019_v43 }
  0xf9   :  { %v357_v53 = vadd.f32 %v1232_v24, %v321_v10  ;;  %v370_v30 = vmax.f32 %v340_v37, 0.0  ;;  %v342_v40 = vadd.f32 %v1232_v24, %v306_v35 }
  0xfa   :  { %v371_v56 = vmax.f32 %v341_v58, 0.0  ;;  %v386_v57 = vmax.f32 %v356_v61, 0.0  ;;  %v343_v2 = vadd.f32 %v1232_v24, %v307_v60 }
  0xfb   :  { %701 = vmatmul.mubr.msk.bf16.gmra.mrb[8].mxu0 %vm85_vm1, %v390_v14  ;;  %733 = vmatmul.mubr.msk.bf16.gmra.mrb[8].mxu1 %vm85_vm1, %v398_v15  ;;  %v387_v59 = vmax.f32 %v357_v53, 0.0  ;;  %v372_v9 = vmax.f32 %v342_v40, 0.0 }
  0xfc   :  { %704 = vmatprep.mubr.msk.bf16.mxu0 %vm843_vm0, %v842_v0  ;;  %736 = vmatprep.mubr.msk.bf16.mxu1 %vm843_vm0, %v842_v0  ;;  %v394_v62 = vpack.c.bf16 %v371_v56, %v370_v30  ;;  %v373_v11 = vmax.f32 %v343_v2, 0.0 }
  0xfd   :  { %v402_v63 = vpack.c.bf16 %v387_v59, %v386_v57 }
  0xfe   :  { %v395_v43 = vpack.c.bf16 %v373_v11, %v372_v9 }
 0x103   :  { %705 = vmatmul.mubr.msk.bf16.gmra.mrb[12].mxu0 %vm85_vm1, %v391_v27  ;;  %737 = vmatmul.mubr.msk.bf16.gmra.mrb[12].mxu1 %vm85_vm1, %v399_v5 }
 0x104   :  { %708 = vmatprep.mubr.msk.bf16.mxu0 %vm843_vm0, %v842_v0  ;;  %740 = vmatprep.mubr.msk.bf16.mxu1 %vm843_vm0, %v842_v0 }
 0x10b   :  { %709 = vmatmul.mubr.msk.bf16.gmra.mrb[16].mxu0 %vm85_vm1, %v392_v39  ;;  %741 = vmatmul.mubr.msk.bf16.gmra.mrb[16].mxu1 %vm85_vm1, %v400_v41 }
 0x10c   :  { %712 = vmatprep.mubr.msk.bf16.mxu0 %vm843_vm0, %v842_v0  ;;  %744 = vmatprep.mubr.msk.bf16.mxu1 %vm843_vm0, %v842_v0 }
 0x113   :  { %713 = vmatmul.mubr.msk.bf16.gmra.mrb[20].mxu0 %vm85_vm1, %v393_v34  ;;  %745 = vmatmul.mubr.msk.bf16.gmra.mrb[20].mxu1 %vm85_vm1, %v401_v13 }
 0x114   :  { %716 = vmatprep.mubr.msk.bf16.mxu0 %vm843_vm0, %v842_v0  ;;  %748 = vmatprep.mubr.msk.bf16.mxu1 %vm843_vm0, %v842_v0 }
 0x11b   :  { %717 = vmatmul.mubr.msk.bf16.gmra.mrb[24].mxu0 %vm85_vm1, %v394_v62  ;;  %749 = vmatmul.mubr.msk.bf16.gmra.mrb[24].mxu1 %vm85_vm1, %v402_v63 }
 0x11c   :  { %720 = vmatprep.mubr.msk.bf16.mxu0 %vm843_vm0, %v842_v0 }
 0x123   :  { %721 = vmatmul.mubr.msk.bf16.gmra.mrb[28].mxu0 %vm85_vm1, %v395_v43 }
 0x1be   :  { %v498_v7 = vpop.f32.mrb[0].mxu0  ;;  %v562_v16 = vpop.f32.mrb[0].mxu1 }
 0x1bf   :  { %618 = vst.msk [vmem:[%s1475_s4] sm:$0xff] %vm617_vm2, %v498_v7  ;;  %v694_v24 = vpop.f32.mrb[1].mxu0  ;;  %634 = vst.msk [vmem:[%s1475_s4 + $0x80] sm:$0xff] %vm617_vm2, %v562_v16  ;;  %v726_v19 = vpop.f32.mrb[1].mxu1 }
 0x1c0   :  { %v501_v14 = vpop.f32.mrb[2].mxu0  ;;  %v565_v0 = vpop.f32.mrb[2].mxu1 }
 0x1c1   :  { %619 = vst.msk [vmem:[%s1475_s4 + $0x8] sm:$0xff] %vm617_vm2, %v501_v14  ;;  %v695_v15 = vpop.f32.mrb[3].mxu0  ;;  %635 = vst.msk [vmem:[%s1475_s4 + $0x88] sm:$0xff] %vm617_vm2, %v565_v0  ;;  %v727_v18 = vpop.f32.mrb[3].mxu1 }
 0x1c6   :  { %v506_v20 = vpop.f32.mrb[4].mxu0  ;;  %v570_v1 = vpop.f32.mrb[4].mxu1 }
 0x1c7   :  { %620 = vst.msk [vmem:[%s1475_s4 + $0x10] sm:$0xff] %vm617_vm2, %v506_v20  ;;  %v698_v54 = vpop.f32.mrb[5].mxu0  ;;  %636 = vst.msk [vmem:[%s1475_s4 + $0x90] sm:$0xff] %vm617_vm2, %v570_v1  ;;  %v730_v8 = vpop.f32.mrb[5].mxu1 }
 0x1c8   :  { %v509_v23 = vpop.f32.mrb[6].mxu0  ;;  %v573_v3 = vpop.f32.mrb[6].mxu1 }
 0x1c9   :  { %621 = vst.msk [vmem:[%s1475_s4 + $0x18] sm:$0xff] %vm617_vm2, %v509_v23  ;;  %v699_v4 = vpop.f32.mrb[7].mxu0  ;;  %637 = vst.msk [vmem:[%s1475_s4 + $0x98] sm:$0xff] %vm617_vm2, %v573_v3  ;;  %v731_v46 = vpop.f32.mrb[7].mxu1 }
 0x1ce   :  { %v514_v49 = vpop.f32.mrb[8].mxu0  ;;  %v578_v22 = vpop.f32.mrb[8].mxu1 }
 0x1cf   :  { %622 = vst.msk [vmem:[%s1475_s4 + $0x20] sm:$0xff] %vm617_vm2, %v514_v49  ;;  %v702_v25 = vpop.f32.mrb[9].mxu0  ;;  %638 = vst.msk [vmem:[%s1475_s4 + $0xa0] sm:$0xff] %vm617_vm2, %v578_v22  ;;  %v734_v27 = vpop.f32.mrb[9].mxu1 }
 0x1d0   :  { %v517_v5 = vpop.f32.mrb[10].mxu0  ;;  %v581_v6 = vpop.f32.mrb[10].mxu1 }
 0x1d1   :  { %623 = vst.msk [vmem:[%s1475_s4 + $0x28] sm:$0xff] %vm617_vm2, %v517_v5  ;;  %v703_v29 = vpop.f32.mrb[11].mxu0  ;;  %639 = vst.msk [vmem:[%s1475_s4 + $0xa8] sm:$0xff] %vm617_vm2, %v581_v6  ;;  %v735_v12 = vpop.f32.mrb[11].mxu1 }
 0x1d6   :  { %v522_v52 = vpop.f32.mrb[12].mxu0  ;;  %v586_v17 = vpop.f32.mrb[12].mxu1 }
 0x1d7   :  { %624 = vst.msk [vmem:[%s1475_s4 + $0x30] sm:$0xff] %vm617_vm2, %v522_v52  ;;  %v706_v32 = vpop.f32.mrb[13].mxu0  ;;  %640 = vst.msk [vmem:[%s1475_s4 + $0xb0] sm:$0xff] %vm617_vm2, %v586_v17  ;;  %v738_v33 = vpop.f32.mrb[13].mxu1 }
 0x1d8   :  { %v525_v36 = vpop.f32.mrb[14].mxu0  ;;  %v589_v55 = vpop.f32.mrb[14].mxu1 }
 0x1d9   :  { %625 = vst.msk [vmem:[%s1475_s4 + $0x38] sm:$0xff] %vm617_vm2, %v525_v36  ;;  %v707_v38 = vpop.f32.mrb[15].mxu0  ;;  %641 = vst.msk [vmem:[%s1475_s4 + $0xb8] sm:$0xff] %vm617_vm2, %v589_v55  ;;  %v739_v28 = vpop.f32.mrb[15].mxu1 }
 0x1de   :  { %v530_v31 = vpop.f32.mrb[16].mxu0  ;;  %v594_v39 = vpop.f32.mrb[16].mxu1 }
 0x1df   :  { %626 = vst.msk [vmem:[%s1475_s4 + $0x40] sm:$0xff] %vm617_vm2, %v530_v31  ;;  %v710_v41 = vpop.f32.mrb[17].mxu0  ;;  %642 = vst.msk [vmem:[%s1475_s4 + $0xc0] sm:$0xff] %vm617_vm2, %v594_v39  ;;  %v742_v42 = vpop.f32.mrb[17].mxu1 }
 0x1e0   :  { %v533_v44 = vpop.f32.mrb[18].mxu0  ;;  %v597_v21 = vpop.f32.mrb[18].mxu1 }
 0x1e1   :  { %627 = vst.msk [vmem:[%s1475_s4 + $0x48] sm:$0xff] %vm617_vm2, %v533_v44  ;;  %v711_v45 = vpop.f32.mrb[19].mxu0  ;;  %643 = vst.msk [vmem:[%s1475_s4 + $0xc8] sm:$0xff] %vm617_vm2, %v597_v21  ;;  %v743_v26 = vpop.f32.mrb[19].mxu1 }
 0x1e6   :  { %v538_v47 = vpop.f32.mrb[20].mxu0  ;;  %v602_v48 = vpop.f32.mrb[20].mxu1 }
 0x1e7   :  { %628 = vst.msk [vmem:[%s1475_s4 + $0x50] sm:$0xff] %vm617_vm2, %v538_v47  ;;  %v714_v50 = vpop.f32.mrb[21].mxu0  ;;  %644 = vst.msk [vmem:[%s1475_s4 + $0xd0] sm:$0xff] %vm617_vm2, %v602_v48  ;;  %v746_v51 = vpop.f32.mrb[21].mxu1 }
 0x1e8   :  { %v541_v10 = vpop.f32.mrb[22].mxu0  ;;  %v605_v34 = vpop.f32.mrb[22].mxu1 }
 0x1e9   :  { %629 = vst.msk [vmem:[%s1475_s4 + $0x58] sm:$0xff] %vm617_vm2, %v541_v10  ;;  %v715_v37 = vpop.f32.mrb[23].mxu0  ;;  %645 = vst.msk [vmem:[%s1475_s4 + $0xd8] sm:$0xff] %vm617_vm2, %v605_v34  ;;  %v747_v13 = vpop.f32.mrb[23].mxu1 }
 0x1ee   :  { %v546_v58 = vpop.f32.mrb[24].mxu0  ;;  %v610_v61 = vpop.f32.mrb[24].mxu1 }
 0x1ef   :  { %630 = vst.msk [vmem:[%s1475_s4 + $0x60] sm:$0xff] %vm617_vm2, %v546_v58  ;;  %v718_v53 = vpop.f32.mrb[25].mxu0  ;;  %646 = vst.msk [vmem:[%s1475_s4 + $0xe0] sm:$0xff] %vm617_vm2, %v610_v61  ;;  %v750_v30 = vpop.f32.mrb[25].mxu1 }
 0x1f0   :  { %v549_v35 = vpop.f32.mrb[26].mxu0  ;;  %v613_v56 = vpop.f32.mrb[26].mxu1 }
 0x1f1   :  { %631 = vst.msk [vmem:[%s1475_s4 + $0x68] sm:$0xff] %vm617_vm2, %v549_v35  ;;  %v719_v57 = vpop.f32.mrb[27].mxu0  ;;  %647 = vst.msk [vmem:[%s1475_s4 + $0xe8] sm:$0xff] %vm617_vm2, %v613_v56  ;;  %v751_v59 = vpop.f32.mrb[27].mxu1 }
 0x1f6   :  { %v554_v60 = vpop.f32.mrb[28].mxu0 }
 0x1f7   :  { %632 = vst.msk [vmem:[%s1475_s4 + $0x70] sm:$0xff] %vm617_vm2, %v554_v60  ;;  %v722_v62 = vpop.f32.mrb[29].mxu0 }
 0x1f8   :  { %v557_v63 = vpop.f32.mrb[30].mxu0 }
 0x1f9   :  { %633 = vst.msk [vmem:[%s1475_s4 + $0x78] sm:$0xff] %vm617_vm2, %v557_v63  ;;  %v723_v40 = vpop.f32.mrb[31].mxu0 }
 0x1fa   :  { %652 = vsyncpa [#allocation3], 1 }
 0x1fb   :  { %653 = vsyncpa [#allocation5], 1 }

// kernel: conditional_generator_forward.4
= control target key start
LH: loop header
LB: loop body
LE: loop exit
PB: predicated region body
PF: predicated region fallthrough
CT: control target
= control target key end

     0   :  { %7 = vsyncpa [#allocation3], 0  ;;  %s2098_s0 = inlined_call_operand.hbm [shape: f32[2,50], index: 0, kind: input, shape index: {}]   ;;  %s2099_s1 = inlined_call_operand.hbm [shape: bf16[50,3840], index: 1, kind: input, shape index: {}]   ;;  %s2100_s2 = inlined_call_operand.vmem [shape: f32[2,3840], index: 2, kind: output, shape index: {}]  }
   0x1   :  { %8 = vsyncpa [#allocation5], 0  ;;  %s1929_s9 = smov [#allocation2]   ;;  %s1930_s11 = smov [#allocation4]  }
   0x2   :  { %s15_s10 = sshll.u32 %s1929_s9, 4  ;;  %s24_s12 = sshll.u32 %s1930_s11, 4  ;;  %s16_s10 = int_to_ptr.vmem [resolvable:$true] %s15_s10  ;;  %s1950_s12 = int_to_ptr.vmem [resolvable:$true] %s24_s12 }
   0x3   :  { %s1881_s15 = scalar_lea.hbm %s2098_s0, 32 }
   0x4   :  { %p1882_p0 = scmp.ne.s32.totalorder %s2098_s0, %s1881_s15  ;;  %p1885_p1 = scmp.lt.u32.totalorder %s1881_s15, %s2098_s0 }
   0x6   :  { %p1887_p2 = pnand %p1885_p1, %p1882_p0 }
   0x8   :  { %1890 = shalt.err (!%p1887_p2)
}
   0x9   :  { %s1891_s20 = scalar_lea.vmem %s16_s10, 32  ;;  %p1896_p4 = scmp.lt.s32.totalorder %s16_s10, %s16_s10 }
   0xa   :  { %p1892_p3 = scmp.ne.s32.totalorder %s16_s10, %s1891_s20  ;;  %p1897_p5 = scmp.lt.s32.totalorder %s1891_s20, %s1891_s20 }
   0xc   :  { %p1898_p6 = por %p1897_p5, %p1896_p4 }
   0xe   :  { %p1899_p7 = pnand %p1898_p6, %p1892_p3 }
  0x10   :  { %1902 = shalt.err (!%p1899_p7)
}
  0x11   :  { %18 = dma.hbm_to_vmem [thread:$0]  %s2098_s0, 32, %s16_s10, [#allocation3]  }
  0x12   :  { %s1903_s25 = scalar_lea.hbm %s2099_s1, 13440 }
  0x13   :  { %p1904_p8 = scmp.ne.s32.totalorder %s2099_s1, %s1903_s25  ;;  %p1907_p9 = scmp.lt.u32.totalorder %s1903_s25, %s2099_s1 }
  0x15   :  { %p1909_p10 = pnand %p1907_p9, %p1904_p8 }
  0x17   :  { %1912 = shalt.err (!%p1909_p10)
}
  0x18   :  { %s1913_s30 = scalar_lea.vmem %s1950_s12, 13440  ;;  %p1918_p12 = scmp.lt.s32.totalorder %s1950_s12, %s1950_s12 }
  0x19   :  { %p1914_p11 = scmp.ne.s32.totalorder %s1950_s12, %s1913_s30  ;;  %p1919_p13 = scmp.lt.s32.totalorder %s1913_s30, %s1913_s30 }
  0x1b   :  { %p1920_p0 = por %p1919_p13, %p1918_p12 }
  0x1d   :  { %p1921_p1 = pnand %p1920_p0, %p1914_p11 }
  0x1f   :  { %1924 = shalt.err (!%p1921_p1)
}
  0x20   :  { %s1931_s0 = smov 1920   ;;  %s1932_s3 = smov 120  }
  0x21   :  { %30 = dma.hbm_to_vmem [thread:$0]  %s2099_s1, 13440, %s1950_s12, [#allocation5], %s1931_s0, %s1931_s0, %s1932_s3  }
  0x22   :  { %1925 = dma.done.wait [#allocation3], 32  }
  0x23   :  { %1926 = vsyncadd [#allocation3], 4294967264 }
  0x24   :  { %1927 = dma.done.wait [#allocation5], 13440  }
  0x25   :  { %1928 = vsyncadd [#allocation5], 4294953856  ;;  %v1933_v0 = vmov 0   ;;  %v1716_v1 = vld [vmem:[#allocation4 + $0x4] ss:$120 sps:$4 sm:$0xff]   ;;  %vm674_vm0 = vcmask 1040384  }
  0x26   :  { %797 = vmatprep.mubr.bf16.mxu0 %v1933_v0  ;;  %838 = vmatprep.mubr.bf16.mxu1 %v1933_v0  ;;  %v1718_v2 = vld [vmem:[#allocation4 + $0xc] ss:$120 sps:$4 sm:$0xff]   ;;  %v1720_v3 = vld [vmem:[#allocation4] ss:$120 sps:$4 sm:$0xff]   ;;  %v1724_v6 = vld [vmem:[#allocation4 + $0xfc] ss:$120 sps:$4 sm:$0xff]  }
  0x27   :  { %765 = vmatprep.subr.bf16.mxu0 %v1716_v1  ;;  %v1721_v4 = vld [vmem:[#allocation4 + $0x8] ss:$120 sps:$4 sm:$0xff]   ;;  %806 = vmatprep.subr.bf16.mxu1 %v1718_v2  ;;  %v1722_v5 = vld [vmem:[#allocation4 + $0xf4] ss:$120 sps:$4 sm:$0xff]   ;;  %v1727_v8 = vld [vmem:[#allocation4 + $0xf8] ss:$120 sps:$4 sm:$0xff]  }
  0x28   :  { %766 = vmatpush1.bf16.msra.mxu0 %v1720_v3  ;;  %807 = vmatpush1.bf16.msra.mxu1 %v1721_v4  ;;  %v1726_v7 = vld [vmem:[#allocation4 + $0xf0] ss:$120 sps:$4 sm:$0xff]   ;;  %v1728_v9 = vld [vmem:[#allocation4 + $0x1e4] ss:$120 sps:$4 sm:$0xff]   ;;  %v1732_v11 = vld [vmem:[#allocation4 + $0x1e0] ss:$120 sps:$4 sm:$0xff]  }
  0x29   :  { %767 = vmatprep.subr.bf16.mxu0 %v1722_v5  ;;  %808 = vmatprep.subr.bf16.mxu1 %v1724_v6  ;;  %v1730_v10 = vld [vmem:[#allocation4 + $0x1ec] ss:$120 sps:$4 sm:$0xff]   ;;  %v1733_v12 = vld [vmem:[#allocation4 + $0x1e8] ss:$120 sps:$4 sm:$0xff]   ;;  %v130_v13 = vld [vmem:[#allocation4 + $0x2d0] sm:$0x11] }
  0x2a   :  { %v131_v14 = vld [vmem:[#allocation4 + $0x2d8] sm:$0x11]  ;;  %v1650_v15 = vcombine.high %v130_v13, %v130_v13  ;;  %v1649_v17 = vcombine.low %v130_v13, %v130_v13  ;;  %v38_v19 = vld [vmem:[#allocation2] sm:$0x3]  ;;  %v1740_v20 = vld [vmem:[#allocation4 + $0x14] ss:$120 sps:$4 sm:$0xff]  }
  0x2b   :  { %v1652_v16 = vcombine.high %v131_v14, %v131_v14  ;;  %v1651_v18 = vcombine.low %v131_v14, %v131_v14  ;;  %v1743_v23 = vld [vmem:[#allocation4 + $0x1c] ss:$120 sps:$4 sm:$0xff]   ;;  %v1987_v24 = vpack.c.bf16 %v38_v19, %v38_v19  ;;  %vm670_vm1 = vcmask 408576   ;;  %v1738_v25 = vld [vmem:[#allocation4 + $0x10] ss:$120 sps:$4 sm:$0xff]  }
  0x2c   :  { %768 = vmatpush1.bf16.msra.mxu0 %v1726_v7  ;;  %809 = vmatpush1.bf16.msra.mxu1 %v1727_v8  ;;  %v676_v21 = vsel %vm674_vm0, %v1649_v17, 0  ;;  %v1741_v26 = vld [vmem:[#allocation4 + $0x18] ss:$120 sps:$4 sm:$0xff]   ;;  %v1746_v27 = vld [vmem:[#allocation4 + $0x104] ss:$120 sps:$4 sm:$0xff]  }
  0x2d   :  { %769 = vmatprep.subr.bf16.mxu0 %v1728_v9  ;;  %810 = vmatprep.subr.bf16.mxu1 %v1730_v10  ;;  %v682_v22 = vsel %vm674_vm0, %v1651_v18, 0  ;;  %v1749_v28 = vld [vmem:[#allocation4 + $0x10c] ss:$120 sps:$4 sm:$0xff]   ;;  %v1744_v29 = vld [vmem:[#allocation4 + $0x100] ss:$120 sps:$4 sm:$0xff]  }
  0x2e   :  { %v1747_v30 = vld [vmem:[#allocation4 + $0x108] ss:$120 sps:$4 sm:$0xff]   ;;  %v1752_v31 = vld [vmem:[#allocation4 + $0x1f4] ss:$120 sps:$4 sm:$0xff]   ;;  %v1753_v36 = vld [vmem:[#allocation4 + $0x1f8] ss:$120 sps:$4 sm:$0xff]  }
  0x2f   :  { %v1755_v32 = vld [vmem:[#allocation4 + $0x1fc] ss:$120 sps:$4 sm:$0xff]   ;;  %v132_v33 = vld [vmem:[#allocation4 + $0x2e0] sm:$0x11]  ;;  %v133_v34 = vld [vmem:[#allocation4 + $0x2e8] sm:$0x11] }
  0x30   :  { %770 = vmatpush1.bf16.msra.mxu0 %v1732_v11  ;;  %811 = vmatpush1.bf16.msra.mxu1 %v1733_v12  ;;  %v1750_v35 = vld [vmem:[#allocation4 + $0x1f0] ss:$120 sps:$4 sm:$0xff]   ;;  %v1654_v37 = vcombine.high %v132_v33, %v132_v33  ;;  %v1656_v38 = vcombine.high %v133_v34, %v133_v34  ;;  %v1653_v39 = vcombine.low %v132_v33, %v132_v33  ;;  %v1762_v41 = vld [vmem:[#allocation4 + $0x24] ss:$120 sps:$4 sm:$0xff]   ;;  %v1760_v45 = vld [vmem:[#allocation4 + $0x20] ss:$120 sps:$4 sm:$0xff]  }
  0x31   :  { %1679 = vmatprep.subr.msk.bf16.mxu0 %vm674_vm0, %v1650_v15  ;;  %1681 = vmatprep.subr.msk.bf16.mxu1 %vm674_vm0, %v1652_v16  ;;  %v1655_v40 = vcombine.low %v133_v34, %v133_v34  ;;  %v1765_v44 = vld [vmem:[#allocation4 + $0x2c] ss:$120 sps:$4 sm:$0xff]   ;;  %v1763_v46 = vld [vmem:[#allocation4 + $0x28] ss:$120 sps:$4 sm:$0xff]   ;;  %v1771_v48 = vld [vmem:[#allocation4 + $0x11c] ss:$120 sps:$4 sm:$0xff]  }
  0x32   :  { %v688_v42 = vsel %vm674_vm0, %v1653_v39, 0  ;;  %v1768_v47 = vld [vmem:[#allocation4 + $0x114] ss:$120 sps:$4 sm:$0xff]   ;;  %v1766_v49 = vld [vmem:[#allocation4 + $0x110] ss:$120 sps:$4 sm:$0xff]  }
  0x33   :  { %v694_v43 = vsel %vm674_vm0, %v1655_v40, 0  ;;  %v1769_v50 = vld [vmem:[#allocation4 + $0x118] ss:$120 sps:$4 sm:$0xff]   ;;  %v1774_v51 = vld [vmem:[#allocation4 + $0x204] ss:$120 sps:$4 sm:$0xff]  }
  0x34   :  { %772 = vmatpush1.bf16.msra.mxu0 %v676_v21  ;;  %813 = vmatpush1.bf16.msra.mxu1 %v682_v22  ;;  %v1777_v52 = vld [vmem:[#allocation4 + $0x20c] ss:$120 sps:$4 sm:$0xff]   ;;  %v134_v53 = vld [vmem:[#allocation4 + $0x2f0] sm:$0x11]  ;;  %v135_v54 = vld [vmem:[#allocation4 + $0x2f8] sm:$0x11] }
  0x35   :  { %847 = vmatprep.subr.bf16.mxu0 %v1740_v20  ;;  %888 = vmatprep.subr.bf16.mxu1 %v1743_v23  ;;  %v1772_v55 = vld [vmem:[#allocation4 + $0x200] ss:$120 sps:$4 sm:$0xff]   ;;  %v1658_v57 = vcombine.high %v134_v53, %v134_v53  ;;  %v1660_v58 = vcombine.high %v135_v54, %v135_v54  ;;  %v1657_v59 = vcombine.low %v134_v53, %v134_v53  ;;  %v1784_v61 = vld [vmem:[#allocation4 + $0x34] ss:$120 sps:$4 sm:$0xff]   ;;  %v1782_v2 = vld [vmem:[#allocation4 + $0x30] ss:$120 sps:$4 sm:$0xff]  }
  0x36   :  { %v1775_v56 = vld [vmem:[#allocation4 + $0x208] ss:$120 sps:$4 sm:$0xff]   ;;  %v1659_v60 = vcombine.low %v135_v54, %v135_v54  ;;  %v1787_v1 = vld [vmem:[#allocation4 + $0x3c] ss:$120 sps:$4 sm:$0xff]   ;;  %v1785_v3 = vld [vmem:[#allocation4 + $0x38] ss:$120 sps:$4 sm:$0xff]  }
  0x37   :  { %1680 = vmatmul.mubr.msk.bf16.vlgmr.msra.gmra.mrb[0].mxu0 %vm670_vm1, %v1987_v24  ;;  %1682 = vmatmul.mubr.msk.bf16.vlgmr.msra.gmra.mrb[0].mxu1 %vm670_vm1, %v1987_v24  ;;  %v700_v62 = vsel %vm674_vm0, %v1657_v59, 0  ;;  %v1790_v4 = vld [vmem:[#allocation4 + $0x124] ss:$120 sps:$4 sm:$0xff]   ;;  %v1788_v6 = vld [vmem:[#allocation4 + $0x120] ss:$120 sps:$4 sm:$0xff]  }
  0x38   :  { %848 = vmatpush1.bf16.msra.mxu0 %v1738_v25  ;;  %889 = vmatpush1.bf16.msra.mxu1 %v1741_v26  ;;  %v706_v63 = vsel %vm674_vm0, %v1659_v60, 0  ;;  %v1793_v5 = vld [vmem:[#allocation4 + $0x12c] ss:$120 sps:$4 sm:$0xff]   ;;  %v1791_v7 = vld [vmem:[#allocation4 + $0x128] ss:$120 sps:$4 sm:$0xff]  }
  0x39   :  { %849 = vmatprep.subr.bf16.mxu0 %v1746_v27  ;;  %890 = vmatprep.subr.bf16.mxu1 %v1749_v28  ;;  %v1796_v8 = vld [vmem:[#allocation4 + $0x214] ss:$120 sps:$4 sm:$0xff]   ;;  %v136_v10 = vld [vmem:[#allocation4 + $0x300] sm:$0x11]  ;;  %v1794_v12 = vld [vmem:[#allocation4 + $0x210] ss:$120 sps:$4 sm:$0xff]  }
  0x3a   :  { %879 = vmatprep.mubr.bf16.mxu0 %v1933_v0  ;;  %920 = vmatprep.mubr.bf16.mxu1 %v1933_v0  ;;  %v1799_v9 = vld [vmem:[#allocation4 + $0x21c] ss:$120 sps:$4 sm:$0xff]   ;;  %v137_v11 = vld [vmem:[#allocation4 + $0x308] sm:$0x11]  ;;  %v1797_v13 = vld [vmem:[#allocation4 + $0x218] ss:$120 sps:$4 sm:$0xff]   ;;  %v1662_v14 = vcombine.high %v136_v10, %v136_v10  ;;  %v1661_v16 = vcombine.low %v136_v10, %v136_v10 }
  0x3b   :  { %v1664_v15 = vcombine.high %v137_v11, %v137_v11  ;;  %v1663_v17 = vcombine.low %v137_v11, %v137_v11  ;;  %v1806_v18 = vld [vmem:[#allocation4 + $0x44] ss:$120 sps:$4 sm:$0xff]   ;;  %v1804_v22 = vld [vmem:[#allocation4 + $0x40] ss:$120 sps:$4 sm:$0xff]   ;;  %v1812_v25 = vld [vmem:[#allocation4 + $0x134] ss:$120 sps:$4 sm:$0xff]  }
  0x3c   :  { %850 = vmatpush1.bf16.msra.mxu0 %v1744_v29  ;;  %891 = vmatpush1.bf16.msra.mxu1 %v1747_v30  ;;  %v712_v19 = vsel %vm674_vm0, %v1661_v16, 0  ;;  %v1809_v21 = vld [vmem:[#allocation4 + $0x4c] ss:$120 sps:$4 sm:$0xff]   ;;  %v1807_v23 = vld [vmem:[#allocation4 + $0x48] ss:$120 sps:$4 sm:$0xff]  }
  0x3d   :  { %851 = vmatprep.subr.bf16.mxu0 %v1752_v31  ;;  %892 = vmatprep.subr.bf16.mxu1 %v1755_v32  ;;  %v718_v20 = vsel %vm674_vm0, %v1663_v17, 0  ;;  %v1815_v26 = vld [vmem:[#allocation4 + $0x13c] ss:$120 sps:$4 sm:$0xff]   ;;  %v1810_v27 = vld [vmem:[#allocation4 + $0x130] ss:$120 sps:$4 sm:$0xff]  }
  0x3e   :  { %v1813_v28 = vld [vmem:[#allocation4 + $0x138] ss:$120 sps:$4 sm:$0xff]   ;;  %v1818_v29 = vld [vmem:[#allocation4 + $0x224] ss:$120 sps:$4 sm:$0xff]   ;;  %v1819_v34 = vld [vmem:[#allocation4 + $0x228] ss:$120 sps:$4 sm:$0xff]  }
  0x3f   :  { %v1821_v30 = vld [vmem:[#allocation4 + $0x22c] ss:$120 sps:$4 sm:$0xff]   ;;  %v138_v31 = vld [vmem:[#allocation4 + $0x310] sm:$0x11]  ;;  %v139_v32 = vld [vmem:[#allocation4 + $0x318] sm:$0x11] }
  0x40   :  { %852 = vmatpush1.bf16.msra.mxu0 %v1750_v35  ;;  %893 = vmatpush1.bf16.msra.mxu1 %v1753_v36  ;;  %v1816_v33 = vld [vmem:[#allocation4 + $0x220] ss:$120 sps:$4 sm:$0xff]   ;;  %v1666_v35 = vcombine.high %v138_v31, %v138_v31  ;;  %v1668_v36 = vcombine.high %v139_v32, %v139_v32  ;;  %v1838_v53 = vld [vmem:[#allocation4 + $0x230] ss:$120 sps:$4 sm:$0xff]  }
  0x41   :  { %1683 = vmatprep.subr.msk.bf16.mxu0 %vm674_vm0, %v1654_v37  ;;  %1685 = vmatprep.subr.msk.bf16.mxu1 %vm674_vm0, %v1656_v38  ;;  %v1665_v37 = vcombine.low %v138_v31, %v138_v31  ;;  %v1667_v38 = vcombine.low %v139_v32, %v139_v32  ;;  %v1841_v54 = vld [vmem:[#allocation4 + $0x238] ss:$120 sps:$4 sm:$0xff]   ;;  %v1863_v11 = vld [vmem:[#allocation4 + $0x248] ss:$120 sps:$4 sm:$0xff]  }
  0x42   :  { %v1860_v10 = vld [vmem:[#allocation4 + $0x240] ss:$120 sps:$4 sm:$0xff]  }
  0x43   :  { %v724_v39 = vsel %vm674_vm0, %v1665_v37, 0  ;;  %v730_v40 = vsel %vm674_vm0, %v1667_v38, 0 }
  0x44   :  { %854 = vmatpush1.bf16.msra.mxu0 %v688_v42  ;;  %895 = vmatpush1.bf16.msra.mxu1 %v694_v43  ;;  %v1831_v42 = vld [vmem:[#allocation4 + $0x5c] ss:$120 sps:$4 sm:$0xff]   ;;  %v1826_v43 = vld [vmem:[#allocation4 + $0x50] ss:$120 sps:$4 sm:$0xff]  }
  0x45   :  { %929 = vmatprep.subr.bf16.mxu0 %v1762_v41  ;;  %970 = vmatprep.subr.bf16.mxu1 %v1765_v44  ;;  %v1828_v41 = vld [vmem:[#allocation4 + $0x54] ss:$120 sps:$4 sm:$0xff]   ;;  %v1829_v44 = vld [vmem:[#allocation4 + $0x58] ss:$120 sps:$4 sm:$0xff]  }
  0x47   :  { %1684 = vmatmul.mubr.msk.bf16.vlgmr.msra.gmra.mrb[4].mxu0 %vm670_vm1, %v1987_v24  ;;  %1686 = vmatmul.mubr.msk.bf16.vlgmr.msra.gmra.mrb[4].mxu1 %vm670_vm1, %v1987_v24 }
  0x48   :  { %930 = vmatpush1.bf16.msra.mxu0 %v1760_v45  ;;  %971 = vmatpush1.bf16.msra.mxu1 %v1763_v46  ;;  %v1834_v45 = vld [vmem:[#allocation4 + $0x144] ss:$120 sps:$4 sm:$0xff]  }
  0x49   :  { %931 = vmatprep.subr.bf16.mxu0 %v1768_v47  ;;  %972 = vmatprep.subr.bf16.mxu1 %v1771_v48  ;;  %v1837_v46 = vld [vmem:[#allocation4 + $0x14c] ss:$120 sps:$4 sm:$0xff]   ;;  %v1832_v47 = vld [vmem:[#allocation4 + $0x140] ss:$120 sps:$4 sm:$0xff]  }
  0x4a   :  { %961 = vmatprep.mubr.bf16.mxu0 %v1933_v0  ;;  %1002 = vmatprep.mubr.bf16.mxu1 %v1933_v0  ;;  %v1835_v48 = vld [vmem:[#allocation4 + $0x148] ss:$120 sps:$4 sm:$0xff]  }
  0x4c   :  { %932 = vmatpush1.bf16.msra.mxu0 %v1766_v49  ;;  %973 = vmatpush1.bf16.msra.mxu1 %v1769_v50  ;;  %v1840_v49 = vld [vmem:[#allocation4 + $0x234] ss:$120 sps:$4 sm:$0xff]  }
  0x4d   :  { %933 = vmatprep.subr.bf16.mxu0 %v1774_v51  ;;  %974 = vmatprep.subr.bf16.mxu1 %v1777_v52  ;;  %v1843_v50 = vld [vmem:[#allocation4 + $0x23c] ss:$120 sps:$4 sm:$0xff]   ;;  %v140_v51 = vld [vmem:[#allocation4 + $0x320] sm:$0x11]  ;;  %v141_v52 = vld [vmem:[#allocation4 + $0x328] sm:$0x11] }
  0x50   :  { %934 = vmatpush1.bf16.msra.mxu0 %v1772_v55  ;;  %975 = vmatpush1.bf16.msra.mxu1 %v1775_v56  ;;  %v1670_v55 = vcombine.high %v140_v51, %v140_v51  ;;  %v1672_v56 = vcombine.high %v141_v52, %v141_v52 }
  0x51   :  { %1687 = vmatprep.subr.msk.bf16.mxu0 %vm674_vm0, %v1658_v57  ;;  %1689 = vmatprep.subr.msk.bf16.mxu1 %vm674_vm0, %v1660_v58  ;;  %v1669_v57 = vcombine.low %v140_v51, %v140_v51  ;;  %v1671_v58 = vcombine.low %v141_v52, %v141_v52 }
  0x53   :  { %v736_v59 = vsel %vm674_vm0, %v1669_v57, 0  ;;  %v742_v60 = vsel %vm674_vm0, %v1671_v58, 0 }
  0x54   :  { %936 = vmatpush1.bf16.msra.mxu0 %v700_v62  ;;  %977 = vmatpush1.bf16.msra.mxu1 %v706_v63  ;;  %v1853_v62 = vld [vmem:[#allocation4 + $0x6c] ss:$120 sps:$4 sm:$0xff]   ;;  %v1848_v63 = vld [vmem:[#allocation4 + $0x60] ss:$120 sps:$4 sm:$0xff]  }
  0x55   :  { %1011 = vmatprep.subr.bf16.mxu0 %v1784_v61  ;;  %1052 = vmatprep.subr.bf16.mxu1 %v1787_v1  ;;  %v1850_v61 = vld [vmem:[#allocation4 + $0x64] ss:$120 sps:$4 sm:$0xff]   ;;  %v1851_v1 = vld [vmem:[#allocation4 + $0x68] ss:$120 sps:$4 sm:$0xff]  }
  0x57   :  { %1688 = vmatmul.mubr.msk.bf16.vlgmr.msra.gmra.mrb[8].mxu0 %vm670_vm1, %v1987_v24  ;;  %1690 = vmatmul.mubr.msk.bf16.vlgmr.msra.gmra.mrb[8].mxu1 %vm670_vm1, %v1987_v24 }
  0x58   :  { %1012 = vmatpush1.bf16.msra.mxu0 %v1782_v2  ;;  %1053 = vmatpush1.bf16.msra.mxu1 %v1785_v3  ;;  %v1856_v2 = vld [vmem:[#allocation4 + $0x154] ss:$120 sps:$4 sm:$0xff]  }
  0x59   :  { %1013 = vmatprep.subr.bf16.mxu0 %v1790_v4  ;;  %1054 = vmatprep.subr.bf16.mxu1 %v1793_v5  ;;  %v1859_v3 = vld [vmem:[#allocation4 + $0x15c] ss:$120 sps:$4 sm:$0xff]   ;;  %v1854_v4 = vld [vmem:[#allocation4 + $0x150] ss:$120 sps:$4 sm:$0xff]  }
  0x5a   :  { %1043 = vmatprep.mubr.bf16.mxu0 %v1933_v0  ;;  %1084 = vmatprep.mubr.bf16.mxu1 %v1933_v0  ;;  %v1857_v5 = vld [vmem:[#allocation4 + $0x158] ss:$120 sps:$4 sm:$0xff]  }
  0x5c   :  { %1014 = vmatpush1.bf16.msra.mxu0 %v1788_v6  ;;  %1055 = vmatpush1.bf16.msra.mxu1 %v1791_v7  ;;  %v1862_v6 = vld [vmem:[#allocation4 + $0x244] ss:$120 sps:$4 sm:$0xff]  }
  0x5d   :  { %1015 = vmatprep.subr.bf16.mxu0 %v1796_v8  ;;  %1056 = vmatprep.subr.bf16.mxu1 %v1799_v9  ;;  %v1865_v7 = vld [vmem:[#allocation4 + $0x24c] ss:$120 sps:$4 sm:$0xff]   ;;  %v142_v8 = vld [vmem:[#allocation4 + $0x330] sm:$0x11]  ;;  %v143_v9 = vld [vmem:[#allocation4 + $0x338] sm:$0x11] }
  0x60   :  { %1016 = vmatpush1.bf16.msra.mxu0 %v1794_v12  ;;  %1057 = vmatpush1.bf16.msra.mxu1 %v1797_v13  ;;  %v1674_v12 = vcombine.high %v142_v8, %v142_v8  ;;  %v1676_v13 = vcombine.high %v143_v9, %v143_v9 }
  0x61   :  { %1691 = vmatprep.subr.msk.bf16.mxu0 %vm674_vm0, %v1662_v14  ;;  %1693 = vmatprep.subr.msk.bf16.mxu1 %vm674_vm0, %v1664_v15  ;;  %v1673_v14 = vcombine.low %v142_v8, %v142_v8  ;;  %v1675_v15 = vcombine.low %v143_v9, %v143_v9 }
  0x63   :  { %v748_v16 = vsel %vm674_vm0, %v1673_v14, 0  ;;  %v754_v17 = vsel %vm674_vm0, %v1675_v15, 0 }
  0x64   :  { %1018 = vmatpush1.bf16.msra.mxu0 %v712_v19  ;;  %1059 = vmatpush1.bf16.msra.mxu1 %v718_v20  ;;  %v1870_v19 = vld [vmem:[#allocation4 + $0x70] ss:$120 sps:$4 sm:$0xff]   ;;  %v1875_v20 = vld [vmem:[#allocation4 + $0x164] ss:$120 sps:$4 sm:$0xff]  }
  0x65   :  { %1093 = vmatprep.subr.bf16.mxu0 %v1806_v18  ;;  %1134 = vmatprep.subr.bf16.mxu1 %v1809_v21  ;;  %v1872_v18 = vld [vmem:[#allocation4 + $0x74] ss:$120 sps:$4 sm:$0xff]   ;;  %v1873_v21 = vld [vmem:[#allocation4 + $0x160] ss:$120 sps:$4 sm:$0xff]  }
  0x67   :  { %1692 = vmatmul.mubr.msk.bf16.vlgmr.msra.gmra.mrb[12].mxu0 %vm670_vm1, %v1987_v24  ;;  %1694 = vmatmul.mubr.msk.bf16.vlgmr.msra.gmra.mrb[12].mxu1 %vm670_vm1, %v1987_v24 }
  0x68   :  { %1094 = vmatpush1.bf16.msra.mxu0 %v1804_v22  ;;  %1135 = vmatpush1.bf16.msra.mxu1 %v1807_v23  ;;  %v1878_v22 = vld [vmem:[#allocation4 + $0x254] ss:$120 sps:$4 sm:$0xff]   ;;  %v144_v23 = vld [vmem:[#allocation4 + $0x340] sm:$0x11] }
  0x69   :  { %1095 = vmatprep.subr.bf16.mxu0 %v1812_v25  ;;  %1136 = vmatprep.subr.bf16.mxu1 %v1815_v26  ;;  %v1876_v25 = vld [vmem:[#allocation4 + $0x250] ss:$120 sps:$4 sm:$0xff]   ;;  %v1678_v26 = vcombine.high %v144_v23, %v144_v23 }
  0x6a   :  { %1125 = vmatprep.mubr.bf16.mxu0 %v1933_v0  ;;  %1166 = vmatprep.mubr.bf16.mxu1 %v1933_v0 }
  0x6c   :  { %1096 = vmatpush1.bf16.msra.mxu0 %v1810_v27  ;;  %1137 = vmatpush1.bf16.msra.mxu1 %v1813_v28  ;;  %v1677_v27 = vcombine.low %v144_v23, %v144_v23 }
  0x6d   :  { %1097 = vmatprep.subr.bf16.mxu0 %v1818_v29  ;;  %1138 = vmatprep.subr.bf16.mxu1 %v1821_v30  ;;  %v1934_v29 = vmov 1983009808  }
  0x6e   :  { %v760_v28 = vsel %vm674_vm0, %v1677_v27, 0  ;;  %v1413_v30 = vunpack.c.l.s4 %v1934_v29 }
  0x70   :  { %1098 = vmatpush1.bf16.msra.mxu0 %v1816_v33  ;;  %1139 = vmatpush1.bf16.msra.mxu1 %v1819_v34  ;;  %v1414_v31 = vunpack.c.0.s8 %v1413_v30 }
  0x71   :  { %1695 = vmatprep.subr.msk.bf16.mxu0 %vm674_vm0, %v1666_v35  ;;  %1697 = vmatprep.subr.msk.bf16.mxu1 %vm674_vm0, %v1668_v36 }
  0x74   :  { %1100 = vmatpush1.bf16.msra.mxu0 %v724_v39  ;;  %1141 = vmatpush1.bf16.msra.mxu1 %v730_v40 }
  0x75   :  { %1175 = vmatprep.subr.bf16.mxu0 %v1828_v41  ;;  %1216 = vmatprep.subr.bf16.mxu1 %v1831_v42 }
  0x77   :  { %1696 = vmatmul.mubr.msk.bf16.vlgmr.msra.gmra.mrb[16].mxu0 %vm670_vm1, %v1987_v24  ;;  %1698 = vmatmul.mubr.msk.bf16.vlgmr.msra.gmra.mrb[16].mxu1 %vm670_vm1, %v1987_v24 }
  0x78   :  { %1176 = vmatpush1.bf16.msra.mxu0 %v1826_v43  ;;  %1217 = vmatpush1.bf16.msra.mxu1 %v1829_v44 }
  0x79   :  { %1177 = vmatprep.subr.bf16.mxu0 %v1834_v45  ;;  %1218 = vmatprep.subr.bf16.mxu1 %v1837_v46 }
  0x7a   :  { %1207 = vmatprep.mubr.bf16.mxu0 %v1933_v0  ;;  %1248 = vmatprep.mubr.bf16.mxu1 %v1933_v0 }
  0x7c   :  { %1178 = vmatpush1.bf16.msra.mxu0 %v1832_v47  ;;  %1219 = vmatpush1.bf16.msra.mxu1 %v1835_v48 }
  0x7d   :  { %1179 = vmatprep.subr.bf16.mxu0 %v1840_v49  ;;  %1220 = vmatprep.subr.bf16.mxu1 %v1843_v50 }
  0x80   :  { %1180 = vmatpush1.bf16.msra.mxu0 %v1838_v53  ;;  %1221 = vmatpush1.bf16.msra.mxu1 %v1841_v54 }
  0x81   :  { %1699 = vmatprep.subr.msk.bf16.mxu0 %vm674_vm0, %v1670_v55  ;;  %1701 = vmatprep.subr.msk.bf16.mxu1 %vm674_vm0, %v1672_v56 }
  0x84   :  { %1182 = vmatpush1.bf16.msra.mxu0 %v736_v59  ;;  %1223 = vmatpush1.bf16.msra.mxu1 %v742_v60 }
  0x85   :  { %1257 = vmatprep.subr.bf16.mxu0 %v1850_v61  ;;  %1298 = vmatprep.subr.bf16.mxu1 %v1853_v62 }
  0x87   :  { %1700 = vmatmul.mubr.msk.bf16.vlgmr.msra.gmra.mrb[20].mxu0 %vm670_vm1, %v1987_v24  ;;  %1702 = vmatmul.mubr.msk.bf16.vlgmr.msra.gmra.mrb[20].mxu1 %vm670_vm1, %v1987_v24 }
  0x88   :  { %1258 = vmatpush1.bf16.msra.mxu0 %v1848_v63  ;;  %1299 = vmatpush1.bf16.msra.mxu1 %v1851_v1 }
  0x89   :  { %1259 = vmatprep.subr.bf16.mxu0 %v1856_v2  ;;  %1300 = vmatprep.subr.bf16.mxu1 %v1859_v3 }
  0x8a   :  { %1289 = vmatprep.mubr.bf16.mxu0 %v1933_v0  ;;  %1330 = vmatprep.mubr.bf16.mxu1 %v1933_v0 }
  0x8c   :  { %1260 = vmatpush1.bf16.msra.mxu0 %v1854_v4  ;;  %1301 = vmatpush1.bf16.msra.mxu1 %v1857_v5 }
  0x8d   :  { %1261 = vmatprep.subr.bf16.mxu0 %v1862_v6  ;;  %1302 = vmatprep.subr.bf16.mxu1 %v1865_v7 }
  0x90   :  { %1262 = vmatpush1.bf16.msra.mxu0 %v1860_v10  ;;  %1303 = vmatpush1.bf16.msra.mxu1 %v1863_v11 }
  0x91   :  { %1703 = vmatprep.subr.msk.bf16.mxu0 %vm674_vm0, %v1674_v12  ;;  %1705 = vmatprep.subr.msk.bf16.mxu1 %vm674_vm0, %v1676_v13 }
  0x94   :  { %1264 = vmatpush1.bf16.msra.mxu0 %v748_v16  ;;  %1305 = vmatpush1.bf16.msra.mxu1 %v754_v17 }
  0x95   :  { %1339 = vmatprep.subr.bf16.mxu0 %v1872_v18 }
  0x97   :  { %1704 = vmatmul.mubr.msk.bf16.vlgmr.msra.gmra.mrb[24].mxu0 %vm670_vm1, %v1987_v24  ;;  %1706 = vmatmul.mubr.msk.bf16.vlgmr.msra.gmra.mrb[24].mxu1 %vm670_vm1, %v1987_v24 }
  0x98   :  { %1340 = vmatpush1.bf16.msra.mxu0 %v1870_v19  ;;  %1371 = vmatprep.mubr.bf16.mxu0 %v1933_v0  ;;  %v1415_v0 = vlaneseq }
  0x99   :  { %1341 = vmatprep.subr.bf16.mxu0 %v1875_v20 }
  0x9a   :  { %v1416_v32 = vshrl.u32 %v1415_v0, 7 }
  0x9c   :  { %1342 = vmatpush1.bf16.msra.mxu0 %v1873_v21  ;;  %v2058_v35 = vsub.s32 %v1414_v31, %v1416_v32 }
  0x9d   :  { %1343 = vmatprep.subr.bf16.mxu0 %v1878_v22 }
  0xa0   :  { %1344 = vmatpush1.bf16.msra.mxu0 %v1876_v25 }
  0xa1   :  { %1707 = vmatprep.subr.msk.bf16.mxu0 %vm674_vm0, %v1678_v26 }
  0xa4   :  { %1346 = vmatpush1.bf16.msra.mxu0 %v760_v28 }
  0xa7   :  { %1708 = vmatmul.mubr.msk.bf16.vlgmr.msra.gmra.mrb[28].mxu0 %vm670_vm1, %v1987_v24 }
 0x10a   :  { %v799_v33 = vpop.f32.mrb[0].mxu0  ;;  %v840_v34 = vpop.f32.mrb[0].mxu1 }
 0x10b   :  { %v801_v36 = vpop.f32.mrb[1].mxu0  ;;  %v842_v37 = vpop.f32.mrb[1].mxu1 }
 0x10c   :  { %v1410_v38 = vcombine.low %v799_v33, %v801_v36  ;;  %v1411_v39 = vcombine.low %v840_v34, %v842_v37  ;;  %v803_v40 = vpop.f32.mrb[2].mxu0  ;;  %v844_v41 = vpop.f32.mrb[2].mxu1 }
 0x10d   :  { %v804_v42 = vpop.f32.mrb[3].mxu0  ;;  %v845_v43 = vpop.f32.mrb[3].mxu1 }
 0x10e   :  { %v1418_v44 = vrot.slane %v1410_v38, %v2058_v35  ;;  %v1425_v24 = vrot.slane %v1411_v39, %v2058_v35 }
 0x110   :  { %v1426_v45 = vcombine.low %v1418_v44, %v1425_v24 }
 0x112   :  { %1545 = vst [vmem:[%s2100_s2] sm:$0xff] %v1426_v45 }
 0x11a   :  { %v881_v46 = vpop.f32.mrb[4].mxu0  ;;  %v922_v47 = vpop.f32.mrb[4].mxu1 }
 0x11b   :  { %v883_v48 = vpop.f32.mrb[5].mxu0  ;;  %v924_v49 = vpop.f32.mrb[5].mxu1 }
 0x11c   :  { %v1427_v50 = vcombine.low %v881_v46, %v883_v48  ;;  %v1428_v51 = vcombine.low %v922_v47, %v924_v49  ;;  %v885_v52 = vpop.f32.mrb[6].mxu0  ;;  %v926_v53 = vpop.f32.mrb[6].mxu1 }
 0x11d   :  { %v886_v54 = vpop.f32.mrb[7].mxu0  ;;  %v927_v55 = vpop.f32.mrb[7].mxu1 }
 0x11e   :  { %v1435_v56 = vrot.slane %v1427_v50, %v2058_v35  ;;  %v1442_v57 = vrot.slane %v1428_v51, %v2058_v35 }
 0x120   :  { %v1443_v58 = vcombine.low %v1435_v56, %v1442_v57 }
 0x122   :  { %1546 = vst [vmem:[%s2100_s2 + $0x8] sm:$0xff] %v1443_v58 }
 0x12a   :  { %v963_v59 = vpop.f32.mrb[8].mxu0  ;;  %v1004_v60 = vpop.f32.mrb[8].mxu1 }
 0x12b   :  { %v965_v61 = vpop.f32.mrb[9].mxu0  ;;  %v1006_v62 = vpop.f32.mrb[9].mxu1 }
 0x12c   :  { %v1444_v63 = vcombine.low %v963_v59, %v965_v61  ;;  %v1445_v1 = vcombine.low %v1004_v60, %v1006_v62  ;;  %v967_v2 = vpop.f32.mrb[10].mxu0  ;;  %v1008_v3 = vpop.f32.mrb[10].mxu1 }
 0x12d   :  { %v968_v4 = vpop.f32.mrb[11].mxu0  ;;  %v1009_v5 = vpop.f32.mrb[11].mxu1 }
 0x12e   :  { %v1452_v6 = vrot.slane %v1444_v63, %v2058_v35  ;;  %v1459_v7 = vrot.slane %v1445_v1, %v2058_v35 }
 0x130   :  { %v1460_v8 = vcombine.low %v1452_v6, %v1459_v7 }
 0x132   :  { %1547 = vst [vmem:[%s2100_s2 + $0x10] sm:$0xff] %v1460_v8 }
 0x13a   :  { %v1045_v9 = vpop.f32.mrb[12].mxu0  ;;  %v1086_v10 = vpop.f32.mrb[12].mxu1 }
 0x13b   :  { %v1047_v11 = vpop.f32.mrb[13].mxu0  ;;  %v1088_v12 = vpop.f32.mrb[13].mxu1 }
 0x13c   :  { %v1461_v13 = vcombine.low %v1045_v9, %v1047_v11  ;;  %v1462_v14 = vcombine.low %v1086_v10, %v1088_v12  ;;  %v1049_v15 = vpop.f32.mrb[14].mxu0  ;;  %v1090_v16 = vpop.f32.mrb[14].mxu1 }
 0x13d   :  { %v1050_v17 = vpop.f32.mrb[15].mxu0  ;;  %v1091_v18 = vpop.f32.mrb[15].mxu1 }
 0x13e   :  { %v1469_v19 = vrot.slane %v1461_v13, %v2058_v35  ;;  %v1476_v20 = vrot.slane %v1462_v14, %v2058_v35 }
 0x140   :  { %v1477_v21 = vcombine.low %v1469_v19, %v1476_v20 }
 0x142   :  { %1548 = vst [vmem:[%s2100_s2 + $0x18] sm:$0xff] %v1477_v21 }
 0x14a   :  { %v1127_v22 = vpop.f32.mrb[16].mxu0  ;;  %v1168_v23 = vpop.f32.mrb[16].mxu1 }
 0x14b   :  { %v1129_v25 = vpop.f32.mrb[17].mxu0  ;;  %v1170_v26 = vpop.f32.mrb[17].mxu1 }
 0x14c   :  { %v1478_v27 = vcombine.low %v1127_v22, %v1129_v25  ;;  %v1479_v28 = vcombine.low %v1168_v23, %v1170_v26  ;;  %v1131_v29 = vpop.f32.mrb[18].mxu0  ;;  %v1172_v30 = vpop.f32.mrb[18].mxu1 }
 0x14d   :  { %v1132_v0 = vpop.f32.mrb[19].mxu0  ;;  %v1173_v31 = vpop.f32.mrb[19].mxu1 }
 0x14e   :  { %v1486_v32 = vrot.slane %v1478_v27, %v2058_v35  ;;  %v1493_v33 = vrot.slane %v1479_v28, %v2058_v35 }
 0x150   :  { %v1494_v34 = vcombine.low %v1486_v32, %v1493_v33 }
 0x152   :  { %1549 = vst [vmem:[%s2100_s2 + $0x20] sm:$0xff] %v1494_v34 }
 0x15a   :  { %v1209_v36 = vpop.f32.mrb[20].mxu0  ;;  %v1250_v37 = vpop.f32.mrb[20].mxu1 }
 0x15b   :  { %v1211_v38 = vpop.f32.mrb[21].mxu0  ;;  %v1252_v39 = vpop.f32.mrb[21].mxu1 }
 0x15c   :  { %v1495_v40 = vcombine.low %v1209_v36, %v1211_v38  ;;  %v1496_v41 = vcombine.low %v1250_v37, %v1252_v39  ;;  %v1213_v42 = vpop.f32.mrb[22].mxu0  ;;  %v1254_v43 = vpop.f32.mrb[22].mxu1 }
 0x15d   :  { %v1214_v44 = vpop.f32.mrb[23].mxu0  ;;  %v1255_v24 = vpop.f32.mrb[23].mxu1 }
 0x15e   :  { %v1503_v45 = vrot.slane %v1495_v40, %v2058_v35  ;;  %v1510_v46 = vrot.slane %v1496_v41, %v2058_v35 }
 0x160   :  { %v1511_v47 = vcombine.low %v1503_v45, %v1510_v46 }
 0x162   :  { %1550 = vst [vmem:[%s2100_s2 + $0x28] sm:$0xff] %v1511_v47 }
 0x16a   :  { %v1291_v48 = vpop.f32.mrb[24].mxu0  ;;  %v1332_v49 = vpop.f32.mrb[24].mxu1 }
 0x16b   :  { %v1293_v50 = vpop.f32.mrb[25].mxu0  ;;  %v1334_v51 = vpop.f32.mrb[25].mxu1 }
 0x16c   :  { %v1512_v52 = vcombine.low %v1291_v48, %v1293_v50  ;;  %v1513_v53 = vcombine.low %v1332_v49, %v1334_v51  ;;  %v1295_v54 = vpop.f32.mrb[26].mxu0  ;;  %v1336_v55 = vpop.f32.mrb[26].mxu1 }
 0x16d   :  { %v1296_v56 = vpop.f32.mrb[27].mxu0  ;;  %v1337_v57 = vpop.f32.mrb[27].mxu1 }
 0x16e   :  { %v1520_v58 = vrot.slane %v1512_v52, %v2058_v35  ;;  %v1527_v59 = vrot.slane %v1513_v53, %v2058_v35 }
 0x170   :  { %v1528_v60 = vcombine.low %v1520_v58, %v1527_v59 }
 0x172   :  { %1551 = vst [vmem:[%s2100_s2 + $0x30] sm:$0xff] %v1528_v60 }
 0x17a   :  { %v1373_v61 = vpop.f32.mrb[28].mxu0 }
 0x17b   :  { %v1375_v62 = vpop.f32.mrb[29].mxu0 }
 0x17c   :  { %v1529_v63 = vcombine.low %v1373_v61, %v1375_v62  ;;  %v1377_v1 = vpop.f32.mrb[30].mxu0 }
 0x17d   :  { %v1378_v2 = vpop.f32.mrb[31].mxu0 }
 0x17e   :  { %1709 = vst.sshfl [vmem:[%s2100_s2 + $0x38] sm:$0x33 pattern:$0x76325410] %v1529_v63 }
 0x17f   :  { %1557 = vsyncpa [#allocation3], 1 }
 0x180   :  { %1558 = vsyncpa [#allocation5], 1 }

// kernel: conditional_generator_forward.6
= control target key start
LH: loop header
LB: loop body
LE: loop exit
PB: predicated region body
PF: predicated region fallthrough
CT: control target
= control target key end

     0   :  { %vm138_vm0 = vcmask 130048   ;;  %vm2012_vm1 = vcmask 261120   ;;  %s4887_s3 = inlined_call_operand.vmem [shape: bf16[16,32], index: 3, kind: input, shape index: {}]   ;;  %s4888_s0 = inlined_call_operand.vmem [shape: f32[960,16], index: 0, kind: input, shape index: {}]   ;;  %s4889_s1 = inlined_call_operand.vmem [shape: f32[1,16], index: 1, kind: input, shape index: {}]   ;;  %s4890_s2 = inlined_call_operand.vmem [shape: f32[1,16], index: 2, kind: input, shape index: {}]   ;;  %s4891_s4 = inlined_call_operand.vmem [shape: f32[960,32], index: 4, kind: output, shape index: {}]  }
   0x1   :  { %v2383_v0 = vld [vmem:[%s4887_s3] sm:$0xff]   ;;  %v2542_v2 = vld [vmem:[%s4888_s0 + $0x8] sm:$0xff]  ;;  %v2547_v3 = vld [vmem:[%s4888_s0 + $0x10] sm:$0xff] }
   0x2   :  { %v2537_v1 = vld [vmem:[%s4888_s0] sm:$0xff]  ;;  %2259 = vmatprep.subr.bf16.mxu0 %v2383_v0  ;;  %2381 = vmatprep.subr.bf16.mxu1 %v2383_v0  ;;  %v2552_v4 = vld [vmem:[%s4888_s0 + $0x18] sm:$0xff]  ;;  %v140_v6 = vsel %vm138_vm0, %v2542_v2, 0.0  ;;  %v142_v7 = vsel %vm138_vm0, %v2547_v3, 0.0  ;;  %v2570_v11 = vld [vmem:[%s4888_s0 + $0x28] sm:$0xff] }
   0x3   :  { %v139_v5 = vsel %vm138_vm0, %v2537_v1, 0.0  ;;  %2260 = vmatpush3.bf16.msra.mxu0 %v2383_v0  ;;  %2382 = vmatpush3.bf16.msra.mxu1 %v2383_v0  ;;  %v2563_v8 = vld [vmem:[%s4888_s0 + $0x20] sm:$0xff]  ;;  %v144_v10 = vsel %vm138_vm0, %v2552_v4, 0.0  ;;  %v2577_v14 = vld [vmem:[%s4888_s0 + $0x30] sm:$0xff]  ;;  %v148_v16 = vsel %vm138_vm0, %v2570_v11, 0.0  ;;  %v2584_v17 = vld [vmem:[%s4888_s0 + $0x38] sm:$0xff] }
   0x4   :  { %v141_v9 = vadd.f32 %v140_v6, %v139_v5  ;;  %v146_v13 = vsel %vm138_vm0, %v2563_v8, 0.0  ;;  %v150_v19 = vsel %vm138_vm0, %v2577_v14, 0.0  ;;  %v2591_v20 = vld [vmem:[%s4888_s0 + $0x40] sm:$0xff]  ;;  %v152_v22 = vsel %vm138_vm0, %v2584_v17, 0.0  ;;  %v2598_v23 = vld [vmem:[%s4888_s0 + $0x48] sm:$0xff]  ;;  %v2605_v26 = vld [vmem:[%s4888_s0 + $0x50] sm:$0xff] }
   0x5   :  { %v154_v25 = vsel %vm138_vm0, %v2591_v20, 0.0  ;;  %v156_v28 = vsel %vm138_vm0, %v2598_v23, 0.0  ;;  %v2612_v29 = vld [vmem:[%s4888_s0 + $0x58] sm:$0xff]  ;;  %v158_v31 = vsel %vm138_vm0, %v2605_v26, 0.0  ;;  %v2619_v32 = vld [vmem:[%s4888_s0 + $0x60] sm:$0xff]  ;;  %v2626_v35 = vld [vmem:[%s4888_s0 + $0x68] sm:$0xff] }
   0x6   :  { %v143_v12 = vadd.f32 %v142_v7, %v141_v9  ;;  %v160_v34 = vsel %vm138_vm0, %v2612_v29, 0.0  ;;  %v162_v37 = vsel %vm138_vm0, %v2619_v32, 0.0  ;;  %v2633_v38 = vld [vmem:[%s4888_s0 + $0x70] sm:$0xff]  ;;  %v164_v40 = vsel %vm138_vm0, %v2626_v35, 0.0  ;;  %v2640_v41 = vld [vmem:[%s4888_s0 + $0x78] sm:$0xff]  ;;  %v2647_v44 = vld [vmem:[%s4888_s0 + $0x80] sm:$0xff] }
   0x7   :  { %v166_v43 = vsel %vm138_vm0, %v2633_v38, 0.0  ;;  %v168_v46 = vsel %vm138_vm0, %v2640_v41, 0.0  ;;  %v2654_v47 = vld [vmem:[%s4888_s0 + $0x88] sm:$0xff]  ;;  %v170_v49 = vsel %vm138_vm0, %v2647_v44, 0.0  ;;  %v2661_v50 = vld [vmem:[%s4888_s0 + $0x90] sm:$0xff]  ;;  %v2668_v53 = vld [vmem:[%s4888_s0 + $0x98] sm:$0xff] }
   0x8   :  { %v145_v15 = vadd.f32 %v144_v10, %v143_v12  ;;  %v172_v52 = vsel %vm138_vm0, %v2654_v47, 0.0  ;;  %v174_v55 = vsel %vm138_vm0, %v2661_v50, 0.0  ;;  %v2675_v56 = vld [vmem:[%s4888_s0 + $0xa0] sm:$0xff]  ;;  %v176_v58 = vsel %vm138_vm0, %v2668_v53, 0.0  ;;  %v2682_v59 = vld [vmem:[%s4888_s0 + $0xa8] sm:$0xff]  ;;  %v2689_v62 = vld [vmem:[%s4888_s0 + $0xb0] sm:$0xff] }
   0x9   :  { %v178_v61 = vsel %vm138_vm0, %v2675_v56, 0.0  ;;  %v180_v0 = vsel %vm138_vm0, %v2682_v59, 0.0  ;;  %v2696_v5 = vld [vmem:[%s4888_s0 + $0xb8] sm:$0xff]  ;;  %v182_v7 = vsel %vm138_vm0, %v2689_v62, 0.0  ;;  %v2703_v9 = vld [vmem:[%s4888_s0 + $0xc0] sm:$0xff] }
   0xa   :  { %v147_v18 = vadd.f32 %v146_v13, %v145_v15  ;;  %v184_v12 = vsel %vm138_vm0, %v2696_v5, 0.0  ;;  %v2710_v13 = vld [vmem:[%s4888_s0 + $0xc8] sm:$0xff] }
   0xc   :  { %v149_v21 = vadd.f32 %v148_v16, %v147_v18  ;;  %v186_v16 = vsel %vm138_vm0, %v2703_v9, 0.0  ;;  %v2717_v18 = vld [vmem:[%s4888_s0 + $0xd0] sm:$0xff] }
   0xe   :  { %v151_v24 = vadd.f32 %v150_v19, %v149_v21  ;;  %v188_v21 = vsel %vm138_vm0, %v2710_v13, 0.0 }
  0x10   :  { %v153_v27 = vadd.f32 %v152_v22, %v151_v24  ;;  %v2724_v22 = vld [vmem:[%s4888_s0 + $0xd8] sm:$0xff] }
  0x12   :  { %v155_v30 = vadd.f32 %v154_v25, %v153_v27  ;;  %v190_v25 = vsel %vm138_vm0, %v2717_v18, 0.0  ;;  %v2731_v27 = vld [vmem:[%s4888_s0 + $0xe0] sm:$0xff] }
  0x14   :  { %v157_v33 = vadd.f32 %v156_v28, %v155_v30  ;;  %v192_v30 = vsel %vm138_vm0, %v2724_v22, 0.0 }
  0x16   :  { %v159_v36 = vadd.f32 %v158_v31, %v157_v33  ;;  %v2738_v31 = vld [vmem:[%s4888_s0 + $0xe8] sm:$0xff] }
  0x18   :  { %v161_v39 = vadd.f32 %v160_v34, %v159_v36  ;;  %v194_v34 = vsel %vm138_vm0, %v2731_v27, 0.0  ;;  %v2745_v36 = vld [vmem:[%s4888_s0 + $0xf0] sm:$0xff] }
  0x1a   :  { %v163_v42 = vadd.f32 %v162_v37, %v161_v39  ;;  %v196_v39 = vsel %vm138_vm0, %v2738_v31, 0.0 }
  0x1c   :  { %v165_v45 = vadd.f32 %v164_v40, %v163_v42  ;;  %v2752_v40 = vld [vmem:[%s4888_s0 + $0xf8] sm:$0xff] }
  0x1e   :  { %v167_v48 = vadd.f32 %v166_v43, %v165_v45  ;;  %v198_v43 = vsel %vm138_vm0, %v2745_v36, 0.0  ;;  %v2759_v45 = vld [vmem:[%s4888_s0 + $0x100] sm:$0xff] }
  0x20   :  { %v169_v51 = vadd.f32 %v168_v46, %v167_v48  ;;  %v200_v48 = vsel %vm138_vm0, %v2752_v40, 0.0 }
  0x22   :  { %v171_v54 = vadd.f32 %v170_v49, %v169_v51  ;;  %v2766_v49 = vld [vmem:[%s4888_s0 + $0x108] sm:$0xff] }
  0x24   :  { %v173_v57 = vadd.f32 %v172_v52, %v171_v54  ;;  %v202_v52 = vsel %vm138_vm0, %v2759_v45, 0.0  ;;  %v2773_v54 = vld [vmem:[%s4888_s0 + $0x110] sm:$0xff] }
  0x26   :  { %v175_v60 = vadd.f32 %v174_v55, %v173_v57  ;;  %v204_v57 = vsel %vm138_vm0, %v2766_v49, 0.0 }
  0x28   :  { %v177_v63 = vadd.f32 %v176_v58, %v175_v60  ;;  %v2780_v58 = vld [vmem:[%s4888_s0 + $0x118] sm:$0xff] }
  0x2a   :  { %v179_v6 = vadd.f32 %v178_v61, %v177_v63  ;;  %v206_v61 = vsel %vm138_vm0, %v2773_v54, 0.0  ;;  %v2787_v63 = vld [vmem:[%s4888_s0 + $0x120] sm:$0xff] }
  0x2c   :  { %v181_v10 = vadd.f32 %v180_v0, %v179_v6  ;;  %v208_v6 = vsel %vm138_vm0, %v2780_v58, 0.0 }
  0x2e   :  { %v183_v15 = vadd.f32 %v182_v7, %v181_v10  ;;  %v2794_v7 = vld [vmem:[%s4888_s0 + $0x128] sm:$0xff] }
  0x30   :  { %v185_v19 = vadd.f32 %v184_v12, %v183_v15  ;;  %v210_v12 = vsel %vm138_vm0, %v2787_v63, 0.0  ;;  %v2801_v15 = vld [vmem:[%s4888_s0 + $0x130] sm:$0xff] }
  0x32   :  { %v187_v24 = vadd.f32 %v186_v16, %v185_v19  ;;  %v212_v19 = vsel %vm138_vm0, %v2794_v7, 0.0 }
  0x34   :  { %v189_v28 = vadd.f32 %v188_v21, %v187_v24  ;;  %v2808_v21 = vld [vmem:[%s4888_s0 + $0x138] sm:$0xff] }
  0x36   :  { %v191_v33 = vadd.f32 %v190_v25, %v189_v28  ;;  %v214_v25 = vsel %vm138_vm0, %v2801_v15, 0.0  ;;  %v2815_v28 = vld [vmem:[%s4888_s0 + $0x140] sm:$0xff] }
  0x38   :  { %v193_v37 = vadd.f32 %v192_v30, %v191_v33  ;;  %v216_v33 = vsel %vm138_vm0, %v2808_v21, 0.0 }
  0x3a   :  { %v195_v42 = vadd.f32 %v194_v34, %v193_v37  ;;  %v2822_v34 = vld [vmem:[%s4888_s0 + $0x148] sm:$0xff] }
  0x3c   :  { %v197_v46 = vadd.f32 %v196_v39, %v195_v42  ;;  %v218_v39 = vsel %vm138_vm0, %v2815_v28, 0.0  ;;  %v2829_v42 = vld [vmem:[%s4888_s0 + $0x150] sm:$0xff] }
  0x3e   :  { %v199_v51 = vadd.f32 %v198_v43, %v197_v46  ;;  %v220_v46 = vsel %vm138_vm0, %v2822_v34, 0.0 }
  0x40   :  { %v201_v55 = vadd.f32 %v200_v48, %v199_v51  ;;  %v2836_v48 = vld [vmem:[%s4888_s0 + $0x158] sm:$0xff] }
  0x42   :  { %v203_v60 = vadd.f32 %v202_v52, %v201_v55  ;;  %v222_v52 = vsel %vm138_vm0, %v2829_v42, 0.0  ;;  %v2843_v55 = vld [vmem:[%s4888_s0 + $0x160] sm:$0xff] }
  0x44   :  { %v205_v0 = vadd.f32 %v204_v57, %v203_v60  ;;  %v224_v60 = vsel %vm138_vm0, %v2836_v48, 0.0 }
  0x46   :  { %v207_v10 = vadd.f32 %v206_v61, %v205_v0  ;;  %v2850_v61 = vld [vmem:[%s4888_s0 + $0x168] sm:$0xff] }
  0x48   :  { %v209_v16 = vadd.f32 %v208_v6, %v207_v10  ;;  %v226_v6 = vsel %vm138_vm0, %v2843_v55, 0.0  ;;  %v2857_v10 = vld [vmem:[%s4888_s0 + $0x170] sm:$0xff] }
  0x4a   :  { %v211_v24 = vadd.f32 %v210_v12, %v209_v16  ;;  %v228_v16 = vsel %vm138_vm0, %v2850_v61, 0.0 }
  0x4c   :  { %v213_v30 = vadd.f32 %v212_v19, %v211_v24  ;;  %v2864_v19 = vld [vmem:[%s4888_s0 + $0x178] sm:$0xff] }
  0x4e   :  { %v215_v37 = vadd.f32 %v214_v25, %v213_v30  ;;  %v230_v25 = vsel %vm138_vm0, %v2857_v10, 0.0  ;;  %v2871_v30 = vld [vmem:[%s4888_s0 + $0x180] sm:$0xff] }
  0x50   :  { %v217_v43 = vadd.f32 %v216_v33, %v215_v37  ;;  %v232_v37 = vsel %vm138_vm0, %v2864_v19, 0.0 }
  0x52   :  { %v219_v51 = vadd.f32 %v218_v39, %v217_v43  ;;  %v2878_v39 = vld [vmem:[%s4888_s0 + $0x188] sm:$0xff] }
  0x53   :  { %4962 = vst [vmem:[#allocation2_spill] sm:$0xff] %v2878_v39 }
  0x54   :  { %v221_v57 = vadd.f32 %v220_v46, %v219_v51  ;;  %v234_v46 = vsel %vm138_vm0, %v2871_v30, 0.0  ;;  %v2885_v51 = vld [vmem:[%s4888_s0 + $0x190] sm:$0xff] }
  0x55   :  { %4963 = vst [vmem:[#allocation3_spill] sm:$0xff] %v2885_v51 }
  0x56   :  { %v223_v0 = vadd.f32 %v222_v52, %v221_v57  ;;  %v236_v57 = vsel %vm138_vm0, %v2878_v39, 0.0 }
  0x58   :  { %v225_v12 = vadd.f32 %v224_v60, %v223_v0  ;;  %v2892_v60 = vld [vmem:[%s4888_s0 + $0x198] sm:$0xff] }
  0x59   :  { %4964 = vst [vmem:[#allocation4_spill] sm:$0xff] %v2892_v60 }
  0x5a   :  { %v227_v24 = vadd.f32 %v226_v6, %v225_v12  ;;  %v238_v6 = vsel %vm138_vm0, %v2885_v51, 0.0  ;;  %v2899_v12 = vld [vmem:[%s4888_s0 + $0x1a0] sm:$0xff] }
  0x5b   :  { %4965 = vst [vmem:[#allocation5_spill] sm:$0xff] %v2899_v12 }
  0x5c   :  { %v229_v33 = vadd.f32 %v228_v16, %v227_v24  ;;  %v240_v24 = vsel %vm138_vm0, %v2892_v60, 0.0 }
  0x5e   :  { %v231_v43 = vadd.f32 %v230_v25, %v229_v33  ;;  %v2906_v25 = vld [vmem:[%s4888_s0 + $0x1a8] sm:$0xff] }
  0x5f   :  { %4966 = vst [vmem:[#allocation6_spill] sm:$0xff] %v2906_v25 }
  0x60   :  { %v233_v52 = vadd.f32 %v232_v37, %v231_v43  ;;  %v242_v37 = vsel %vm138_vm0, %v2899_v12, 0.0  ;;  %v2913_v43 = vld [vmem:[%s4888_s0 + $0x1b0] sm:$0xff] }
  0x61   :  { %4967 = vst [vmem:[#allocation7_spill] sm:$0xff] %v2913_v43 }
  0x62   :  { %v235_v0 = vadd.f32 %v234_v46, %v233_v52  ;;  %v244_v52 = vsel %vm138_vm0, %v2906_v25, 0.0 }
  0x64   :  { %v237_v16 = vadd.f32 %v236_v57, %v235_v0  ;;  %v2920_v57 = vld [vmem:[%s4888_s0 + $0x1b8] sm:$0xff] }
  0x65   :  { %4968 = vst [vmem:[#allocation8_spill] sm:$0xff] %v2920_v57 }
  0x66   :  { %v239_v33 = vadd.f32 %v238_v6, %v237_v16  ;;  %v246_v6 = vsel %vm138_vm0, %v2913_v43, 0.0  ;;  %v2927_v16 = vld [vmem:[%s4888_s0 + $0x1c0] sm:$0xff] }
  0x67   :  { %4969 = vst [vmem:[#allocation9_spill] sm:$0xff] %v2927_v16 }
  0x68   :  { %v241_v46 = vadd.f32 %v240_v24, %v239_v33  ;;  %v248_v24 = vsel %vm138_vm0, %v2920_v57, 0.0  ;;  %v2934_v33 = vld [vmem:[%s4888_s0 + $0x1c8] sm:$0xff] }
  0x69   :  { %4970 = vst [vmem:[#allocation10_spill] sm:$0xff] %v2934_v33 }
  0x6a   :  { %v243_v0 = vadd.f32 %v242_v37, %v241_v46  ;;  %v250_v37 = vsel %vm138_vm0, %v2927_v16, 0.0  ;;  %v2941_v46 = vld [vmem:[%s4888_s0 + $0x1d0] sm:$0xff] }
  0x6b   :  { %4971 = vst [vmem:[#allocation11_spill] sm:$0xff] %v2941_v46 }
  0x6c   :  { %v245_v12 = vadd.f32 %v244_v52, %v243_v0  ;;  %v252_v52 = vsel %vm138_vm0, %v2934_v33, 0.0  ;;  %v2948_v0 = vld [vmem:[%s4888_s0 + $0x1d8] sm:$0xff] }
  0x6d   :  { %4972 = vst [vmem:[#allocation12_spill] sm:$0xff] %v2948_v0 }
  0x6e   :  { %v247_v25 = vadd.f32 %v246_v6, %v245_v12  ;;  %v254_v12 = vsel %vm138_vm0, %v2941_v46, 0.0  ;;  %v2955_v6 = vld [vmem:[%s4888_s0 + $0x1e0] sm:$0xff] }
  0x6f   :  { %4973 = vst [vmem:[#allocation13_spill] sm:$0xff] %v2955_v6 }
  0x70   :  { %v249_v43 = vadd.f32 %v248_v24, %v247_v25  ;;  %v256_v25 = vsel %vm138_vm0, %v2948_v0, 0.0  ;;  %v2962_v24 = vld [vmem:[%s4888_s0 + $0x1e8] sm:$0xff] }
  0x71   :  { %4974 = vst [vmem:[#allocation14_spill] sm:$0xff] %v2962_v24 }
  0x72   :  { %v251_v57 = vadd.f32 %v250_v37, %v249_v43  ;;  %v258_v43 = vsel %vm138_vm0, %v2955_v6, 0.0  ;;  %v2969_v37 = vld [vmem:[%s4888_s0 + $0x1f0] sm:$0xff] }
  0x73   :  { %4975 = vst [vmem:[#allocation15_spill] sm:$0xff] %v2969_v37 }
  0x74   :  { %v253_v16 = vadd.f32 %v252_v52, %v251_v57  ;;  %v260_v57 = vsel %vm138_vm0, %v2962_v24, 0.0  ;;  %v2976_v52 = vld [vmem:[%s4888_s0 + $0x1f8] sm:$0xff] }
  0x75   :  { %4976 = vst [vmem:[#allocation16_spill] sm:$0xff] %v2976_v52 }
  0x76   :  { %v255_v33 = vadd.f32 %v254_v12, %v253_v16  ;;  %v262_v16 = vsel %vm138_vm0, %v2969_v37, 0.0  ;;  %v2983_v12 = vld [vmem:[%s4888_s0 + $0x200] sm:$0xff] }
  0x77   :  { %4977 = vst [vmem:[#allocation17_spill] sm:$0xff] %v2983_v12 }
  0x78   :  { %v257_v46 = vadd.f32 %v256_v25, %v255_v33  ;;  %v264_v33 = vsel %vm138_vm0, %v2976_v52, 0.0  ;;  %v2990_v25 = vld [vmem:[%s4888_s0 + $0x208] sm:$0xff] }
  0x79   :  { %4978 = vst [vmem:[#allocation18_spill] sm:$0xff] %v2990_v25 }
  0x7a   :  { %v259_v0 = vadd.f32 %v258_v43, %v257_v46  ;;  %v266_v46 = vsel %vm138_vm0, %v2983_v12, 0.0  ;;  %v2997_v43 = vld [vmem:[%s4888_s0 + $0x210] sm:$0xff] }
  0x7b   :  { %4979 = vst [vmem:[#allocation19_spill] sm:$0xff] %v2997_v43 }
  0x7c   :  { %v261_v6 = vadd.f32 %v260_v57, %v259_v0  ;;  %v268_v0 = vsel %vm138_vm0, %v2990_v25, 0.0  ;;  %v3004_v57 = vld [vmem:[%s4888_s0 + $0x218] sm:$0xff] }
  0x7d   :  { %4980 = vst [vmem:[#allocation20_spill] sm:$0xff] %v3004_v57 }
  0x7e   :  { %v263_v24 = vadd.f32 %v262_v16, %v261_v6  ;;  %v270_v6 = vsel %vm138_vm0, %v2997_v43, 0.0  ;;  %v3011_v16 = vld [vmem:[%s4888_s0 + $0x220] sm:$0xff] }
  0x7f   :  { %4981 = vst [vmem:[#allocation21_spill] sm:$0xff] %v3011_v16 }
  0x80   :  { %v265_v37 = vadd.f32 %v264_v33, %v263_v24  ;;  %v272_v24 = vsel %vm138_vm0, %v3004_v57, 0.0  ;;  %v3018_v33 = vld [vmem:[%s4888_s0 + $0x228] sm:$0xff] }
  0x81   :  { %4982 = vst [vmem:[#allocation22_spill] sm:$0xff] %v3018_v33 }
  0x82   :  { %v267_v52 = vadd.f32 %v266_v46, %v265_v37  ;;  %v274_v37 = vsel %vm138_vm0, %v3011_v16, 0.0  ;;  %v3025_v46 = vld [vmem:[%s4888_s0 + $0x230] sm:$0xff] }
  0x83   :  { %4983 = vst [vmem:[#allocation23_spill] sm:$0xff] %v3025_v46 }
  0x84   :  { %v269_v12 = vadd.f32 %v268_v0, %v267_v52  ;;  %v276_v52 = vsel %vm138_vm0, %v3018_v33, 0.0  ;;  %v3032_v0 = vld [vmem:[%s4888_s0 + $0x238] sm:$0xff] }
  0x85   :  { %4984 = vst [vmem:[#allocation24_spill] sm:$0xff] %v3032_v0 }
  0x86   :  { %v271_v25 = vadd.f32 %v270_v6, %v269_v12  ;;  %v278_v12 = vsel %vm138_vm0, %v3025_v46, 0.0  ;;  %v3039_v6 = vld [vmem:[%s4888_s0 + $0x240] sm:$0xff] }
  0x87   :  { %4985 = vst [vmem:[#allocation25_spill] sm:$0xff] %v3039_v6 }
  0x88   :  { %v273_v43 = vadd.f32 %v272_v24, %v271_v25  ;;  %v280_v25 = vsel %vm138_vm0, %v3032_v0, 0.0  ;;  %v3046_v24 = vld [vmem:[%s4888_s0 + $0x248] sm:$0xff] }
  0x89   :  { %4986 = vst [vmem:[#allocation26_spill] sm:$0xff] %v3046_v24 }
  0x8a   :  { %v275_v57 = vadd.f32 %v274_v37, %v273_v43  ;;  %v282_v43 = vsel %vm138_vm0, %v3039_v6, 0.0  ;;  %v3053_v37 = vld [vmem:[%s4888_s0 + $0x250] sm:$0xff] }
  0x8b   :  { %4987 = vst [vmem:[#allocation27_spill] sm:$0xff] %v3053_v37 }
  0x8c   :  { %v277_v16 = vadd.f32 %v276_v52, %v275_v57  ;;  %v284_v57 = vsel %vm138_vm0, %v3046_v24, 0.0  ;;  %v3060_v52 = vld [vmem:[%s4888_s0 + $0x258] sm:$0xff] }
  0x8d   :  { %4988 = vst [vmem:[#allocation28_spill] sm:$0xff] %v3060_v52 }
  0x8e   :  { %v279_v33 = vadd.f32 %v278_v12, %v277_v16  ;;  %v286_v16 = vsel %vm138_vm0, %v3053_v37, 0.0  ;;  %v3067_v12 = vld [vmem:[%s4888_s0 + $0x260] sm:$0xff] }
  0x8f   :  { %4989 = vst [vmem:[#allocation29_spill] sm:$0xff] %v3067_v12 }
  0x90   :  { %v281_v46 = vadd.f32 %v280_v25, %v279_v33  ;;  %v288_v33 = vsel %vm138_vm0, %v3060_v52, 0.0  ;;  %v3074_v25 = vld [vmem:[%s4888_s0 + $0x268] sm:$0xff] }
  0x91   :  { %4990 = vst [vmem:[#allocation30_spill] sm:$0xff] %v3074_v25 }
  0x92   :  { %v283_v0 = vadd.f32 %v282_v43, %v281_v46  ;;  %v290_v46 = vsel %vm138_vm0, %v3067_v12, 0.0  ;;  %v3081_v43 = vld [vmem:[%s4888_s0 + $0x270] sm:$0xff] }
  0x93   :  { %4991 = vst [vmem:[#allocation31_spill] sm:$0xff] %v3081_v43 }
  0x94   :  { %v285_v6 = vadd.f32 %v284_v57, %v283_v0  ;;  %v292_v0 = vsel %vm138_vm0, %v3074_v25, 0.0  ;;  %v3088_v57 = vld [vmem:[%s4888_s0 + $0x278] sm:$0xff] }
  0x95   :  { %4992 = vst [vmem:[#allocation32_spill] sm:$0xff] %v3088_v57 }
  0x96   :  { %v287_v24 = vadd.f32 %v286_v16, %v285_v6  ;;  %v294_v6 = vsel %vm138_vm0, %v3081_v43, 0.0  ;;  %v3095_v16 = vld [vmem:[%s4888_s0 + $0x280] sm:$0xff] }
  0x97   :  { %4993 = vst [vmem:[#allocation33_spill] sm:$0xff] %v3095_v16 }
  0x98   :  { %v289_v37 = vadd.f32 %v288_v33, %v287_v24  ;;  %v296_v24 = vsel %vm138_vm0, %v3088_v57, 0.0  ;;  %v3102_v33 = vld [vmem:[%s4888_s0 + $0x288] sm:$0xff] }
  0x99   :  { %4994 = vst [vmem:[#allocation34_spill] sm:$0xff] %v3102_v33 }
  0x9a   :  { %v291_v52 = vadd.f32 %v290_v46, %v289_v37  ;;  %v298_v37 = vsel %vm138_vm0, %v3095_v16, 0.0  ;;  %v3109_v46 = vld [vmem:[%s4888_s0 + $0x290] sm:$0xff] }
  0x9b   :  { %4995 = vst [vmem:[#allocation35_spill] sm:$0xff] %v3109_v46 }
  0x9c   :  { %v293_v12 = vadd.f32 %v292_v0, %v291_v52  ;;  %v300_v52 = vsel %vm138_vm0, %v3102_v33, 0.0  ;;  %v3116_v0 = vld [vmem:[%s4888_s0 + $0x298] sm:$0xff] }
  0x9d   :  { %4996 = vst [vmem:[#allocation36_spill] sm:$0xff] %v3116_v0 }
  0x9e   :  { %v295_v25 = vadd.f32 %v294_v6, %v293_v12  ;;  %v302_v12 = vsel %vm138_vm0, %v3109_v46, 0.0  ;;  %v3123_v6 = vld [vmem:[%s4888_s0 + $0x2a0] sm:$0xff] }
  0x9f   :  { %4997 = vst [vmem:[#allocation37_spill] sm:$0xff] %v3123_v6 }
  0xa0   :  { %v297_v43 = vadd.f32 %v296_v24, %v295_v25  ;;  %v304_v25 = vsel %vm138_vm0, %v3116_v0, 0.0  ;;  %v3130_v24 = vld [vmem:[%s4888_s0 + $0x2a8] sm:$0xff] }
  0xa1   :  { %4998 = vst [vmem:[#allocation38_spill] sm:$0xff] %v3130_v24 }
  0xa2   :  { %v299_v57 = vadd.f32 %v298_v37, %v297_v43  ;;  %v306_v43 = vsel %vm138_vm0, %v3123_v6, 0.0  ;;  %v3137_v37 = vld [vmem:[%s4888_s0 + $0x2b0] sm:$0xff] }
  0xa3   :  { %4999 = vst [vmem:[#allocation39_spill] sm:$0xff] %v3137_v37 }
  0xa4   :  { %v301_v16 = vadd.f32 %v300_v52, %v299_v57  ;;  %v308_v57 = vsel %vm138_vm0, %v3130_v24, 0.0  ;;  %v3144_v52 = vld [vmem:[%s4888_s0 + $0x2b8] sm:$0xff] }
  0xa5   :  { %5000 = vst [vmem:[#allocation40_spill] sm:$0xff] %v3144_v52 }
  0xa6   :  { %v303_v33 = vadd.f32 %v302_v12, %v301_v16  ;;  %v310_v16 = vsel %vm138_vm0, %v3137_v37, 0.0  ;;  %v3151_v12 = vld [vmem:[%s4888_s0 + $0x2c0] sm:$0xff] }
  0xa7   :  { %5001 = vst [vmem:[#allocation41_spill] sm:$0xff] %v3151_v12 }
  0xa8   :  { %v305_v46 = vadd.f32 %v304_v25, %v303_v33  ;;  %v312_v33 = vsel %vm138_vm0, %v3144_v52, 0.0  ;;  %v3158_v25 = vld [vmem:[%s4888_s0 + $0x2c8] sm:$0xff] }
  0xa9   :  { %5002 = vst [vmem:[#allocation42_spill] sm:$0xff] %v3158_v25 }
  0xaa   :  { %v307_v0 = vadd.f32 %v306_v43, %v305_v46  ;;  %v314_v46 = vsel %vm138_vm0, %v3151_v12, 0.0  ;;  %v3165_v43 = vld [vmem:[%s4888_s0 + $0x2d0] sm:$0xff] }
  0xab   :  { %5003 = vst [vmem:[#allocation43_spill] sm:$0xff] %v3165_v43 }
  0xac   :  { %v309_v6 = vadd.f32 %v308_v57, %v307_v0  ;;  %v316_v0 = vsel %vm138_vm0, %v3158_v25, 0.0  ;;  %v3172_v57 = vld [vmem:[%s4888_s0 + $0x2d8] sm:$0xff] }
  0xad   :  { %5004 = vst [vmem:[#allocation44_spill] sm:$0xff] %v3172_v57 }
  0xae   :  { %v311_v24 = vadd.f32 %v310_v16, %v309_v6  ;;  %v318_v6 = vsel %vm138_vm0, %v3165_v43, 0.0  ;;  %v3179_v16 = vld [vmem:[%s4888_s0 + $0x2e0] sm:$0xff] }
  0xaf   :  { %5005 = vst [vmem:[#allocation45_spill] sm:$0xff] %v3179_v16 }
  0xb0   :  { %v313_v37 = vadd.f32 %v312_v33, %v311_v24  ;;  %v320_v24 = vsel %vm138_vm0, %v3172_v57, 0.0  ;;  %v3186_v33 = vld [vmem:[%s4888_s0 + $0x2e8] sm:$0xff] }
  0xb1   :  { %5006 = vst [vmem:[#allocation46_spill] sm:$0xff] %v3186_v33 }
  0xb2   :  { %v315_v52 = vadd.f32 %v314_v46, %v313_v37  ;;  %v322_v37 = vsel %vm138_vm0, %v3179_v16, 0.0  ;;  %v3193_v46 = vld [vmem:[%s4888_s0 + $0x2f0] sm:$0xff] }
  0xb3   :  { %5007 = vst [vmem:[#allocation47_spill] sm:$0xff] %v3193_v46 }
  0xb4   :  { %v317_v12 = vadd.f32 %v316_v0, %v315_v52  ;;  %v324_v52 = vsel %vm138_vm0, %v3186_v33, 0.0  ;;  %v3200_v0 = vld [vmem:[%s4888_s0 + $0x2f8] sm:$0xff] }
  0xb5   :  { %5008 = vst [vmem:[#allocation48_spill] sm:$0xff] %v3200_v0 }
  0xb6   :  { %v319_v25 = vadd.f32 %v318_v6, %v317_v12  ;;  %v326_v12 = vsel %vm138_vm0, %v3193_v46, 0.0  ;;  %v3207_v6 = vld [vmem:[%s4888_s0 + $0x300] sm:$0xff] }
  0xb7   :  { %5009 = vst [vmem:[#allocation49_spill] sm:$0xff] %v3207_v6 }
  0xb8   :  { %v321_v43 = vadd.f32 %v320_v24, %v319_v25  ;;  %v328_v25 = vsel %vm138_vm0, %v3200_v0, 0.0  ;;  %v3214_v24 = vld [vmem:[%s4888_s0 + $0x308] sm:$0xff] }
  0xb9   :  { %5010 = vst [vmem:[#allocation50_spill] sm:$0xff] %v3214_v24 }
  0xba   :  { %v323_v57 = vadd.f32 %v322_v37, %v321_v43  ;;  %v330_v43 = vsel %vm138_vm0, %v3207_v6, 0.0  ;;  %v3221_v37 = vld [vmem:[%s4888_s0 + $0x310] sm:$0xff] }
  0xbb   :  { %5011 = vst [vmem:[#allocation51_spill] sm:$0xff] %v3221_v37 }
  0xbc   :  { %v325_v16 = vadd.f32 %v324_v52, %v323_v57  ;;  %v332_v57 = vsel %vm138_vm0, %v3214_v24, 0.0  ;;  %v3228_v52 = vld [vmem:[%s4888_s0 + $0x318] sm:$0xff] }
  0xbd   :  { %5012 = vst [vmem:[#allocation52_spill] sm:$0xff] %v3228_v52 }
  0xbe   :  { %v327_v33 = vadd.f32 %v326_v12, %v325_v16  ;;  %v334_v16 = vsel %vm138_vm0, %v3221_v37, 0.0  ;;  %v3235_v12 = vld [vmem:[%s4888_s0 + $0x320] sm:$0xff] }
  0xbf   :  { %5013 = vst [vmem:[#allocation53_spill] sm:$0xff] %v3235_v12 }
  0xc0   :  { %v329_v46 = vadd.f32 %v328_v25, %v327_v33  ;;  %v336_v33 = vsel %vm138_vm0, %v3228_v52, 0.0  ;;  %v3242_v25 = vld [vmem:[%s4888_s0 + $0x328] sm:$0xff] }
  0xc1   :  { %5014 = vst [vmem:[#allocation54_spill] sm:$0xff] %v3242_v25  ;;  %v340_v37 = vsel %vm138_vm0, %v3242_v25, 0.0 }
  0xc2   :  { %v331_v0 = vadd.f32 %v330_v43, %v329_v46  ;;  %v338_v46 = vsel %vm138_vm0, %v3235_v12, 0.0 }
  0xc4   :  { %v333_v6 = vadd.f32 %v332_v57, %v331_v0  ;;  %v3251_v0 = vld [vmem:[%s4888_s0 + $0x330] sm:$0xff] }
  0xc5   :  { %5015 = vst [vmem:[#allocation55_spill] sm:$0xff] %v3251_v0  ;;  %v342_v60 = vsel %vm138_vm0, %v3251_v0, 0.0 }
  0xc6   :  { %v335_v24 = vadd.f32 %v334_v16, %v333_v6  ;;  %v3258_v6 = vld [vmem:[%s4888_s0 + $0x338] sm:$0xff] }
  0xc7   :  { %5016 = vst [vmem:[#allocation56_spill] sm:$0xff] %v3258_v6 }
  0xc8   :  { %v337_v43 = vadd.f32 %v336_v33, %v335_v24  ;;  %v344_v24 = vsel %vm138_vm0, %v3258_v6, 0.0  ;;  %v3265_v33 = vld [vmem:[%s4888_s0 + $0x340] sm:$0xff] }
  0xc9   :  { %5017 = vst [vmem:[#allocation57_spill] sm:$0xff] %v3265_v33 }
  0xca   :  { %v339_v57 = vadd.f32 %v338_v46, %v337_v43  ;;  %v3272_v46 = vld [vmem:[%s4888_s0 + $0x348] sm:$0xff] }
  0xcb   :  { %5018 = vst [vmem:[#allocation58_spill] sm:$0xff] %v3272_v46 }
  0xcc   :  { %v341_v52 = vadd.f32 %v340_v37, %v339_v57  ;;  %v346_v37 = vsel %vm138_vm0, %v3265_v33, 0.0 }
  0xce   :  { %v343_v16 = vadd.f32 %v342_v60, %v341_v52  ;;  %v348_v60 = vsel %vm138_vm0, %v3272_v46, 0.0  ;;  %v3279_v52 = vld [vmem:[%s4888_s0 + $0x350] sm:$0xff] }
  0xcf   :  { %5019 = vst [vmem:[#allocation59_spill] sm:$0xff] %v3279_v52 }
  0xd0   :  { %v345_v25 = vadd.f32 %v344_v24, %v343_v16  ;;  %v350_v16 = vsel %vm138_vm0, %v3279_v52, 0.0  ;;  %v3286_v24 = vld [vmem:[%s4888_s0 + $0x358] sm:$0xff] }
  0xd1   :  { %5020 = vst [vmem:[#allocation60_spill] sm:$0xff] %v3286_v24 }
  0xd2   :  { %v347_v43 = vadd.f32 %v346_v37, %v345_v25  ;;  %v352_v25 = vsel %vm138_vm0, %v3286_v24, 0.0  ;;  %v3293_v37 = vld [vmem:[%s4888_s0 + $0x360] sm:$0xff] }
  0xd3   :  { %5021 = vst [vmem:[#allocation61_spill] sm:$0xff] %v3293_v37 }
  0xd4   :  { %v349_v57 = vadd.f32 %v348_v60, %v347_v43  ;;  %v354_v43 = vsel %vm138_vm0, %v3293_v37, 0.0  ;;  %v3300_v60 = vld [vmem:[%s4888_s0 + $0x368] sm:$0xff] }
  0xd5   :  { %5022 = vst [vmem:[#allocation62_spill] sm:$0xff] %v3300_v60 }
  0xd6   :  { %v351_v33 = vadd.f32 %v350_v16, %v349_v57  ;;  %v356_v57 = vsel %vm138_vm0, %v3300_v60, 0.0  ;;  %v3307_v16 = vld [vmem:[%s4888_s0 + $0x370] sm:$0xff] }
  0xd7   :  { %5023 = vst [vmem:[#allocation63_spill] sm:$0xff] %v3307_v16 }
  0xd8   :  { %v353_v46 = vadd.f32 %v352_v25, %v351_v33  ;;  %v358_v33 = vsel %vm138_vm0, %v3307_v16, 0.0  ;;  %v3314_v25 = vld [vmem:[%s4888_s0 + $0x378] sm:$0xff] }
  0xd9   :  { %5024 = vst [vmem:[#allocation64_spill] sm:$0xff] %v3314_v25 }
  0xda   :  { %v355_v52 = vadd.f32 %v354_v43, %v353_v46  ;;  %v360_v46 = vsel %vm138_vm0, %v3314_v25, 0.0  ;;  %v3321_v43 = vld [vmem:[%s4888_s0 + $0x380] sm:$0xff] }
  0xdb   :  { %5025 = vst [vmem:[#allocation65_spill] sm:$0xff] %v3321_v43 }
  0xdc   :  { %v357_v24 = vadd.f32 %v356_v57, %v355_v52  ;;  %v362_v52 = vsel %vm138_vm0, %v3321_v43, 0.0  ;;  %v3328_v57 = vld [vmem:[%s4888_s0 + $0x388] sm:$0xff] }
  0xdd   :  { %5026 = vst [vmem:[#allocation66_spill] sm:$0xff] %v3328_v57 }
  0xde   :  { %v359_v37 = vadd.f32 %v358_v33, %v357_v24  ;;  %v364_v24 = vsel %vm138_vm0, %v3328_v57, 0.0  ;;  %v3335_v33 = vld [vmem:[%s4888_s0 + $0x390] sm:$0xff] }
  0xdf   :  { %5027 = vst [vmem:[#allocation67_spill] sm:$0xff] %v3335_v33 }
  0xe0   :  { %v361_v60 = vadd.f32 %v360_v46, %v359_v37  ;;  %v366_v37 = vsel %vm138_vm0, %v3335_v33, 0.0  ;;  %v3342_v46 = vld [vmem:[%s4888_s0 + $0x398] sm:$0xff] }
  0xe1   :  { %5028 = vst [vmem:[#allocation68_spill] sm:$0xff] %v3342_v46 }
  0xe2   :  { %v363_v16 = vadd.f32 %v362_v52, %v361_v60  ;;  %v368_v60 = vsel %vm138_vm0, %v3342_v46, 0.0  ;;  %v3349_v52 = vld [vmem:[%s4888_s0 + $0x3a0] sm:$0xff] }
  0xe3   :  { %5029 = vst [vmem:[#allocation69_spill] sm:$0xff] %v3349_v52 }
  0xe4   :  { %v365_v25 = vadd.f32 %v364_v24, %v363_v16  ;;  %v370_v16 = vsel %vm138_vm0, %v3349_v52, 0.0  ;;  %v3356_v24 = vld [vmem:[%s4888_s0 + $0x3a8] sm:$0xff] }
  0xe5   :  { %5030 = vst [vmem:[#allocation70_spill] sm:$0xff] %v3356_v24 }
  0xe6   :  { %v367_v43 = vadd.f32 %v366_v37, %v365_v25  ;;  %v372_v25 = vsel %vm138_vm0, %v3356_v24, 0.0  ;;  %v3363_v37 = vld [vmem:[%s4888_s0 + $0x3b0] sm:$0xff] }
  0xe7   :  { %5031 = vst [vmem:[#allocation71_spill] sm:$0xff] %v3363_v37 }
  0xe8   :  { %v369_v57 = vadd.f32 %v368_v60, %v367_v43  ;;  %v374_v43 = vsel %vm138_vm0, %v3363_v37, 0.0  ;;  %v3370_v60 = vld [vmem:[%s4888_s0 + $0x3b8] sm:$0xff] }
  0xea   :  { %v371_v33 = vadd.f32 %v370_v16, %v369_v57  ;;  %v376_v57 = vsel %vm138_vm0, %v3370_v60, 0.0 }
  0xec   :  { %v373_v46 = vadd.f32 %v372_v25, %v371_v33 }
  0xee   :  { %v375_v52 = vadd.f32 %v374_v43, %v373_v46 }
  0xf0   :  { %v377_v16 = vadd.f32 %v376_v57, %v375_v52 }
  0xf2   :  { %v378_v24 = vrot.slane %v377_v16, 4 }
  0xf4   :  { %v379_v6 = vadd.f32 %v378_v24, %v377_v16 }
  0xf6   :  { %v380_v0 = vrot.slane %v379_v6, 2 }
  0xf8   :  { %v381_v12 = vadd.f32 %v380_v0, %v379_v6 }
  0xfa   :  { %v382_v51 = vrot.slane %v381_v12, 1 }
  0xfc   :  { %v383_v39 = vadd.f32 %v382_v51, %v381_v12 }
  0xfe   :  { %v3374_v33 = vmul.f32 0.0010416667, %v383_v39 }
 0x100   :  { %v386_v25 = vsub.f32 %v2537_v1, %v3374_v33  ;;  %v387_v37 = vsub.f32 %v2542_v2, %v3374_v33  ;;  %v388_v46 = vsub.f32 %v2547_v3, %v3374_v33  ;;  %v389_v52 = vsub.f32 %v2552_v4, %v3374_v33 }
 0x101   :  { %v390_v24 = vsub.f32 %v2563_v8, %v3374_v33  ;;  %v391_v39 = vsub.f32 %v2570_v11, %v3374_v33  ;;  %v392_v1 = vsub.f32 %v2577_v14, %v3374_v33  ;;  %v393_v8 = vsub.f32 %v2584_v17, %v3374_v33 }
 0x102   :  { %v506_v0 = vmul.f32 %v386_v25, %v386_v25  ;;  %v507_v6 = vmul.f32 %v387_v37, %v387_v37  ;;  %v508_v51 = vmul.f32 %v388_v46, %v388_v46  ;;  %v509_v12 = vmul.f32 %v389_v52, %v389_v52 }
 0x103   :  { %v510_v2 = vmul.f32 %v390_v24, %v390_v24  ;;  %v511_v37 = vmul.f32 %v391_v39, %v391_v39  ;;  %v394_v11 = vsub.f32 %v2591_v20, %v3374_v33  ;;  %v512_v46 = vmul.f32 %v392_v1, %v392_v1 }
 0x104   :  { %v626_v43 = vsel %vm138_vm0, %v506_v0, 0.0  ;;  %v627_v3 = vsel %vm138_vm0, %v507_v6, 0.0  ;;  %v629_v4 = vsel %vm138_vm0, %v508_v51, 0.0  ;;  %v631_v16 = vsel %vm138_vm0, %v509_v12, 0.0 }
 0x105   :  { %v628_v57 = vadd.f32 %v627_v3, %v626_v43  ;;  %v633_v14 = vsel %vm138_vm0, %v510_v2, 0.0  ;;  %v395_v24 = vsub.f32 %v2598_v23, %v3374_v33  ;;  %v513_v0 = vmul.f32 %v393_v8, %v393_v8 }
 0x106   :  { %v635_v6 = vsel %vm138_vm0, %v511_v37, 0.0  ;;  %v396_v17 = vsub.f32 %v2605_v26, %v3374_v33  ;;  %v514_v39 = vmul.f32 %v394_v11, %v394_v11  ;;  %v637_v12 = vsel %vm138_vm0, %v512_v46, 0.0 }
 0x107   :  { %v630_v25 = vadd.f32 %v629_v4, %v628_v57  ;;  %v397_v20 = vsub.f32 %v2612_v29, %v3374_v33  ;;  %v515_v1 = vmul.f32 %v395_v24, %v395_v24  ;;  %v639_v2 = vsel %vm138_vm0, %v513_v0, 0.0 }
 0x108   :  { %v398_v23 = vsub.f32 %v2619_v32, %v3374_v33  ;;  %v516_v4 = vmul.f32 %v396_v17, %v396_v17  ;;  %v641_v57 = vsel %vm138_vm0, %v514_v39, 0.0  ;;  %v399_v26 = vsub.f32 %v2626_v35, %v3374_v33 }
 0x109   :  { %v632_v52 = vadd.f32 %v631_v16, %v630_v25  ;;  %v517_v37 = vmul.f32 %v397_v20, %v397_v20  ;;  %v643_v16 = vsel %vm138_vm0, %v515_v1, 0.0  ;;  %v400_v29 = vsub.f32 %v2633_v38, %v3374_v33 }
 0x10a   :  { %v518_v11 = vmul.f32 %v398_v23, %v398_v23  ;;  %v645_v46 = vsel %vm138_vm0, %v516_v4, 0.0  ;;  %v401_v32 = vsub.f32 %v2640_v41, %v3374_v33  ;;  %v402_v35 = vsub.f32 %v2647_v44, %v3374_v33 }
 0x10b   :  { %v634_v51 = vadd.f32 %v633_v14, %v632_v52  ;;  %v519_v52 = vmul.f32 %v399_v26, %v399_v26  ;;  %v647_v24 = vsel %vm138_vm0, %v517_v37, 0.0  ;;  %v403_v38 = vsub.f32 %v2654_v47, %v3374_v33 }
 0x10c   :  { %v521_v39 = vmul.f32 %v401_v32, %v401_v32  ;;  %v404_v41 = vsub.f32 %v2661_v50, %v3374_v33  ;;  %v522_v20 = vmul.f32 %v402_v35, %v402_v35  ;;  %v405_v44 = vsub.f32 %v2668_v53, %v3374_v33 }
 0x10d   :  { %v636_v43 = vadd.f32 %v635_v6, %v634_v51  ;;  %v520_v6 = vmul.f32 %v400_v29, %v400_v29  ;;  %v649_v51 = vsel %vm138_vm0, %v518_v11, 0.0  ;;  %v406_v47 = vsub.f32 %v2675_v56, %v3374_v33 }
 0x10e   :  { %v655_v23 = vsel %vm138_vm0, %v521_v39, 0.0  ;;  %v407_v50 = vsub.f32 %v2682_v59, %v3374_v33  ;;  %v525_v37 = vmul.f32 %v405_v44, %v405_v44  ;;  %v408_v53 = vsub.f32 %v2689_v62, %v3374_v33 }
 0x10f   :  { %v638_v3 = vadd.f32 %v637_v12, %v636_v43  ;;  %v651_v12 = vsel %vm138_vm0, %v519_v52, 0.0  ;;  %v653_v1 = vsel %vm138_vm0, %v520_v6, 0.0  ;;  %v526_v29 = vmul.f32 %v406_v47, %v406_v47 }
 0x110   :  { %v409_v56 = vsub.f32 %v2696_v5, %v3374_v33  ;;  %v663_v32 = vsel %vm138_vm0, %v525_v37, 0.0  ;;  %v410_v59 = vsub.f32 %v2703_v9, %v3374_v33  ;;  %v411_v62 = vsub.f32 %v2710_v13, %v3374_v33 }
 0x111   :  { %v640_v8 = vadd.f32 %v639_v2, %v638_v3  ;;  %v523_v3 = vmul.f32 %v403_v38, %v403_v38  ;;  %v412_v5 = vsub.f32 %v2717_v18, %v3374_v33  ;;  %v413_v9 = vsub.f32 %v2724_v22, %v3374_v33 }
 0x112   :  { %v529_v6 = vmul.f32 %v409_v56, %v409_v56  ;;  %v530_v38 = vmul.f32 %v410_v59, %v410_v59  ;;  %v414_v13 = vsub.f32 %v2731_v27, %v3374_v33  ;;  %v415_v18 = vsub.f32 %v2738_v31, %v3374_v33 }
 0x113   :  { %v642_v25 = vadd.f32 %v641_v57, %v640_v8  ;;  %v524_v57 = vmul.f32 %v404_v41, %v404_v41  ;;  %v657_v8 = vsel %vm138_vm0, %v522_v20, 0.0  ;;  %v416_v22 = vsub.f32 %v2745_v36, %v3374_v33 }
 0x114   :  { %v671_v41 = vsel %vm138_vm0, %v529_v6, 0.0  ;;  %v534_v47 = vmul.f32 %v414_v13, %v414_v13  ;;  %v417_v27 = vsub.f32 %v2752_v40, %v3374_v33  ;;  %v418_v31 = vsub.f32 %v2759_v45, %v3374_v33 }
 0x115   :  { %v644_v14 = vadd.f32 %v643_v16, %v642_v25  ;;  %v659_v16 = vsel %vm138_vm0, %v523_v3, 0.0  ;;  %v661_v11 = vsel %vm138_vm0, %v524_v57, 0.0  ;;  %v533_v3 = vmul.f32 %v413_v9, %v413_v9 }
 0x116   :  { %v419_v36 = vsub.f32 %v2766_v49, %v3374_v33  ;;  %v420_v40 = vsub.f32 %v2773_v54, %v3374_v33  ;;  %v538_v56 = vmul.f32 %v418_v31, %v418_v31  ;;  %v421_v45 = vsub.f32 %v2780_v58, %v3374_v33 }
 0x117   :  { %v646_v0 = vadd.f32 %v645_v46, %v644_v14  ;;  %v527_v14 = vmul.f32 %v407_v50, %v407_v50  ;;  %v679_v50 = vsel %vm138_vm0, %v533_v3, 0.0  ;;  %v422_v49 = vsub.f32 %v2787_v63, %v3374_v33 }
 0x118   :  { %v423_v54 = vsub.f32 %v2794_v7, %v3374_v33  ;;  %v541_v6 = vmul.f32 %v421_v45, %v421_v45  ;;  %v424_v58 = vsub.f32 %v2801_v15, %v3374_v33  ;;  %v425_v63 = vsub.f32 %v2808_v21, %v3374_v33 }
 0x119   :  { %v648_v17 = vadd.f32 %v647_v24, %v646_v0  ;;  %v528_v24 = vmul.f32 %v408_v53, %v408_v53  ;;  %v665_v0 = vsel %vm138_vm0, %v526_v29, 0.0  ;;  %v537_v29 = vmul.f32 %v417_v27, %v417_v27 }
 0x11a   :  { %v695_v9 = vsel %vm138_vm0, %v541_v6, 0.0  ;;  %v426_v7 = vsub.f32 %v2815_v28, %v3374_v33  ;;  %v427_v15 = vsub.f32 %v2822_v34, %v3374_v33  ;;  %v428_v21 = vsub.f32 %v2829_v42, %v3374_v33  ;;  %v5035_v6 = vld [vmem:[#allocation5_spill] sm:$0xff] }
 0x11b   :  { %v650_v43 = vadd.f32 %v649_v51, %v648_v17  ;;  %v667_v51 = vsel %vm138_vm0, %v527_v14, 0.0  ;;  %v669_v39 = vsel %vm138_vm0, %v528_v24, 0.0  ;;  %v687_v59 = vsel %vm138_vm0, %v537_v29, 0.0 }
 0x11c   :  { %v429_v28 = vsub.f32 %v2836_v48, %v3374_v33  ;;  %v430_v34 = vsub.f32 %v2843_v55, %v3374_v33  ;;  %v431_v42 = vsub.f32 %v2850_v61, %v3374_v33  ;;  %v432_v48 = vsub.f32 %v2857_v10, %v3374_v33  ;;  %v5032_v10 = vld [vmem:[#allocation2_spill] sm:$0xff] }
 0x11d   :  { %v652_v2 = vadd.f32 %v651_v12, %v650_v43  ;;  %v531_v43 = vmul.f32 %v411_v62, %v411_v62  ;;  %v433_v55 = vsub.f32 %v2864_v19, %v3374_v33  ;;  %v434_v61 = vsub.f32 %v2871_v30, %v3374_v33  ;;  %v5033_v19 = vld [vmem:[#allocation3_spill] sm:$0xff]  ;;  %v5034_v30 = vld [vmem:[#allocation4_spill] sm:$0xff] }
 0x11e   :  { %v550_v31 = vmul.f32 %v430_v34, %v430_v34 }
 0x11f   :  { %v654_v4 = vadd.f32 %v653_v1, %v652_v2  ;;  %v532_v1 = vmul.f32 %v412_v5, %v412_v5  ;;  %v673_v2 = vsel %vm138_vm0, %v530_v38, 0.0  ;;  %v542_v5 = vmul.f32 %v422_v49, %v422_v49 }
 0x121   :  { %v656_v26 = vadd.f32 %v655_v23, %v654_v4  ;;  %v675_v23 = vsel %vm138_vm0, %v531_v43, 0.0  ;;  %v677_v57 = vsel %vm138_vm0, %v532_v1, 0.0  ;;  %v545_v1 = vmul.f32 %v425_v63, %v425_v63 }
 0x123   :  { %v658_v25 = vadd.f32 %v657_v8, %v656_v26  ;;  %v535_v26 = vmul.f32 %v415_v18, %v415_v18  ;;  %v546_v18 = vmul.f32 %v426_v7, %v426_v7 }
 0x125   :  { %v660_v46 = vadd.f32 %v659_v16, %v658_v25  ;;  %v536_v16 = vmul.f32 %v416_v22, %v416_v22  ;;  %v681_v25 = vsel %vm138_vm0, %v534_v47, 0.0  ;;  %v703_v22 = vsel %vm138_vm0, %v545_v1, 0.0 }
 0x127   :  { %v662_v52 = vadd.f32 %v661_v11, %v660_v46  ;;  %v683_v11 = vsel %vm138_vm0, %v535_v26, 0.0  ;;  %v685_v14 = vsel %vm138_vm0, %v536_v16, 0.0  ;;  %v549_v26 = vmul.f32 %v429_v28, %v429_v28 }
 0x129   :  { %v664_v35 = vadd.f32 %v663_v32, %v662_v52  ;;  %v539_v52 = vmul.f32 %v419_v36, %v419_v36  ;;  %v711_v36 = vsel %vm138_vm0, %v549_v26, 0.0 }
 0x12b   :  { %v666_v17 = vadd.f32 %v665_v0, %v664_v35  ;;  %v540_v0 = vmul.f32 %v420_v40, %v420_v40  ;;  %v689_v35 = vsel %vm138_vm0, %v538_v56, 0.0  ;;  %v435_v56 = vsub.f32 %v5032_v10, %v3374_v33 }
 0x12d   :  { %v668_v12 = vadd.f32 %v667_v51, %v666_v17  ;;  %v691_v51 = vsel %vm138_vm0, %v539_v52, 0.0  ;;  %v693_v38 = vsel %vm138_vm0, %v540_v0, 0.0  ;;  %v436_v52 = vsub.f32 %v5033_v19, %v3374_v33 }
 0x12e   :  { %v437_v0 = vsub.f32 %v5034_v30, %v3374_v33 }
 0x12f   :  { %v670_v20 = vadd.f32 %v669_v39, %v668_v12  ;;  %v543_v12 = vmul.f32 %v423_v54, %v423_v54 }
 0x130   :  { %v557_v63 = vmul.f32 %v437_v0, %v437_v0 }
 0x131   :  { %v672_v44 = vadd.f32 %v671_v41, %v670_v20  ;;  %v544_v41 = vmul.f32 %v424_v58, %v424_v58  ;;  %v697_v20 = vsel %vm138_vm0, %v542_v5, 0.0 }
 0x133   :  { %v674_v4 = vadd.f32 %v673_v2, %v672_v44  ;;  %v699_v2 = vsel %vm138_vm0, %v543_v12, 0.0  ;;  %v701_v3 = vsel %vm138_vm0, %v544_v41, 0.0 }
 0x135   :  { %v676_v8 = vadd.f32 %v675_v23, %v674_v4  ;;  %v547_v4 = vmul.f32 %v427_v15, %v427_v15  ;;  %v5038_v15 = vld [vmem:[#allocation8_spill] sm:$0xff] }
 0x136   :  { %v441_v1 = vsub.f32 %v5038_v15, %v3374_v33 }
 0x137   :  { %v678_v37 = vadd.f32 %v677_v57, %v676_v8  ;;  %v548_v57 = vmul.f32 %v428_v21, %v428_v21  ;;  %v705_v8 = vsel %vm138_vm0, %v546_v18, 0.0  ;;  %v5039_v18 = vld [vmem:[#allocation9_spill] sm:$0xff] }
 0x138   :  { %v561_v34 = vmul.f32 %v441_v1, %v441_v1 }
 0x139   :  { %v680_v53 = vadd.f32 %v679_v50, %v678_v37  ;;  %v707_v50 = vsel %vm138_vm0, %v547_v4, 0.0  ;;  %v709_v16 = vsel %vm138_vm0, %v548_v57, 0.0 }
 0x13b   :  { %v682_v46 = vadd.f32 %v681_v25, %v680_v53  ;;  %v551_v53 = vmul.f32 %v431_v42, %v431_v42 }
 0x13d   :  { %v684_v32 = vadd.f32 %v683_v11, %v682_v46  ;;  %v552_v11 = vmul.f32 %v432_v48, %v432_v48  ;;  %v713_v46 = vsel %vm138_vm0, %v550_v31, 0.0  ;;  %v5042_v48 = vld [vmem:[#allocation12_spill] sm:$0xff] }
 0x13e   :  { %v445_v31 = vsub.f32 %v5042_v48, %v3374_v33 }
 0x13f   :  { %v686_v24 = vadd.f32 %v685_v14, %v684_v32  ;;  %v553_v14 = vmul.f32 %v433_v55, %v433_v55  ;;  %v715_v32 = vsel %vm138_vm0, %v551_v53, 0.0  ;;  %v5043_v53 = vld [vmem:[#allocation13_spill] sm:$0xff] }
 0x140   :  { %v565_v10 = vmul.f32 %v445_v31, %v445_v31 }
 0x141   :  { %v688_v62 = vadd.f32 %v687_v59, %v686_v24  ;;  %v554_v59 = vmul.f32 %v434_v61, %v434_v61  ;;  %v717_v24 = vsel %vm138_vm0, %v552_v11, 0.0 }
 0x142   :  { %v743_v0 = vsel %vm138_vm0, %v565_v10, 0.0 }
 0x143   :  { %v690_v17 = vadd.f32 %v689_v35, %v688_v62  ;;  %v555_v35 = vmul.f32 %v435_v56, %v435_v56  ;;  %v719_v62 = vsel %vm138_vm0, %v553_v14, 0.0  ;;  %v721_v58 = vsel %vm138_vm0, %v554_v59, 0.0 }
 0x145   :  { %v692_v39 = vadd.f32 %v691_v51, %v690_v17  ;;  %v438_v51 = vsub.f32 %v5035_v6, %v3374_v33  ;;  %v556_v17 = vmul.f32 %v436_v52, %v436_v52  ;;  %v723_v12 = vsel %vm138_vm0, %v555_v35, 0.0 }
 0x147   :  { %v694_v43 = vadd.f32 %v693_v38, %v692_v39  ;;  %v5036_v38 = vld [vmem:[#allocation6_spill] sm:$0xff]  ;;  %v558_v41 = vmul.f32 %v438_v51, %v438_v51 }
 0x148   :  { %v439_v39 = vsub.f32 %v5036_v38, %v3374_v33 }
 0x149   :  { %v696_v13 = vadd.f32 %v695_v9, %v694_v43  ;;  %v5037_v43 = vld [vmem:[#allocation7_spill] sm:$0xff]  ;;  %v729_v28 = vsel %vm138_vm0, %v558_v41, 0.0 }
 0x14a   :  { %v440_v7 = vsub.f32 %v5037_v43, %v3374_v33 }
 0x14b   :  { %v698_v44 = vadd.f32 %v697_v20, %v696_v13  ;;  %v725_v20 = vsel %vm138_vm0, %v556_v17, 0.0 }
 0x14d   :  { %v700_v23 = vadd.f32 %v699_v2, %v698_v44  ;;  %v559_v2 = vmul.f32 %v439_v39, %v439_v39  ;;  %v727_v44 = vsel %vm138_vm0, %v557_v63, 0.0 }
 0x14f   :  { %v702_v47 = vadd.f32 %v701_v3, %v700_v23  ;;  %v442_v3 = vsub.f32 %v5039_v18, %v3374_v33  ;;  %v560_v23 = vmul.f32 %v440_v7, %v440_v7  ;;  %v731_v57 = vsel %vm138_vm0, %v559_v2, 0.0 }
 0x151   :  { %v704_v27 = vadd.f32 %v703_v22, %v702_v47  ;;  %v5040_v22 = vld [vmem:[#allocation10_spill] sm:$0xff]  ;;  %v562_v26 = vmul.f32 %v442_v3, %v442_v3 }
 0x152   :  { %v443_v47 = vsub.f32 %v5040_v22, %v3374_v33 }
 0x153   :  { %v706_v37 = vadd.f32 %v705_v8, %v704_v27  ;;  %v5041_v27 = vld [vmem:[#allocation11_spill] sm:$0xff]  ;;  %v737_v61 = vsel %vm138_vm0, %v562_v26, 0.0 }
 0x154   :  { %v444_v42 = vsub.f32 %v5041_v27, %v3374_v33 }
 0x155   :  { %v708_v25 = vadd.f32 %v707_v50, %v706_v37  ;;  %v733_v50 = vsel %vm138_vm0, %v560_v23, 0.0 }
 0x157   :  { %v710_v29 = vadd.f32 %v709_v16, %v708_v25  ;;  %v563_v16 = vmul.f32 %v443_v47, %v443_v47  ;;  %v735_v25 = vsel %vm138_vm0, %v561_v34, 0.0 }
 0x159   :  { %v712_v40 = vadd.f32 %v711_v36, %v710_v29  ;;  %v446_v36 = vsub.f32 %v5043_v53, %v3374_v33  ;;  %v564_v29 = vmul.f32 %v444_v42, %v444_v42  ;;  %v739_v56 = vsel %vm138_vm0, %v563_v16, 0.0 }
 0x15b   :  { %v714_v45 = vadd.f32 %v713_v46, %v712_v40  ;;  %v5044_v46 = vld [vmem:[#allocation14_spill] sm:$0xff]  ;;  %v566_v19 = vmul.f32 %v446_v36, %v446_v36  ;;  %v741_v52 = vsel %vm138_vm0, %v564_v29, 0.0 }
 0x15c   :  { %v447_v40 = vsub.f32 %v5044_v46, %v3374_v33 }
 0x15d   :  { %v716_v49 = vadd.f32 %v715_v32, %v714_v45  ;;  %v5045_v32 = vld [vmem:[#allocation15_spill] sm:$0xff]  ;;  %v745_v51 = vsel %vm138_vm0, %v566_v19, 0.0 }
 0x15e   :  { %v448_v45 = vsub.f32 %v5045_v32, %v3374_v33  ;;  %v567_v30 = vmul.f32 %v447_v40, %v447_v40 }
 0x15f   :  { %v718_v54 = vadd.f32 %v717_v24, %v716_v49  ;;  %v5046_v24 = vld [vmem:[#allocation16_spill] sm:$0xff] }
 0x160   :  { %v449_v49 = vsub.f32 %v5046_v24, %v3374_v33  ;;  %v568_v6 = vmul.f32 %v448_v45, %v448_v45  ;;  %v747_v39 = vsel %vm138_vm0, %v567_v30, 0.0 }
 0x161   :  { %v720_v5 = vadd.f32 %v719_v62, %v718_v54  ;;  %v5047_v62 = vld [vmem:[#allocation17_spill] sm:$0xff] }
 0x162   :  { %v450_v54 = vsub.f32 %v5047_v62, %v3374_v33  ;;  %v569_v38 = vmul.f32 %v449_v49, %v449_v49  ;;  %v749_v7 = vsel %vm138_vm0, %v568_v6, 0.0 }
 0x163   :  { %v722_v9 = vadd.f32 %v721_v58, %v720_v5  ;;  %v5048_v58 = vld [vmem:[#allocation18_spill] sm:$0xff] }
 0x164   :  { %v451_v5 = vsub.f32 %v5048_v58, %v3374_v33  ;;  %v570_v43 = vmul.f32 %v450_v54, %v450_v54  ;;  %v751_v1 = vsel %vm138_vm0, %v569_v38, 0.0 }
 0x165   :  { %v724_v13 = vadd.f32 %v723_v12, %v722_v9  ;;  %v5049_v12 = vld [vmem:[#allocation19_spill] sm:$0xff] }
 0x166   :  { %v452_v9 = vsub.f32 %v5049_v12, %v3374_v33  ;;  %v571_v15 = vmul.f32 %v451_v5, %v451_v5  ;;  %v753_v3 = vsel %vm138_vm0, %v570_v43, 0.0 }
 0x167   :  { %v726_v21 = vadd.f32 %v725_v20, %v724_v13  ;;  %v5050_v20 = vld [vmem:[#allocation20_spill] sm:$0xff] }
 0x168   :  { %v453_v13 = vsub.f32 %v5050_v20, %v3374_v33  ;;  %v572_v18 = vmul.f32 %v452_v9, %v452_v9  ;;  %v755_v47 = vsel %vm138_vm0, %v571_v15, 0.0 }
 0x169   :  { %v728_v4 = vadd.f32 %v727_v44, %v726_v21  ;;  %v5051_v44 = vld [vmem:[#allocation21_spill] sm:$0xff] }
 0x16a   :  { %v454_v21 = vsub.f32 %v5051_v44, %v3374_v33  ;;  %v573_v22 = vmul.f32 %v453_v13, %v453_v13  ;;  %v757_v42 = vsel %vm138_vm0, %v572_v18, 0.0 }
 0x16b   :  { %v730_v8 = vadd.f32 %v729_v28, %v728_v4  ;;  %v5052_v28 = vld [vmem:[#allocation22_spill] sm:$0xff] }
 0x16c   :  { %v455_v4 = vsub.f32 %v5052_v28, %v3374_v33  ;;  %v574_v27 = vmul.f32 %v454_v21, %v454_v21  ;;  %v759_v31 = vsel %vm138_vm0, %v573_v22, 0.0 }
 0x16d   :  { %v732_v37 = vadd.f32 %v731_v57, %v730_v8  ;;  %v5053_v57 = vld [vmem:[#allocation23_spill] sm:$0xff] }
 0x16e   :  { %v456_v8 = vsub.f32 %v5053_v57, %v3374_v33  ;;  %v575_v48 = vmul.f32 %v455_v4, %v455_v4  ;;  %v761_v36 = vsel %vm138_vm0, %v574_v27, 0.0 }
 0x16f   :  { %v734_v55 = vadd.f32 %v733_v50, %v732_v37  ;;  %v5054_v50 = vld [vmem:[#allocation24_spill] sm:$0xff] }
 0x170   :  { %v457_v37 = vsub.f32 %v5054_v50, %v3374_v33  ;;  %v576_v53 = vmul.f32 %v456_v8, %v456_v8  ;;  %v763_v40 = vsel %vm138_vm0, %v575_v48, 0.0 }
 0x171   :  { %v736_v11 = vadd.f32 %v735_v25, %v734_v55  ;;  %v5055_v25 = vld [vmem:[#allocation25_spill] sm:$0xff] }
 0x172   :  { %v458_v55 = vsub.f32 %v5055_v25, %v3374_v33  ;;  %v577_v46 = vmul.f32 %v457_v37, %v457_v37  ;;  %v765_v45 = vsel %vm138_vm0, %v576_v53, 0.0 }
 0x173   :  { %v738_v14 = vadd.f32 %v737_v61, %v736_v11  ;;  %v5056_v61 = vld [vmem:[#allocation26_spill] sm:$0xff] }
 0x174   :  { %v459_v11 = vsub.f32 %v5056_v61, %v3374_v33  ;;  %v578_v32 = vmul.f32 %v458_v55, %v458_v55  ;;  %v767_v49 = vsel %vm138_vm0, %v577_v46, 0.0 }
 0x175   :  { %v740_v59 = vadd.f32 %v739_v56, %v738_v14  ;;  %v5057_v56 = vld [vmem:[#allocation27_spill] sm:$0xff] }
 0x176   :  { %v460_v14 = vsub.f32 %v5057_v56, %v3374_v33  ;;  %v579_v24 = vmul.f32 %v459_v11, %v459_v11  ;;  %v769_v54 = vsel %vm138_vm0, %v578_v32, 0.0 }
 0x177   :  { %v742_v35 = vadd.f32 %v741_v52, %v740_v59  ;;  %v5058_v52 = vld [vmem:[#allocation28_spill] sm:$0xff] }
 0x178   :  { %v461_v59 = vsub.f32 %v5058_v52, %v3374_v33  ;;  %v580_v62 = vmul.f32 %v460_v14, %v460_v14  ;;  %v771_v5 = vsel %vm138_vm0, %v579_v24, 0.0 }
 0x179   :  { %v744_v17 = vadd.f32 %v743_v0, %v742_v35  ;;  %v5059_v0 = vld [vmem:[#allocation29_spill] sm:$0xff] }
 0x17a   :  { %v462_v35 = vsub.f32 %v5059_v0, %v3374_v33  ;;  %v581_v58 = vmul.f32 %v461_v59, %v461_v59  ;;  %v773_v9 = vsel %vm138_vm0, %v580_v62, 0.0 }
 0x17b   :  { %v746_v63 = vadd.f32 %v745_v51, %v744_v17  ;;  %v5060_v51 = vld [vmem:[#allocation30_spill] sm:$0xff] }
 0x17c   :  { %v463_v17 = vsub.f32 %v5060_v51, %v3374_v33  ;;  %v582_v12 = vmul.f32 %v462_v35, %v462_v35  ;;  %v775_v13 = vsel %vm138_vm0, %v581_v58, 0.0 }
 0x17d   :  { %v748_v41 = vadd.f32 %v747_v39, %v746_v63  ;;  %v5061_v39 = vld [vmem:[#allocation31_spill] sm:$0xff] }
 0x17e   :  { %v464_v63 = vsub.f32 %v5061_v39, %v3374_v33  ;;  %v583_v20 = vmul.f32 %v463_v17, %v463_v17  ;;  %v777_v21 = vsel %vm138_vm0, %v582_v12, 0.0 }
 0x17f   :  { %v750_v2 = vadd.f32 %v749_v7, %v748_v41  ;;  %v5062_v7 = vld [vmem:[#allocation32_spill] sm:$0xff] }
 0x180   :  { %v465_v41 = vsub.f32 %v5062_v7, %v3374_v33  ;;  %v584_v44 = vmul.f32 %v464_v63, %v464_v63  ;;  %v779_v4 = vsel %vm138_vm0, %v583_v20, 0.0 }
 0x181   :  { %v752_v23 = vadd.f32 %v751_v1, %v750_v2  ;;  %v5063_v1 = vld [vmem:[#allocation33_spill] sm:$0xff] }
 0x182   :  { %v466_v2 = vsub.f32 %v5063_v1, %v3374_v33  ;;  %v585_v28 = vmul.f32 %v465_v41, %v465_v41  ;;  %v781_v8 = vsel %vm138_vm0, %v584_v44, 0.0 }
 0x183   :  { %v754_v34 = vadd.f32 %v753_v3, %v752_v23  ;;  %v5064_v3 = vld [vmem:[#allocation34_spill] sm:$0xff] }
 0x184   :  { %v467_v23 = vsub.f32 %v5064_v3, %v3374_v33  ;;  %v586_v57 = vmul.f32 %v466_v2, %v466_v2  ;;  %v783_v37 = vsel %vm138_vm0, %v585_v28, 0.0 }
 0x185   :  { %v756_v26 = vadd.f32 %v755_v47, %v754_v34  ;;  %v5065_v47 = vld [vmem:[#allocation35_spill] sm:$0xff] }
 0x186   :  { %v468_v34 = vsub.f32 %v5065_v47, %v3374_v33  ;;  %v587_v50 = vmul.f32 %v467_v23, %v467_v23  ;;  %v785_v55 = vsel %vm138_vm0, %v586_v57, 0.0 }
 0x187   :  { %v758_v16 = vadd.f32 %v757_v42, %v756_v26  ;;  %v5066_v42 = vld [vmem:[#allocation36_spill] sm:$0xff] }
 0x188   :  { %v469_v26 = vsub.f32 %v5066_v42, %v3374_v33  ;;  %v588_v25 = vmul.f32 %v468_v34, %v468_v34  ;;  %v787_v11 = vsel %vm138_vm0, %v587_v50, 0.0 }
 0x189   :  { %v760_v29 = vadd.f32 %v759_v31, %v758_v16  ;;  %v5067_v31 = vld [vmem:[#allocation37_spill] sm:$0xff] }
 0x18a   :  { %v470_v16 = vsub.f32 %v5067_v31, %v3374_v33  ;;  %v589_v61 = vmul.f32 %v469_v26, %v469_v26  ;;  %v789_v14 = vsel %vm138_vm0, %v588_v25, 0.0 }
 0x18b   :  { %v762_v10 = vadd.f32 %v761_v36, %v760_v29  ;;  %v5068_v36 = vld [vmem:[#allocation38_spill] sm:$0xff] }
 0x18c   :  { %v471_v29 = vsub.f32 %v5068_v36, %v3374_v33  ;;  %v590_v56 = vmul.f32 %v470_v16, %v470_v16  ;;  %v791_v59 = vsel %vm138_vm0, %v589_v61, 0.0 }
 0x18d   :  { %v764_v19 = vadd.f32 %v763_v40, %v762_v10  ;;  %v5069_v40 = vld [vmem:[#allocation39_spill] sm:$0xff] }
 0x18e   :  { %v472_v10 = vsub.f32 %v5069_v40, %v3374_v33  ;;  %v591_v52 = vmul.f32 %v471_v29, %v471_v29  ;;  %v793_v35 = vsel %vm138_vm0, %v590_v56, 0.0 }
 0x18f   :  { %v766_v30 = vadd.f32 %v765_v45, %v764_v19  ;;  %v5070_v45 = vld [vmem:[#allocation40_spill] sm:$0xff] }
 0x190   :  { %v473_v19 = vsub.f32 %v5070_v45, %v3374_v33  ;;  %v592_v0 = vmul.f32 %v472_v10, %v472_v10  ;;  %v795_v17 = vsel %vm138_vm0, %v591_v52, 0.0 }
 0x191   :  { %v768_v6 = vadd.f32 %v767_v49, %v766_v30  ;;  %v5071_v49 = vld [vmem:[#allocation41_spill] sm:$0xff] }
 0x192   :  { %v474_v30 = vsub.f32 %v5071_v49, %v3374_v33  ;;  %v593_v51 = vmul.f32 %v473_v19, %v473_v19  ;;  %v797_v63 = vsel %vm138_vm0, %v592_v0, 0.0 }
 0x193   :  { %v770_v38 = vadd.f32 %v769_v54, %v768_v6  ;;  %v5072_v54 = vld [vmem:[#allocation42_spill] sm:$0xff] }
 0x194   :  { %v475_v6 = vsub.f32 %v5072_v54, %v3374_v33  ;;  %v594_v39 = vmul.f32 %v474_v30, %v474_v30  ;;  %v799_v41 = vsel %vm138_vm0, %v593_v51, 0.0 }
 0x195   :  { %v772_v43 = vadd.f32 %v771_v5, %v770_v38  ;;  %v5073_v5 = vld [vmem:[#allocation43_spill] sm:$0xff] }
 0x196   :  { %v476_v38 = vsub.f32 %v5073_v5, %v3374_v33  ;;  %v595_v7 = vmul.f32 %v475_v6, %v475_v6  ;;  %v801_v2 = vsel %vm138_vm0, %v594_v39, 0.0 }
 0x197   :  { %v774_v15 = vadd.f32 %v773_v9, %v772_v43  ;;  %v5074_v9 = vld [vmem:[#allocation44_spill] sm:$0xff] }
 0x198   :  { %v477_v43 = vsub.f32 %v5074_v9, %v3374_v33  ;;  %v596_v1 = vmul.f32 %v476_v38, %v476_v38  ;;  %v803_v23 = vsel %vm138_vm0, %v595_v7, 0.0 }
 0x199   :  { %v776_v18 = vadd.f32 %v775_v13, %v774_v15  ;;  %v5075_v13 = vld [vmem:[#allocation45_spill] sm:$0xff] }
 0x19a   :  { %v478_v15 = vsub.f32 %v5075_v13, %v3374_v33  ;;  %v597_v3 = vmul.f32 %v477_v43, %v477_v43  ;;  %v805_v34 = vsel %vm138_vm0, %v596_v1, 0.0 }
 0x19b   :  { %v778_v22 = vadd.f32 %v777_v21, %v776_v18  ;;  %v5076_v21 = vld [vmem:[#allocation46_spill] sm:$0xff] }
 0x19c   :  { %v479_v18 = vsub.f32 %v5076_v21, %v3374_v33  ;;  %v598_v47 = vmul.f32 %v478_v15, %v478_v15  ;;  %v807_v26 = vsel %vm138_vm0, %v597_v3, 0.0 }
 0x19d   :  { %v780_v27 = vadd.f32 %v779_v4, %v778_v22  ;;  %v5077_v4 = vld [vmem:[#allocation47_spill] sm:$0xff] }
 0x19e   :  { %v480_v22 = vsub.f32 %v5077_v4, %v3374_v33  ;;  %v599_v42 = vmul.f32 %v479_v18, %v479_v18  ;;  %v809_v16 = vsel %vm138_vm0, %v598_v47, 0.0 }
 0x19f   :  { %v782_v48 = vadd.f32 %v781_v8, %v780_v27  ;;  %v5078_v8 = vld [vmem:[#allocation48_spill] sm:$0xff] }
 0x1a0   :  { %v481_v27 = vsub.f32 %v5078_v8, %v3374_v33  ;;  %v600_v31 = vmul.f32 %v480_v22, %v480_v22  ;;  %v811_v29 = vsel %vm138_vm0, %v599_v42, 0.0 }
 0x1a1   :  { %v784_v53 = vadd.f32 %v783_v37, %v782_v48  ;;  %v5079_v37 = vld [vmem:[#allocation49_spill] sm:$0xff] }
 0x1a2   :  { %v482_v48 = vsub.f32 %v5079_v37, %v3374_v33  ;;  %v601_v36 = vmul.f32 %v481_v27, %v481_v27  ;;  %v813_v10 = vsel %vm138_vm0, %v600_v31, 0.0 }
 0x1a3   :  { %v786_v46 = vadd.f32 %v785_v55, %v784_v53  ;;  %v5080_v55 = vld [vmem:[#allocation50_spill] sm:$0xff] }
 0x1a4   :  { %v483_v53 = vsub.f32 %v5080_v55, %v3374_v33  ;;  %v602_v40 = vmul.f32 %v482_v48, %v482_v48  ;;  %v815_v19 = vsel %vm138_vm0, %v601_v36, 0.0 }
 0x1a5   :  { %v788_v32 = vadd.f32 %v787_v11, %v786_v46  ;;  %v5081_v11 = vld [vmem:[#allocation51_spill] sm:$0xff] }
 0x1a6   :  { %v484_v46 = vsub.f32 %v5081_v11, %v3374_v33  ;;  %v603_v45 = vmul.f32 %v483_v53, %v483_v53  ;;  %v817_v30 = vsel %vm138_vm0, %v602_v40, 0.0 }
 0x1a7   :  { %v790_v24 = vadd.f32 %v789_v14, %v788_v32  ;;  %v5082_v14 = vld [vmem:[#allocation52_spill] sm:$0xff] }
 0x1a8   :  { %v485_v32 = vsub.f32 %v5082_v14, %v3374_v33  ;;  %v604_v49 = vmul.f32 %v484_v46, %v484_v46  ;;  %v819_v6 = vsel %vm138_vm0, %v603_v45, 0.0 }
 0x1a9   :  { %v792_v62 = vadd.f32 %v791_v59, %v790_v24  ;;  %v5083_v59 = vld [vmem:[#allocation53_spill] sm:$0xff] }
 0x1aa   :  { %v486_v24 = vsub.f32 %v5083_v59, %v3374_v33  ;;  %v605_v54 = vmul.f32 %v485_v32, %v485_v32  ;;  %v821_v38 = vsel %vm138_vm0, %v604_v49, 0.0 }
 0x1ab   :  { %v794_v58 = vadd.f32 %v793_v35, %v792_v62  ;;  %v5084_v35 = vld [vmem:[#allocation54_spill] sm:$0xff] }
 0x1ac   :  { %v487_v62 = vsub.f32 %v5084_v35, %v3374_v33  ;;  %v606_v5 = vmul.f32 %v486_v24, %v486_v24  ;;  %v823_v43 = vsel %vm138_vm0, %v605_v54, 0.0 }
 0x1ad   :  { %v796_v12 = vadd.f32 %v795_v17, %v794_v58  ;;  %v5085_v17 = vld [vmem:[#allocation55_spill] sm:$0xff] }
 0x1ae   :  { %v488_v58 = vsub.f32 %v5085_v17, %v3374_v33  ;;  %v607_v9 = vmul.f32 %v487_v62, %v487_v62  ;;  %v825_v15 = vsel %vm138_vm0, %v606_v5, 0.0 }
 0x1af   :  { %v798_v20 = vadd.f32 %v797_v63, %v796_v12  ;;  %v5086_v63 = vld [vmem:[#allocation56_spill] sm:$0xff] }
 0x1b0   :  { %v489_v12 = vsub.f32 %v5086_v63, %v3374_v33  ;;  %v608_v13 = vmul.f32 %v488_v58, %v488_v58  ;;  %v827_v18 = vsel %vm138_vm0, %v607_v9, 0.0 }
 0x1b1   :  { %v800_v44 = vadd.f32 %v799_v41, %v798_v20  ;;  %v5087_v41 = vld [vmem:[#allocation57_spill] sm:$0xff] }
 0x1b2   :  { %v490_v20 = vsub.f32 %v5087_v41, %v3374_v33  ;;  %v609_v21 = vmul.f32 %v489_v12, %v489_v12  ;;  %v829_v22 = vsel %vm138_vm0, %v608_v13, 0.0 }
 0x1b3   :  { %v802_v28 = vadd.f32 %v801_v2, %v800_v44  ;;  %v5088_v2 = vld [vmem:[#allocation58_spill] sm:$0xff] }
 0x1b4   :  { %v491_v44 = vsub.f32 %v5088_v2, %v3374_v33  ;;  %v610_v4 = vmul.f32 %v490_v20, %v490_v20  ;;  %v831_v27 = vsel %vm138_vm0, %v609_v21, 0.0 }
 0x1b5   :  { %v804_v57 = vadd.f32 %v803_v23, %v802_v28  ;;  %v5089_v23 = vld [vmem:[#allocation59_spill] sm:$0xff] }
 0x1b6   :  { %v492_v28 = vsub.f32 %v5089_v23, %v3374_v33  ;;  %v611_v8 = vmul.f32 %v491_v44, %v491_v44  ;;  %v833_v48 = vsel %vm138_vm0, %v610_v4, 0.0 }
 0x1b7   :  { %v806_v50 = vadd.f32 %v805_v34, %v804_v57  ;;  %v5090_v34 = vld [vmem:[#allocation60_spill] sm:$0xff] }
 0x1b8   :  { %v493_v57 = vsub.f32 %v5090_v34, %v3374_v33  ;;  %v612_v37 = vmul.f32 %v492_v28, %v492_v28  ;;  %v835_v53 = vsel %vm138_vm0, %v611_v8, 0.0 }
 0x1b9   :  { %v808_v25 = vadd.f32 %v807_v26, %v806_v50  ;;  %v5091_v26 = vld [vmem:[#allocation61_spill] sm:$0xff] }
 0x1ba   :  { %v494_v50 = vsub.f32 %v5091_v26, %v3374_v33  ;;  %v613_v55 = vmul.f32 %v493_v57, %v493_v57  ;;  %v837_v46 = vsel %vm138_vm0, %v612_v37, 0.0 }
 0x1bb   :  { %v810_v61 = vadd.f32 %v809_v16, %v808_v25  ;;  %v5092_v16 = vld [vmem:[#allocation62_spill] sm:$0xff] }
 0x1bc   :  { %v495_v25 = vsub.f32 %v5092_v16, %v3374_v33  ;;  %v614_v11 = vmul.f32 %v494_v50, %v494_v50  ;;  %v839_v32 = vsel %vm138_vm0, %v613_v55, 0.0 }
 0x1bd   :  { %v812_v56 = vadd.f32 %v811_v29, %v810_v61  ;;  %v5093_v29 = vld [vmem:[#allocation63_spill] sm:$0xff] }
 0x1be   :  { %v496_v61 = vsub.f32 %v5093_v29, %v3374_v33  ;;  %v615_v14 = vmul.f32 %v495_v25, %v495_v25  ;;  %v841_v24 = vsel %vm138_vm0, %v614_v11, 0.0 }
 0x1bf   :  { %v814_v52 = vadd.f32 %v813_v10, %v812_v56  ;;  %v5094_v10 = vld [vmem:[#allocation64_spill] sm:$0xff] }
 0x1c0   :  { %v497_v56 = vsub.f32 %v5094_v10, %v3374_v33  ;;  %v616_v59 = vmul.f32 %v496_v61, %v496_v61  ;;  %v843_v62 = vsel %vm138_vm0, %v615_v14, 0.0  ;;  %v880_v10 = vlaneseq  ;;  %v872_v14 = vld [vmem:[%s4889_s1] sm:$0x1] }
 0x1c1   :  { %v816_v0 = vadd.f32 %v815_v19, %v814_v52  ;;  %v5095_v19 = vld [vmem:[#allocation65_spill] sm:$0xff] }
 0x1c2   :  { %v498_v52 = vsub.f32 %v5095_v19, %v3374_v33  ;;  %v617_v35 = vmul.f32 %v497_v56, %v497_v56  ;;  %v845_v58 = vsel %vm138_vm0, %v616_v59, 0.0  ;;  %v881_v56 = vshrl.u32 %v880_v10, 7 }
 0x1c3   :  { %v818_v51 = vadd.f32 %v817_v30, %v816_v0  ;;  %v5096_v30 = vld [vmem:[#allocation66_spill] sm:$0xff] }
 0x1c4   :  { %v499_v0 = vsub.f32 %v5096_v30, %v3374_v33  ;;  %v618_v17 = vmul.f32 %v498_v52, %v498_v52  ;;  %v847_v12 = vsel %vm138_vm0, %v617_v35, 0.0  ;;  %v876_v52 = vld [vmem:[%s4890_s2] sm:$0x1]  ;;  %v2387_v35 = vld [vmem:[%s4888_s0 + $0x8] sm:$0xff] }
 0x1c5   :  { %v820_v39 = vadd.f32 %v819_v6, %v818_v51  ;;  %v5097_v6 = vld [vmem:[#allocation67_spill] sm:$0xff]  ;;  %v2386_v30 = vld [vmem:[%s4888_s0] sm:$0xff] }
 0x1c6   :  { %v500_v51 = vsub.f32 %v5097_v6, %v3374_v33  ;;  %v619_v63 = vmul.f32 %v499_v0, %v499_v0  ;;  %v849_v20 = vsel %vm138_vm0, %v618_v17, 0.0  ;;  %v2389_v6 = vld [vmem:[%s4888_s0 + $0x1e8] sm:$0xff]  ;;  %v2390_v17 = vld [vmem:[%s4888_s0 + $0x10] sm:$0xff] }
 0x1c7   :  { %v822_v7 = vadd.f32 %v821_v38, %v820_v39  ;;  %v5098_v38 = vld [vmem:[#allocation68_spill] sm:$0xff] }
 0x1c8   :  { %v501_v39 = vsub.f32 %v5098_v38, %v3374_v33  ;;  %v620_v41 = vmul.f32 %v500_v51, %v500_v51  ;;  %v851_v44 = vsel %vm138_vm0, %v619_v63, 0.0 }
 0x1c9   :  { %v824_v1 = vadd.f32 %v823_v43, %v822_v7  ;;  %v5099_v43 = vld [vmem:[#allocation69_spill] sm:$0xff] }
 0x1ca   :  { %v502_v7 = vsub.f32 %v5099_v43, %v3374_v33  ;;  %v621_v2 = vmul.f32 %v501_v39, %v501_v39  ;;  %v853_v28 = vsel %vm138_vm0, %v620_v41, 0.0  ;;  %v2392_v39 = vld [vmem:[%s4888_s0 + $0x1f0] sm:$0xff] }
 0x1cb   :  { %v826_v3 = vadd.f32 %v825_v15, %v824_v1  ;;  %v5100_v15 = vld [vmem:[#allocation70_spill] sm:$0xff] }
 0x1cc   :  { %v503_v1 = vsub.f32 %v5100_v15, %v3374_v33  ;;  %v622_v23 = vmul.f32 %v502_v7, %v502_v7  ;;  %v855_v34 = vsel %vm138_vm0, %v621_v2, 0.0  ;;  %v2394_v7 = vld [vmem:[%s4888_s0 + $0x20] sm:$0xff]  ;;  %v2397_v2 = vld [vmem:[%s4888_s0 + $0x208] sm:$0xff] }
 0x1cd   :  { %v828_v47 = vadd.f32 %v827_v18, %v826_v3  ;;  %v5101_v18 = vld [vmem:[#allocation71_spill] sm:$0xff]  ;;  %v2396_v15 = vld [vmem:[%s4888_s0 + $0x200] sm:$0xff] }
 0x1ce   :  { %v504_v3 = vsub.f32 %v5101_v18, %v3374_v33 }
 0x1cf   :  { %v830_v42 = vadd.f32 %v829_v22, %v828_v47  ;;  %v505_v22 = vsub.f32 %v3370_v60, %v3374_v33  ;;  %v623_v47 = vmul.f32 %v503_v1, %v503_v1 }
 0x1d0   :  { %v624_v8 = vmul.f32 %v504_v3, %v504_v3  ;;  %v2399_v3 = vld [vmem:[%s4888_s0 + $0x38] sm:$0xff] }
 0x1d1   :  { %v832_v31 = vadd.f32 %v831_v27, %v830_v42  ;;  %v857_v27 = vsel %vm138_vm0, %v622_v23, 0.0  ;;  %v625_v26 = vmul.f32 %v505_v22, %v505_v22  ;;  %v859_v50 = vsel %vm138_vm0, %v623_v47, 0.0 }
 0x1d3   :  { %v834_v36 = vadd.f32 %v833_v48, %v832_v31  ;;  %v861_v48 = vsel %vm138_vm0, %v624_v8, 0.0  ;;  %v863_v16 = vsel %vm138_vm0, %v625_v26, 0.0 }
 0x1d5   :  { %v836_v40 = vadd.f32 %v835_v53, %v834_v36 }
 0x1d7   :  { %v838_v45 = vadd.f32 %v837_v46, %v836_v40 }
 0x1d9   :  { %v840_v49 = vadd.f32 %v839_v32, %v838_v45  ;;  %v882_v32 = vsub.s32 0, %v881_v56 }
 0x1db   :  { %v842_v54 = vadd.f32 %v841_v24, %v840_v49 }
 0x1dd   :  { %v844_v5 = vadd.f32 %v843_v62, %v842_v54  ;;  %v2388_v54 = vld [vmem:[%s4888_s0 + $0x1e0] sm:$0xff] }
 0x1df   :  { %v846_v9 = vadd.f32 %v845_v58, %v844_v5  ;;  %v2391_v5 = vld [vmem:[%s4888_s0 + $0x18] sm:$0xff] }
 0x1e1   :  { %v848_v13 = vadd.f32 %v847_v12, %v846_v9  ;;  %v2393_v9 = vld [vmem:[%s4888_s0 + $0x1f8] sm:$0xff] }
 0x1e3   :  { %v850_v21 = vadd.f32 %v849_v20, %v848_v13  ;;  %v2395_v20 = vld [vmem:[%s4888_s0 + $0x28] sm:$0xff] }
 0x1e5   :  { %v852_v4 = vadd.f32 %v851_v44, %v850_v21  ;;  %v2398_v21 = vld [vmem:[%s4888_s0 + $0x30] sm:$0xff] }
 0x1e7   :  { %v854_v57 = vadd.f32 %v853_v28, %v852_v4 }
 0x1e9   :  { %v856_v42 = vadd.f32 %v855_v34, %v854_v57 }
 0x1eb   :  { %v858_v37 = vadd.f32 %v857_v27, %v856_v42 }
 0x1ed   :  { %v860_v31 = vadd.f32 %v859_v50, %v858_v37 }
 0x1ef   :  { %v862_v25 = vadd.f32 %v861_v48, %v860_v31 }
 0x1f1   :  { %v864_v55 = vadd.f32 %v863_v16, %v862_v25 }
 0x1f3   :  { %v865_v60 = vrot.slane %v864_v55, 4 }
 0x1f5   :  { %v866_v53 = vadd.f32 %v865_v60, %v864_v55 }
 0x1f7   :  { %v867_v36 = vrot.slane %v866_v53, 2 }
 0x1f9   :  { %v868_v29 = vadd.f32 %v867_v36, %v866_v53 }
 0x1fb   :  { %v869_v61 = vrot.slane %v868_v29, 1 }
 0x1fd   :  { %v870_v11 = vadd.f32 %v869_v61, %v868_v29 }
 0x1ff   :  { %v871_v46 = vmul.f32 0.0010416667, %v870_v11 }
 0x201   :  { %v873_v40 = vadd.f32 1e-05, %v871_v46 }
 0x203   :  { %2384 = vrsqrt.f32 %v873_v40 }
 0x20d   :  { %v2385_v45 = vpop.eup %2384 }
 0x20e   :  { %v875_v19 = vmul.f32 %v2385_v45, %v872_v14 }
 0x210   :  { %v877_v59 = vmul.f32 %v875_v19, %v3374_v33  ;;  %v3743_v24 = vrot.slane %v875_v19, %v882_v32  ;;  %v2400_v19 = vld [vmem:[%s4888_s0 + $0x210] sm:$0xff] }
 0x212   :  { %v878_v49 = vsub.f32 %v876_v52, %v877_v59  ;;  %v885_v0 = vmul.f32 %v2386_v30, %v3743_v24  ;;  %v886_v62 = vmul.f32 %v2387_v35, %v3743_v24  ;;  %v945_v33 = vmul.f32 %v2388_v54, %v3743_v24  ;;  %v2401_v59 = vld [vmem:[%s4888_s0 + $0x218] sm:$0xff] }
 0x213   :  { %v946_v51 = vmul.f32 %v2389_v6, %v3743_v24  ;;  %v887_v58 = vmul.f32 %v2390_v17, %v3743_v24  ;;  %v888_v38 = vmul.f32 %v2391_v5, %v3743_v24  ;;  %v947_v63 = vmul.f32 %v2392_v39, %v3743_v24  ;;  %v2403_v17 = vld [vmem:[%s4888_s0 + $0x48] sm:$0xff]  ;;  %v2404_v39 = vld [vmem:[%s4888_s0 + $0x220] sm:$0xff] }
 0x214   :  { %v3773_v12 = vrot.slane %v878_v49, %v882_v32  ;;  %v948_v43 = vmul.f32 %v2393_v9, %v3743_v24  ;;  %v889_v41 = vmul.f32 %v2394_v7, %v3743_v24  ;;  %v890_v13 = vmul.f32 %v2395_v20, %v3743_v24  ;;  %v2405_v9 = vld [vmem:[%s4888_s0 + $0x228] sm:$0xff] }
 0x215   :  { %v949_v1 = vmul.f32 %v2396_v15, %v3743_v24  ;;  %v950_v44 = vmul.f32 %v2397_v2, %v3743_v24  ;;  %v891_v18 = vmul.f32 %v2398_v21, %v3743_v24  ;;  %v892_v23 = vmul.f32 %v2399_v3, %v3743_v24  ;;  %v2407_v21 = vld [vmem:[%s4888_s0 + $0x58] sm:$0xff] }
 0x216   :  { %v1011_v28 = vadd.f32 %v3773_v12, %v885_v0  ;;  %v1012_v4 = vadd.f32 %v3773_v12, %v886_v62  ;;  %v1071_v22 = vadd.f32 %v3773_v12, %v945_v33  ;;  %v1072_v47 = vadd.f32 %v3773_v12, %v946_v51  ;;  %v2402_v62 = vld [vmem:[%s4888_s0 + $0x40] sm:$0xff] }
 0x217   :  { %v1013_v34 = vadd.f32 %v3773_v12, %v887_v58  ;;  %v1014_v57 = vadd.f32 %v3773_v12, %v888_v38  ;;  %v1073_v8 = vadd.f32 %v3773_v12, %v947_v63  ;;  %v1074_v27 = vadd.f32 %v3773_v12, %v948_v43 }
 0x218   :  { %v1131_v42 = vmax.f32 %v1011_v28, 0.0  ;;  %v1132_v26 = vmax.f32 %v1012_v4, 0.0  ;;  %v1191_v50 = vmax.f32 %v1071_v22, 0.0  ;;  %v1192_v37 = vmax.f32 %v1072_v47, 0.0  ;;  %v2408_v4 = vld [vmem:[%s4888_s0 + $0x230] sm:$0xff] }
 0x219   :  { %v1133_v48 = vmax.f32 %v1013_v34, 0.0  ;;  %v1134_v31 = vmax.f32 %v1014_v57, 0.0  ;;  %v1193_v16 = vmax.f32 %v1073_v8, 0.0  ;;  %v1194_v25 = vmax.f32 %v1074_v27, 0.0  ;;  %v2409_v8 = vld [vmem:[%s4888_s0 + $0x238] sm:$0xff] }
 0x21a   :  { %v1251_v55 = vpack.c.bf16 %v1132_v26, %v1131_v42  ;;  %v1281_v60 = vpack.c.bf16 %v1192_v37, %v1191_v50  ;;  %v1015_v53 = vadd.f32 %v3773_v12, %v889_v41  ;;  %v1016_v36 = vadd.f32 %v3773_v12, %v890_v13  ;;  %v2406_v13 = vld [vmem:[%s4888_s0 + $0x50] sm:$0xff]  ;;  %v2410_v37 = vld [vmem:[%s4888_s0 + $0x60] sm:$0xff] }
 0x21b   :  { %v1252_v29 = vpack.c.bf16 %v1134_v31, %v1133_v48  ;;  %v1282_v61 = vpack.c.bf16 %v1194_v25, %v1193_v16  ;;  %v1075_v11 = vadd.f32 %v3773_v12, %v949_v1  ;;  %v1076_v46 = vadd.f32 %v3773_v12, %v950_v44 }
 0x21c   :  { %2261 = vmatprep.mubr.msk.bf16.mxu0 %vm138_vm0, %v1251_v55  ;;  %2321 = vmatprep.mubr.msk.bf16.mxu1 %vm138_vm0, %v1281_v60  ;;  %v1135_v40 = vmax.f32 %v1015_v53, 0.0  ;;  %v1136_v10 = vmax.f32 %v1016_v36, 0.0  ;;  %v1017_v56 = vadd.f32 %v3773_v12, %v891_v18  ;;  %v1018_v14 = vadd.f32 %v3773_v12, %v892_v23  ;;  %v2411_v55 = vld [vmem:[%s4888_s0 + $0x68] sm:$0xff] }
 0x21d   :  { %2262 = vmatmul.mubr.msk.bf16.vlgmr.msra.gmra.mrb[0].mxu0 %vm138_vm0, %v1252_v29  ;;  %2322 = vmatmul.mubr.msk.bf16.vlgmr.msra.gmra.mrb[0].mxu1 %vm138_vm0, %v1282_v61  ;;  %v1195_v32 = vmax.f32 %v1075_v11, 0.0  ;;  %v1196_v45 = vmax.f32 %v1076_v46, 0.0  ;;  %v951_v52 = vmul.f32 %v2400_v19, %v3743_v24  ;;  %v952_v49 = vmul.f32 %v2401_v59, %v3743_v24  ;;  %v2412_v29 = vld [vmem:[%s4888_s0 + $0x240] sm:$0xff]  ;;  %v2413_v11 = vld [vmem:[%s4888_s0 + $0x248] sm:$0xff]  ;;  %v2415_v59 = vld [vmem:[%s4888_s0 + $0x78] sm:$0xff] }
 0x21e   :  { %v1253_v30 = vpack.c.bf16 %v1136_v10, %v1135_v40  ;;  %v1137_v0 = vmax.f32 %v1017_v56, 0.0  ;;  %v1138_v35 = vmax.f32 %v1018_v14, 0.0  ;;  %v893_v54 = vmul.f32 %v2402_v62, %v3743_v24  ;;  %v2414_v14 = vld [vmem:[%s4888_s0 + $0x70] sm:$0xff] }
 0x21f   :  { %v1283_v33 = vpack.c.bf16 %v1196_v45, %v1195_v32  ;;  %v1077_v6 = vadd.f32 %v3773_v12, %v951_v52  ;;  %v1078_v51 = vadd.f32 %v3773_v12, %v952_v49  ;;  %v894_v58 = vmul.f32 %v2403_v17, %v3743_v24  ;;  %v2416_v62 = vld [vmem:[%s4888_s0 + $0x250] sm:$0xff]  ;;  %v2417_v17 = vld [vmem:[%s4888_s0 + $0x258] sm:$0xff] }
 0x220   :  { %2265 = vmatprep.mubr.msk.bf16.mxu0 %vm138_vm0, %v1253_v30  ;;  %v1254_v5 = vpack.c.bf16 %v1138_v35, %v1137_v0  ;;  %v1019_v38 = vadd.f32 %v3773_v12, %v893_v54  ;;  %v953_v63 = vmul.f32 %v2404_v39, %v3743_v24  ;;  %v954_v43 = vmul.f32 %v2405_v9, %v3743_v24 }
 0x221   :  { %2325 = vmatprep.mubr.msk.bf16.mxu1 %vm138_vm0, %v1283_v33  ;;  %v1197_v7 = vmax.f32 %v1077_v6, 0.0  ;;  %v1198_v41 = vmax.f32 %v1078_v51, 0.0  ;;  %v1020_v20 = vadd.f32 %v3773_v12, %v894_v58  ;;  %v895_v15 = vmul.f32 %v2406_v13, %v3743_v24 }
 0x222   :  { %v1139_v1 = vmax.f32 %v1019_v38, 0.0  ;;  %v1079_v2 = vadd.f32 %v3773_v12, %v953_v63  ;;  %v1080_v44 = vadd.f32 %v3773_v12, %v954_v43  ;;  %v896_v18 = vmul.f32 %v2407_v21, %v3743_v24  ;;  %v2418_v63 = vld [vmem:[%s4888_s0 + $0x80] sm:$0xff]  ;;  %v2421_v21 = vld [vmem:[%s4888_s0 + $0x268] sm:$0xff] }
 0x223   :  { %v1284_v3 = vpack.c.bf16 %v1198_v41, %v1197_v7  ;;  %v1140_v23 = vmax.f32 %v1020_v20, 0.0  ;;  %v1021_v28 = vadd.f32 %v3773_v12, %v895_v15  ;;  %v955_v22 = vmul.f32 %v2408_v4, %v3743_v24  ;;  %v2419_v20 = vld [vmem:[%s4888_s0 + $0x88] sm:$0xff]  ;;  %v2422_v4 = vld [vmem:[%s4888_s0 + $0x90] sm:$0xff] }
 0x224   :  { %v1199_v47 = vmax.f32 %v1079_v2, 0.0  ;;  %v1200_v34 = vmax.f32 %v1080_v44, 0.0  ;;  %v1022_v57 = vadd.f32 %v3773_v12, %v896_v18  ;;  %v956_v27 = vmul.f32 %v2409_v8, %v3743_v24  ;;  %v2420_v2 = vld [vmem:[%s4888_s0 + $0x260] sm:$0xff]  ;;  %v2423_v8 = vld [vmem:[%s4888_s0 + $0x98] sm:$0xff] }
 0x225   :  { %2266 = vmatmul.mubr.msk.bf16.gmra.mrb[4].mxu0 %vm138_vm0, %v1254_v5  ;;  %2326 = vmatmul.mubr.msk.bf16.gmra.mrb[4].mxu1 %vm138_vm0, %v1284_v3  ;;  %v1255_v42 = vpack.c.bf16 %v1140_v23, %v1139_v1  ;;  %v1141_v26 = vmax.f32 %v1021_v28, 0.0  ;;  %v1081_v50 = vadd.f32 %v3773_v12, %v955_v22  ;;  %v897_v48 = vmul.f32 %v2410_v37, %v3743_v24  ;;  %v2424_v37 = vld [vmem:[%s4888_s0 + $0x270] sm:$0xff] }
 0x226   :  { %v1285_v31 = vpack.c.bf16 %v1200_v34, %v1199_v47  ;;  %v1142_v16 = vmax.f32 %v1022_v57, 0.0  ;;  %v1082_v25 = vadd.f32 %v3773_v12, %v956_v27  ;;  %v898_v60 = vmul.f32 %v2411_v55, %v3743_v24  ;;  %v2425_v55 = vld [vmem:[%s4888_s0 + $0x278] sm:$0xff] }
 0x227   :  { %2269 = vmatprep.mubr.msk.bf16.mxu0 %vm138_vm0, %v1255_v42  ;;  %v1201_v53 = vmax.f32 %v1081_v50, 0.0  ;;  %v1023_v36 = vadd.f32 %v3773_v12, %v897_v48  ;;  %v957_v61 = vmul.f32 %v2412_v29, %v3743_v24  ;;  %v958_v46 = vmul.f32 %v2413_v11, %v3743_v24 }
 0x228   :  { %2329 = vmatprep.mubr.msk.bf16.mxu1 %vm138_vm0, %v1285_v31  ;;  %v1256_v40 = vpack.c.bf16 %v1142_v16, %v1141_v26  ;;  %v1202_v10 = vmax.f32 %v1082_v25, 0.0  ;;  %v1024_v56 = vadd.f32 %v3773_v12, %v898_v60  ;;  %v899_v32 = vmul.f32 %v2414_v14, %v3743_v24 }
 0x229   :  { %v1143_v45 = vmax.f32 %v1023_v36, 0.0  ;;  %v1083_v19 = vadd.f32 %v3773_v12, %v957_v61  ;;  %v1084_v52 = vadd.f32 %v3773_v12, %v958_v46  ;;  %v900_v49 = vmul.f32 %v2415_v59, %v3743_v24  ;;  %v2426_v61 = vld [vmem:[%s4888_s0 + $0xa0] sm:$0xff]  ;;  %v2429_v59 = vld [vmem:[%s4888_s0 + $0x288] sm:$0xff] }
 0x22a   :  { %v1286_v30 = vpack.c.bf16 %v1202_v10, %v1201_v53  ;;  %v1144_v0 = vmax.f32 %v1024_v56, 0.0  ;;  %v1025_v35 = vadd.f32 %v3773_v12, %v899_v32  ;;  %v959_v54 = vmul.f32 %v2416_v62, %v3743_v24  ;;  %v2427_v56 = vld [vmem:[%s4888_s0 + $0xa8] sm:$0xff]  ;;  %v2430_v62 = vld [vmem:[%s4888_s0 + $0xb0] sm:$0xff] }
 0x22b   :  { %v1203_v33 = vmax.f32 %v1083_v19, 0.0  ;;  %v1204_v6 = vmax.f32 %v1084_v52, 0.0  ;;  %v1026_v51 = vadd.f32 %v3773_v12, %v900_v49  ;;  %v960_v58 = vmul.f32 %v2417_v17, %v3743_v24  ;;  %v2428_v19 = vld [vmem:[%s4888_s0 + $0x280] sm:$0xff]  ;;  %v2431_v17 = vld [vmem:[%s4888_s0 + $0xb8] sm:$0xff] }
 0x22c   :  { %v1257_v5 = vpack.c.bf16 %v1144_v0, %v1143_v45  ;;  %v1145_v38 = vmax.f32 %v1025_v35, 0.0  ;;  %v1085_v39 = vadd.f32 %v3773_v12, %v959_v54  ;;  %v901_v9 = vmul.f32 %v2418_v63, %v3743_v24  ;;  %v2432_v63 = vld [vmem:[%s4888_s0 + $0x290] sm:$0xff] }
 0x22d   :  { %2270 = vmatmul.mubr.msk.bf16.gmra.mrb[8].mxu0 %vm138_vm0, %v1256_v40  ;;  %2330 = vmatmul.mubr.msk.bf16.gmra.mrb[8].mxu1 %vm138_vm0, %v1286_v30  ;;  %v1287_v43 = vpack.c.bf16 %v1204_v6, %v1203_v33  ;;  %v1146_v7 = vmax.f32 %v1026_v51, 0.0  ;;  %v1086_v41 = vadd.f32 %v3773_v12, %v960_v58  ;;  %v902_v13 = vmul.f32 %v2419_v20, %v3743_v24  ;;  %v2433_v20 = vld [vmem:[%s4888_s0 + $0x298] sm:$0xff] }
 0x22e   :  { %2273 = vmatprep.mubr.msk.bf16.mxu0 %vm138_vm0, %v1257_v5  ;;  %v1205_v15 = vmax.f32 %v1085_v39, 0.0  ;;  %v1027_v1 = vadd.f32 %v3773_v12, %v901_v9  ;;  %v961_v44 = vmul.f32 %v2420_v2, %v3743_v24  ;;  %v962_v18 = vmul.f32 %v2421_v21, %v3743_v24 }
 0x22f   :  { %2333 = vmatprep.mubr.msk.bf16.mxu1 %vm138_vm0, %v1287_v43  ;;  %v1258_v3 = vpack.c.bf16 %v1146_v7, %v1145_v38  ;;  %v1206_v23 = vmax.f32 %v1086_v41, 0.0  ;;  %v1028_v28 = vadd.f32 %v3773_v12, %v902_v13  ;;  %v903_v22 = vmul.f32 %v2422_v4, %v3743_v24 }
 0x230   :  { %v1147_v47 = vmax.f32 %v1027_v1, 0.0  ;;  %v1087_v34 = vadd.f32 %v3773_v12, %v961_v44  ;;  %v1088_v57 = vadd.f32 %v3773_v12, %v962_v18  ;;  %v904_v27 = vmul.f32 %v2423_v8, %v3743_v24  ;;  %v2434_v44 = vld [vmem:[%s4888_s0 + $0xc0] sm:$0xff]  ;;  %v2437_v8 = vld [vmem:[%s4888_s0 + $0x2a8] sm:$0xff] }
 0x231   :  { %v1288_v42 = vpack.c.bf16 %v1206_v23, %v1205_v15  ;;  %v1148_v26 = vmax.f32 %v1028_v28, 0.0  ;;  %v1029_v50 = vadd.f32 %v3773_v12, %v903_v22  ;;  %v963_v48 = vmul.f32 %v2424_v37, %v3743_v24  ;;  %v2435_v28 = vld [vmem:[%s4888_s0 + $0xc8] sm:$0xff]  ;;  %v2438_v37 = vld [vmem:[%s4888_s0 + $0xd0] sm:$0xff] }
 0x232   :  { %v1207_v31 = vmax.f32 %v1087_v34, 0.0  ;;  %v1208_v16 = vmax.f32 %v1088_v57, 0.0  ;;  %v1030_v25 = vadd.f32 %v3773_v12, %v904_v27  ;;  %v964_v60 = vmul.f32 %v2425_v55, %v3743_v24  ;;  %v2436_v34 = vld [vmem:[%s4888_s0 + $0x2a0] sm:$0xff]  ;;  %v2439_v55 = vld [vmem:[%s4888_s0 + $0xd8] sm:$0xff] }
 0x233   :  { %v1259_v53 = vpack.c.bf16 %v1148_v26, %v1147_v47  ;;  %v1149_v36 = vmax.f32 %v1029_v50, 0.0  ;;  %v1089_v29 = vadd.f32 %v3773_v12, %v963_v48  ;;  %v905_v11 = vmul.f32 %v2426_v61, %v3743_v24  ;;  %v2440_v61 = vld [vmem:[%s4888_s0 + $0x2b0] sm:$0xff] }
 0x234   :  { %v1289_v46 = vpack.c.bf16 %v1208_v16, %v1207_v31  ;;  %v1150_v40 = vmax.f32 %v1030_v25, 0.0  ;;  %v1090_v10 = vadd.f32 %v3773_v12, %v964_v60  ;;  %v906_v14 = vmul.f32 %v2427_v56, %v3743_v24  ;;  %v2441_v56 = vld [vmem:[%s4888_s0 + $0x2b8] sm:$0xff] }
 0x235   :  { %2274 = vmatmul.mubr.msk.bf16.gmra.mrb[12].mxu0 %vm138_vm0, %v1258_v3  ;;  %2334 = vmatmul.mubr.msk.bf16.gmra.mrb[12].mxu1 %vm138_vm0, %v1288_v42  ;;  %v1209_v32 = vmax.f32 %v1089_v29, 0.0  ;;  %v1031_v45 = vadd.f32 %v3773_v12, %v905_v11  ;;  %v965_v52 = vmul.f32 %v2428_v19, %v3743_v24  ;;  %v966_v49 = vmul.f32 %v2429_v59, %v3743_v24 }
 0x236   :  { %2277 = vmatprep.mubr.msk.bf16.mxu0 %vm138_vm0, %v1259_v53  ;;  %2337 = vmatprep.mubr.msk.bf16.mxu1 %vm138_vm0, %v1289_v46  ;;  %v1260_v30 = vpack.c.bf16 %v1150_v40, %v1149_v36  ;;  %v1210_v0 = vmax.f32 %v1090_v10, 0.0  ;;  %v1032_v35 = vadd.f32 %v3773_v12, %v906_v14  ;;  %v907_v54 = vmul.f32 %v2430_v62, %v3743_v24 }
 0x237   :  { %v1151_v33 = vmax.f32 %v1031_v45, 0.0  ;;  %v1091_v6 = vadd.f32 %v3773_v12, %v965_v52  ;;  %v1092_v51 = vadd.f32 %v3773_v12, %v966_v49  ;;  %v908_v58 = vmul.f32 %v2431_v17, %v3743_v24  ;;  %v2442_v52 = vld [vmem:[%s4888_s0 + $0xe0] sm:$0xff] }
 0x238   :  { %v1290_v5 = vpack.c.bf16 %v1210_v0, %v1209_v32  ;;  %v1152_v38 = vmax.f32 %v1032_v35, 0.0  ;;  %v1033_v39 = vadd.f32 %v3773_v12, %v907_v54  ;;  %v967_v9 = vmul.f32 %v2432_v63, %v3743_v24  ;;  %v2443_v35 = vld [vmem:[%s4888_s0 + $0xe8] sm:$0xff] }
 0x239   :  { %v1211_v43 = vmax.f32 %v1091_v6, 0.0  ;;  %v1212_v7 = vmax.f32 %v1092_v51, 0.0  ;;  %v1034_v41 = vadd.f32 %v3773_v12, %v908_v58  ;;  %v968_v13 = vmul.f32 %v2433_v20, %v3743_v24  ;;  %v2445_v51 = vld [vmem:[%s4888_s0 + $0x2c8] sm:$0xff] }
 0x23a   :  { %v1261_v15 = vpack.c.bf16 %v1152_v38, %v1151_v33  ;;  %v1153_v1 = vmax.f32 %v1033_v39, 0.0  ;;  %v1093_v2 = vadd.f32 %v3773_v12, %v967_v9  ;;  %v909_v21 = vmul.f32 %v2434_v44, %v3743_v24  ;;  %v2444_v33 = vld [vmem:[%s4888_s0 + $0x2c0] sm:$0xff]  ;;  %v2446_v39 = vld [vmem:[%s4888_s0 + $0xf0] sm:$0xff] }
 0x23b   :  { %v1291_v18 = vpack.c.bf16 %v1212_v7, %v1211_v43  ;;  %v1154_v3 = vmax.f32 %v1034_v41, 0.0  ;;  %v1094_v23 = vadd.f32 %v3773_v12, %v968_v13  ;;  %v910_v4 = vmul.f32 %v2435_v28, %v3743_v24  ;;  %v2447_v41 = vld [vmem:[%s4888_s0 + $0xf8] sm:$0xff] }
 0x23c   :  { %v1213_v22 = vmax.f32 %v1093_v2, 0.0  ;;  %v1035_v47 = vadd.f32 %v3773_v12, %v909_v21  ;;  %v969_v57 = vmul.f32 %v2436_v34, %v3743_v24  ;;  %v970_v27 = vmul.f32 %v2437_v8, %v3743_v24  ;;  %v2448_v2 = vld [vmem:[%s4888_s0 + $0x2d0] sm:$0xff]  ;;  %v2450_v34 = vld [vmem:[%s4888_s0 + $0x100] sm:$0xff] }
 0x23d   :  { %2278 = vmatmul.mubr.msk.bf16.gmra.mrb[16].mxu0 %vm138_vm0, %v1260_v30  ;;  %2338 = vmatmul.mubr.msk.bf16.gmra.mrb[16].mxu1 %vm138_vm0, %v1290_v5  ;;  %v1262_v42 = vpack.c.bf16 %v1154_v3, %v1153_v1  ;;  %v1214_v26 = vmax.f32 %v1094_v23, 0.0  ;;  %v1036_v50 = vadd.f32 %v3773_v12, %v910_v4  ;;  %v911_v48 = vmul.f32 %v2438_v37, %v3743_v24  ;;  %v2449_v23 = vld [vmem:[%s4888_s0 + $0x2d8] sm:$0xff] }
 0x23e   :  { %2281 = vmatprep.mubr.msk.bf16.mxu0 %vm138_vm0, %v1261_v15  ;;  %2341 = vmatprep.mubr.msk.bf16.mxu1 %vm138_vm0, %v1291_v18  ;;  %v1155_v31 = vmax.f32 %v1035_v47, 0.0  ;;  %v1095_v16 = vadd.f32 %v3773_v12, %v969_v57  ;;  %v1096_v25 = vadd.f32 %v3773_v12, %v970_v27  ;;  %v912_v60 = vmul.f32 %v2439_v55, %v3743_v24 }
 0x23f   :  { %v1292_v53 = vpack.c.bf16 %v1214_v26, %v1213_v22  ;;  %v1156_v36 = vmax.f32 %v1036_v50, 0.0  ;;  %v1037_v29 = vadd.f32 %v3773_v12, %v911_v48  ;;  %v971_v11 = vmul.f32 %v2440_v61, %v3743_v24  ;;  %v2451_v26 = vld [vmem:[%s4888_s0 + $0x108] sm:$0xff] }
 0x240   :  { %v1215_v46 = vmax.f32 %v1095_v16, 0.0  ;;  %v1216_v40 = vmax.f32 %v1096_v25, 0.0  ;;  %v1038_v10 = vadd.f32 %v3773_v12, %v912_v60  ;;  %v972_v14 = vmul.f32 %v2441_v56, %v3743_v24  ;;  %v2453_v25 = vld [vmem:[%s4888_s0 + $0x2e8] sm:$0xff] }
 0x241   :  { %v1263_v32 = vpack.c.bf16 %v1156_v36, %v1155_v31  ;;  %v1157_v45 = vmax.f32 %v1037_v29, 0.0  ;;  %v1097_v19 = vadd.f32 %v3773_v12, %v971_v11  ;;  %v913_v59 = vmul.f32 %v2442_v52, %v3743_v24  ;;  %v2452_v31 = vld [vmem:[%s4888_s0 + $0x2e0] sm:$0xff]  ;;  %v2454_v29 = vld [vmem:[%s4888_s0 + $0x110] sm:$0xff] }
 0x242   :  { %v1293_v49 = vpack.c.bf16 %v1216_v40, %v1215_v46  ;;  %v1158_v30 = vmax.f32 %v1038_v10, 0.0  ;;  %v1098_v0 = vadd.f32 %v3773_v12, %v972_v14  ;;  %v914_v62 = vmul.f32 %v2443_v35, %v3743_v24  ;;  %v2455_v10 = vld [vmem:[%s4888_s0 + $0x118] sm:$0xff] }
 0x243   :  { %v1039_v54 = vadd.f32 %v3773_v12, %v913_v59  ;;  %v973_v6 = vmul.f32 %v2444_v33, %v3743_v24  ;;  %v974_v17 = vmul.f32 %v2445_v51, %v3743_v24  ;;  %v1217_v58 = vmax.f32 %v1097_v19, 0.0  ;;  %v2458_v33 = vld [vmem:[%s4888_s0 + $0x120] sm:$0xff] }
 0x244   :  { %v1218_v5 = vmax.f32 %v1098_v0, 0.0  ;;  %v1040_v38 = vadd.f32 %v3773_v12, %v914_v62  ;;  %v915_v63 = vmul.f32 %v2446_v39, %v3743_v24  ;;  %v916_v20 = vmul.f32 %v2447_v41, %v3743_v24 }
 0x245   :  { %2282 = vmatmul.mubr.msk.bf16.gmra.mrb[20].mxu0 %vm138_vm0, %v1262_v42  ;;  %2342 = vmatmul.mubr.msk.bf16.gmra.mrb[20].mxu1 %vm138_vm0, %v1292_v53  ;;  %v1159_v9 = vmax.f32 %v1039_v54, 0.0  ;;  %v1099_v43 = vadd.f32 %v3773_v12, %v973_v6  ;;  %v1100_v7 = vadd.f32 %v3773_v12, %v974_v17  ;;  %v1264_v13 = vpack.c.bf16 %v1158_v30, %v1157_v45  ;;  %v2456_v45 = vld [vmem:[%s4888_s0 + $0x2f0] sm:$0xff]  ;;  %v2457_v30 = vld [vmem:[%s4888_s0 + $0x2f8] sm:$0xff] }
 0x246   :  { %2285 = vmatprep.mubr.msk.bf16.mxu0 %vm138_vm0, %v1263_v32  ;;  %2345 = vmatprep.mubr.msk.bf16.mxu1 %vm138_vm0, %v1293_v49  ;;  %v1160_v15 = vmax.f32 %v1040_v38, 0.0  ;;  %v1041_v1 = vadd.f32 %v3773_v12, %v915_v63  ;;  %v975_v44 = vmul.f32 %v2448_v2, %v3743_v24  ;;  %v1042_v3 = vadd.f32 %v3773_v12, %v916_v20 }
 0x247   :  { %v1219_v21 = vmax.f32 %v1099_v43, 0.0  ;;  %v1220_v18 = vmax.f32 %v1100_v7, 0.0  ;;  %v976_v28 = vmul.f32 %v2449_v23, %v3743_v24  ;;  %v1294_v4 = vpack.c.bf16 %v1218_v5, %v1217_v58  ;;  %v2459_v5 = vld [vmem:[%s4888_s0 + $0x128] sm:$0xff] }
 0x248   :  { %v1265_v22 = vpack.c.bf16 %v1160_v15, %v1159_v9  ;;  %v1101_v47 = vadd.f32 %v3773_v12, %v975_v44  ;;  %v917_v57 = vmul.f32 %v2450_v34, %v3743_v24  ;;  %v1161_v27 = vmax.f32 %v1041_v1, 0.0  ;;  %v2460_v9 = vld [vmem:[%s4888_s0 + $0x300] sm:$0xff]  ;;  %v2461_v7 = vld [vmem:[%s4888_s0 + $0x308] sm:$0xff]  ;;  %v2465_v34 = vld [vmem:[%s4888_s0 + $0x318] sm:$0xff] }
 0x249   :  { %v1295_v8 = vpack.c.bf16 %v1220_v18, %v1219_v21  ;;  %v1102_v42 = vadd.f32 %v3773_v12, %v976_v28  ;;  %v918_v50 = vmul.f32 %v2451_v26, %v3743_v24  ;;  %v1162_v37 = vmax.f32 %v1042_v3, 0.0  ;;  %v2462_v21 = vld [vmem:[%s4888_s0 + $0x130] sm:$0xff]  ;;  %v2463_v3 = vld [vmem:[%s4888_s0 + $0x138] sm:$0xff]  ;;  %v2466_v26 = vld [vmem:[%s4888_s0 + $0x140] sm:$0xff] }
 0x24a   :  { %v1043_v48 = vadd.f32 %v3773_v12, %v917_v57  ;;  %v977_v16 = vmul.f32 %v2452_v31, %v3743_v24  ;;  %v978_v55 = vmul.f32 %v2453_v25, %v3743_v24  ;;  %v1221_v60 = vmax.f32 %v1101_v47, 0.0  ;;  %v2464_v28 = vld [vmem:[%s4888_s0 + $0x310] sm:$0xff] }
 0x24b   :  { %v1222_v53 = vmax.f32 %v1102_v42, 0.0  ;;  %v1044_v36 = vadd.f32 %v3773_v12, %v918_v50  ;;  %v919_v61 = vmul.f32 %v2454_v29, %v3743_v24  ;;  %v920_v56 = vmul.f32 %v2455_v10, %v3743_v24  ;;  %v2469_v29 = vld [vmem:[%s4888_s0 + $0x328] sm:$0xff]  ;;  %v2470_v10 = vld [vmem:[%s4888_s0 + $0x150] sm:$0xff] }
 0x24c   :  { %v1163_v11 = vmax.f32 %v1043_v48, 0.0  ;;  %v1103_v46 = vadd.f32 %v3773_v12, %v977_v16  ;;  %v1104_v40 = vadd.f32 %v3773_v12, %v978_v55  ;;  %v979_v19 = vmul.f32 %v2456_v45, %v3743_v24  ;;  %v2467_v16 = vld [vmem:[%s4888_s0 + $0x148] sm:$0xff] }
 0x24d   :  { %2286 = vmatmul.mubr.msk.bf16.gmra.mrb[24].mxu0 %vm138_vm0, %v1264_v13  ;;  %2346 = vmatmul.mubr.msk.bf16.gmra.mrb[24].mxu1 %vm138_vm0, %v1294_v4  ;;  %v1164_v14 = vmax.f32 %v1044_v36, 0.0  ;;  %v1045_v32 = vadd.f32 %v3773_v12, %v919_v61  ;;  %v1046_v49 = vadd.f32 %v3773_v12, %v920_v56  ;;  %v980_v0 = vmul.f32 %v2457_v30, %v3743_v24 }
 0x24e   :  { %2289 = vmatprep.mubr.msk.bf16.mxu0 %vm138_vm0, %v1265_v22  ;;  %2349 = vmatprep.mubr.msk.bf16.mxu1 %vm138_vm0, %v1295_v8  ;;  %v1223_v52 = vmax.f32 %v1103_v46, 0.0  ;;  %v1224_v59 = vmax.f32 %v1104_v40, 0.0  ;;  %v1266_v35 = vpack.c.bf16 %v1162_v37, %v1161_v27  ;;  %v1296_v62 = vpack.c.bf16 %v1222_v53, %v1221_v60  ;;  %v2468_v53 = vld [vmem:[%s4888_s0 + $0x320] sm:$0xff] }
 0x24f   :  { %v1105_v54 = vadd.f32 %v3773_v12, %v979_v19  ;;  %v921_v6 = vmul.f32 %v2458_v33, %v3743_v24  ;;  %v1267_v51 = vpack.c.bf16 %v1164_v14, %v1163_v11  ;;  %v1165_v17 = vmax.f32 %v1045_v32, 0.0  ;;  %v2471_v19 = vld [vmem:[%s4888_s0 + $0x158] sm:$0xff] }
 0x250   :  { %v1106_v58 = vadd.f32 %v3773_v12, %v980_v0  ;;  %v922_v38 = vmul.f32 %v2459_v5, %v3743_v24  ;;  %v1297_v39 = vpack.c.bf16 %v1224_v59, %v1223_v52  ;;  %v981_v43 = vmul.f32 %v2460_v9, %v3743_v24  ;;  %v2475_v9 = vld [vmem:[%s4888_s0 + $0x168] sm:$0xff] }
 0x251   :  { %v1047_v63 = vadd.f32 %v3773_v12, %v921_v6  ;;  %v982_v41 = vmul.f32 %v2461_v7, %v3743_v24  ;;  %v1166_v20 = vmax.f32 %v1046_v49, 0.0  ;;  %v1225_v13 = vmax.f32 %v1105_v54, 0.0  ;;  %v2472_v49 = vld [vmem:[%s4888_s0 + $0x330] sm:$0xff]  ;;  %v2473_v54 = vld [vmem:[%s4888_s0 + $0x338] sm:$0xff] }
 0x252   :  { %v1226_v15 = vmax.f32 %v1106_v58, 0.0  ;;  %v1048_v1 = vadd.f32 %v3773_v12, %v922_v38  ;;  %v1107_v2 = vadd.f32 %v3773_v12, %v981_v43  ;;  %v923_v18 = vmul.f32 %v2462_v21, %v3743_v24  ;;  %v2474_v58 = vld [vmem:[%s4888_s0 + $0x160] sm:$0xff] }
 0x253   :  { %v1108_v44 = vadd.f32 %v3773_v12, %v982_v41  ;;  %v924_v23 = vmul.f32 %v2463_v3, %v3743_v24  ;;  %v983_v4 = vmul.f32 %v2464_v28, %v3743_v24  ;;  %v1167_v22 = vmax.f32 %v1047_v63, 0.0 }
 0x254   :  { %v1168_v47 = vmax.f32 %v1048_v1, 0.0  ;;  %v984_v57 = vmul.f32 %v2465_v34, %v3743_v24  ;;  %v1268_v8 = vpack.c.bf16 %v1166_v20, %v1165_v17  ;;  %v1227_v27 = vmax.f32 %v1107_v2, 0.0  ;;  %v2476_v20 = vld [vmem:[%s4888_s0 + $0x340] sm:$0xff] }
 0x255   :  { %2290 = vmatmul.mubr.msk.bf16.gmra.mrb[28].mxu0 %vm138_vm0, %v1266_v35  ;;  %2350 = vmatmul.mubr.msk.bf16.gmra.mrb[28].mxu1 %vm138_vm0, %v1296_v62  ;;  %v1228_v42 = vmax.f32 %v1108_v44, 0.0  ;;  %v925_v50 = vmul.f32 %v2466_v26, %v3743_v24  ;;  %v1298_v37 = vpack.c.bf16 %v1226_v15, %v1225_v13  ;;  %v1049_v48 = vadd.f32 %v3773_v12, %v923_v18  ;;  %v2477_v15 = vld [vmem:[%s4888_s0 + $0x348] sm:$0xff]  ;;  %v2479_v26 = vld [vmem:[%s4888_s0 + $0x178] sm:$0xff] }
 0x256   :  { %2293 = vmatprep.mubr.msk.bf16.mxu0 %vm138_vm0, %v1267_v51  ;;  %2353 = vmatprep.mubr.msk.bf16.mxu1 %vm138_vm0, %v1297_v39  ;;  %v1050_v31 = vadd.f32 %v3773_v12, %v924_v23  ;;  %v926_v25 = vmul.f32 %v2467_v16, %v3743_v24  ;;  %v1109_v55 = vadd.f32 %v3773_v12, %v983_v4 }
 0x257   :  { %v1110_v60 = vadd.f32 %v3773_v12, %v984_v57  ;;  %v985_v36 = vmul.f32 %v2468_v53, %v3743_v24  ;;  %v986_v61 = vmul.f32 %v2469_v29, %v3743_v24  ;;  %v1269_v11 = vpack.c.bf16 %v1168_v47, %v1167_v22  ;;  %v2482_v53 = vld [vmem:[%s4888_s0 + $0x180] sm:$0xff]  ;;  %v2483_v29 = vld [vmem:[%s4888_s0 + $0x188] sm:$0xff] }
 0x258   :  { %v1051_v46 = vadd.f32 %v3773_v12, %v925_v50  ;;  %v1052_v40 = vadd.f32 %v3773_v12, %v926_v25  ;;  %v927_v56 = vmul.f32 %v2470_v10, %v3743_v24  ;;  %v1299_v14 = vpack.c.bf16 %v1228_v42, %v1227_v27 }
 0x259   :  { %v1111_v32 = vadd.f32 %v3773_v12, %v985_v36  ;;  %v1112_v45 = vadd.f32 %v3773_v12, %v986_v61  ;;  %v928_v52 = vmul.f32 %v2471_v19, %v3743_v24  ;;  %v1169_v59 = vmax.f32 %v1049_v48, 0.0 }
 0x25a   :  { %v987_v30 = vmul.f32 %v2472_v49, %v3743_v24  ;;  %v1170_v0 = vmax.f32 %v1050_v31, 0.0  ;;  %v1229_v35 = vmax.f32 %v1109_v55, 0.0  ;;  %v1230_v62 = vmax.f32 %v1110_v60, 0.0  ;;  %v2481_v31 = vld [vmem:[%s4888_s0 + $0x358] sm:$0xff] }
 0x25b   :  { %v988_v33 = vmul.f32 %v2473_v54, %v3743_v24  ;;  %v1171_v6 = vmax.f32 %v1051_v46, 0.0  ;;  %v1172_v51 = vmax.f32 %v1052_v40, 0.0  ;;  %v1053_v17 = vadd.f32 %v3773_v12, %v927_v56  ;;  %v2485_v40 = vld [vmem:[%s4888_s0 + $0x368] sm:$0xff]  ;;  %v2486_v54 = vld [vmem:[%s4888_s0 + $0x190] sm:$0xff] }
 0x25c   :  { %v929_v5 = vmul.f32 %v2474_v58, %v3743_v24  ;;  %v1231_v38 = vmax.f32 %v1111_v32, 0.0  ;;  %v1232_v39 = vmax.f32 %v1112_v45, 0.0  ;;  %v1054_v63 = vadd.f32 %v3773_v12, %v928_v52  ;;  %v2488_v58 = vld [vmem:[%s4888_s0 + $0x370] sm:$0xff] }
 0x25d   :  { %2294 = vmatmul.mubr.msk.bf16.gmra.mrb[32].mxu0 %vm138_vm0, %v1268_v8  ;;  %2354 = vmatmul.mubr.msk.bf16.gmra.mrb[32].mxu1 %vm138_vm0, %v1298_v37  ;;  %v930_v43 = vmul.f32 %v2475_v9, %v3743_v24  ;;  %v1113_v7 = vadd.f32 %v3773_v12, %v987_v30  ;;  %v1114_v41 = vadd.f32 %v3773_v12, %v988_v33  ;;  %v1173_v22 = vmax.f32 %v1053_v17, 0.0  ;;  %v2478_v8 = vld [vmem:[%s4888_s0 + $0x170] sm:$0xff] }
 0x25e   :  { %2297 = vmatprep.mubr.msk.bf16.mxu0 %vm138_vm0, %v1269_v11  ;;  %2357 = vmatprep.mubr.msk.bf16.mxu1 %vm138_vm0, %v1299_v14  ;;  %v989_v13 = vmul.f32 %v2476_v20, %v3743_v24  ;;  %v990_v1 = vmul.f32 %v2477_v15, %v3743_v24  ;;  %v1270_v2 = vpack.c.bf16 %v1170_v0, %v1169_v59  ;;  %v1174_v47 = vmax.f32 %v1054_v63, 0.0  ;;  %v2480_v37 = vld [vmem:[%s4888_s0 + $0x350] sm:$0xff]  ;;  %v2484_v11 = vld [vmem:[%s4888_s0 + $0x360] sm:$0xff] }
 0x25f   :  { %v1055_v44 = vadd.f32 %v3773_v12, %v929_v5  ;;  %v1300_v21 = vpack.c.bf16 %v1230_v62, %v1229_v35  ;;  %v1056_v18 = vadd.f32 %v3773_v12, %v930_v43  ;;  %v1271_v28 = vpack.c.bf16 %v1172_v51, %v1171_v6  ;;  %v2487_v51 = vld [vmem:[%s4888_s0 + $0x198] sm:$0xff] }
 0x260   :  { %v1115_v3 = vadd.f32 %v3773_v12, %v989_v13  ;;  %v1116_v23 = vadd.f32 %v3773_v12, %v990_v1  ;;  %v1301_v4 = vpack.c.bf16 %v1232_v39, %v1231_v38  ;;  %v1233_v34 = vmax.f32 %v1113_v7, 0.0  ;;  %v2489_v38 = vld [vmem:[%s4888_s0 + $0x378] sm:$0xff]  ;;  %v2490_v7 = vld [vmem:[%s4888_s0 + $0x1a0] sm:$0xff]  ;;  %v2491_v13 = vld [vmem:[%s4888_s0 + $0x1a8] sm:$0xff] }
 0x261   :  { %v1234_v57 = vmax.f32 %v1114_v41, 0.0  ;;  %v931_v27 = vmul.f32 %v2478_v8, %v3743_v24  ;;  %v1175_v42 = vmax.f32 %v1055_v44, 0.0  ;;  %v932_v50 = vmul.f32 %v2479_v26, %v3743_v24  ;;  %v2492_v1 = vld [vmem:[%s4888_s0 + $0x380] sm:$0xff]  ;;  %v2493_v44 = vld [vmem:[%s4888_s0 + $0x388] sm:$0xff] }
 0x262   :  { %v991_v48 = vmul.f32 %v2480_v37, %v3743_v24  ;;  %v992_v16 = vmul.f32 %v2481_v31, %v3743_v24  ;;  %v1176_v25 = vmax.f32 %v1056_v18, 0.0  ;;  %v1235_v55 = vmax.f32 %v1115_v3, 0.0 }
 0x263   :  { %v1236_v60 = vmax.f32 %v1116_v23, 0.0  ;;  %v933_v36 = vmul.f32 %v2482_v53, %v3743_v24  ;;  %v934_v61 = vmul.f32 %v2483_v29, %v3743_v24  ;;  %v993_v46 = vmul.f32 %v2484_v11, %v3743_v24 }
 0x264   :  { %v994_v10 = vmul.f32 %v2485_v40, %v3743_v24  ;;  %v1057_v56 = vadd.f32 %v3773_v12, %v931_v27  ;;  %v1272_v14 = vpack.c.bf16 %v1174_v47, %v1173_v22  ;;  %v1058_v32 = vadd.f32 %v3773_v12, %v932_v50 }
 0x265   :  { %2298 = vmatmul.mubr.msk.bf16.gmra.mrb[36].mxu0 %vm138_vm0, %v1270_v2  ;;  %2358 = vmatmul.mubr.msk.bf16.gmra.mrb[36].mxu1 %vm138_vm0, %v1300_v21  ;;  %v1117_v45 = vadd.f32 %v3773_v12, %v991_v48  ;;  %v1118_v19 = vadd.f32 %v3773_v12, %v992_v16  ;;  %v1302_v52 = vpack.c.bf16 %v1234_v57, %v1233_v34 }
 0x266   :  { %2301 = vmatprep.mubr.msk.bf16.mxu0 %vm138_vm0, %v1271_v28  ;;  %2361 = vmatprep.mubr.msk.bf16.mxu1 %vm138_vm0, %v1301_v4  ;;  %v1273_v59 = vpack.c.bf16 %v1176_v25, %v1175_v42  ;;  %v1303_v49 = vpack.c.bf16 %v1236_v60, %v1235_v55  ;;  %v1059_v30 = vadd.f32 %v3773_v12, %v933_v36  ;;  %v1177_v6 = vmax.f32 %v1057_v56, 0.0  ;;  %v2494_v55 = vld [vmem:[%s4888_s0 + $0x1b0] sm:$0xff]  ;;  %v2495_v36 = vld [vmem:[%s4888_s0 + $0x1b8] sm:$0xff] }
 0x267   :  { %v1060_v0 = vadd.f32 %v3773_v12, %v934_v61  ;;  %v1119_v35 = vadd.f32 %v3773_v12, %v993_v46  ;;  %v1120_v62 = vadd.f32 %v3773_v12, %v994_v10  ;;  %v935_v33 = vmul.f32 %v2486_v54, %v3743_v24  ;;  %v2496_v61 = vld [vmem:[%s4888_s0 + $0x390] sm:$0xff]  ;;  %v2497_v46 = vld [vmem:[%s4888_s0 + $0x398] sm:$0xff] }
 0x268   :  { %v936_v17 = vmul.f32 %v2487_v51, %v3743_v24  ;;  %v995_v5 = vmul.f32 %v2488_v58, %v3743_v24  ;;  %v996_v39 = vmul.f32 %v2489_v38, %v3743_v24  ;;  %v1178_v63 = vmax.f32 %v1058_v32, 0.0  ;;  %v2498_v32 = vld [vmem:[%s4888_s0 + $0x1c0] sm:$0xff] }
 0x269   :  { %v1237_v9 = vmax.f32 %v1117_v45, 0.0  ;;  %v1238_v43 = vmax.f32 %v1118_v19, 0.0  ;;  %v937_v41 = vmul.f32 %v2490_v7, %v3743_v24  ;;  %v1179_v20 = vmax.f32 %v1059_v30, 0.0  ;;  %v2499_v19 = vld [vmem:[%s4888_s0 + $0x1c8] sm:$0xff] }
 0x26a   :  { %v938_v15 = vmul.f32 %v2491_v13, %v3743_v24  ;;  %v997_v2 = vmul.f32 %v2492_v1, %v3743_v24  ;;  %v998_v21 = vmul.f32 %v2493_v44, %v3743_v24  ;;  %v1180_v18 = vmax.f32 %v1060_v0, 0.0  ;;  %v2501_v30 = vld [vmem:[%s4888_s0 + $0x3a8] sm:$0xff] }
 0x26b   :  { %v1239_v3 = vmax.f32 %v1119_v35, 0.0  ;;  %v1240_v23 = vmax.f32 %v1120_v62, 0.0  ;;  %v1061_v28 = vadd.f32 %v3773_v12, %v935_v33  ;;  %v1062_v4 = vadd.f32 %v3773_v12, %v936_v17 }
 0x26c   :  { %v1121_v22 = vadd.f32 %v3773_v12, %v995_v5  ;;  %v1122_v47 = vadd.f32 %v3773_v12, %v996_v39  ;;  %v1274_v34 = vpack.c.bf16 %v1178_v63, %v1177_v6  ;;  %v1063_v57 = vadd.f32 %v3773_v12, %v937_v41 }
 0x26d   :  { %2302 = vmatmul.mubr.msk.bf16.gmra.mrb[40].mxu0 %vm138_vm0, %v1272_v14  ;;  %2362 = vmatmul.mubr.msk.bf16.gmra.mrb[40].mxu1 %vm138_vm0, %v1302_v52  ;;  %v1304_v8 = vpack.c.bf16 %v1238_v43, %v1237_v9  ;;  %v1064_v27 = vadd.f32 %v3773_v12, %v938_v15  ;;  %v1123_v42 = vadd.f32 %v3773_v12, %v997_v2  ;;  %v1181_v48 = vmax.f32 %v1061_v28, 0.0  ;;  %v2503_v15 = vld [vmem:[%s4888_s0 + $0x1d8] sm:$0xff]  ;;  %v2504_v2 = vld [vmem:[%s4888_s0 + $0x3b0] sm:$0xff] }
 0x26e   :  { %2305 = vmatprep.mubr.msk.bf16.mxu0 %vm138_vm0, %v1273_v59  ;;  %2365 = vmatprep.mubr.msk.bf16.mxu1 %vm138_vm0, %v1303_v49  ;;  %v1124_v26 = vadd.f32 %v3773_v12, %v998_v21  ;;  %v1275_v50 = vpack.c.bf16 %v1180_v18, %v1179_v20  ;;  %v1305_v37 = vpack.c.bf16 %v1240_v23, %v1239_v3  ;;  %v1182_v31 = vmax.f32 %v1062_v4, 0.0  ;;  %v2500_v59 = vld [vmem:[%s4888_s0 + $0x3a0] sm:$0xff]  ;;  %v2502_v20 = vld [vmem:[%s4888_s0 + $0x1d0] sm:$0xff]  ;;  %v2505_v21 = vld [vmem:[%s4888_s0 + $0x3b8] sm:$0xff] }
 0x26f   :  { %v1241_v16 = vmax.f32 %v1121_v22, 0.0  ;;  %v1242_v25 = vmax.f32 %v1122_v47, 0.0  ;;  %v939_v60 = vmul.f32 %v2494_v55, %v3743_v24  ;;  %v1183_v53 = vmax.f32 %v1063_v57, 0.0 }
 0x270   :  { %v940_v29 = vmul.f32 %v2495_v36, %v3743_v24  ;;  %v999_v11 = vmul.f32 %v2496_v61, %v3743_v24  ;;  %v1000_v40 = vmul.f32 %v2497_v46, %v3743_v24  ;;  %v1184_v10 = vmax.f32 %v1064_v27, 0.0 }
 0x271   :  { %v1243_v56 = vmax.f32 %v1123_v42, 0.0  ;;  %v1244_v14 = vmax.f32 %v1124_v26, 0.0  ;;  %v941_v45 = vmul.f32 %v2498_v32, %v3743_v24  ;;  %v942_v52 = vmul.f32 %v2499_v19, %v3743_v24 }
 0x272   :  { %v1001_v49 = vmul.f32 %v2500_v59, %v3743_v24  ;;  %v1002_v0 = vmul.f32 %v2501_v30, %v3743_v24  ;;  %v1065_v35 = vadd.f32 %v3773_v12, %v939_v60  ;;  %v1066_v62 = vadd.f32 %v3773_v12, %v940_v29 }
 0x273   :  { %v1125_v54 = vadd.f32 %v3773_v12, %v999_v11  ;;  %v1126_v33 = vadd.f32 %v3773_v12, %v1000_v40  ;;  %v1276_v6 = vpack.c.bf16 %v1182_v31, %v1181_v48  ;;  %v1306_v51 = vpack.c.bf16 %v1242_v25, %v1241_v16 }
 0x274   :  { %v1277_v17 = vpack.c.bf16 %v1184_v10, %v1183_v53  ;;  %v1307_v58 = vpack.c.bf16 %v1244_v14, %v1243_v56  ;;  %v1067_v5 = vadd.f32 %v3773_v12, %v941_v45  ;;  %v1068_v38 = vadd.f32 %v3773_v12, %v942_v52 }
 0x275   :  { %2306 = vmatmul.mubr.msk.bf16.gmra.mrb[44].mxu0 %vm138_vm0, %v1274_v34  ;;  %2366 = vmatmul.mubr.msk.bf16.gmra.mrb[44].mxu1 %vm138_vm0, %v1304_v8  ;;  %v1127_v39 = vadd.f32 %v3773_v12, %v1001_v49  ;;  %v1128_v63 = vadd.f32 %v3773_v12, %v1002_v0  ;;  %v1185_v9 = vmax.f32 %v1065_v35, 0.0  ;;  %v1186_v43 = vmax.f32 %v1066_v62, 0.0 }
 0x276   :  { %2309 = vmatprep.mubr.msk.bf16.mxu0 %vm138_vm0, %v1275_v50  ;;  %2369 = vmatprep.mubr.msk.bf16.mxu1 %vm138_vm0, %v1305_v37  ;;  %v1245_v7 = vmax.f32 %v1125_v54, 0.0  ;;  %v1246_v41 = vmax.f32 %v1126_v33, 0.0  ;;  %v943_v13 = vmul.f32 %v2502_v20, %v3743_v24  ;;  %v944_v1 = vmul.f32 %v2503_v15, %v3743_v24 }
 0x277   :  { %v1003_v44 = vmul.f32 %v2504_v2, %v3743_v24  ;;  %v1004_v18 = vmul.f32 %v2505_v21, %v3743_v24  ;;  %v1187_v3 = vmax.f32 %v1067_v5, 0.0  ;;  %v1188_v23 = vmax.f32 %v1068_v38, 0.0 }
 0x278   :  { %v1247_v28 = vmax.f32 %v1127_v39, 0.0  ;;  %v1248_v4 = vmax.f32 %v1128_v63, 0.0  ;;  %v1278_v22 = vpack.c.bf16 %v1186_v43, %v1185_v9  ;;  %v1308_v47 = vpack.c.bf16 %v1246_v41, %v1245_v7 }
 0x279   :  { %v1069_v34 = vadd.f32 %v3773_v12, %v943_v13  ;;  %v1070_v57 = vadd.f32 %v3773_v12, %v944_v1  ;;  %v1129_v8 = vadd.f32 %v3773_v12, %v1003_v44  ;;  %v1130_v27 = vadd.f32 %v3773_v12, %v1004_v18 }
 0x27a   :  { %v1279_v42 = vpack.c.bf16 %v1188_v23, %v1187_v3  ;;  %v1309_v24 = vpack.c.bf16 %v1248_v4, %v1247_v28 }
 0x27b   :  { %v1189_v26 = vmax.f32 %v1069_v34, 0.0  ;;  %v1190_v50 = vmax.f32 %v1070_v57, 0.0  ;;  %v1249_v37 = vmax.f32 %v1129_v8, 0.0  ;;  %v1250_v48 = vmax.f32 %v1130_v27, 0.0 }
 0x27d   :  { %2310 = vmatmul.mubr.msk.bf16.gmra.mrb[48].mxu0 %vm138_vm0, %v1276_v6  ;;  %2370 = vmatmul.mubr.msk.bf16.gmra.mrb[48].mxu1 %vm138_vm0, %v1306_v51  ;;  %v1280_v31 = vpack.c.bf16 %v1190_v50, %v1189_v26  ;;  %v1310_v16 = vpack.c.bf16 %v1250_v48, %v1249_v37 }
 0x27e   :  { %2313 = vmatprep.mubr.msk.bf16.mxu0 %vm138_vm0, %v1277_v17  ;;  %2373 = vmatprep.mubr.msk.bf16.mxu1 %vm138_vm0, %v1307_v58 }
 0x285   :  { %2314 = vmatmul.mubr.msk.bf16.gmra.mrb[52].mxu0 %vm138_vm0, %v1278_v22  ;;  %2374 = vmatmul.mubr.msk.bf16.gmra.mrb[52].mxu1 %vm138_vm0, %v1308_v47 }
 0x286   :  { %2317 = vmatprep.mubr.msk.bf16.mxu0 %vm138_vm0, %v1279_v42  ;;  %2377 = vmatprep.mubr.msk.bf16.mxu1 %vm138_vm0, %v1309_v24 }
 0x28d   :  { %2318 = vmatmul.mubr.msk.bf16.gmra.mrb[56].mxu0 %vm138_vm0, %v1280_v31  ;;  %2378 = vmatmul.mubr.msk.bf16.gmra.mrb[56].mxu1 %vm138_vm0, %v1310_v16 }
 0x2f0   :  { %v2263_v12 = vpop.f32.mrb[0].mxu0  ;;  %v2323_v25 = vpop.f32.mrb[0].mxu1 }
 0x2f1   :  { %2015 = vst.msk [vmem:[%s4891_s4 + $0x10] sm:$0xff] %vm2012_vm1, %v2263_v12  ;;  %2075 = vst.msk [vmem:[%s4891_s4 + $0x1f0] sm:$0xff] %vm2012_vm1, %v2323_v25  ;;  %v1533_v55 = vpop.f32.mrb[1].mxu0  ;;  %v1773_v60 = vpop.f32.mrb[1].mxu1 }
 0x2f2   :  { %2013 = vst.msk [vmem:[%s4891_s4] sm:$0xff] %vm2012_vm1, %v1533_v55  ;;  %2073 = vst.msk [vmem:[%s4891_s4 + $0x1e0] sm:$0xff] %vm2012_vm1, %v1773_v60  ;;  %v2264_v53 = vpop.f32.mrb[2].mxu0  ;;  %v2324_v36 = vpop.f32.mrb[2].mxu1 }
 0x2f3   :  { %2016 = vst.msk [vmem:[%s4891_s4 + $0x18] sm:$0xff] %vm2012_vm1, %v2264_v53  ;;  %2076 = vst.msk [vmem:[%s4891_s4 + $0x1f8] sm:$0xff] %vm2012_vm1, %v2324_v36  ;;  %v1536_v29 = vpop.f32.mrb[3].mxu0  ;;  %v1776_v61 = vpop.f32.mrb[3].mxu1 }
 0x2f4   :  { %2014 = vst.msk [vmem:[%s4891_s4 + $0x8] sm:$0xff] %vm2012_vm1, %v1536_v29  ;;  %2074 = vst.msk [vmem:[%s4891_s4 + $0x1e8] sm:$0xff] %vm2012_vm1, %v1776_v61 }
 0x2f8   :  { %v2267_v11 = vpop.f32.mrb[4].mxu0  ;;  %v2327_v46 = vpop.f32.mrb[4].mxu1 }
 0x2f9   :  { %2019 = vst.msk [vmem:[%s4891_s4 + $0x30] sm:$0xff] %vm2012_vm1, %v2267_v11  ;;  %2079 = vst.msk [vmem:[%s4891_s4 + $0x210] sm:$0xff] %vm2012_vm1, %v2327_v46  ;;  %v1549_v40 = vpop.f32.mrb[5].mxu0  ;;  %v1789_v10 = vpop.f32.mrb[5].mxu1 }
 0x2fa   :  { %2017 = vst.msk [vmem:[%s4891_s4 + $0x20] sm:$0xff] %vm2012_vm1, %v1549_v40  ;;  %2077 = vst.msk [vmem:[%s4891_s4 + $0x200] sm:$0xff] %vm2012_vm1, %v1789_v10  ;;  %v2268_v56 = vpop.f32.mrb[6].mxu0  ;;  %v2328_v14 = vpop.f32.mrb[6].mxu1 }
 0x2fb   :  { %2020 = vst.msk [vmem:[%s4891_s4 + $0x38] sm:$0xff] %vm2012_vm1, %v2268_v56  ;;  %2080 = vst.msk [vmem:[%s4891_s4 + $0x218] sm:$0xff] %vm2012_vm1, %v2328_v14  ;;  %v1552_v32 = vpop.f32.mrb[7].mxu0  ;;  %v1792_v45 = vpop.f32.mrb[7].mxu1 }
 0x2fc   :  { %2018 = vst.msk [vmem:[%s4891_s4 + $0x28] sm:$0xff] %vm2012_vm1, %v1552_v32  ;;  %2078 = vst.msk [vmem:[%s4891_s4 + $0x208] sm:$0xff] %vm2012_vm1, %v1792_v45 }
 0x300   :  { %v2271_v19 = vpop.f32.mrb[8].mxu0  ;;  %v2331_v52 = vpop.f32.mrb[8].mxu1 }
 0x301   :  { %2023 = vst.msk [vmem:[%s4891_s4 + $0x50] sm:$0xff] %vm2012_vm1, %v2271_v19  ;;  %2083 = vst.msk [vmem:[%s4891_s4 + $0x230] sm:$0xff] %vm2012_vm1, %v2331_v52  ;;  %v1565_v59 = vpop.f32.mrb[9].mxu0  ;;  %v1805_v49 = vpop.f32.mrb[9].mxu1 }
 0x302   :  { %2021 = vst.msk [vmem:[%s4891_s4 + $0x40] sm:$0xff] %vm2012_vm1, %v1565_v59  ;;  %2081 = vst.msk [vmem:[%s4891_s4 + $0x220] sm:$0xff] %vm2012_vm1, %v1805_v49  ;;  %v2272_v30 = vpop.f32.mrb[10].mxu0  ;;  %v2332_v0 = vpop.f32.mrb[10].mxu1 }
 0x303   :  { %2024 = vst.msk [vmem:[%s4891_s4 + $0x58] sm:$0xff] %vm2012_vm1, %v2272_v30  ;;  %2084 = vst.msk [vmem:[%s4891_s4 + $0x238] sm:$0xff] %vm2012_vm1, %v2332_v0  ;;  %v1568_v35 = vpop.f32.mrb[11].mxu0  ;;  %v1808_v62 = vpop.f32.mrb[11].mxu1 }
 0x304   :  { %2022 = vst.msk [vmem:[%s4891_s4 + $0x48] sm:$0xff] %vm2012_vm1, %v1568_v35  ;;  %2082 = vst.msk [vmem:[%s4891_s4 + $0x228] sm:$0xff] %vm2012_vm1, %v1808_v62 }
 0x308   :  { %v2275_v54 = vpop.f32.mrb[12].mxu0  ;;  %v2335_v33 = vpop.f32.mrb[12].mxu1 }
 0x309   :  { %2027 = vst.msk [vmem:[%s4891_s4 + $0x70] sm:$0xff] %vm2012_vm1, %v2275_v54  ;;  %2087 = vst.msk [vmem:[%s4891_s4 + $0x250] sm:$0xff] %vm2012_vm1, %v2335_v33  ;;  %v1581_v6 = vpop.f32.mrb[13].mxu0  ;;  %v1821_v51 = vpop.f32.mrb[13].mxu1 }
 0x30a   :  { %2025 = vst.msk [vmem:[%s4891_s4 + $0x60] sm:$0xff] %vm2012_vm1, %v1581_v6  ;;  %2085 = vst.msk [vmem:[%s4891_s4 + $0x240] sm:$0xff] %vm2012_vm1, %v1821_v51  ;;  %v2276_v17 = vpop.f32.mrb[14].mxu0  ;;  %v2336_v58 = vpop.f32.mrb[14].mxu1 }
 0x30b   :  { %2028 = vst.msk [vmem:[%s4891_s4 + $0x78] sm:$0xff] %vm2012_vm1, %v2276_v17  ;;  %2088 = vst.msk [vmem:[%s4891_s4 + $0x258] sm:$0xff] %vm2012_vm1, %v2336_v58  ;;  %v1584_v5 = vpop.f32.mrb[15].mxu0  ;;  %v1824_v38 = vpop.f32.mrb[15].mxu1 }
 0x30c   :  { %2026 = vst.msk [vmem:[%s4891_s4 + $0x68] sm:$0xff] %vm2012_vm1, %v1584_v5  ;;  %2086 = vst.msk [vmem:[%s4891_s4 + $0x248] sm:$0xff] %vm2012_vm1, %v1824_v38 }
 0x310   :  { %v2279_v39 = vpop.f32.mrb[16].mxu0  ;;  %v2339_v63 = vpop.f32.mrb[16].mxu1 }
 0x311   :  { %2031 = vst.msk [vmem:[%s4891_s4 + $0x90] sm:$0xff] %vm2012_vm1, %v2279_v39  ;;  %2091 = vst.msk [vmem:[%s4891_s4 + $0x270] sm:$0xff] %vm2012_vm1, %v2339_v63  ;;  %v1597_v9 = vpop.f32.mrb[17].mxu0  ;;  %v1837_v43 = vpop.f32.mrb[17].mxu1 }
 0x312   :  { %2029 = vst.msk [vmem:[%s4891_s4 + $0x80] sm:$0xff] %vm2012_vm1, %v1597_v9  ;;  %2089 = vst.msk [vmem:[%s4891_s4 + $0x260] sm:$0xff] %vm2012_vm1, %v1837_v43  ;;  %v2280_v7 = vpop.f32.mrb[18].mxu0  ;;  %v2340_v41 = vpop.f32.mrb[18].mxu1 }
 0x313   :  { %2032 = vst.msk [vmem:[%s4891_s4 + $0x98] sm:$0xff] %vm2012_vm1, %v2280_v7  ;;  %2092 = vst.msk [vmem:[%s4891_s4 + $0x278] sm:$0xff] %vm2012_vm1, %v2340_v41  ;;  %v1600_v20 = vpop.f32.mrb[19].mxu0  ;;  %v1840_v13 = vpop.f32.mrb[19].mxu1 }
 0x314   :  { %2030 = vst.msk [vmem:[%s4891_s4 + $0x88] sm:$0xff] %vm2012_vm1, %v1600_v20  ;;  %2090 = vst.msk [vmem:[%s4891_s4 + $0x268] sm:$0xff] %vm2012_vm1, %v1840_v13 }
 0x318   :  { %v2283_v15 = vpop.f32.mrb[20].mxu0  ;;  %v2343_v1 = vpop.f32.mrb[20].mxu1 }
 0x319   :  { %2035 = vst.msk [vmem:[%s4891_s4 + $0xb0] sm:$0xff] %vm2012_vm1, %v2283_v15  ;;  %2095 = vst.msk [vmem:[%s4891_s4 + $0x290] sm:$0xff] %vm2012_vm1, %v2343_v1  ;;  %v1613_v2 = vpop.f32.mrb[21].mxu0  ;;  %v1853_v44 = vpop.f32.mrb[21].mxu1 }
 0x31a   :  { %2033 = vst.msk [vmem:[%s4891_s4 + $0xa0] sm:$0xff] %vm2012_vm1, %v1613_v2  ;;  %2093 = vst.msk [vmem:[%s4891_s4 + $0x280] sm:$0xff] %vm2012_vm1, %v1853_v44  ;;  %v2284_v21 = vpop.f32.mrb[22].mxu0  ;;  %v2344_v18 = vpop.f32.mrb[22].mxu1 }
 0x31b   :  { %2036 = vst.msk [vmem:[%s4891_s4 + $0xb8] sm:$0xff] %vm2012_vm1, %v2284_v21  ;;  %2096 = vst.msk [vmem:[%s4891_s4 + $0x298] sm:$0xff] %vm2012_vm1, %v2344_v18  ;;  %v1616_v3 = vpop.f32.mrb[23].mxu0  ;;  %v1856_v23 = vpop.f32.mrb[23].mxu1 }
 0x31c   :  { %2034 = vst.msk [vmem:[%s4891_s4 + $0xa8] sm:$0xff] %vm2012_vm1, %v1616_v3  ;;  %2094 = vst.msk [vmem:[%s4891_s4 + $0x288] sm:$0xff] %vm2012_vm1, %v1856_v23 }
 0x320   :  { %v2287_v28 = vpop.f32.mrb[24].mxu0  ;;  %v2347_v4 = vpop.f32.mrb[24].mxu1 }
 0x321   :  { %2039 = vst.msk [vmem:[%s4891_s4 + $0xd0] sm:$0xff] %vm2012_vm1, %v2287_v28  ;;  %2099 = vst.msk [vmem:[%s4891_s4 + $0x2b0] sm:$0xff] %vm2012_vm1, %v2347_v4  ;;  %v1629_v22 = vpop.f32.mrb[25].mxu0  ;;  %v1869_v47 = vpop.f32.mrb[25].mxu1 }
 0x322   :  { %2037 = vst.msk [vmem:[%s4891_s4 + $0xc0] sm:$0xff] %vm2012_vm1, %v1629_v22  ;;  %2097 = vst.msk [vmem:[%s4891_s4 + $0x2a0] sm:$0xff] %vm2012_vm1, %v1869_v47  ;;  %v2288_v34 = vpop.f32.mrb[26].mxu0  ;;  %v2348_v57 = vpop.f32.mrb[26].mxu1 }
 0x323   :  { %2040 = vst.msk [vmem:[%s4891_s4 + $0xd8] sm:$0xff] %vm2012_vm1, %v2288_v34  ;;  %2100 = vst.msk [vmem:[%s4891_s4 + $0x2b8] sm:$0xff] %vm2012_vm1, %v2348_v57  ;;  %v1632_v8 = vpop.f32.mrb[27].mxu0  ;;  %v1872_v27 = vpop.f32.mrb[27].mxu1 }
 0x324   :  { %2038 = vst.msk [vmem:[%s4891_s4 + $0xc8] sm:$0xff] %vm2012_vm1, %v1632_v8  ;;  %2098 = vst.msk [vmem:[%s4891_s4 + $0x2a8] sm:$0xff] %vm2012_vm1, %v1872_v27 }
 0x328   :  { %v2291_v42 = vpop.f32.mrb[28].mxu0  ;;  %v2351_v24 = vpop.f32.mrb[28].mxu1 }
 0x329   :  { %2043 = vst.msk [vmem:[%s4891_s4 + $0xf0] sm:$0xff] %vm2012_vm1, %v2291_v42  ;;  %2103 = vst.msk [vmem:[%s4891_s4 + $0x2d0] sm:$0xff] %vm2012_vm1, %v2351_v24  ;;  %v1645_v26 = vpop.f32.mrb[29].mxu0  ;;  %v1885_v50 = vpop.f32.mrb[29].mxu1 }
 0x32a   :  { %2041 = vst.msk [vmem:[%s4891_s4 + $0xe0] sm:$0xff] %vm2012_vm1, %v1645_v26  ;;  %2101 = vst.msk [vmem:[%s4891_s4 + $0x2c0] sm:$0xff] %vm2012_vm1, %v1885_v50  ;;  %v2292_v37 = vpop.f32.mrb[30].mxu0  ;;  %v2352_v48 = vpop.f32.mrb[30].mxu1 }
 0x32b   :  { %2044 = vst.msk [vmem:[%s4891_s4 + $0xf8] sm:$0xff] %vm2012_vm1, %v2292_v37  ;;  %2104 = vst.msk [vmem:[%s4891_s4 + $0x2d8] sm:$0xff] %vm2012_vm1, %v2352_v48  ;;  %v1648_v31 = vpop.f32.mrb[31].mxu0  ;;  %v1888_v16 = vpop.f32.mrb[31].mxu1 }
 0x32c   :  { %2042 = vst.msk [vmem:[%s4891_s4 + $0xe8] sm:$0xff] %vm2012_vm1, %v1648_v31  ;;  %2102 = vst.msk [vmem:[%s4891_s4 + $0x2c8] sm:$0xff] %vm2012_vm1, %v1888_v16 }
 0x330   :  { %v2295_v12 = vpop.f32.mrb[32].mxu0  ;;  %v2355_v25 = vpop.f32.mrb[32].mxu1 }
 0x331   :  { %2047 = vst.msk [vmem:[%s4891_s4 + $0x110] sm:$0xff] %vm2012_vm1, %v2295_v12  ;;  %2107 = vst.msk [vmem:[%s4891_s4 + $0x2f0] sm:$0xff] %vm2012_vm1, %v2355_v25  ;;  %v1661_v55 = vpop.f32.mrb[33].mxu0  ;;  %v1901_v60 = vpop.f32.mrb[33].mxu1 }
 0x332   :  { %2045 = vst.msk [vmem:[%s4891_s4 + $0x100] sm:$0xff] %vm2012_vm1, %v1661_v55  ;;  %2105 = vst.msk [vmem:[%s4891_s4 + $0x2e0] sm:$0xff] %vm2012_vm1, %v1901_v60  ;;  %v2296_v53 = vpop.f32.mrb[34].mxu0  ;;  %v2356_v36 = vpop.f32.mrb[34].mxu1 }
 0x333   :  { %2048 = vst.msk [vmem:[%s4891_s4 + $0x118] sm:$0xff] %vm2012_vm1, %v2296_v53  ;;  %2108 = vst.msk [vmem:[%s4891_s4 + $0x2f8] sm:$0xff] %vm2012_vm1, %v2356_v36  ;;  %v1664_v29 = vpop.f32.mrb[35].mxu0  ;;  %v1904_v61 = vpop.f32.mrb[35].mxu1 }
 0x334   :  { %2046 = vst.msk [vmem:[%s4891_s4 + $0x108] sm:$0xff] %vm2012_vm1, %v1664_v29  ;;  %2106 = vst.msk [vmem:[%s4891_s4 + $0x2e8] sm:$0xff] %vm2012_vm1, %v1904_v61 }
 0x338   :  { %v2299_v11 = vpop.f32.mrb[36].mxu0  ;;  %v2359_v46 = vpop.f32.mrb[36].mxu1 }
 0x339   :  { %2051 = vst.msk [vmem:[%s4891_s4 + $0x130] sm:$0xff] %vm2012_vm1, %v2299_v11  ;;  %2111 = vst.msk [vmem:[%s4891_s4 + $0x310] sm:$0xff] %vm2012_vm1, %v2359_v46  ;;  %v1677_v40 = vpop.f32.mrb[37].mxu0  ;;  %v1917_v10 = vpop.f32.mrb[37].mxu1 }
 0x33a   :  { %2049 = vst.msk [vmem:[%s4891_s4 + $0x120] sm:$0xff] %vm2012_vm1, %v1677_v40  ;;  %2109 = vst.msk [vmem:[%s4891_s4 + $0x300] sm:$0xff] %vm2012_vm1, %v1917_v10  ;;  %v2300_v56 = vpop.f32.mrb[38].mxu0  ;;  %v2360_v14 = vpop.f32.mrb[38].mxu1 }
 0x33b   :  { %2052 = vst.msk [vmem:[%s4891_s4 + $0x138] sm:$0xff] %vm2012_vm1, %v2300_v56  ;;  %2112 = vst.msk [vmem:[%s4891_s4 + $0x318] sm:$0xff] %vm2012_vm1, %v2360_v14  ;;  %v1680_v32 = vpop.f32.mrb[39].mxu0  ;;  %v1920_v45 = vpop.f32.mrb[39].mxu1 }
 0x33c   :  { %2050 = vst.msk [vmem:[%s4891_s4 + $0x128] sm:$0xff] %vm2012_vm1, %v1680_v32  ;;  %2110 = vst.msk [vmem:[%s4891_s4 + $0x308] sm:$0xff] %vm2012_vm1, %v1920_v45 }
 0x340   :  { %v2303_v19 = vpop.f32.mrb[40].mxu0  ;;  %v2363_v52 = vpop.f32.mrb[40].mxu1 }
 0x341   :  { %2055 = vst.msk [vmem:[%s4891_s4 + $0x150] sm:$0xff] %vm2012_vm1, %v2303_v19  ;;  %2115 = vst.msk [vmem:[%s4891_s4 + $0x330] sm:$0xff] %vm2012_vm1, %v2363_v52  ;;  %v1693_v59 = vpop.f32.mrb[41].mxu0  ;;  %v1933_v49 = vpop.f32.mrb[41].mxu1 }
 0x342   :  { %2053 = vst.msk [vmem:[%s4891_s4 + $0x140] sm:$0xff] %vm2012_vm1, %v1693_v59  ;;  %2113 = vst.msk [vmem:[%s4891_s4 + $0x320] sm:$0xff] %vm2012_vm1, %v1933_v49  ;;  %v2304_v30 = vpop.f32.mrb[42].mxu0  ;;  %v2364_v0 = vpop.f32.mrb[42].mxu1 }
 0x343   :  { %2056 = vst.msk [vmem:[%s4891_s4 + $0x158] sm:$0xff] %vm2012_vm1, %v2304_v30  ;;  %2116 = vst.msk [vmem:[%s4891_s4 + $0x338] sm:$0xff] %vm2012_vm1, %v2364_v0  ;;  %v1696_v35 = vpop.f32.mrb[43].mxu0  ;;  %v1936_v62 = vpop.f32.mrb[43].mxu1 }
 0x344   :  { %2054 = vst.msk [vmem:[%s4891_s4 + $0x148] sm:$0xff] %vm2012_vm1, %v1696_v35  ;;  %2114 = vst.msk [vmem:[%s4891_s4 + $0x328] sm:$0xff] %vm2012_vm1, %v1936_v62 }
 0x348   :  { %v2307_v54 = vpop.f32.mrb[44].mxu0  ;;  %v2367_v33 = vpop.f32.mrb[44].mxu1 }
 0x349   :  { %2059 = vst.msk [vmem:[%s4891_s4 + $0x170] sm:$0xff] %vm2012_vm1, %v2307_v54  ;;  %2119 = vst.msk [vmem:[%s4891_s4 + $0x350] sm:$0xff] %vm2012_vm1, %v2367_v33  ;;  %v1709_v6 = vpop.f32.mrb[45].mxu0  ;;  %v1949_v51 = vpop.f32.mrb[45].mxu1 }
 0x34a   :  { %2057 = vst.msk [vmem:[%s4891_s4 + $0x160] sm:$0xff] %vm2012_vm1, %v1709_v6  ;;  %2117 = vst.msk [vmem:[%s4891_s4 + $0x340] sm:$0xff] %vm2012_vm1, %v1949_v51  ;;  %v2308_v17 = vpop.f32.mrb[46].mxu0  ;;  %v2368_v58 = vpop.f32.mrb[46].mxu1 }
 0x34b   :  { %2060 = vst.msk [vmem:[%s4891_s4 + $0x178] sm:$0xff] %vm2012_vm1, %v2308_v17  ;;  %2120 = vst.msk [vmem:[%s4891_s4 + $0x358] sm:$0xff] %vm2012_vm1, %v2368_v58  ;;  %v1712_v5 = vpop.f32.mrb[47].mxu0  ;;  %v1952_v38 = vpop.f32.mrb[47].mxu1 }
 0x34c   :  { %2058 = vst.msk [vmem:[%s4891_s4 + $0x168] sm:$0xff] %vm2012_vm1, %v1712_v5  ;;  %2118 = vst.msk [vmem:[%s4891_s4 + $0x348] sm:$0xff] %vm2012_vm1, %v1952_v38 }
 0x350   :  { %v2311_v39 = vpop.f32.mrb[48].mxu0  ;;  %v2371_v63 = vpop.f32.mrb[48].mxu1 }
 0x351   :  { %2063 = vst.msk [vmem:[%s4891_s4 + $0x190] sm:$0xff] %vm2012_vm1, %v2311_v39  ;;  %2123 = vst.msk [vmem:[%s4891_s4 + $0x370] sm:$0xff] %vm2012_vm1, %v2371_v63  ;;  %v1725_v9 = vpop.f32.mrb[49].mxu0  ;;  %v1965_v43 = vpop.f32.mrb[49].mxu1 }
 0x352   :  { %2061 = vst.msk [vmem:[%s4891_s4 + $0x180] sm:$0xff] %vm2012_vm1, %v1725_v9  ;;  %2121 = vst.msk [vmem:[%s4891_s4 + $0x360] sm:$0xff] %vm2012_vm1, %v1965_v43  ;;  %v2312_v7 = vpop.f32.mrb[50].mxu0  ;;  %v2372_v41 = vpop.f32.mrb[50].mxu1 }
 0x353   :  { %2064 = vst.msk [vmem:[%s4891_s4 + $0x198] sm:$0xff] %vm2012_vm1, %v2312_v7  ;;  %2124 = vst.msk [vmem:[%s4891_s4 + $0x378] sm:$0xff] %vm2012_vm1, %v2372_v41  ;;  %v1728_v20 = vpop.f32.mrb[51].mxu0  ;;  %v1968_v13 = vpop.f32.mrb[51].mxu1 }
 0x354   :  { %2062 = vst.msk [vmem:[%s4891_s4 + $0x188] sm:$0xff] %vm2012_vm1, %v1728_v20  ;;  %2122 = vst.msk [vmem:[%s4891_s4 + $0x368] sm:$0xff] %vm2012_vm1, %v1968_v13 }
 0x358   :  { %v2315_v15 = vpop.f32.mrb[52].mxu0  ;;  %v2375_v1 = vpop.f32.mrb[52].mxu1 }
 0x359   :  { %2067 = vst.msk [vmem:[%s4891_s4 + $0x1b0] sm:$0xff] %vm2012_vm1, %v2315_v15  ;;  %2127 = vst.msk [vmem:[%s4891_s4 + $0x390] sm:$0xff] %vm2012_vm1, %v2375_v1  ;;  %v1741_v2 = vpop.f32.mrb[53].mxu0  ;;  %v1981_v44 = vpop.f32.mrb[53].mxu1 }
 0x35a   :  { %2065 = vst.msk [vmem:[%s4891_s4 + $0x1a0] sm:$0xff] %vm2012_vm1, %v1741_v2  ;;  %2125 = vst.msk [vmem:[%s4891_s4 + $0x380] sm:$0xff] %vm2012_vm1, %v1981_v44  ;;  %v2316_v21 = vpop.f32.mrb[54].mxu0  ;;  %v2376_v18 = vpop.f32.mrb[54].mxu1 }
 0x35b   :  { %2068 = vst.msk [vmem:[%s4891_s4 + $0x1b8] sm:$0xff] %vm2012_vm1, %v2316_v21  ;;  %2128 = vst.msk [vmem:[%s4891_s4 + $0x398] sm:$0xff] %vm2012_vm1, %v2376_v18  ;;  %v1744_v3 = vpop.f32.mrb[55].mxu0  ;;  %v1984_v23 = vpop.f32.mrb[55].mxu1 }
 0x35c   :  { %2066 = vst.msk [vmem:[%s4891_s4 + $0x1a8] sm:$0xff] %vm2012_vm1, %v1744_v3  ;;  %2126 = vst.msk [vmem:[%s4891_s4 + $0x388] sm:$0xff] %vm2012_vm1, %v1984_v23 }
 0x360   :  { %v2319_v28 = vpop.f32.mrb[56].mxu0  ;;  %v2379_v4 = vpop.f32.mrb[56].mxu1 }
 0x361   :  { %2071 = vst.msk [vmem:[%s4891_s4 + $0x1d0] sm:$0xff] %vm2012_vm1, %v2319_v28  ;;  %2131 = vst.msk [vmem:[%s4891_s4 + $0x3b0] sm:$0xff] %vm2012_vm1, %v2379_v4  ;;  %v1757_v22 = vpop.f32.mrb[57].mxu0  ;;  %v1997_v47 = vpop.f32.mrb[57].mxu1 }
 0x362   :  { %2069 = vst.msk [vmem:[%s4891_s4 + $0x1c0] sm:$0xff] %vm2012_vm1, %v1757_v22  ;;  %2129 = vst.msk [vmem:[%s4891_s4 + $0x3a0] sm:$0xff] %vm2012_vm1, %v1997_v47  ;;  %v2320_v34 = vpop.f32.mrb[58].mxu0  ;;  %v2380_v57 = vpop.f32.mrb[58].mxu1 }
 0x363   :  { %2072 = vst.msk [vmem:[%s4891_s4 + $0x1d8] sm:$0xff] %vm2012_vm1, %v2320_v34  ;;  %2132 = vst.msk [vmem:[%s4891_s4 + $0x3b8] sm:$0xff] %vm2012_vm1, %v2380_v57  ;;  %v1760_v8 = vpop.f32.mrb[59].mxu0  ;;  %v2000_v27 = vpop.f32.mrb[59].mxu1 }
 0x364   :  { %2070 = vst.msk [vmem:[%s4891_s4 + $0x1c8] sm:$0xff] %vm2012_vm1, %v1760_v8  ;;  %2130 = vst.msk [vmem:[%s4891_s4 + $0x3a8] sm:$0xff] %vm2012_vm1, %v2000_v27 }

// kernel: conditional_generator_forward.7
= control target key start
LH: loop header
LB: loop body
LE: loop exit
PB: predicated region body
PF: predicated region fallthrough
CT: control target
= control target key end

     0   :  { %vm97_vm0 = vcmask 523264   ;;  %v11820_v3 = vmov 0.0|0.0   ;;  %vm8635_vm1 = vmmov 0   ;;  %v11817_v4 = vmov 0.0   ;;  %s8638_s12 = smov 32   ;;  %s8639_s21 = smov 64   ;;  %s11809_s3 = inlined_call_operand.vmem [shape: f32[320,8], index: 3, kind: input, shape index: {}]   ;;  %s11810_s0 = inlined_call_operand.vmem [shape: f32[96,320], index: 0, kind: input, shape index: {}]   ;;  %s11811_s4 = inlined_call_operand.vmem [shape: f32[8,320], index: 4, kind: input, shape index: {}]   ;;  %s11812_s5 = inlined_call_operand.vmem [shape: bf16[960,160], index: 5, kind: input, shape index: {}]   ;;  %s11813_s6 = inlined_call_operand.vmem [shape: bf16[960,160], index: 6, kind: input, shape index: {}]   ;;  %s11814_s1 = inlined_call_operand.vmem [shape: f32[1,8], index: 1, kind: input, shape index: {}]   ;;  %s11815_s2 = inlined_call_operand.vmem [shape: f32[1,8], index: 2, kind: input, shape index: {}]   ;;  %s11816_s7 = inlined_call_operand.vmem [shape: f32[2,48,640], index: 7, kind: output, shape index: {}]  }
   0x1   :  { %v143_v0 = vld [vmem:[%s11809_s3 + $0x80] sm:$0xff]  ;;  %v144_v1 = vld [vmem:[%s11809_s3 + $0x88] sm:$0xff]  ;;  %7468 = vmatprep.subr.bf16.mxu1 %v11820_v3  ;;  %7399 = vmatprep.mubr.msk.f32.mxu1 %vm8635_vm1, %v11817_v4  ;;  %1178 = vst [vmem:[#allocation2] sm:$0xff] %v11817_v4  ;;  %1179 = vst [vmem:[#allocation2 + $0x8] sm:$0xff] %v11817_v4  ;;  %vm315_vm2 = vcmask 64512   ;;  %vm1198_vm3 = vcmask 517120  }
   0x2   :  { %v127_v2 = vld [vmem:[%s11809_s3] sm:$0xff]  ;;  %1196 = vst [vmem:[#allocation2 + $0x90] sm:$0x3] %v11817_v4  ;;  %1197 = vst [vmem:[#allocation2 + $0x98] sm:$0x3] %v11817_v4  ;;  %v8725_v5 = vpack.c.bf16 %v144_v1, %v143_v0  ;;  %v128_v6 = vld [vmem:[%s11809_s3 + $0x8] sm:$0xff] }
   0x3   :  { %1200 = vst [vmem:[#allocation2 + $0xa8] sm:$0xff] %v11817_v4  ;;  %1201 = vst [vmem:[#allocation2 + $0xb0] sm:$0xff] %v11817_v4  ;;  %v145_v7 = vld [vmem:[%s11809_s3 + $0x90] sm:$0xff]  ;;  %v146_v8 = vld [vmem:[%s11809_s3 + $0x98] sm:$0xff]  ;;  %v8736_v9 = vpack.c.bf16 %v128_v6, %v127_v2  ;;  %vm1239_vm4 = vcmask 1040384   ;;  %vm1296_vm5 = vcmask 523265  }
   0x4   :  { %1218 = vst [vmem:[#allocation2 + $0x138] sm:$0x3] %v11817_v4  ;;  %1219 = vst [vmem:[#allocation2 + $0x140] sm:$0x3] %v11817_v4  ;;  %v8738_v10 = vpack.c.bf16 %v146_v8, %v145_v7  ;;  %v129_v11 = vld [vmem:[%s11809_s3 + $0x10] sm:$0xff]  ;;  %v130_v12 = vld [vmem:[%s11809_s3 + $0x18] sm:$0xff]  ;;  %7437 = vmatprep.subr.bf16.mxu0 %v8725_v5 }
   0x5   :  { %1180 = vst.msk [vmem:[#allocation2 + $0x10] sm:$0xff] %vm97_vm0, %v11817_v4  ;;  %1183 = vst.msk [vmem:[#allocation2 + $0x28] sm:$0xff] %vm97_vm0, %v11817_v4  ;;  %v147_v13 = vld [vmem:[%s11809_s3 + $0xa0] sm:$0xff]  ;;  %v148_v14 = vld [vmem:[%s11809_s3 + $0xa8] sm:$0xff]  ;;  %7439 = vmatpush3.bf16.msra.mxu0 %v8736_v9  ;;  %v8754_v15 = vpack.c.bf16 %v130_v12, %v129_v11  ;;  %vm1570_vm6 = vsmask.f32 7424 }
   0x6   :  { %1186 = vst.msk [vmem:[#allocation2 + $0x40] sm:$0xff] %vm97_vm0, %v11817_v4  ;;  %1189 = vst.msk [vmem:[#allocation2 + $0x58] sm:$0xff] %vm97_vm0, %v11817_v4  ;;  %7441 = vmatprep.subr.bf16.mxu0 %v8738_v10  ;;  %v8757_v16 = vpack.c.bf16 %v148_v14, %v147_v13  ;;  %v131_v17 = vld [vmem:[%s11809_s3 + $0x20] sm:$0xff]  ;;  %v132_v18 = vld [vmem:[%s11809_s3 + $0x28] sm:$0xff]  ;;  %vm1315_vm7 = vcmask 516096   ;;  %vm3085_vm8 = vcmask 1046528  }
   0x7   :  { %1192 = vst.msk [vmem:[#allocation2 + $0x70] sm:$0xff] %vm97_vm0, %v11817_v4  ;;  %1195 = vst.msk [vmem:[#allocation2 + $0x88] sm:$0xff] %vm97_vm0, %v11817_v4  ;;  %v149_v19 = vld [vmem:[%s11809_s3 + $0xb0] sm:$0xff]  ;;  %v150_v20 = vld [vmem:[%s11809_s3 + $0xb8] sm:$0xff]  ;;  %v8778_v23 = vpack.c.bf16 %v132_v18, %v131_v17  ;;  %vm3863_vm9 = vcmask 261120   ;;  %vm3929_vm10 = vcmask 1047808  }
   0x8   :  { %1202 = vst.msk [vmem:[#allocation2 + $0xb8] sm:$0xff] %vm97_vm0, %v11817_v4  ;;  %1205 = vst.msk [vmem:[#allocation2 + $0xd0] sm:$0xff] %vm97_vm0, %v11817_v4  ;;  %v159_v21 = vld [vmem:[%s11809_s3 + $0x100] sm:$0xff]  ;;  %v160_v22 = vld [vmem:[%s11809_s3 + $0x108] sm:$0xff]  ;;  %v8786_v26 = vpack.c.bf16 %v150_v20, %v149_v19  ;;  %vm3998_vm11 = vcmask 785408   ;;  %vm4052_vm12 = vcmask 1048320  }
   0x9   :  { %1208 = vst.msk [vmem:[#allocation2 + $0xe8] sm:$0xff] %vm97_vm0, %v11817_v4  ;;  %1211 = vst.msk [vmem:[#allocation2 + $0x100] sm:$0xff] %vm97_vm0, %v11817_v4  ;;  %7443 = vmatpush3.bf16.msra.mxu0 %v8754_v15  ;;  %v8780_v24 = vpack.c.bf16 %v160_v22, %v159_v21  ;;  %v161_v25 = vld [vmem:[%s11809_s3 + $0x110] sm:$0xff]  ;;  %v134_v28 = vld [vmem:[%s11809_s3 + $0x38] sm:$0xff]  ;;  %vm3996_vm13 = vcmask 1048064  }
   0xa   :  { %1214 = vst.msk [vmem:[#allocation2 + $0x118] sm:$0xff] %vm97_vm0, %v11817_v4  ;;  %1217 = vst.msk [vmem:[#allocation2 + $0x130] sm:$0xff] %vm97_vm0, %v11817_v4  ;;  %7445 = vmatprep.subr.bf16.mxu0 %v8757_v16  ;;  %v133_v27 = vld [vmem:[%s11809_s3 + $0x30] sm:$0xff]  ;;  %v162_v29 = vld [vmem:[%s11809_s3 + $0x118] sm:$0xff] }
   0xb   :  { %v151_v30 = vld [vmem:[%s11809_s3 + $0xc0] sm:$0xff]  ;;  %v152_v31 = vld [vmem:[%s11809_s3 + $0xc8] sm:$0xff]  ;;  %7470 = vmatpush3.bf16.msra.mxu1 %v8780_v24  ;;  %v8804_v32 = vpack.c.bf16 %v162_v29, %v161_v25  ;;  %v8814_v35 = vpack.c.bf16 %v134_v28, %v133_v27  ;;  %v8838_v41 = vld [vmem:[%s11810_s0 + $0x38] sm:$0xff] }
   0xc   :  { %7471 = vmatprep.subr.bf16.mxu1 %v11820_v3  ;;  %v163_v33 = vld [vmem:[%s11809_s3 + $0x120] sm:$0xff]  ;;  %v164_v34 = vld [vmem:[%s11809_s3 + $0x128] sm:$0xff]  ;;  %v8825_v38 = vpack.c.bf16 %v152_v31, %v151_v30  ;;  %v153_v42 = vld [vmem:[%s11809_s3 + $0xd0] sm:$0xff] }
   0xd   :  { %7447 = vmatpush3.bf16.msra.mxu0 %v8778_v23  ;;  %v135_v36 = vld [vmem:[%s11809_s3 + $0x40] sm:$0xff]  ;;  %v8822_v37 = vld [vmem:[%s11810_s0 + $0x8] sm:$0xff]  ;;  %v154_v43 = vld [vmem:[%s11809_s3 + $0xd8] sm:$0xff]  ;;  %v8847_v44 = vpack.c.bf16 %v164_v34, %v163_v33 }
   0xe   :  { %7449 = vmatprep.subr.bf16.mxu0 %v8786_v26  ;;  %v136_v39 = vld [vmem:[%s11809_s3 + $0x48] sm:$0xff]  ;;  %v8833_v40 = vld [vmem:[%s11810_s0 + $0x20] sm:$0xff]  ;;  %v137_v46 = vld [vmem:[%s11809_s3 + $0x50] sm:$0xff]  ;;  %v8876_v53 = vpack.c.bf16 %v154_v43, %v153_v42 }
   0xf   :  { %7473 = vmatpush3.bf16.msra.mxu1 %v8804_v32  ;;  %v80_v45 = vadd.f32 %v8833_v40, %v8822_v37  ;;  %v8858_v47 = vld [vmem:[%s11810_s0 + $0x50] sm:$0xff]  ;;  %v8861_v48 = vpack.c.bf16 %v136_v39, %v135_v36  ;;  %v138_v49 = vld [vmem:[%s11809_s3 + $0x58] sm:$0xff]  ;;  %v8869_v50 = vld [vmem:[%s11810_s0 + $0x68] sm:$0xff] }
  0x10   :  { %7474 = vmatprep.subr.bf16.mxu1 %v11820_v3  ;;  %v165_v52 = vld [vmem:[%s11809_s3 + $0x130] sm:$0xff]  ;;  %v166_v54 = vld [vmem:[%s11809_s3 + $0x138] sm:$0xff]  ;;  %v8884_v55 = vld [vmem:[%s11810_s0] sm:$0xff]  ;;  %v8923_v2 = vpack.c.bf16 %v138_v49, %v137_v46 }
  0x11   :  { %7451 = vmatpush3.bf16.msra.mxu0 %v8814_v35  ;;  %v81_v51 = vadd.f32 %v80_v45, %v8838_v41  ;;  %v8889_v56 = vld [vmem:[%s11810_s0 + $0x18] sm:$0xff]  ;;  %v155_v57 = vld [vmem:[%s11809_s3 + $0xe0] sm:$0xff]  ;;  %v156_v58 = vld [vmem:[%s11809_s3 + $0xe8] sm:$0xff]  ;;  %v8899_v60 = vpack.c.bf16 %v166_v54, %v165_v52 }
  0x12   :  { %7453 = vmatprep.subr.bf16.mxu0 %v8825_v38  ;;  %v8904_v61 = vld [vmem:[%s11810_s0 + $0x30] sm:$0xff]  ;;  %v63_v62 = vadd.f32 %v8889_v56, %v8884_v55  ;;  %v139_v63 = vld [vmem:[%s11809_s3 + $0x60] sm:$0xff]  ;;  %v8920_v1 = vld [vmem:[%s11810_s0 + $0x48] sm:$0xff]  ;;  %v8939_v13 = vpack.c.bf16 %v156_v58, %v155_v57 }
  0x13   :  { %7476 = vmatpush3.bf16.msra.mxu1 %v8847_v44  ;;  %v82_v59 = vadd.f32 %v81_v51, %v8858_v47  ;;  %v8915_v0 = vld [vmem:[%s11810_s0 + $0x80] sm:$0xff]  ;;  %v140_v6 = vld [vmem:[%s11809_s3 + $0x68] sm:$0xff]  ;;  %v157_v7 = vld [vmem:[%s11809_s3 + $0xf0] sm:$0xff] }
  0x14   :  { %7477 = vmatprep.subr.bf16.mxu1 %v11820_v3  ;;  %v8934_v8 = vld [vmem:[%s11810_s0 + $0x98] sm:$0xff]  ;;  %v64_v12 = vadd.f32 %v63_v62, %v8904_v61  ;;  %v8944_v14 = vld [vmem:[%s11810_s0 + $0x60] sm:$0xff]  ;;  %v8949_v17 = vld [vmem:[%s11810_s0 + $0x10] sm:$0xff]  ;;  %v8994_v36 = vpack.c.bf16 %v140_v6, %v139_v63 }
  0x15   :  { %7455 = vmatpush3.bf16.msra.mxu0 %v8861_v48  ;;  %v83_v11 = vadd.f32 %v82_v59, %v8869_v50  ;;  %v8954_v18 = vld [vmem:[%s11810_s0 + $0x28] sm:$0xff]  ;;  %v158_v19 = vld [vmem:[%s11809_s3 + $0xf8] sm:$0xff]  ;;  %v8965_v22 = vld [vmem:[%s11810_s0 + $0x40] sm:$0xff]  ;;  %v98_v27 = vsel %vm97_vm0, %v8949_v17, 0.0 }
  0x16   :  { %7457 = vmatprep.subr.bf16.mxu0 %v8876_v53  ;;  %v65_v21 = vadd.f32 %v64_v12, %v8920_v1  ;;  %11836 = vst [vmem:[#allocation3_spill] sm:$0xff] %v8965_v22  ;;  %v8970_v25 = vld [vmem:[%s11810_s0 + $0x58] sm:$0xff]  ;;  %v99_v28 = vsel %vm97_vm0, %v8954_v18, 0.0  ;;  %v8979_v29 = vld [vmem:[%s11810_s0 + $0xb0] sm:$0xff]  ;;  %v101_v34 = vsel %vm97_vm0, %v8965_v22, 0.0  ;;  %v9007_v49 = vpack.c.bf16 %v158_v19, %v157_v7  ;;  %v9012_v51 = vld [vmem:[%s11810_s0 + $0xc8] sm:$0xff] }
  0x17   :  { %v84_v20 = vadd.f32 %v83_v11, %v8915_v0  ;;  %7479 = vmatpush3.bf16.msra.mxu1 %v8899_v60  ;;  %11837 = vst [vmem:[#allocation4_spill] sm:$0xff] %v8970_v25  ;;  %v8984_v30 = vld [vmem:[%s11810_s0 + $0x78] sm:$0xff]  ;;  %v8989_v31 = vld [vmem:[%s11810_s0 + $0x70] sm:$0xff]  ;;  %v100_v33 = vadd.f32 %v99_v28, %v98_v27  ;;  %v103_v46 = vsel %vm97_vm0, %v8970_v25, 0.0  ;;  %v9022_v54 = vld [vmem:[%s11810_s0 + $0x88] sm:$0xff] }
  0x18   :  { %11838 = vst [vmem:[#allocation5_spill] sm:$0xff] %v8989_v31  ;;  %v141_v39 = vld [vmem:[%s11809_s3 + $0x70] sm:$0xff]  ;;  %v142_v42 = vld [vmem:[%s11809_s3 + $0x78] sm:$0xff]  ;;  %v66_v45 = vadd.f32 %v65_v21, %v8944_v14  ;;  %11840 = vst [vmem:[#allocation7_spill] sm:$0xff] %v9022_v54  ;;  %v105_v62 = vsel %vm97_vm0, %v8989_v31, 0.0  ;;  %v107_v21 = vsel %vm97_vm0, %v9022_v54, 0.0 }
  0x19   :  { %7459 = vmatpush3.bf16.msra.mxu0 %v8923_v2  ;;  %v85_v43 = vadd.f32 %v84_v20, %v8934_v8  ;;  %v9017_v52 = vld [vmem:[%s11810_s0 + $0x90] sm:$0xff]  ;;  %v102_v57 = vadd.f32 %v101_v34, %v100_v33  ;;  %v9031_v63 = vld [vmem:[%s11810_s0 + $0xe0] sm:$0xff]  ;;  %v9036_v6 = vld [vmem:[%s11810_s0 + $0xa8] sm:$0xff]  ;;  %v9044_v12 = vpack.c.bf16 %v142_v42, %v141_v39  ;;  %s8640_s3 = smov 96  }
  0x1a   :  { %7461 = vmatprep.subr.bf16.mxu0 %v8939_v13  ;;  %11839 = vst [vmem:[#allocation6_spill] sm:$0xff] %v9017_v52  ;;  %v67_v59 = vadd.f32 %v66_v45, %v8984_v30  ;;  %11841 = vst [vmem:[#allocation8_spill] sm:$0xff] %v9036_v6  ;;  %v9041_v7 = vld [vmem:[%s11810_s0 + $0xa0] sm:$0xff]  ;;  %v9054_v27 = vld [vmem:[%s11810_s0 + $0xf8] sm:$0xff] }
  0x1b   :  { %v86_v58 = vadd.f32 %v85_v43, %v8979_v29  ;;  %11842 = vst [vmem:[#allocation9_spill] sm:$0xff] %v9041_v7  ;;  %v104_v11 = vadd.f32 %v103_v46, %v102_v57  ;;  %v9059_v28 = vld [vmem:[%s11810_s0 + $0xc0] sm:$0xff]  ;;  %v9064_v33 = vld [vmem:[%s11810_s0 + $0xb8] sm:$0xff]  ;;  %v109_v43 = vsel %vm97_vm0, %v9041_v7, 0.0  ;;  %v9073_v45 = vld [vmem:[%s11810_s0 + $0x110] sm:$0xff] }
  0x1c   :  { %v68_v20 = vadd.f32 %v67_v59, %v9017_v52  ;;  %11843 = vst [vmem:[#allocation10_spill] sm:$0xff] %v9059_v28  ;;  %11844 = vst [vmem:[#allocation11_spill] sm:$0xff] %v9064_v33  ;;  %v9078_v46 = vld [vmem:[%s11810_s0 + $0xd8] sm:$0xff]  ;;  %v9083_v57 = vld [vmem:[%s11810_s0 + $0xd0] sm:$0xff] }
  0x1d   :  { %7463 = vmatpush3.bf16.msra.mxu0 %v8994_v36  ;;  %v87_v19 = vadd.f32 %v86_v58, %v9012_v51  ;;  %v106_v34 = vadd.f32 %v105_v62, %v104_v11  ;;  %11845 = vst [vmem:[#allocation12_spill] sm:$0xff] %v9078_v46  ;;  %11846 = vst [vmem:[#allocation13_spill] sm:$0xff] %v9083_v57  ;;  %v111_v11 = vsel %vm97_vm0, %v9064_v33, 0.0  ;;  %v9108_v4 = vld [vmem:[%s11810_s0 + $0x108] sm:$0xff]  ;;  %v9113_v33 = vld [vmem:[%s11810_s0 + $0x100] sm:$0xff] }
  0x1e   :  { %7465 = vmatprep.subr.bf16.mxu0 %v9007_v49  ;;  %v69_v42 = vadd.f32 %v68_v20, %v9036_v6  ;;  %v9098_v20 = vld [vmem:[%s11810_s0 + $0xe8] sm:$0xff]  ;;  %11849 = vst [vmem:[#allocation16_spill] sm:$0xff] %v9113_v33  ;;  %v117_v54 = vsel %vm97_vm0, %v9113_v33, 0.0 }
  0x1f   :  { %v88_v39 = vadd.f32 %v87_v19, %v9031_v63  ;;  %v108_v58 = vadd.f32 %v107_v21, %v106_v34  ;;  %v9093_v19 = vld [vmem:[%s11810_s0 + $0xf0] sm:$0xff]  ;;  %11848 = vst [vmem:[#allocation15_spill] sm:$0xff] %v9098_v20 }
  0x20   :  { %v70_v62 = vadd.f32 %v69_v42, %v9059_v28  ;;  %11847 = vst [vmem:[#allocation14_spill] sm:$0xff] %v9093_v19  ;;  %v113_v42 = vsel %vm97_vm0, %v9083_v57, 0.0 }
  0x21   :  { %7467 = vmatpush3.bf16.msra.mxu0 %v9044_v12  ;;  %v89_v59 = vadd.f32 %v88_v39, %v9054_v27  ;;  %v110_v21 = vadd.f32 %v109_v43, %v108_v58 }
  0x22   :  { %7512 = vmatprep.subr.bf16.mxu0 %v11820_v3  ;;  %v71_v39 = vadd.f32 %v70_v62, %v9078_v46  ;;  %v9121_v62 = vld [vmem:[%s11810_s0 + $0x118] sm:$0xff] }
  0x23   :  { %v90_v34 = vadd.f32 %v89_v59, %v9073_v45  ;;  %v112_v43 = vadd.f32 %v111_v11, %v110_v21  ;;  %v115_v59 = vsel %vm97_vm0, %v9098_v20, 0.0  ;;  %11850 = vst [vmem:[#allocation17_spill] sm:$0xff] %v9121_v62 }
  0x24   :  { %v72_v3 = vadd.f32 %v71_v39, %v9093_v19  ;;  %v119_v39 = vsel %vm97_vm0, %v9121_v62, 0.0  ;;  %v11851_v62 = vmov 0.0  }
  0x25   :  { %v91_v58 = vrot.slane %v90_v34, 4  ;;  %v114_v57 = vadd.f32 %v113_v42, %v112_v43 }
  0x26   :  { %v73_v46 = vadd.f32 %v72_v3, %v9108_v4 }
  0x27   :  { %v92_v7 = vadd.f32 %v91_v58, %v90_v34  ;;  %v116_v28 = vadd.f32 %v115_v59, %v114_v57 }
  0x28   :  { %v74_v21 = vrot.slane %v73_v46, 4 }
  0x29   :  { %v93_v11 = vrot.slane %v92_v7, 2  ;;  %v118_v19 = vadd.f32 %v117_v54, %v116_v28  ;;  %v11852_v54 = vmov 0.0|0.0   ;;  %v9154_v28 = vld [vmem:[%s11811_s4 + $0x10] sm:$0xff] }
  0x2a   :  { %v75_v31 = vadd.f32 %v74_v21, %v73_v46 }
  0x2b   :  { %v94_v20 = vadd.f32 %v93_v11, %v92_v7  ;;  %v120_v6 = vadd.f32 %v119_v39, %v118_v19 }
  0x2c   :  { %v76_v52 = vrot.slane %v75_v31, 2 }
  0x2d   :  { %v95_v25 = vrot.slane %v94_v20, 1  ;;  %v121_v22 = vrot.slane %v120_v6, 4 }
  0x2e   :  { %v77_v34 = vadd.f32 %v76_v52, %v75_v31 }
  0x2f   :  { %v96_v42 = vadd.f32 %v95_v25, %v94_v20  ;;  %v122_v43 = vadd.f32 %v121_v22, %v120_v6  ;;  %v9145_v22 = vld [vmem:[%s11811_s4] sm:$0xff] }
  0x30   :  { %v78_v3 = vrot.slane %v77_v34, 1 }
  0x31   :  { %234 = vmatprep.mubr.f32.mxu0 %v96_v42  ;;  %v123_v58 = vrot.slane %v122_v43, 2 }
  0x32   :  { %v79_v33 = vadd.f32 %v78_v3, %v77_v34 }
  0x33   :  { %v124_v57 = vadd.f32 %v123_v58, %v122_v43 }
  0x34   :  { %235 = vmatmul.mubr.f32.vlgmr.msra.gmra.mrb[0].mxu0 %v79_v33 }
  0x35   :  { %v125_v59 = vrot.slane %v124_v57, 1  ;;  %7514 = vmatpush3.bf16.msra.mxu0 %v8780_v24  ;;  %7423 = vmatprep.mubr.msk.f32.mxu0 %vm8635_vm1, %v11851_v62  ;;  %v313_v24 = vld [vmem:[%s11811_s4 + $0x8] sm:$0xff] }
  0x36   :  { %7515 = vmatprep.subr.bf16.mxu0 %v11852_v54  ;;  %319 = vmatprep.subr.mxu1 %v313_v24 }
  0x37   :  { %v126_v7 = vadd.f32 %v125_v59, %v124_v57 }
  0x39   :  { %7400 = vmatmul.mubr.msk.f32.vlgmr.msra.gmra.mrb[0].mxu1 %vm97_vm0, %v126_v7  ;;  %7517 = vmatpush3.bf16.msra.mxu0 %v8804_v32 }
  0x3a   :  { %383 = vmatprep.mubr.f32.mxu1 %v11851_v62  ;;  %7518 = vmatprep.subr.bf16.mxu0 %v11852_v54 }
  0x3b   :  { %320 = vmatpush1.msra.mxu1 %v9145_v22 }
  0x3c   :  { %7402 = vmatprep.subr.mxu1 %v11851_v62 }
  0x3d   :  { %7520 = vmatpush3.bf16.msra.mxu0 %v8847_v44 }
  0x3e   :  { %7521 = vmatprep.subr.bf16.mxu0 %v11852_v54 }
  0x41   :  { %7523 = vmatpush3.bf16.msra.mxu0 %v8899_v60 }
  0x42   :  { %761 = vmatprep.subr.mxu0 %v313_v24 }
 0x107   :  { %v7321_v32 = vpop.f32.mrb[0].mxu0 }
 0x108   :  { %v7322_v44 = vpop.f32.mrb[1].mxu0 }
 0x109   :  { %v7323_v25 = vadd.f32 %v7322_v44, %v7321_v32 }
 0x10c   :  { %v306_v31 = vpop.f32.mrb[0].mxu1 }
 0x10d   :  { %v307_v60 = vadd.f32 %v7323_v25, %v306_v31  ;;  %v7401_v52 = vpop.f32.mrb[1].mxu1  ;;  %v11854_v31 = vld [vmem:[#allocation6_spill] sm:$0xff] }
 0x10e   :  { %v11855_v52 = vld [vmem:[#allocation4_spill] sm:$0xff] }
 0x10f   :  { %v9149_v6 = vmul.f32 0.00026041668, %v307_v60 }
 0x111   :  { %6718 = vmatmul.mubr.msk.f32.vlgmr.msra.gmra.mrb[2].mxu1 %vm315_vm2, %v9149_v6 }
 0x112   :  { %7403 = vmatpush3.msra.mxu1 %v9154_v28  ;;  %7404 = vmatprep.mubr.msk.f32.mxu1 %vm8635_vm1, %v11851_v62 }
 0x113   :  { %7481 = vmatprep.subr.bf16.mxu1 %v8725_v5  ;;  %v460_v5 = vlaneseq }
 0x115   :  { %7405 = vmatmul.mubr.msk.f32.vlgmr.msra.gmra.mrb[4].mxu1 %vm315_vm2, %v9149_v6 }
 0x116   :  { %7483 = vmatpush3.bf16.msra.mxu1 %v8736_v9  ;;  %v461_v9 = vshrl.u32 %v460_v5, 7 }
 0x117   :  { %7485 = vmatprep.subr.bf16.mxu1 %v8738_v10 }
 0x118   :  { %v9180_v10 = vsub.s32 0, %v461_v9 }
 0x11a   :  { %7487 = vmatpush3.bf16.msra.mxu1 %v8754_v15 }
 0x11b   :  { %7489 = vmatprep.subr.bf16.mxu1 %v8757_v16 }
 0x11e   :  { %7491 = vmatpush3.bf16.msra.mxu1 %v8778_v23 }
 0x11f   :  { %7493 = vmatprep.subr.bf16.mxu1 %v8786_v26 }
 0x122   :  { %7495 = vmatpush3.bf16.msra.mxu1 %v8814_v35 }
 0x123   :  { %7497 = vmatprep.subr.bf16.mxu1 %v8825_v38 }
 0x126   :  { %7499 = vmatpush3.bf16.msra.mxu1 %v8861_v48 }
 0x127   :  { %7501 = vmatprep.subr.bf16.mxu1 %v8876_v53 }
 0x12a   :  { %7503 = vmatpush3.bf16.msra.mxu1 %v8923_v2 }
 0x12b   :  { %7505 = vmatprep.subr.bf16.mxu1 %v8939_v13 }
 0x12e   :  { %7507 = vmatpush3.bf16.msra.mxu1 %v8994_v36 }
 0x12f   :  { %7509 = vmatprep.subr.bf16.mxu1 %v9007_v49 }
 0x132   :  { %7511 = vmatpush3.bf16.msra.mxu1 %v9044_v12 }
 0x133   :  { %7431 = vmatprep.subr.mxu1 %v11851_v62 }
 0x1e4   :  { %v385_v15 = vpop.f32.mrb[2].mxu1 }
 0x1e5   :  { %v387_v16 = vpop.f32.mrb[3].mxu1  ;;  %v9184_v26 = vrot.slane %v385_v15, %v9180_v10 }
 0x1e6   :  { %v467_v23 = vrot.slane %v387_v16, %v9180_v10 }
 0x1e7   :  { %v472_v12 = vsub.f32 %v8884_v55, %v9184_v26  ;;  %v475_v33 = vsub.f32 %v8889_v56, %v9184_v26  ;;  %v484_v58 = vsub.f32 %v8944_v14, %v9184_v26  ;;  %v487_v7 = vsub.f32 %v8984_v30, %v9184_v26  ;;  %v11853_v14 = vld [vmem:[#allocation3_spill] sm:$0xff] }
 0x1e8   :  { %v456_v35 = vpop.f32.mrb[4].mxu1  ;;  %v473_v38 = vsub.f32 %v8822_v37, %v467_v23  ;;  %v476_v48 = vsub.f32 %v8833_v40, %v467_v23  ;;  %v479_v2 = vsub.f32 %v8838_v41, %v467_v23  ;;  %v482_v49 = vsub.f32 %v8858_v47, %v467_v23 }
 0x1e9   :  { %v7406_v53 = vpop.f32.mrb[5].mxu1  ;;  %v485_v46 = vsub.f32 %v8869_v50, %v467_v23  ;;  %v488_v37 = vsub.f32 %v8915_v0, %v467_v23  ;;  %v478_v40 = vsub.f32 %v8904_v61, %v9184_v26  ;;  %v481_v41 = vsub.f32 %v8920_v1, %v9184_v26 }
 0x1ea   :  { %v509_v13 = vmul.f32 %v473_v38, %v473_v38  ;;  %v512_v36 = vmul.f32 %v476_v48, %v476_v48  ;;  %v515_v19 = vmul.f32 %v479_v2, %v479_v2  ;;  %v9201_v47 = vrot.slane %v456_v35, %v9180_v10  ;;  %v11856_v35 = vld [vmem:[#allocation8_spill] sm:$0xff] }
 0x1eb   :  { %v518_v11 = vmul.f32 %v482_v49, %v482_v49  ;;  %v508_v21 = vmul.f32 %v472_v12, %v472_v12  ;;  %v491_v56 = vsub.f32 %v8934_v8, %v467_v23  ;;  %v494_v50 = vsub.f32 %v8979_v29, %v467_v23  ;;  %v11858_v12 = vld [vmem:[#allocation10_spill] sm:$0xff] }
 0x1ec   :  { %v561_v20 = vadd.f32 %v512_v36, %v509_v13  ;;  %v497_v39 = vsub.f32 %v9012_v51, %v467_v23  ;;  %v511_v42 = vmul.f32 %v475_v33, %v475_v33  ;;  %v500_v0 = vsub.f32 %v9031_v63, %v467_v23  ;;  %v11857_v13 = vld [vmem:[#allocation5_spill] sm:$0xff] }
 0x1ed   :  { %v503_v61 = vsub.f32 %v9054_v27, %v467_v23  ;;  %v521_v34 = vmul.f32 %v485_v46, %v485_v46  ;;  %v506_v1 = vsub.f32 %v9073_v45, %v467_v23  ;;  %v524_v3 = vmul.f32 %v488_v37, %v488_v37 }
 0x1ee   :  { %v562_v55 = vadd.f32 %v561_v20, %v515_v19  ;;  %v514_v57 = vmul.f32 %v478_v40, %v478_v40  ;;  %v544_v8 = vadd.f32 %v511_v42, %v508_v21  ;;  %v474_v29 = vsub.f32 %v8949_v17, %v9201_v47  ;;  %v11859_v19 = vld [vmem:[#allocation7_spill] sm:$0xff]  ;;  %v11860_v21 = vld [vmem:[#allocation12_spill] sm:$0xff] }
 0x1ef   :  { %v477_v51 = vsub.f32 %v8954_v18, %v9201_v47  ;;  %v527_v63 = vmul.f32 %v491_v56, %v491_v56  ;;  %v530_v54 = vmul.f32 %v494_v50, %v494_v50  ;;  %v533_v27 = vmul.f32 %v497_v39, %v497_v39  ;;  %v11861_v39 = vld [vmem:[#allocation9_spill] sm:$0xff] }
 0x1f0   :  { %v563_v43 = vadd.f32 %v562_v55, %v518_v11  ;;  %v517_v24 = vmul.f32 %v481_v41, %v481_v41  ;;  %v545_v32 = vadd.f32 %v544_v8, %v514_v57  ;;  %v480_v44 = vsub.f32 %v11853_v14, %v9201_v47 }
 0x1f1   :  { %v536_v25 = vmul.f32 %v500_v0, %v500_v0  ;;  %v490_v60 = vsub.f32 %v11854_v31, %v9184_v26  ;;  %v520_v17 = vmul.f32 %v484_v58, %v484_v58  ;;  %v483_v18 = vsub.f32 %v11855_v52, %v9201_v47  ;;  %v11865_v52 = vld [vmem:[#allocation15_spill] sm:$0xff] }
 0x1f2   :  { %v564_v59 = vadd.f32 %v563_v43, %v521_v34  ;;  %v546_v9 = vadd.f32 %v545_v32, %v517_v24  ;;  %v510_v15 = vmul.f32 %v474_v29, %v474_v29  ;;  %v513_v16 = vmul.f32 %v477_v51, %v477_v51  ;;  %v11864_v24 = vld [vmem:[#allocation13_spill] sm:$0xff] }
 0x1f3   :  { %v539_v23 = vmul.f32 %v503_v61, %v503_v61  ;;  %v542_v30 = vmul.f32 %v506_v1, %v506_v1  ;;  %v493_v38 = vsub.f32 %v11856_v35, %v9184_v26  ;;  %v523_v48 = vmul.f32 %v487_v7, %v487_v7 }
 0x1f4   :  { %v565_v45 = vadd.f32 %v564_v59, %v524_v3  ;;  %v547_v2 = vadd.f32 %v546_v9, %v520_v17  ;;  %v486_v36 = vsub.f32 %v11857_v13, %v9201_v47  ;;  %v516_v49 = vmul.f32 %v480_v44, %v480_v44  ;;  %v11862_v3 = vld [vmem:[#allocation14_spill] sm:$0xff]  ;;  %v11863_v59 = vld [vmem:[#allocation11_spill] sm:$0xff]  ;;  %v11867_v13 = vld [vmem:[#allocation17_spill] sm:$0xff] }
 0x1f5   :  { %v496_v33 = vsub.f32 %v11858_v12, %v9184_v26  ;;  %v526_v46 = vmul.f32 %v490_v60, %v490_v60  ;;  %v489_v20 = vsub.f32 %v11859_v19, %v9201_v47  ;;  %v519_v37 = vmul.f32 %v483_v18, %v483_v18 }
 0x1f6   :  { %v566_v5 = vadd.f32 %v565_v45, %v527_v63  ;;  %v548_v41 = vadd.f32 %v547_v2, %v523_v48  ;;  %v578_v11 = vsel %vm97_vm0, %v510_v15, 0.0  ;;  %v579_v55 = vsel %vm97_vm0, %v513_v16, 0.0 }
 0x1f7   :  { %v499_v56 = vsub.f32 %v11860_v21, %v9184_v26  ;;  %v529_v50 = vmul.f32 %v493_v38, %v493_v38  ;;  %v492_v42 = vsub.f32 %v11861_v39, %v9201_v47  ;;  %v580_v0 = vadd.f32 %v579_v55, %v578_v11 }
 0x1f8   :  { %v567_v53 = vadd.f32 %v566_v5, %v530_v54  ;;  %v549_v34 = vadd.f32 %v548_v41, %v526_v46  ;;  %v522_v43 = vmul.f32 %v486_v36, %v486_v36  ;;  %v581_v1 = vsel %vm97_vm0, %v516_v49, 0.0 }
 0x1f9   :  { %v502_v58 = vsub.f32 %v11862_v3, %v9184_v26  ;;  %v532_v57 = vmul.f32 %v496_v33, %v496_v33  ;;  %v495_v8 = vsub.f32 %v11863_v59, %v9201_v47  ;;  %v582_v29 = vadd.f32 %v581_v1, %v580_v0 }
 0x1fa   :  { %v568_v40 = vadd.f32 %v567_v53, %v533_v27  ;;  %v550_v63 = vadd.f32 %v549_v34, %v529_v50  ;;  %v525_v54 = vmul.f32 %v489_v20, %v489_v20  ;;  %v583_v27 = vsel %vm97_vm0, %v519_v37, 0.0 }
 0x1fb   :  { %v505_v7 = vsub.f32 %v9108_v4, %v9184_v26  ;;  %v535_v45 = vmul.f32 %v499_v56, %v499_v56  ;;  %v498_v32 = vsub.f32 %v11864_v24, %v9201_v47  ;;  %v584_v14 = vadd.f32 %v583_v27, %v582_v29  ;;  %v7776_v27 = vld [vmem:[%s11813_s6 + $0x144] ss:$8 sps:$4 sm:$0xff]  }
 0x1fc   :  { %v569_v61 = vadd.f32 %v568_v40, %v536_v25  ;;  %v551_v25 = vadd.f32 %v550_v63, %v532_v57  ;;  %v528_v31 = vmul.f32 %v492_v42, %v492_v42  ;;  %v585_v60 = vsel %vm97_vm0, %v522_v43, 0.0 }
 0x1fd   :  { %v538_v17 = vmul.f32 %v502_v58, %v502_v58  ;;  %v501_v18 = vsub.f32 %v11865_v52, %v9201_v47  ;;  %v586_v5 = vadd.f32 %v585_v60, %v584_v14  ;;  %v531_v16 = vmul.f32 %v495_v8, %v495_v8  ;;  %v7773_v52 = vld [vmem:[%s11812_s5 + $0x144] ss:$8 sps:$4 sm:$0xff]  }
 0x1fe   :  { %v570_v51 = vadd.f32 %v569_v61, %v539_v23  ;;  %v552_v15 = vadd.f32 %v551_v25, %v535_v45  ;;  %v587_v4 = vsel %vm97_vm0, %v525_v54, 0.0  ;;  %v541_v26 = vmul.f32 %v505_v7, %v505_v7  ;;  %v11866_v23 = vld [vmem:[#allocation16_spill] sm:$0xff] }
 0x1ff   :  { %v504_v35 = vsub.f32 %v11866_v23, %v9201_v47  ;;  %v588_v38 = vadd.f32 %v587_v4, %v586_v5  ;;  %v534_v53 = vmul.f32 %v498_v32, %v498_v32  ;;  %v589_v2 = vsel %vm97_vm0, %v528_v31, 0.0  ;;  %v8589_v5 = vld [vmem:[%s11811_s4 + $0x10] sm:$0xff]  ;;  %v7771_v4 = vld [vmem:[%s11812_s5 + $0x140] ss:$8 sps:$4 sm:$0xff]  }
 0x200   :  { %v571_v44 = vadd.f32 %v570_v51, %v542_v30  ;;  %v553_v48 = vadd.f32 %v552_v15, %v538_v17  ;;  %v507_v36 = vsub.f32 %v11867_v13, %v9201_v47  ;;  %v537_v46 = vmul.f32 %v501_v18, %v501_v18  ;;  %v7774_v18 = vld [vmem:[%s11813_s6 + $0x140] ss:$8 sps:$4 sm:$0xff]   ;;  %v7780_v23 = vld [vmem:[%s11813_s6 + $0x150] ss:$8 sps:$4 sm:$0xff]  }
 0x201   :  { %v590_v49 = vadd.f32 %v589_v2, %v588_v38  ;;  %v591_v19 = vsel %vm97_vm0, %v531_v16, 0.0  ;;  %v540_v41 = vmul.f32 %v504_v35, %v504_v35  ;;  %v593_v11 = vsel %vm97_vm0, %v534_v53, 0.0  ;;  %v8591_v15 = vld [vmem:[%s11811_s4 + $0x8] sm:$0xff]  ;;  %v8592_v35 = vld [vmem:[%s11811_s4] sm:$0xff]  ;;  %v7794_v2 = vld [vmem:[%s11813_s6 + $0x174] ss:$8 sps:$4 sm:$0xff]  }
 0x202   :  { %v572_v9 = vrot.slane %v571_v44, 4  ;;  %v554_v33 = vadd.f32 %v553_v48, %v541_v26  ;;  %v543_v50 = vmul.f32 %v507_v36, %v507_v36  ;;  %v595_v39 = vsel %vm97_vm0, %v537_v46, 0.0  ;;  %v7779_v26 = vld [vmem:[%s11812_s5 + $0x154] ss:$8 sps:$4 sm:$0xff]   ;;  %v7788_v38 = vld [vmem:[%s11813_s6 + $0x164] ss:$8 sps:$4 sm:$0xff]  }
 0x203   :  { %v592_v20 = vadd.f32 %v591_v19, %v590_v49  ;;  %v597_v61 = vsel %vm97_vm0, %v540_v41, 0.0  ;;  %v7785_v48 = vld [vmem:[%s11812_s5 + $0x164] ss:$8 sps:$4 sm:$0xff]   ;;  %v7786_v53 = vld [vmem:[%s11813_s6 + $0x160] ss:$8 sps:$4 sm:$0xff]  }
 0x204   :  { %v573_v30 = vadd.f32 %v572_v9, %v571_v44  ;;  %v555_v40 = vrot.slane %v554_v33, 4  ;;  %v599_v1 = vsel %vm97_vm0, %v543_v50, 0.0  ;;  %v9288_v9 = vld [vmem:[#allocation2] sm:$0xff]  ;;  %v7791_v36 = vld [vmem:[%s11812_s5 + $0x174] ss:$8 sps:$4 sm:$0xff]  }
 0x205   :  { %v594_v55 = vadd.f32 %v593_v11, %v592_v20  ;;  %v7783_v13 = vld [vmem:[%s11812_s5 + $0x160] ss:$8 sps:$4 sm:$0xff]   ;;  %v7792_v49 = vld [vmem:[%s11813_s6 + $0x170] ss:$8 sps:$4 sm:$0xff]   ;;  %v7797_v46 = vld [vmem:[%s11812_s5 + $0x184] ss:$8 sps:$4 sm:$0xff]  }
 0x206   :  { %v574_v12 = vrot.slane %v573_v30, 2  ;;  %v556_v56 = vadd.f32 %v555_v40, %v554_v33  ;;  %v7789_v33 = vld [vmem:[%s11812_s5 + $0x170] ss:$8 sps:$4 sm:$0xff]   ;;  %v7798_v19 = vld [vmem:[%s11813_s6 + $0x180] ss:$8 sps:$4 sm:$0xff]  }
 0x207   :  { %v596_v42 = vadd.f32 %v595_v39, %v594_v55  ;;  %v7806_v20 = vld [vmem:[%s11813_s6 + $0x194] ss:$8 sps:$4 sm:$0xff]   ;;  %v7804_v41 = vld [vmem:[%s11813_s6 + $0x190] ss:$8 sps:$4 sm:$0xff]   ;;  %v7812_v11 = vld [vmem:[%s11813_s6 + $0x1a4] ss:$8 sps:$4 sm:$0xff]  }
 0x208   :  { %v575_v37 = vadd.f32 %v574_v12, %v573_v30  ;;  %v557_v0 = vrot.slane %v556_v56, 2  ;;  %v7777_v30 = vld [vmem:[%s11812_s5 + $0x150] ss:$8 sps:$4 sm:$0xff]   ;;  %v7800_v12 = vld [vmem:[%s11813_s6 + $0x184] ss:$8 sps:$4 sm:$0xff]  }
 0x209   :  { %v598_v34 = vadd.f32 %v597_v61, %v596_v42  ;;  %v7803_v40 = vld [vmem:[%s11812_s5 + $0x194] ss:$8 sps:$4 sm:$0xff]   ;;  %v7801_v55 = vld [vmem:[%s11812_s5 + $0x190] ss:$8 sps:$4 sm:$0xff]   ;;  %v7807_v50 = vld [vmem:[%s11812_s5 + $0x1a0] ss:$8 sps:$4 sm:$0xff]  }
 0x20a   :  { %v576_v21 = vrot.slane %v575_v37, 1  ;;  %v558_v43 = vadd.f32 %v557_v0, %v556_v56  ;;  %v7810_v56 = vld [vmem:[%s11813_s6 + $0x1a0] ss:$8 sps:$4 sm:$0xff]   ;;  %v7813_v39 = vld [vmem:[%s11812_s5 + $0x1b0] ss:$8 sps:$4 sm:$0xff]  }
 0x20b   :  { %v600_v3 = vadd.f32 %v599_v1, %v598_v34  ;;  %v7815_v42 = vld [vmem:[%s11812_s5 + $0x1b4] ss:$8 sps:$4 sm:$0xff]   ;;  %v7819_v61 = vld [vmem:[%s11812_s5 + $0x1c0] ss:$8 sps:$4 sm:$0xff]   ;;  %v7821_v34 = vld [vmem:[%s11812_s5 + $0x1c4] ss:$8 sps:$4 sm:$0xff]  }
 0x20c   :  { %v577_v47 = vadd.f32 %v576_v21, %v575_v37  ;;  %v559_v58 = vrot.slane %v558_v43, 1  ;;  %v7795_v37 = vld [vmem:[%s11812_s5 + $0x180] ss:$8 sps:$4 sm:$0xff]   ;;  %v7809_v21 = vld [vmem:[%s11812_s5 + $0x1a4] ss:$8 sps:$4 sm:$0xff]  }
 0x20d   :  { %v601_v57 = vrot.slane %v600_v3, 4  ;;  %v7818_v0 = vld [vmem:[%s11813_s6 + $0x1b4] ss:$8 sps:$4 sm:$0xff]   ;;  %v7824_v1 = vld [vmem:[%s11813_s6 + $0x1c4] ss:$8 sps:$4 sm:$0xff]  }
 0x20e   :  { %674 = vmatprep.mubr.f32.mxu1 %v577_v47  ;;  %v560_v59 = vadd.f32 %v559_v58, %v558_v43  ;;  %v7816_v47 = vld [vmem:[%s11813_s6 + $0x1b0] ss:$8 sps:$4 sm:$0xff]   ;;  %v7822_v43 = vld [vmem:[%s11813_s6 + $0x1c0] ss:$8 sps:$4 sm:$0xff]   ;;  %v7827_v58 = vld [vmem:[%s11812_s5 + $0x1d4] ss:$8 sps:$4 sm:$0xff]  }
 0x20f   :  { %v602_v8 = vadd.f32 %v601_v57, %v600_v3  ;;  %v7825_v3 = vld [vmem:[%s11812_s5 + $0x1d0] ss:$8 sps:$4 sm:$0xff]   ;;  %1199 = vst.msk [vmem:[#allocation2 + $0xa0] sm:$0x3] %vm1198_vm3, %v9288_v9  ;;  %1220 = vst.msk [vmem:[#allocation2 + $0x148] sm:$0x3] %vm1198_vm3, %v9288_v9 }
 0x210   :  { %675 = vmatmul.mubr.f32.vlgmr.msra.gmra.mrb[6].mxu1 %v560_v59  ;;  %v7828_v57 = vld [vmem:[%s11813_s6 + $0x1d0] ss:$8 sps:$4 sm:$0xff]   ;;  %v7830_v59 = vld [vmem:[%s11813_s6 + $0x1d4] ss:$8 sps:$4 sm:$0xff]  }
 0x211   :  { %v603_v29 = vrot.slane %v602_v8, 2  ;;  %7432 = vmatpush3.msra.mxu1 %v9154_v28  ;;  %7433 = vmatprep.mubr.msk.f32.mxu1 %vm8635_vm1, %v11851_v62 }
 0x212   :  { %2569 = vmatprep.subr.bf16.mxu1 %v7776_v27  ;;  %v7842_v27 = vld [vmem:[%s11813_s6 + $0x1f4] ss:$8 sps:$4 sm:$0xff]  }
 0x213   :  { %v604_v51 = vadd.f32 %v603_v29, %v602_v8  ;;  %v7833_v8 = vld [vmem:[%s11812_s5 + $0x1e4] ss:$8 sps:$4 sm:$0xff]  }
 0x214   :  { %v7836_v29 = vld [vmem:[%s11813_s6 + $0x1e4] ss:$8 sps:$4 sm:$0xff]  }
 0x215   :  { %v605_v63 = vrot.slane %v604_v51, 1 }
 0x217   :  { %v606_v54 = vadd.f32 %v605_v63, %v604_v51  ;;  %v7831_v51 = vld [vmem:[%s11812_s5 + $0x1e0] ss:$8 sps:$4 sm:$0xff]  }
 0x218   :  { %v7834_v63 = vld [vmem:[%s11813_s6 + $0x1e0] ss:$8 sps:$4 sm:$0xff]  }
 0x219   :  { %7424 = vmatmul.mubr.msk.f32.vlgmr.msra.gmra.mrb[2].mxu0 %vm97_vm0, %v606_v54  ;;  %v7839_v54 = vld [vmem:[%s11812_s5 + $0x1f4] ss:$8 sps:$4 sm:$0xff]  }
 0x21a   :  { %762 = vmatpush1.msra.mxu0 %v9145_v22  ;;  %825 = vmatprep.mubr.f32.mxu0 %v11851_v62  ;;  %v751_v22 = vld [vmem:[%s11814_s1] sm:$0x1] }
 0x21b   :  { %7426 = vmatprep.subr.mxu0 %v11851_v62  ;;  %v755_v62 = vld [vmem:[%s11815_s2] sm:$0x1] }
 0x2e3   :  { %v7367_v28 = vpop.f32.mrb[6].mxu1 }
 0x2e4   :  { %v7368_v7 = vpop.f32.mrb[7].mxu1 }
 0x2e5   :  { %v7369_v45 = vadd.f32 %v7368_v7, %v7367_v28  ;;  %v7837_v28 = vld [vmem:[%s11812_s5 + $0x1f0] ss:$8 sps:$4 sm:$0xff]  }
 0x2e6   :  { %v7840_v7 = vld [vmem:[%s11813_s6 + $0x1f0] ss:$8 sps:$4 sm:$0xff]  }
 0x2ec   :  { %v746_v24 = vpop.f32.mrb[2].mxu0 }
 0x2ed   :  { %v747_v32 = vadd.f32 %v7369_v45, %v746_v24  ;;  %v7425_v14 = vpop.f32.mrb[3].mxu0  ;;  %v7845_v45 = vld [vmem:[%s11812_s5 + $0x204] ss:$8 sps:$4 sm:$0xff]  }
 0x2ee   :  { %v7848_v24 = vld [vmem:[%s11813_s6 + $0x204] ss:$8 sps:$4 sm:$0xff]   ;;  %v7846_v14 = vld [vmem:[%s11813_s6 + $0x200] ss:$8 sps:$4 sm:$0xff]  }
 0x2ef   :  { %v750_v44 = vmul.f32 0.00026041668, %v747_v32  ;;  %v7843_v32 = vld [vmem:[%s11812_s5 + $0x200] ss:$8 sps:$4 sm:$0xff]  }
 0x2f1   :  { %v752_v25 = vadd.f32 1e-05, %v750_v44  ;;  %v7851_v44 = vld [vmem:[%s11812_s5 + $0x214] ss:$8 sps:$4 sm:$0xff]  }
 0x2f3   :  { %8491 = vrsqrt.f32 %v752_v25  ;;  %v7854_v25 = vld [vmem:[%s11813_s6 + $0x214] ss:$8 sps:$4 sm:$0xff]  }
 0x2fd   :  { %v8492_v31 = vpop.eup %8491 }
 0x2fe   :  { %v754_v60 = vmul.f32 %v8492_v31, %v751_v22  ;;  %v7849_v22 = vld [vmem:[%s11812_s5 + $0x210] ss:$8 sps:$4 sm:$0xff]  }
 0x2ff   :  { %v7852_v31 = vld [vmem:[%s11813_s6 + $0x210] ss:$8 sps:$4 sm:$0xff]  }
 0x300   :  { %6721 = vmatmul.mubr.msk.f32.vlgmr.msra.gmra.mrb[4].mxu0 %vm315_vm2, %v754_v60  ;;  %v756_v17 = vmul.f32 %v754_v60, %v9149_v6  ;;  %v7782_v6 = vld [vmem:[%s11813_s6 + $0x154] ss:$8 sps:$4 sm:$0xff]  }
 0x301   :  { %7427 = vmatpush3.msra.mxu0 %v8589_v5  ;;  %7428 = vmatprep.mubr.msk.f32.mxu0 %vm8635_vm1, %v9288_v9  ;;  %v7866_v5 = vld [vmem:[%s11813_s6 + $0x234] ss:$8 sps:$4 sm:$0xff]  }
 0x302   :  { %905 = vmatprep.subr.mxu0 %v8591_v15  ;;  %v757_v16 = vsub.f32 %v755_v62, %v756_v17  ;;  %v7857_v62 = vld [vmem:[%s11812_s5 + $0x224] ss:$8 sps:$4 sm:$0xff]   ;;  %v7855_v17 = vld [vmem:[%s11812_s5 + $0x220] ss:$8 sps:$4 sm:$0xff]   ;;  %v7864_v15 = vld [vmem:[%s11813_s6 + $0x230] ss:$8 sps:$4 sm:$0xff]  }
 0x304   :  { %7429 = vmatmul.mubr.msk.f32.vlgmr.msra.gmra.mrb[6].mxu0 %vm315_vm2, %v754_v60  ;;  %7434 = vmatmul.mubr.msk.f32.vlgmr.msra.gmra.mrb[8].mxu1 %vm315_vm2, %v757_v16  ;;  %v7860_v60 = vld [vmem:[%s11813_s6 + $0x224] ss:$8 sps:$4 sm:$0xff]  }
 0x305   :  { %906 = vmatpush1.msra.mxu0 %v8592_v35  ;;  %969 = vmatprep.mubr.f32.mxu0 %v9288_v9  ;;  %v8593_v9 = vld [vmem:[%s11810_s0] sm:$0xff] }
 0x306   :  { %1870 = vmatprep.subr.bf16.mxu0 %v7773_v52  ;;  %2570 = vmatpush1.bf16.msra.mxu1 %v7774_v18  ;;  %v7858_v52 = vld [vmem:[%s11813_s6 + $0x220] ss:$8 sps:$4 sm:$0xff]   ;;  %v7863_v18 = vld [vmem:[%s11812_s5 + $0x234] ss:$8 sps:$4 sm:$0xff]  }
 0x307   :  { %2571 = vmatprep.subr.bf16.mxu1 %v7782_v6  ;;  %v7861_v6 = vld [vmem:[%s11812_s5 + $0x230] ss:$8 sps:$4 sm:$0xff]  }
 0x308   :  { %6723 = vmatmul.mubr.msk.f32.vlgmr.msra.gmra.mrb[8].mxu0 %vm315_vm2, %v757_v16  ;;  %v7869_v16 = vld [vmem:[%s11812_s5 + $0x244] ss:$8 sps:$4 sm:$0xff]  }
 0x309   :  { %1871 = vmatpush1.bf16.msra.mxu0 %v7771_v4  ;;  %v7872_v4 = vld [vmem:[%s11813_s6 + $0x244] ss:$8 sps:$4 sm:$0xff]  }
 0x30a   :  { %1872 = vmatprep.subr.bf16.mxu0 %v7779_v26  ;;  %2572 = vmatpush1.bf16.msra.mxu1 %v7780_v23 }
 0x30b   :  { %2573 = vmatprep.subr.bf16.mxu1 %v7788_v38 }
 0x30d   :  { %1873 = vmatpush1.bf16.msra.mxu0 %v7777_v30 }
 0x30e   :  { %1874 = vmatprep.subr.bf16.mxu0 %v7785_v48  ;;  %2574 = vmatpush1.bf16.msra.mxu1 %v7786_v53 }
 0x30f   :  { %2575 = vmatprep.subr.bf16.mxu1 %v7794_v2  ;;  %v8594_v2 = vld [vmem:[%s11810_s0 + $0x18] sm:$0xff] }
 0x311   :  { %1875 = vmatpush1.bf16.msra.mxu0 %v7783_v13 }
 0x312   :  { %1876 = vmatprep.subr.bf16.mxu0 %v7791_v36  ;;  %2576 = vmatpush1.bf16.msra.mxu1 %v7792_v49  ;;  %v8595_v36 = vld [vmem:[%s11810_s0 + $0x30] sm:$0xff] }
 0x313   :  { %2577 = vmatprep.subr.bf16.mxu1 %v7800_v12  ;;  %v8596_v12 = vld [vmem:[%s11810_s0 + $0x48] sm:$0xff] }
 0x315   :  { %1877 = vmatpush1.bf16.msra.mxu0 %v7789_v33 }
 0x316   :  { %1878 = vmatprep.subr.bf16.mxu0 %v7797_v46  ;;  %2578 = vmatpush1.bf16.msra.mxu1 %v7798_v19 }
 0x317   :  { %2579 = vmatprep.subr.bf16.mxu1 %v7806_v20 }
 0x319   :  { %1879 = vmatpush1.bf16.msra.mxu0 %v7795_v37  ;;  %v8597_v37 = vld [vmem:[%s11810_s0 + $0x8] sm:$0xff] }
 0x31a   :  { %1880 = vmatprep.subr.bf16.mxu0 %v7803_v40  ;;  %2580 = vmatpush1.bf16.msra.mxu1 %v7804_v41  ;;  %v8598_v41 = vld [vmem:[%s11810_s0 + $0x20] sm:$0xff] }
 0x31b   :  { %2581 = vmatprep.subr.bf16.mxu1 %v7812_v11 }
 0x31d   :  { %1881 = vmatpush1.bf16.msra.mxu0 %v7801_v55  ;;  %v8599_v55 = vld [vmem:[%s11810_s0 + $0x38] sm:$0xff] }
 0x31e   :  { %1882 = vmatprep.subr.bf16.mxu0 %v7809_v21  ;;  %2582 = vmatpush1.bf16.msra.mxu1 %v7810_v56 }
 0x31f   :  { %2583 = vmatprep.subr.bf16.mxu1 %v7818_v0  ;;  %v8602_v0 = vld [vmem:[%s11810_s0 + $0x80] sm:$0xff] }
 0x321   :  { %1883 = vmatpush1.bf16.msra.mxu0 %v7807_v50  ;;  %v8600_v50 = vld [vmem:[%s11810_s0 + $0x50] sm:$0xff] }
 0x322   :  { %1884 = vmatprep.subr.bf16.mxu0 %v7815_v42  ;;  %2584 = vmatpush1.bf16.msra.mxu1 %v7816_v47  ;;  %v8601_v42 = vld [vmem:[%s11810_s0 + $0x68] sm:$0xff] }
 0x323   :  { %2585 = vmatprep.subr.bf16.mxu1 %v7824_v1  ;;  %v8604_v1 = vld [vmem:[%s11810_s0 + $0x28] sm:$0xff] }
 0x325   :  { %1885 = vmatpush1.bf16.msra.mxu0 %v7813_v39 }
 0x326   :  { %1886 = vmatprep.subr.bf16.mxu0 %v7821_v34  ;;  %2586 = vmatpush1.bf16.msra.mxu1 %v7822_v43  ;;  %v8603_v34 = vld [vmem:[%s11810_s0 + $0x10] sm:$0xff] }
 0x327   :  { %2587 = vmatprep.subr.bf16.mxu1 %v7830_v59  ;;  %v8606_v59 = vld [vmem:[%s11810_s0 + $0x58] sm:$0xff] }
 0x329   :  { %1887 = vmatpush1.bf16.msra.mxu0 %v7819_v61 }
 0x32a   :  { %1888 = vmatprep.subr.bf16.mxu0 %v7827_v58  ;;  %2588 = vmatpush1.bf16.msra.mxu1 %v7828_v57  ;;  %v8605_v58 = vld [vmem:[%s11810_s0 + $0x40] sm:$0xff] }
 0x32b   :  { %2589 = vmatprep.subr.bf16.mxu1 %v7836_v29 }
 0x32d   :  { %1889 = vmatpush1.bf16.msra.mxu0 %v7825_v3 }
 0x32e   :  { %1890 = vmatprep.subr.bf16.mxu0 %v7833_v8  ;;  %2590 = vmatpush1.bf16.msra.mxu1 %v7834_v63 }
 0x32f   :  { %2591 = vmatprep.subr.bf16.mxu1 %v7842_v27 }
 0x331   :  { %1891 = vmatpush1.bf16.msra.mxu0 %v7831_v51  ;;  %v8607_v51 = vld [vmem:[%s11810_s0 + $0x60] sm:$0xff] }
 0x332   :  { %1892 = vmatprep.subr.bf16.mxu0 %v7839_v54  ;;  %2592 = vmatpush1.bf16.msra.mxu1 %v7840_v7  ;;  %v8608_v54 = vld [vmem:[%s11810_s0 + $0x78] sm:$0xff] }
 0x333   :  { %2593 = vmatprep.subr.bf16.mxu1 %v7848_v24 }
 0x335   :  { %1893 = vmatpush1.bf16.msra.mxu0 %v7837_v28  ;;  %v8609_v28 = vld [vmem:[%s11810_s0 + $0x70] sm:$0xff] }
 0x336   :  { %1894 = vmatprep.subr.bf16.mxu0 %v7845_v45  ;;  %2594 = vmatpush1.bf16.msra.mxu1 %v7846_v14  ;;  %v8610_v45 = vld [vmem:[%s11810_s0 + $0x88] sm:$0xff] }
 0x337   :  { %2595 = vmatprep.subr.bf16.mxu1 %v7854_v25 }
 0x339   :  { %1895 = vmatpush1.bf16.msra.mxu0 %v7843_v32 }
 0x33a   :  { %1896 = vmatprep.subr.bf16.mxu0 %v7851_v44  ;;  %2596 = vmatpush1.bf16.msra.mxu1 %v7852_v31 }
 0x33b   :  { %2597 = vmatprep.subr.bf16.mxu1 %v7860_v60 }
 0x33d   :  { %1897 = vmatpush1.bf16.msra.mxu0 %v7849_v22 }
 0x33e   :  { %1898 = vmatprep.subr.bf16.mxu0 %v7857_v62  ;;  %2598 = vmatpush1.bf16.msra.mxu1 %v7858_v52 }
 0x33f   :  { %2599 = vmatprep.subr.bf16.mxu1 %v7866_v5 }
 0x341   :  { %1899 = vmatpush1.bf16.msra.mxu0 %v7855_v17 }
 0x342   :  { %1900 = vmatprep.subr.bf16.mxu0 %v7863_v18  ;;  %2600 = vmatpush1.bf16.msra.mxu1 %v7864_v15 }
 0x343   :  { %2632 = vmatprep.subr.bf16.mxu1 %v7872_v4 }
 0x345   :  { %1901 = vmatpush1.bf16.msra.mxu0 %v7861_v6 }
 0x346   :  { %1933 = vmatprep.subr.bf16.mxu0 %v7869_v16 }
 0x3d3   :  { %v827_v26 = vpop.f32.mrb[4].mxu0 }
 0x3d4   :  { %v9494_v23 = vrot.slane %v827_v26, %v9180_v10  ;;  %v829_v35 = vpop.f32.mrb[5].mxu0 }
 0x3d5   :  { %v9497_v38 = vrot.slane %v829_v35, %v9180_v10 }
 0x3d6   :  { %v1058_v53 = vmul.f32 %v8593_v9, %v9494_v23  ;;  %v1061_v13 = vmul.f32 %v8594_v2, %v9494_v23  ;;  %v1064_v49 = vmul.f32 %v8595_v36, %v9494_v23  ;;  %v1067_v33 = vmul.f32 %v8596_v12, %v9494_v23 }
 0x3d7   :  { %v898_v30 = vpop.f32.mrb[6].mxu0  ;;  %v1042_v48 = vpop.f32.mrb[8].mxu1  ;;  %v1059_v40 = vmul.f32 %v8597_v37, %v9497_v38  ;;  %v1062_v11 = vmul.f32 %v8598_v41, %v9497_v38  ;;  %v1065_v21 = vmul.f32 %v8599_v55, %v9497_v38  ;;  %v1068_v39 = vmul.f32 %v8600_v50, %v9497_v38 }
 0x3d8   :  { %v9516_v46 = vrot.slane %v898_v30, %v9180_v10  ;;  %v7430_v19 = vpop.f32.mrb[7].mxu0  ;;  %v7435_v20 = vpop.f32.mrb[9].mxu1  ;;  %v9531_v56 = vrot.slane %v1042_v48, %v9180_v10  ;;  %v1071_v47 = vmul.f32 %v8601_v42, %v9497_v38  ;;  %v9545_v61 = vmul.f32 %v8602_v0, %v9497_v38 }
 0x3d9   :  { %v1070_v63 = vmul.f32 %v8607_v51, %v9494_v23  ;;  %v1073_v27 = vmul.f32 %v8608_v54, %v9494_v23 }
 0x3da   :  { %v1060_v43 = vmul.f32 %v8603_v34, %v9516_v46  ;;  %v1063_v3 = vmul.f32 %v8604_v1, %v9516_v46  ;;  %v1066_v57 = vmul.f32 %v8605_v58, %v9516_v46  ;;  %v1069_v8 = vmul.f32 %v8606_v59, %v9516_v46 }
 0x3db   :  { %v971_v29 = vpop.f32.mrb[8].mxu0  ;;  %v1072_v7 = vmul.f32 %v8609_v28, %v9516_v46  ;;  %v1075_v24 = vmul.f32 %v8610_v45, %v9516_v46 }
 0x3dc   :  { %v9580_v32 = vrot.slane %v971_v29, %v9180_v10  ;;  %v973_v14 = vpop.f32.mrb[9].mxu0  ;;  %v9583_v44 = vadd.f32 %v9531_v56, %v1060_v43  ;;  %v9586_v25 = vadd.f32 %v9531_v56, %v1063_v3  ;;  %v9589_v22 = vadd.f32 %v9531_v56, %v1066_v57 }
 0x3dd   :  { %v9592_v31 = vrot.slane %v973_v14, %v9180_v10  ;;  %v9595_v62 = vadd.f32 %v9531_v56, %v1069_v8  ;;  %v9598_v60 = vadd.f32 %v9531_v56, %v1072_v7  ;;  %v9601_v17 = vadd.f32 %v9531_v56, %v1075_v24 }
 0x3de   :  { %v1106_v52 = vadd.f32 %v9580_v32, %v1058_v53  ;;  %v1109_v18 = vadd.f32 %v9580_v32, %v1061_v13  ;;  %v1112_v5 = vadd.f32 %v9580_v32, %v1064_v49  ;;  %v1115_v6 = vadd.f32 %v9580_v32, %v1067_v33 }
 0x3df   :  { %v1107_v10 = vadd.f32 %v9592_v31, %v1059_v40  ;;  %v1110_v15 = vadd.f32 %v9592_v31, %v1062_v11  ;;  %v1113_v16 = vadd.f32 %v9592_v31, %v1065_v21  ;;  %v1116_v4 = vadd.f32 %v9592_v31, %v1068_v39 }
 0x3e0   :  { %v1142_v26 = vmax.f32 %v1106_v52, 0.0  ;;  %v1145_v35 = vmax.f32 %v1109_v18, 0.0  ;;  %v1148_v30 = vmax.f32 %v1112_v5, 0.0  ;;  %v1151_v48 = vmax.f32 %v1115_v6, 0.0 }
 0x3e1   :  { %v1143_v9 = vmax.f32 %v1107_v10, 0.0  ;;  %v1146_v53 = vmax.f32 %v1110_v15, 0.0  ;;  %v1149_v2 = vmax.f32 %v1113_v16, 0.0  ;;  %v1152_v13 = vmax.f32 %v1116_v4, 0.0 }
 0x3e2   :  { %v1240_v36 = vrot.slane %v1142_v26, 7  ;;  %v1243_v49 = vrot.slane %v1145_v35, 7  ;;  %v1249_v12 = vrot.slane %v1148_v30, 7  ;;  %v1255_v33 = vrot.slane %v1151_v48, 7 }
 0x3e3   :  { %v1241_v19 = vrot.slane %v1143_v9, 7  ;;  %v1245_v20 = vrot.slane %v1146_v53, 7  ;;  %v1251_v37 = vrot.slane %v1149_v2, 7  ;;  %v1257_v40 = vrot.slane %v1152_v13, 7 }
 0x3e4   :  { %v9612_v41 = vsel %vm1239_vm4, %v1240_v36, %v1243_v49  ;;  %v1250_v11 = vsel %vm1239_vm4, %v1243_v49, %v1249_v12  ;;  %v1256_v55 = vsel %vm1239_vm4, %v1249_v12, %v1255_v33  ;;  %1294 = vst [vmem:[#allocation2] sm:$0xfe] %v1240_v36  ;;  %v1119_v21 = vadd.f32 %v9592_v31, %v1071_v47 }
 0x3e5   :  { %v9618_v50 = vsel %vm1239_vm4, %v1241_v19, %v1245_v20  ;;  %v1252_v39 = vsel %vm1239_vm4, %v1245_v20, %v1251_v37  ;;  %v1258_v42 = vsel %vm1239_vm4, %v1251_v37, %v1257_v40  ;;  %1295 = vst [vmem:[#allocation2 + $0x8] sm:$0xfe] %v1241_v19  ;;  %1298 = vst [vmem:[#allocation2 + $0x18] sm:$0xff] %v9612_v41  ;;  %v1144_v59 = vmax.f32 %v9583_v44, 0.0 }
 0x3e6   :  { %v9623_v0 = vpack.c.bf16 %v1256_v55, %v1250_v11  ;;  %1299 = vst [vmem:[#allocation2 + $0x20] sm:$0xff] %v9618_v50  ;;  %v9626_v34 = vpack.c.bf16 %v1258_v42, %v1252_v39  ;;  %v1122_v43 = vadd.f32 %v9592_v31, %v9545_v61  ;;  %v1155_v47 = vmax.f32 %v1119_v21, 0.0  ;;  %v7867_v21 = vld [vmem:[%s11812_s5 + $0x240] ss:$8 sps:$4 sm:$0xff]  }
 0x3e7   :  { %v1118_v1 = vadd.f32 %v9580_v32, %v1070_v63  ;;  %v1121_v3 = vadd.f32 %v9580_v32, %v1073_v27  ;;  %v1147_v28 = vmax.f32 %v9586_v25, 0.0  ;;  %v1150_v63 = vmax.f32 %v9589_v22, 0.0 }
 0x3e8   :  { %v1158_v58 = vmax.f32 %v1122_v43, 0.0  ;;  %v1263_v57 = vrot.slane %v1155_v47, 7  ;;  %v1591_v7 = vshll.u32 %v9626_v34, 16  ;;  %v1153_v52 = vmax.f32 %v9595_v62, 0.0  ;;  %v7875_v43 = vld [vmem:[%s11812_s5 + $0x254] ss:$8 sps:$4 sm:$0xff]  }
 0x3e9   :  { %v1154_v8 = vmax.f32 %v1118_v1, 0.0  ;;  %v1157_v29 = vmax.f32 %v1121_v3, 0.0  ;;  %v1242_v18 = vrot.slane %v1144_v59, 7  ;;  %v1247_v16 = vrot.slane %v1147_v28, 7 }
 0x3ea   :  { %v1264_v51 = vsel %vm1239_vm4, %v1257_v40, %v1263_v57  ;;  %v1269_v54 = vrot.slane %v1158_v58, 7  ;;  %v1593_v26 = vrot.slane %v1591_v7, 1  ;;  %v1579_v62 = vshll.u32 %v9623_v0, 16  ;;  %v7878_v58 = vld [vmem:[%s11813_s6 + $0x254] ss:$8 sps:$4 sm:$0xff]  }
 0x3eb   :  { %v1518_v61 = vld [vmem:[#allocation2] sm:$0xfe]  ;;  %v1261_v45 = vrot.slane %v1154_v8, 7  ;;  %v1267_v24 = vrot.slane %v1157_v29, 7  ;;  %1297 = vst.msk [vmem:[#allocation2 + $0x10] sm:$0xfe] %vm1296_vm5, %v1242_v18  ;;  %v1248_v53 = vsel %vm1239_vm4, %v1242_v18, %v1247_v16 }
 0x3ec   :  { %v1519_v27 = vld [vmem:[#allocation2 + $0x8] sm:$0xfe]  ;;  %v1524_v14 = vpack.c.bf16 %v9612_v41, %v1518_v61  ;;  %v1270_v44 = vsel %vm1239_vm4, %v1263_v57, %v1269_v54  ;;  %1314 = vst [vmem:[#allocation2 + $0x98] sm:$0x1] %v1269_v54  ;;  %v1615_v35 = vshrl.u32 %v9626_v34, 16  ;;  %v1253_v36 = vrot.slane %v1150_v63, 7 }
 0x3ed   :  { %v1525_v5 = vpack.c.bf16 %v9618_v50, %v1519_v27  ;;  %v9641_v25 = vpack.c.bf16 %v1270_v44, %v1264_v51  ;;  %v1262_v6 = vsel %vm1239_vm4, %v1255_v33, %v1261_v45  ;;  %v1268_v10 = vsel %vm1239_vm4, %v1261_v45, %v1267_v24  ;;  %1313 = vst [vmem:[#allocation2 + $0x90] sm:$0x1] %v1267_v24  ;;  %v7873_v29 = vld [vmem:[%s11812_s5 + $0x250] ss:$8 sps:$4 sm:$0xff]   ;;  %v7881_v27 = vld [vmem:[%s11812_s5 + $0x264] ss:$8 sps:$4 sm:$0xff]  }
 0x3ee   :  { %v1574_v15 = vshll.u32 %v1524_v14, 16  ;;  %v9645_v22 = vpack.c.bf16 %v1268_v10, %v1262_v6  ;;  %v1572_v48 = vshrl.u32 %v1524_v14, 16  ;;  %v1259_v49 = vrot.slane %v1153_v52, 7  ;;  %1300 = vst.msk [vmem:[#allocation2 + $0x28] sm:$0xff] %vm97_vm0, %v1248_v53  ;;  %v7876_v63 = vld [vmem:[%s11813_s6 + $0x250] ss:$8 sps:$4 sm:$0xff]  }
 0x3ef   :  { %v1586_v4 = vshll.u32 %v1525_v5, 16  ;;  %v1584_v30 = vshrl.u32 %v1525_v5, 16  ;;  %v1619_v13 = vshll.u32 %v9641_v25, 16  ;;  %v1156_v33 = vmax.f32 %v9598_v60, 0.0  ;;  %v7884_v52 = vld [vmem:[%s11813_s6 + $0x264] ss:$8 sps:$4 sm:$0xff]  }
 0x3f0   :  { %v1576_v9 = vrot.slane %v1574_v15, 1  ;;  %v1159_v19 = vmax.f32 %v9601_v17, 0.0  ;;  %v1617_v37 = vor.u32 %v1615_v35, %v1593_v26  ;;  %v1254_v11 = vsel %vm1239_vm4, %v1247_v16, %v1253_v36  ;;  %v7870_v17 = vld [vmem:[%s11813_s6 + $0x240] ss:$8 sps:$4 sm:$0xff]   ;;  %v8611_v16 = vld [vmem:[%s11810_s0 + $0x98] sm:$0xff] }
 0x3f1   :  { %v1588_v2 = vrot.slane %v1586_v4, 1  ;;  %v1581_v55 = vrot.slane %v1579_v62, 1  ;;  %1303 = vst.msk [vmem:[#allocation2 + $0x40] sm:$0xff] %vm97_vm0, %v1254_v11  ;;  %v1621_v60 = vrot.slane %v1619_v13, 1  ;;  %v1260_v47 = vsel %vm1239_vm4, %v1253_v36, %v1259_v49  ;;  %v8612_v62 = vld [vmem:[%s11810_s0 + $0xb0] sm:$0xff] }
 0x3f2   :  { %v1577_v12 = vor.u32 %v1576_v9, %v1572_v48  ;;  %v1265_v1 = vrot.slane %v1156_v33, 7  ;;  %1306 = vst.msk [vmem:[#allocation2 + $0x58] sm:$0xff] %vm97_vm0, %v1260_v47  ;;  %v1271_v59 = vrot.slane %v1159_v19, 7  ;;  %v1607_v28 = vshrl.u32 %v9623_v0, 16  ;;  %v1520_v45 = vld [vmem:[#allocation2 + $0x10] sm:$0xfe] }
 0x3f3   :  { %v1589_v20 = vor.u32 %v1588_v2, %v1584_v30  ;;  %v1522_v40 = vld [vmem:[#allocation2 + $0x98] sm:$0x1]  ;;  %v1622_v8 = vsel %vm1570_vm6, %v1617_v37, %v1621_v60  ;;  %v1611_v7 = vshll.u32 %v9645_v22, 16  ;;  %v3023_v18 = vld [vmem:[#allocation2 + $0x10] sm:$0xfc]  ;;  %v1639_v5 = vshrl.u32 %v9641_v25, 16 }
 0x3f4   :  { %v1528_v39 = vpack.c.bf16 %v1522_v40, %v1522_v40  ;;  %v1582_v3 = vsel %vm1570_vm6, %v1577_v12, %v1581_v55  ;;  %v1521_v57 = vld [vmem:[#allocation2 + $0x90] sm:$0x1]  ;;  %v1266_v54 = vsel %vm1239_vm4, %v1259_v49, %v1265_v1  ;;  %v1272_v24 = vsel %vm1239_vm4, %v1265_v1, %v1271_v59  ;;  %1316 = vst.msk [vmem:[#allocation2 + $0xa0] sm:$0x1] %vm1315_vm7, %v1271_v59  ;;  %v8613_v30 = vld [vmem:[%s11810_s0 + $0xc8] sm:$0xff]  ;;  %v8614_v40 = vld [vmem:[%s11810_s0 + $0xe0] sm:$0xff] }
 0x3f5   :  { %v1594_v42 = vsel %vm1570_vm6, %v1589_v20, %v1593_v26  ;;  %v9680_v61 = vld [vmem:[#allocation2 + $0x28] sm:$0xff]  ;;  %1309 = vst.msk [vmem:[#allocation2 + $0x70] sm:$0xff] %vm97_vm0, %v1266_v54  ;;  %v1527_v14 = vpack.c.bf16 %v1521_v57, %v1521_v57  ;;  %1312 = vst.msk [vmem:[#allocation2 + $0x88] sm:$0xff] %vm97_vm0, %v1272_v24  ;;  %v1609_v44 = vor.u32 %v1607_v28, %v1581_v55  ;;  %v1613_v26 = vrot.slane %v1611_v7, 1  ;;  %v7887_v19 = vld [vmem:[%s11812_s5 + $0x274] ss:$8 sps:$4 sm:$0xff]  }
 0x3f6   :  { %1902 = vmatprep.mubr.bf16.mxu0 %v1594_v42  ;;  %2601 = vmatprep.mubr.bf16.mxu1 %v1594_v42  ;;  %v1643_v51 = vshll.u32 %v1528_v39, 16  ;;  %v9697_v15 = vpack.c.bf16 %v9680_v61, %v1520_v45  ;;  %v1077_v4 = vmul.f32 %v8611_v16, %v9497_v38  ;;  %v1080_v35 = vmul.f32 %v8612_v62, %v9497_v38  ;;  %v7879_v53 = vld [vmem:[%s11812_s5 + $0x260] ss:$8 sps:$4 sm:$0xff]   ;;  %v7890_v20 = vld [vmem:[%s11813_s6 + $0x274] ss:$8 sps:$4 sm:$0xff]  }
 0x3f7   :  { %1903 = vmatmul.mubr.bf16.vlgmr.msra.gmra.mrb[12].mxu0 %v1582_v3  ;;  %2602 = vmatmul.mubr.bf16.vlgmr.msra.gmra.mrb[12].mxu1 %v1582_v3  ;;  %v1083_v48 = vmul.f32 %v8613_v30, %v9497_v38  ;;  %v1641_v9 = vor.u32 %v1639_v5, %v1621_v60  ;;  %v7882_v2 = vld [vmem:[%s11813_s6 + $0x260] ss:$8 sps:$4 sm:$0xff]   ;;  %v1635_v13 = vshll.u32 %v1527_v14, 16  ;;  %v3029_v49 = vpack.c.bf16 %v9680_v61, %v3023_v18  ;;  %v7885_v1 = vld [vmem:[%s11812_s5 + $0x270] ss:$8 sps:$4 sm:$0xff]  }
 0x3f8   :  { %1912 = vmatprep.mubr.bf16.mxu0 %v1622_v8  ;;  %1934 = vmatpush1.bf16.msra.mxu0 %v7867_v21  ;;  %v1645_v6 = vrot.slane %v1643_v51, 1  ;;  %v1419_v10 = vld [vmem:[#allocation2 + $0x40] sm:$0xff]  ;;  %v1125_v12 = vadd.f32 %v9592_v31, %v1077_v4  ;;  %v1614_v33 = vsel %vm1570_vm6, %v1609_v44, %v1613_v26  ;;  %v1086_v11 = vmul.f32 %v8614_v40, %v9497_v38  ;;  %v7888_v3 = vld [vmem:[%s11813_s6 + $0x270] ss:$8 sps:$4 sm:$0xff]   ;;  %v8616_v4 = vld [vmem:[%s11810_s0 + $0xa8] sm:$0xff] }
 0x3f9   :  { %2611 = vmatprep.mubr.bf16.mxu1 %v1622_v8  ;;  %2633 = vmatpush1.bf16.msra.mxu1 %v7870_v17  ;;  %v1422_v36 = vld [vmem:[#allocation2 + $0x58] sm:$0xff]  ;;  %v1128_v55 = vadd.f32 %v9592_v31, %v1080_v35  ;;  %v1598_v39 = vshll.u32 %v9697_v15, 16  ;;  %v3092_v42 = vrot.slane %v3029_v49, 1  ;;  %v1131_v60 = vadd.f32 %v9592_v31, %v1083_v48  ;;  %v7893_v57 = vld [vmem:[%s11812_s5 + $0x4] ss:$8 sps:$4 sm:$0xff]   ;;  %v8615_v18 = vld [vmem:[%s11810_s0 + $0x90] sm:$0xff] }
 0x3fa   :  { %1935 = vmatprep.subr.bf16.mxu0 %v7875_v43  ;;  %2634 = vmatprep.subr.bf16.mxu1 %v7878_v58  ;;  %v9726_v37 = vpack.c.bf16 %v1422_v36, %v1419_v10  ;;  %v1646_v21 = vsel %vm1570_vm6, %v1641_v9, %v1645_v6  ;;  %v1631_v43 = vshrl.u32 %v9645_v22, 16  ;;  %v1637_v47 = vrot.slane %v1635_v13, 1  ;;  %v7896_v59 = vld [vmem:[%s11813_s6 + $0x4] ss:$8 sps:$4 sm:$0xff]  }
 0x3fb   :  { %v1134_v58 = vadd.f32 %v9592_v31, %v1086_v11  ;;  %v1600_v54 = vrot.slane %v1598_v39, 1  ;;  %v1164_v28 = vmax.f32 %v1128_v55, 0.0  ;;  %v1596_v45 = vshrl.u32 %v9697_v15, 16  ;;  %v8617_v48 = vld [vmem:[%s11810_s0 + $0xc0] sm:$0xff] }
 0x3fc   :  { %1936 = vmatpush1.bf16.msra.mxu0 %v7873_v29  ;;  %v3093_v17 = vrot.slane %v9726_v37, 1  ;;  %v1161_v29 = vmax.f32 %v1125_v12, 0.0  ;;  %v1633_v51 = vor.u32 %v1631_v43, %v1613_v26  ;;  %v1603_v24 = vshll.u32 %v9726_v37, 16  ;;  %v1425_v35 = vld [vmem:[#allocation2 + $0x70] sm:$0xff]  ;;  %v1428_v30 = vld [vmem:[#allocation2 + $0x88] sm:$0xff] }
 0x3fd   :  { %2635 = vmatpush1.bf16.msra.mxu1 %v7876_v63  ;;  %1937 = vmatprep.subr.bf16.mxu0 %v7881_v27  ;;  %v1167_v63 = vmax.f32 %v1131_v60, 0.0  ;;  %v1170_v27 = vmax.f32 %v1134_v58, 0.0  ;;  %v1340_v44 = vrot.slane %v1164_v28, 7  ;;  %v1076_v5 = vmul.f32 %v8615_v18, %v9494_v23  ;;  %v7894_v39 = vld [vmem:[%s11813_s6] ss:$8 sps:$4 sm:$0xff]   ;;  %v8620_v43 = vld [vmem:[%s11810_s0 + $0x110] sm:$0xff] }
 0x3fe   :  { %2636 = vmatprep.subr.bf16.mxu1 %v7884_v52  ;;  %v9754_v8 = vsel %vm3085_vm8, %v3092_v42, %v3093_v17  ;;  %v1638_v7 = vsel %vm1570_vm6, %v1633_v51, %v1637_v47  ;;  %v1336_v14 = vrot.slane %v1161_v29, 7  ;;  %v1601_v52 = vor.u32 %v1600_v54, %v1596_v45  ;;  %v7899_v58 = vld [vmem:[%s11812_s5 + $0x14] ss:$8 sps:$4 sm:$0xff]   ;;  %v7897_v29 = vld [vmem:[%s11812_s5 + $0x10] ss:$8 sps:$4 sm:$0xff]  }
 0x3ff   :  { %1913 = vmatmul.mubr.bf16.gmra.mrb[16].mxu0 %v1614_v33  ;;  %2612 = vmatmul.mubr.bf16.gmra.mrb[16].mxu1 %v1614_v33  ;;  %v8637_v6 = vmov 0   ;;  %v1346_v15 = vrot.slane %v1167_v63, 7  ;;  %v9768_v16 = vrot.slane %v1170_v27, 7  ;;  %v1079_v26 = vmul.f32 %v8616_v4, %v9494_v23  ;;  %v8619_v33 = vld [vmem:[%s11810_s0 + $0xf8] sm:$0xff]  ;;  %v8621_v27 = vld [vmem:[%s11810_s0 + $0xf0] sm:$0xff] }
 0x400   :  { %1922 = vmatprep.mubr.bf16.mxu0 %v1646_v21  ;;  %2621 = vmatprep.mubr.bf16.mxu1 %v1646_v21  ;;  %v9766_v10 = vsel %vm1239_vm4, %v1336_v14, %v1340_v44  ;;  %1391 = vst [vmem:[#allocation2 + $0xb0] sm:$0xfe] %v1336_v14  ;;  %v1605_v62 = vrot.slane %v1603_v24, 1  ;;  %v1082_v9 = vmul.f32 %v8617_v48, %v9494_v23  ;;  %v7891_v21 = vld [vmem:[%s11812_s5] ss:$8 sps:$4 sm:$0xff]   ;;  %v1623_v45 = vshrl.u32 %v9726_v37, 16 }
 0x401   :  { %1938 = vmatpush1.bf16.msra.mxu0 %v7879_v53  ;;  %2637 = vmatpush1.bf16.msra.mxu1 %v7882_v2  ;;  %1394 = vst [vmem:[#allocation2 + $0xc8] sm:$0xff] %v9766_v10  ;;  %v8618_v53 = vld [vmem:[%s11810_s0 + $0xd8] sm:$0xff]  ;;  %v1124_v13 = vadd.f32 %v9580_v32, %v1076_v5  ;;  %v1347_v36 = vsel %vm1239_vm4, %v1340_v44, %v1346_v15  ;;  %v1523_v4 = vld [vmem:[#allocation2 + $0xa0] sm:$0x1] }
 0x402   :  { %1939 = vmatprep.subr.bf16.mxu0 %v7887_v19  ;;  %2638 = vmatprep.subr.bf16.mxu1 %v7890_v20  ;;  %v1085_v2 = vmul.f32 %v8618_v53, %v9494_v23  ;;  %v1353_v49 = vsel %vm1239_vm4, %v1346_v15, %v9768_v16  ;;  %v1127_v12 = vadd.f32 %v9580_v32, %v1079_v26  ;;  %v7908_v15 = vld [vmem:[%s11813_s6 + $0x24] ss:$8 sps:$4 sm:$0xff]  }
 0x403   :  { %v1089_v19 = vmul.f32 %v8619_v33, %v9497_v38  ;;  %v9792_v20 = vpack.c.bf16 %v1353_v49, %v1347_v36  ;;  %v1130_v40 = vadd.f32 %v9580_v32, %v1082_v9  ;;  %v1160_v55 = vmax.f32 %v1124_v13, 0.0  ;;  %v8623_v36 = vld [vmem:[%s11810_s0 + $0xa0] sm:$0xff] }
 0x404   :  { %v1133_v11 = vadd.f32 %v9580_v32, %v1085_v2  ;;  %v9802_v42 = vpack.c.bf16 %v1428_v30, %v1425_v35  ;;  %v1163_v60 = vmax.f32 %v1127_v12, 0.0  ;;  %v1092_v47 = vmul.f32 %v8620_v43, %v9497_v38  ;;  %v8622_v30 = vld [vmem:[%s11810_s0 + $0x108] sm:$0xff]  ;;  %v8624_v43 = vld [vmem:[%s11810_s0 + $0xb8] sm:$0xff] }
 0x405   :  { %1940 = vmatpush1.bf16.msra.mxu0 %v7885_v1  ;;  %2639 = vmatpush1.bf16.msra.mxu1 %v7888_v3  ;;  %v1137_v1 = vadd.f32 %v9592_v31, %v1089_v19  ;;  %v1606_v3 = vsel %vm1570_vm6, %v1601_v52, %v1605_v62  ;;  %v1335_v54 = vrot.slane %v1160_v55, 7  ;;  %v1088_v14 = vmul.f32 %v8621_v27, %v9494_v23  ;;  %v7920_v27 = vld [vmem:[%s11813_s6 + $0x44] ss:$8 sps:$4 sm:$0xff]  }
 0x406   :  { %2203 = vmatprep.subr.bf16.mxu0 %v7893_v57  ;;  %2895 = vmatprep.subr.bf16.mxu1 %v7896_v59  ;;  %v7902_v57 = vld [vmem:[%s11813_s6 + $0x14] ss:$8 sps:$4 sm:$0xff]   ;;  %v1166_v59 = vmax.f32 %v1130_v40, 0.0  ;;  %v1169_v51 = vmax.f32 %v1133_v11, 0.0  ;;  %v1338_v38 = vrot.slane %v1163_v60, 7  ;;  %v1140_v28 = vadd.f32 %v9592_v31, %v1092_v47 }
 0x407   :  { %1923 = vmatmul.mubr.bf16.gmra.mrb[20].mxu0 %v1638_v7  ;;  %2622 = vmatmul.mubr.bf16.gmra.mrb[20].mxu1 %v1638_v7  ;;  %v7900_v7 = vld [vmem:[%s11813_s6 + $0x10] ss:$8 sps:$4 sm:$0xff]   ;;  %v1173_v63 = vmax.f32 %v1137_v1, 0.0  ;;  %v7905_v31 = vld [vmem:[%s11812_s5 + $0x24] ss:$8 sps:$4 sm:$0xff]   ;;  %v1627_v44 = vshll.u32 %v9802_v42, 16  ;;  %v1091_v48 = vmul.f32 %v8622_v30, %v9494_v23  ;;  %v1136_v9 = vadd.f32 %v9580_v32, %v1088_v14 }
 0x408   :  { %1965 = vmatprep.mubr.bf16.mxu0 %v8637_v6  ;;  %2664 = vmatprep.mubr.bf16.mxu1 %v8637_v6  ;;  %v1344_v24 = vrot.slane %v1166_v59, 7  ;;  %v9835_v52 = vsel %vm1239_vm4, %v1335_v54, %v1338_v38  ;;  %v1350_v18 = vrot.slane %v1169_v51, 7  ;;  %1390 = vst [vmem:[#allocation2 + $0xa8] sm:$0xfe] %v1335_v54  ;;  %v1176_v5 = vmax.f32 %v1140_v28, 0.0  ;;  %v8626_v51 = vld [vmem:[%s11810_s0 + $0xe8] sm:$0xff] }
 0x409   :  { %1393 = vst [vmem:[#allocation2 + $0xc0] sm:$0xff] %v9835_v52  ;;  %v1358_v35 = vrot.slane %v1173_v63, 7  ;;  %v1625_v53 = vor.u32 %v1623_v45, %v1605_v62  ;;  %v1078_v49 = vmul.f32 %v8623_v36, %v9516_v46  ;;  %v1139_v33 = vadd.f32 %v9580_v32, %v1091_v48  ;;  %v7903_v62 = vld [vmem:[%s11812_s5 + $0x20] ss:$8 sps:$4 sm:$0xff]   ;;  %v7911_v32 = vld [vmem:[%s11812_s5 + $0x34] ss:$8 sps:$4 sm:$0xff]  }
 0x40a   :  { %v1345_v26 = vsel %vm1239_vm4, %v1338_v38, %v1344_v24  ;;  %v1351_v2 = vsel %vm1239_vm4, %v1344_v24, %v1350_v18  ;;  %v1364_v13 = vrot.slane %v1176_v5, 7  ;;  %v1172_v19 = vmax.f32 %v1136_v9, 0.0  ;;  %v7906_v40 = vld [vmem:[%s11813_s6 + $0x20] ss:$8 sps:$4 sm:$0xff]   ;;  %v7909_v38 = vld [vmem:[%s11812_s5 + $0x30] ss:$8 sps:$4 sm:$0xff]  }
 0x40b   :  { %v9854_v12 = vpack.c.bf16 %v1351_v2, %v1345_v26  ;;  %v1359_v23 = vsel %vm1239_vm4, %v9768_v16, %v1358_v35  ;;  %v1629_v11 = vrot.slane %v1627_v44, 1  ;;  %v1529_v55 = vpack.c.bf16 %v1523_v4, %v1523_v4  ;;  %v7914_v16 = vld [vmem:[%s11813_s6 + $0x34] ss:$8 sps:$4 sm:$0xff]   ;;  %v7912_v28 = vld [vmem:[%s11813_s6 + $0x30] ss:$8 sps:$4 sm:$0xff]  }
 0x40c   :  { %1409 = vst [vmem:[#allocation2 + $0x140] sm:$0x1] %v1364_v13  ;;  %v1175_v60 = vmax.f32 %v1139_v33, 0.0  ;;  %v1081_v47 = vmul.f32 %v8624_v43, %v9516_v46  ;;  %v1126_v59 = vadd.f32 %v9531_v56, %v1078_v49  ;;  %v1087_v54 = vmul.f32 %v8626_v51, %v9516_v46  ;;  %v7917_v63 = vld [vmem:[%s11812_s5 + $0x44] ss:$8 sps:$4 sm:$0xff]   ;;  %v8628_v36 = vld [vmem:[%s11810_s0 + $0x118] sm:$0xff] }
 0x40d   :  { %v1630_v1 = vsel %vm1570_vm6, %v1625_v53, %v1629_v11  ;;  %v1651_v45 = vshll.u32 %v1529_v55, 16  ;;  %v7915_v30 = vld [vmem:[%s11812_s5 + $0x40] ss:$8 sps:$4 sm:$0xff]   ;;  %v1093_v49 = vmul.f32 %v8628_v36, %v9516_v46  ;;  %v7932_v43 = vld [vmem:[%s11813_s6 + $0x64] ss:$8 sps:$4 sm:$0xff]  }
 0x40e   :  { %v1135_v4 = vadd.f32 %v9531_v56, %v1087_v54  ;;  %v1162_v26 = vmax.f32 %v1126_v59, 0.0  ;;  %v7918_v48 = vld [vmem:[%s11813_s6 + $0x40] ss:$8 sps:$4 sm:$0xff]  }
 0x40f   :  { %6765 = vmatmul.mubr.msk.bf16.vlgmr.msra.gmra.mrb[12].mxu0 %vm97_vm0, %v1606_v3  ;;  %6851 = vmatmul.mubr.msk.bf16.vlgmr.msra.gmra.mrb[12].mxu1 %vm97_vm0, %v1606_v3  ;;  %v1356_v3 = vrot.slane %v1172_v19, 7  ;;  %v1653_v9 = vrot.slane %v1651_v45, 1  ;;  %v8627_v53 = vld [vmem:[%s11810_s0 + $0x100] sm:$0xff]  ;;  %v7923_v19 = vld [vmem:[%s11812_s5 + $0x54] ss:$8 sps:$4 sm:$0xff]  }
 0x410   :  { %2204 = vmatpush1.bf16.msra.mxu0 %v7891_v21  ;;  %2896 = vmatpush1.bf16.msra.mxu1 %v7894_v39  ;;  %v1365_v21 = vsel %vm1239_vm4, %v1358_v35, %v1364_v13  ;;  %v1090_v2 = vmul.f32 %v8627_v53, %v9516_v46  ;;  %v7939_v53 = vld [vmem:[%s11812_s5 + $0x80] ss:$8 sps:$4 sm:$0xff]  }
 0x411   :  { %2205 = vmatprep.subr.bf16.mxu0 %v7899_v58  ;;  %2897 = vmatprep.subr.bf16.mxu1 %v7902_v57  ;;  %v9872_v39 = vpack.c.bf16 %v1365_v21, %v1359_v23  ;;  %v8625_v58 = vld [vmem:[%s11810_s0 + $0xd0] sm:$0xff]  ;;  %v1357_v24 = vsel %vm1239_vm4, %v1350_v18, %v1356_v3 }
 0x412   :  { %1975 = vmatprep.mubr.bf16.mxu0 %v8637_v6  ;;  %2674 = vmatprep.mubr.bf16.mxu1 %v8637_v6  ;;  %v1084_v57 = vmul.f32 %v8625_v58, %v9516_v46  ;;  %v1138_v21 = vadd.f32 %v9531_v56, %v1090_v2  ;;  %v5674_v58 = vld [vmem:[#allocation2 + $0xa8] sm:$0xfc] }
 0x413   :  { %v5680_v45 = vpack.c.bf16 %v9835_v52, %v5674_v58  ;;  %v7942_v2 = vld [vmem:[%s11813_s6 + $0x80] ss:$8 sps:$4 sm:$0xff]   ;;  %v7968_v58 = vld [vmem:[%s11813_s6 + $0xc4] ss:$8 sps:$4 sm:$0xff]  }
 0x414   :  { %2206 = vmatpush1.bf16.msra.mxu0 %v7897_v29  ;;  %2898 = vmatpush1.bf16.msra.mxu1 %v7900_v7  ;;  %v1362_v29 = vrot.slane %v1175_v60, 7  ;;  %v1647_v7 = vshrl.u32 %v9802_v42, 16  ;;  %v1132_v5 = vadd.f32 %v9531_v56, %v1084_v57  ;;  %v7929_v60 = vld [vmem:[%s11812_s5 + $0x64] ss:$8 sps:$4 sm:$0xff]   ;;  %v1174_v59 = vmax.f32 %v1138_v21, 0.0 }
 0x415   :  { %2207 = vmatprep.subr.bf16.mxu0 %v7905_v31  ;;  %2899 = vmatprep.subr.bf16.mxu1 %v7908_v15  ;;  %v1129_v31 = vadd.f32 %v9531_v56, %v1081_v47  ;;  %v1412_v15 = vld [vmem:[#allocation2 + $0x8] sm:$0xff] }
 0x416   :  { %v1363_v14 = vsel %vm1239_vm4, %v1356_v3, %v1362_v29  ;;  %1408 = vst [vmem:[#allocation2 + $0x138] sm:$0x1] %v1362_v29  ;;  %v1649_v44 = vor.u32 %v1647_v7, %v1629_v11  ;;  %v1168_v13 = vmax.f32 %v1132_v5, 0.0  ;;  %v1430_v33 = vpack.c.bf16 %v9618_v50, %v1412_v15  ;;  %v7921_v50 = vld [vmem:[%s11812_s5 + $0x50] ss:$8 sps:$4 sm:$0xff]  }
 0x417   :  { %6766 = vmatmul.mubr.msk.bf16.gmra.mrb[16].mxu0 %vm97_vm0, %v1630_v1  ;;  %6852 = vmatmul.mubr.msk.bf16.gmra.mrb[16].mxu1 %vm97_vm0, %v1630_v1  ;;  %v9908_v18 = vpack.c.bf16 %v1363_v14, %v1357_v24  ;;  %v1165_v35 = vmax.f32 %v1129_v31, 0.0  ;;  %v1337_v11 = vrot.slane %v1162_v26, 7  ;;  %v1141_v3 = vadd.f32 %v9531_v56, %v1093_v49  ;;  %v7927_v29 = vld [vmem:[%s11812_s5 + $0x60] ss:$8 sps:$4 sm:$0xff]   ;;  %v7933_v15 = vld [vmem:[%s11812_s5 + $0x70] ss:$8 sps:$4 sm:$0xff]  }
 0x418   :  { %2208 = vmatpush1.bf16.msra.mxu0 %v7903_v62  ;;  %2900 = vmatpush1.bf16.msra.mxu1 %v7906_v40  ;;  %v1654_v23 = vsel %vm1570_vm6, %v1649_v44, %v1653_v9  ;;  %v7926_v62 = vld [vmem:[%s11813_s6 + $0x54] ss:$8 sps:$4 sm:$0xff]   ;;  %v1171_v40 = vmax.f32 %v1135_v4, 0.0  ;;  %v1348_v46 = vrot.slane %v1168_v13, 7  ;;  %v7930_v56 = vld [vmem:[%s11813_s6 + $0x60] ss:$8 sps:$4 sm:$0xff]  }
 0x419   :  { %2209 = vmatprep.subr.bf16.mxu0 %v7911_v32  ;;  %2901 = vmatprep.subr.bf16.mxu1 %v7914_v16  ;;  %v1342_v55 = vrot.slane %v1165_v35, 7  ;;  %v7924_v32 = vld [vmem:[%s11813_s6 + $0x50] ss:$8 sps:$4 sm:$0xff]   ;;  %1392 = vst.msk [vmem:[#allocation2 + $0xb8] sm:$0xfe] %vm1296_vm5, %v1337_v11  ;;  %v1177_v51 = vmax.f32 %v1141_v3, 0.0 }
 0x41a   :  { %1985 = vmatprep.mubr.bf16.mxu0 %v8637_v6  ;;  %2684 = vmatprep.mubr.bf16.mxu1 %v8637_v6  ;;  %v5675_v16 = vld [vmem:[#allocation2 + $0xb0] sm:$0xfc]  ;;  %v1354_v57 = vrot.slane %v1171_v40, 7  ;;  %v1360_v7 = vrot.slane %v1174_v59, 7  ;;  %v5738_v31 = vrot.slane %v5680_v45, 1  ;;  %v5739_v44 = vrot.slane %v9854_v12, 1 }
 0x41b   :  { %v1343_v47 = vsel %vm1239_vm4, %v1337_v11, %v1342_v55  ;;  %v1349_v1 = vsel %vm1239_vm4, %v1342_v55, %v1348_v46  ;;  %v5681_v54 = vpack.c.bf16 %v9766_v10, %v5675_v16  ;;  %v7938_v10 = vld [vmem:[%s11813_s6 + $0x74] ss:$8 sps:$4 sm:$0xff]   ;;  %v1366_v24 = vrot.slane %v1177_v51, 7  ;;  %v7936_v4 = vld [vmem:[%s11813_s6 + $0x70] ss:$8 sps:$4 sm:$0xff]  }
 0x41c   :  { %2210 = vmatpush1.bf16.msra.mxu0 %v7909_v38  ;;  %2902 = vmatpush1.bf16.msra.mxu1 %v7912_v28  ;;  %1395 = vst.msk [vmem:[#allocation2 + $0xd0] sm:$0xff] %vm97_vm0, %v1343_v47  ;;  %1398 = vst.msk [vmem:[#allocation2 + $0xe8] sm:$0xff] %vm97_vm0, %v1349_v1  ;;  %v7935_v38 = vld [vmem:[%s11812_s5 + $0x74] ss:$8 sps:$4 sm:$0xff]   ;;  %v1355_v28 = vsel %vm1239_vm4, %v1348_v46, %v1354_v57  ;;  %v1361_v14 = vsel %vm1239_vm4, %v1354_v57, %v1360_v7  ;;  %v7941_v35 = vld [vmem:[%s11812_s5 + $0x84] ss:$8 sps:$4 sm:$0xff]  }
 0x41d   :  { %2211 = vmatprep.subr.bf16.mxu0 %v7917_v63  ;;  %2903 = vmatprep.subr.bf16.mxu1 %v7920_v27  ;;  %1401 = vst.msk [vmem:[#allocation2 + $0x100] sm:$0xff] %vm97_vm0, %v1355_v28  ;;  %v5741_v63 = vrot.slane %v5681_v54, 1  ;;  %v5742_v27 = vrot.slane %v9792_v20, 1  ;;  %v1367_v5 = vsel %vm1239_vm4, %v1360_v7, %v1366_v24  ;;  %1404 = vst.msk [vmem:[#allocation2 + $0x118] sm:$0xff] %vm97_vm0, %v1361_v14  ;;  %v7947_v49 = vld [vmem:[%s11812_s5 + $0x94] ss:$8 sps:$4 sm:$0xff]  }
 0x41e   :  { %1410 = vst.msk [vmem:[#allocation2 + $0x148] sm:$0x1] %vm1315_vm7, %v1366_v24  ;;  %v9992_v26 = vsel %vm3085_vm8, %v5738_v31, %v5739_v44  ;;  %v7948_v40 = vld [vmem:[%s11813_s6 + $0x90] ss:$8 sps:$4 sm:$0xff]   ;;  %v7953_v11 = vld [vmem:[%s11812_s5 + $0xa4] ss:$8 sps:$4 sm:$0xff]  }
 0x41f   :  { %6767 = vmatmul.mubr.msk.bf16.gmra.mrb[20].mxu0 %vm97_vm0, %v1654_v23  ;;  %6853 = vmatmul.mubr.msk.bf16.gmra.mrb[20].mxu1 %vm97_vm0, %v1654_v23  ;;  %v9980_v52 = vsel %vm3085_vm8, %v5741_v63, %v5742_v27  ;;  %1407 = vst.msk [vmem:[#allocation2 + $0x130] sm:$0xff] %vm97_vm0, %v1367_v5  ;;  %v7950_v23 = vld [vmem:[%s11813_s6 + $0x94] ss:$8 sps:$4 sm:$0xff]   ;;  %v7956_v55 = vld [vmem:[%s11813_s6 + $0xa4] ss:$8 sps:$4 sm:$0xff]  }
 0x420   :  { %2212 = vmatpush1.bf16.msra.mxu0 %v7915_v30  ;;  %2904 = vmatpush1.bf16.msra.mxu1 %v7918_v48  ;;  %v7944_v30 = vld [vmem:[%s11813_s6 + $0x84] ss:$8 sps:$4 sm:$0xff]   ;;  %v5676_v9 = vld [vmem:[#allocation2 + $0xb8] sm:$0xfc]  ;;  %v7963_v57 = vld [vmem:[%s11812_s5 + $0xc0] ss:$8 sps:$4 sm:$0xff]  }
 0x421   :  { %2235 = vmatprep.mubr.bf16.mxu0 %v1430_v33  ;;  %2927 = vmatprep.mubr.bf16.mxu1 %v1430_v33  ;;  %v7959_v16 = vld [vmem:[%s11812_s5 + $0xb4] ss:$8 sps:$4 sm:$0xff]   ;;  %v7957_v47 = vld [vmem:[%s11812_s5 + $0xb0] ss:$8 sps:$4 sm:$0xff]   ;;  %v7965_v3 = vld [vmem:[%s11812_s5 + $0xc4] ss:$8 sps:$4 sm:$0xff]  }
 0x422   :  { %2213 = vmatprep.subr.bf16.mxu0 %v7923_v19  ;;  %2905 = vmatprep.subr.bf16.mxu1 %v7926_v62  ;;  %v7945_v62 = vld [vmem:[%s11812_s5 + $0x90] ss:$8 sps:$4 sm:$0xff]   ;;  %v7966_v59 = vld [vmem:[%s11813_s6 + $0xc0] ss:$8 sps:$4 sm:$0xff]   ;;  %v7974_v51 = vld [vmem:[%s11813_s6 + $0xd4] ss:$8 sps:$4 sm:$0xff]  }
 0x423   :  { %v4070_v48 = vld [vmem:[#allocation2 + $0xd0] sm:$0xff]  ;;  %v4073_v13 = vld [vmem:[#allocation2 + $0xe8] sm:$0xff] }
 0x424   :  { %2214 = vmatpush1.bf16.msra.mxu0 %v7921_v50  ;;  %2906 = vmatpush1.bf16.msra.mxu1 %v7924_v32  ;;  %v4076_v36 = vld [vmem:[#allocation2 + $0x100] sm:$0xff]  ;;  %v5682_v33 = vpack.c.bf16 %v4070_v48, %v5676_v9  ;;  %v7960_v1 = vld [vmem:[%s11813_s6 + $0xb0] ss:$8 sps:$4 sm:$0xff]   ;;  %v7986_v24 = vld [vmem:[%s11813_s6 + $0xf4] ss:$8 sps:$4 sm:$0xff]  }
 0x425   :  { %2215 = vmatprep.subr.bf16.mxu0 %v7929_v60  ;;  %2907 = vmatprep.subr.bf16.mxu1 %v7932_v43  ;;  %v10012_v19 = vpack.c.bf16 %v4076_v36, %v4073_v13  ;;  %v7951_v50 = vld [vmem:[%s11812_s5 + $0xa0] ss:$8 sps:$4 sm:$0xff]   ;;  %v7962_v60 = vld [vmem:[%s11813_s6 + $0xb4] ss:$8 sps:$4 sm:$0xff]   ;;  %v7969_v54 = vld [vmem:[%s11812_s5 + $0xd0] ss:$8 sps:$4 sm:$0xff]  }
 0x426   :  { %v5744_v46 = vrot.slane %v5682_v33, 1  ;;  %v7954_v32 = vld [vmem:[%s11813_s6 + $0xa0] ss:$8 sps:$4 sm:$0xff]   ;;  %v7980_v28 = vld [vmem:[%s11813_s6 + $0xe4] ss:$8 sps:$4 sm:$0xff]  }
 0x427   :  { %v5745_v21 = vrot.slane %v10012_v19, 1  ;;  %v7975_v7 = vld [vmem:[%s11812_s5 + $0xe0] ss:$8 sps:$4 sm:$0xff]   ;;  %v7981_v63 = vld [vmem:[%s11812_s5 + $0xf0] ss:$8 sps:$4 sm:$0xff]  }
 0x428   :  { %2216 = vmatpush1.bf16.msra.mxu0 %v7927_v29  ;;  %2908 = vmatpush1.bf16.msra.mxu1 %v7930_v56  ;;  %v7971_v29 = vld [vmem:[%s11812_s5 + $0xd4] ss:$8 sps:$4 sm:$0xff]   ;;  %v7972_v56 = vld [vmem:[%s11813_s6 + $0xd0] ss:$8 sps:$4 sm:$0xff]   ;;  %v7978_v45 = vld [vmem:[%s11813_s6 + $0xe0] ss:$8 sps:$4 sm:$0xff]  }
 0x429   :  { %2217 = vmatprep.subr.bf16.mxu0 %v7935_v38  ;;  %2909 = vmatprep.subr.bf16.mxu1 %v7938_v10  ;;  %v10042_v43 = vsel %vm3085_vm8, %v5744_v46, %v5745_v21  ;;  %v7977_v38 = vld [vmem:[%s11812_s5 + $0xe4] ss:$8 sps:$4 sm:$0xff]   ;;  %v7983_v10 = vld [vmem:[%s11812_s5 + $0xf4] ss:$8 sps:$4 sm:$0xff]   ;;  %v7984_v14 = vld [vmem:[%s11813_s6 + $0xf0] ss:$8 sps:$4 sm:$0xff]  }
 0x42a   :  { %v7989_v31 = vld [vmem:[%s11812_s5 + $0x104] ss:$8 sps:$4 sm:$0xff]   ;;  %v7995_v48 = vld [vmem:[%s11812_s5 + $0x114] ss:$8 sps:$4 sm:$0xff]   ;;  %v7999_v36 = vld [vmem:[%s11812_s5 + $0x120] ss:$8 sps:$4 sm:$0xff]  }
 0x42b   :  { %v7992_v5 = vld [vmem:[%s11813_s6 + $0x104] ss:$8 sps:$4 sm:$0xff]   ;;  %v7998_v9 = vld [vmem:[%s11813_s6 + $0x114] ss:$8 sps:$4 sm:$0xff]  }
 0x42c   :  { %2218 = vmatpush1.bf16.msra.mxu0 %v7933_v15  ;;  %2910 = vmatpush1.bf16.msra.mxu1 %v7936_v4  ;;  %v1411_v15 = vld [vmem:[#allocation2] sm:$0xff]  ;;  %v8010_v33 = vld [vmem:[%s11813_s6 + $0x134] ss:$8 sps:$4 sm:$0xff]  }
 0x42d   :  { %2219 = vmatprep.subr.bf16.mxu0 %v7941_v35  ;;  %2911 = vmatprep.subr.bf16.mxu1 %v7944_v30  ;;  %v7987_v4 = vld [vmem:[%s11812_s5 + $0x100] ss:$8 sps:$4 sm:$0xff]   ;;  %v1429_v35 = vpack.c.bf16 %v9612_v41, %v1411_v15  ;;  %v7993_v41 = vld [vmem:[%s11812_s5 + $0x110] ss:$8 sps:$4 sm:$0xff]   ;;  %v8004_v13 = vld [vmem:[%s11813_s6 + $0x124] ss:$8 sps:$4 sm:$0xff]  }
 0x42e   :  { %v7990_v30 = vld [vmem:[%s11813_s6 + $0x100] ss:$8 sps:$4 sm:$0xff]   ;;  %v1413_v46 = vld [vmem:[#allocation2 + $0x10] sm:$0xff] }
 0x42f   :  { %v8046_v15 = vld [vmem:[%s11813_s6 + $0x2d4] ss:$8 sps:$4 sm:$0xff]  }
 0x430   :  { %2220 = vmatpush1.bf16.msra.mxu0 %v7939_v53  ;;  %2912 = vmatpush1.bf16.msra.mxu1 %v7942_v2  ;;  %v7996_v53 = vld [vmem:[%s11813_s6 + $0x110] ss:$8 sps:$4 sm:$0xff]   ;;  %v8001_v2 = vld [vmem:[%s11812_s5 + $0x124] ss:$8 sps:$4 sm:$0xff]  }
 0x431   :  { %2221 = vmatprep.subr.bf16.mxu0 %v7947_v49  ;;  %2913 = vmatprep.subr.bf16.mxu1 %v7950_v23  ;;  %v8002_v49 = vld [vmem:[%s11813_s6 + $0x120] ss:$8 sps:$4 sm:$0xff]   ;;  %v8007_v23 = vld [vmem:[%s11812_s5 + $0x134] ss:$8 sps:$4 sm:$0xff]  }
 0x434   :  { %2222 = vmatpush1.bf16.msra.mxu0 %v7945_v62  ;;  %2914 = vmatpush1.bf16.msra.mxu1 %v7948_v40  ;;  %v8005_v62 = vld [vmem:[%s11812_s5 + $0x130] ss:$8 sps:$4 sm:$0xff]  }
 0x435   :  { %2223 = vmatprep.subr.bf16.mxu0 %v7953_v11  ;;  %2915 = vmatprep.subr.bf16.mxu1 %v7956_v55  ;;  %v8008_v40 = vld [vmem:[%s11813_s6 + $0x130] ss:$8 sps:$4 sm:$0xff]   ;;  %v8013_v11 = vld [vmem:[%s11812_s5 + $0x284] ss:$8 sps:$4 sm:$0xff]  }
 0x436   :  { %v8016_v55 = vld [vmem:[%s11813_s6 + $0x284] ss:$8 sps:$4 sm:$0xff]  }
 0x438   :  { %2224 = vmatpush1.bf16.msra.mxu0 %v7951_v50  ;;  %2916 = vmatpush1.bf16.msra.mxu1 %v7954_v32  ;;  %v8011_v50 = vld [vmem:[%s11812_s5 + $0x280] ss:$8 sps:$4 sm:$0xff]  }
 0x439   :  { %2225 = vmatprep.subr.bf16.mxu0 %v7959_v16  ;;  %2917 = vmatprep.subr.bf16.mxu1 %v7962_v60  ;;  %v8014_v32 = vld [vmem:[%s11813_s6 + $0x280] ss:$8 sps:$4 sm:$0xff]   ;;  %v1431_v16 = vpack.c.bf16 %v9680_v61, %v1413_v46  ;;  %v8019_v60 = vld [vmem:[%s11812_s5 + $0x294] ss:$8 sps:$4 sm:$0xff]   ;;  %v8020_v61 = vld [vmem:[%s11813_s6 + $0x290] ss:$8 sps:$4 sm:$0xff]  }
 0x43a   :  { %v8065_v46 = vld [vmem:[%s11812_s5 + $0x310] ss:$8 sps:$4 sm:$0xff]  }
 0x43c   :  { %2226 = vmatpush1.bf16.msra.mxu0 %v7957_v47  ;;  %2918 = vmatpush1.bf16.msra.mxu1 %v7960_v1  ;;  %v8022_v47 = vld [vmem:[%s11813_s6 + $0x294] ss:$8 sps:$4 sm:$0xff]   ;;  %v8017_v1 = vld [vmem:[%s11812_s5 + $0x290] ss:$8 sps:$4 sm:$0xff]  }
 0x43d   :  { %2227 = vmatprep.subr.bf16.mxu0 %v7965_v3  ;;  %2919 = vmatprep.subr.bf16.mxu1 %v7968_v58  ;;  %v8025_v3 = vld [vmem:[%s11812_s5 + $0x2a4] ss:$8 sps:$4 sm:$0xff]  }
 0x43e   :  { %v8028_v58 = vld [vmem:[%s11813_s6 + $0x2a4] ss:$8 sps:$4 sm:$0xff]  }
 0x440   :  { %2228 = vmatpush1.bf16.msra.mxu0 %v7963_v57  ;;  %2920 = vmatpush1.bf16.msra.mxu1 %v7966_v59  ;;  %v8023_v57 = vld [vmem:[%s11812_s5 + $0x2a0] ss:$8 sps:$4 sm:$0xff]  }
 0x441   :  { %2229 = vmatprep.subr.bf16.mxu0 %v7971_v29  ;;  %2921 = vmatprep.subr.bf16.mxu1 %v7974_v51  ;;  %v8026_v59 = vld [vmem:[%s11813_s6 + $0x2a0] ss:$8 sps:$4 sm:$0xff]   ;;  %v8031_v29 = vld [vmem:[%s11812_s5 + $0x2b4] ss:$8 sps:$4 sm:$0xff]  }
 0x442   :  { %v8034_v51 = vld [vmem:[%s11813_s6 + $0x2b4] ss:$8 sps:$4 sm:$0xff]  }
 0x444   :  { %2230 = vmatpush1.bf16.msra.mxu0 %v7969_v54  ;;  %2922 = vmatpush1.bf16.msra.mxu1 %v7972_v56  ;;  %v3022_v54 = vld [vmem:[#allocation2 + $0x8] sm:$0xfc]  ;;  %v8029_v56 = vld [vmem:[%s11812_s5 + $0x2b0] ss:$8 sps:$4 sm:$0xff]  }
 0x445   :  { %2231 = vmatprep.subr.bf16.mxu0 %v7977_v38  ;;  %2923 = vmatprep.subr.bf16.mxu1 %v7980_v28  ;;  %v8032_v38 = vld [vmem:[%s11813_s6 + $0x2b0] ss:$8 sps:$4 sm:$0xff]   ;;  %v8629_v28 = vld [vmem:[#allocation2 + $0x20] sm:$0xff] }
 0x448   :  { %2232 = vmatpush1.bf16.msra.mxu0 %v7975_v7  ;;  %2924 = vmatpush1.bf16.msra.mxu1 %v7978_v45  ;;  %v3028_v7 = vpack.c.bf16 %v8629_v28, %v3022_v54  ;;  %v8037_v45 = vld [vmem:[%s11812_s5 + $0x2c4] ss:$8 sps:$4 sm:$0xff]   ;;  %v8091_v54 = vld [vmem:[%s11812_s5 + $0x354] ss:$8 sps:$4 sm:$0xff]   ;;  %v8092_v28 = vld [vmem:[%s11813_s6 + $0x350] ss:$8 sps:$4 sm:$0xff]  }
 0x449   :  { %2233 = vmatprep.subr.bf16.mxu0 %v7983_v10  ;;  %2925 = vmatprep.subr.bf16.mxu1 %v7986_v24  ;;  %v8040_v10 = vld [vmem:[%s11813_s6 + $0x2c4] ss:$8 sps:$4 sm:$0xff]   ;;  %v8035_v24 = vld [vmem:[%s11812_s5 + $0x2c0] ss:$8 sps:$4 sm:$0xff]  }
 0x44c   :  { %2234 = vmatpush1.bf16.msra.mxu0 %v7981_v63  ;;  %2926 = vmatpush1.bf16.msra.mxu1 %v7984_v14  ;;  %v8038_v63 = vld [vmem:[%s11813_s6 + $0x2c0] ss:$8 sps:$4 sm:$0xff]   ;;  %v3089_v14 = vrot.slane %v3028_v7, 1  ;;  %v8097_v7 = vld [vmem:[%s11812_s5 + $0x364] ss:$8 sps:$4 sm:$0xff]  }
 0x44d   :  { %2266 = vmatprep.subr.bf16.mxu0 %v7989_v31  ;;  %2958 = vmatprep.subr.bf16.mxu1 %v7992_v5  ;;  %v3090_v31 = vrot.slane %v9626_v34, 1  ;;  %v8043_v5 = vld [vmem:[%s11812_s5 + $0x2d4] ss:$8 sps:$4 sm:$0xff]  }
 0x44f   :  { %2236 = vmatmul.mubr.bf16.vlgmr.msra.gmra.mrb[12].mxu0 %v1429_v35  ;;  %2928 = vmatmul.mubr.bf16.vlgmr.msra.gmra.mrb[12].mxu1 %v1429_v35  ;;  %v8041_v35 = vld [vmem:[%s11812_s5 + $0x2d0] ss:$8 sps:$4 sm:$0xff]  }
 0x450   :  { %2245 = vmatprep.mubr.bf16.mxu0 %v9626_v34  ;;  %2267 = vmatpush1.bf16.msra.mxu0 %v7987_v4  ;;  %v3091_v4 = vsel %vm3085_vm8, %v3089_v14, %v3090_v31  ;;  %v8103_v14 = vld [vmem:[%s11812_s5 + $0x374] ss:$8 sps:$4 sm:$0xff]  }
 0x451   :  { %2937 = vmatprep.mubr.bf16.mxu1 %v9626_v34  ;;  %2959 = vmatpush1.bf16.msra.mxu1 %v7990_v30  ;;  %v8044_v30 = vld [vmem:[%s11813_s6 + $0x2d0] ss:$8 sps:$4 sm:$0xff]   ;;  %v3095_v34 = vrot.slane %v9645_v22, 1 }
 0x452   :  { %2268 = vmatprep.subr.bf16.mxu0 %v7995_v48  ;;  %2960 = vmatprep.subr.bf16.mxu1 %v7998_v9  ;;  %v8049_v48 = vld [vmem:[%s11812_s5 + $0x2e4] ss:$8 sps:$4 sm:$0xff]  }
 0x453   :  { %v8052_v9 = vld [vmem:[%s11813_s6 + $0x2e4] ss:$8 sps:$4 sm:$0xff]  }
 0x454   :  { %2269 = vmatpush1.bf16.msra.mxu0 %v7993_v41  ;;  %v8047_v41 = vld [vmem:[%s11812_s5 + $0x2e0] ss:$8 sps:$4 sm:$0xff]  }
 0x455   :  { %2961 = vmatpush1.bf16.msra.mxu1 %v7996_v53  ;;  %2270 = vmatprep.subr.bf16.mxu0 %v8001_v2  ;;  %v8050_v53 = vld [vmem:[%s11813_s6 + $0x2e0] ss:$8 sps:$4 sm:$0xff]   ;;  %v8055_v2 = vld [vmem:[%s11812_s5 + $0x2f4] ss:$8 sps:$4 sm:$0xff]  }
 0x456   :  { %2962 = vmatprep.subr.bf16.mxu1 %v8004_v13  ;;  %v8058_v13 = vld [vmem:[%s11813_s6 + $0x2f4] ss:$8 sps:$4 sm:$0xff]  }
 0x457   :  { %2246 = vmatmul.mubr.bf16.gmra.mrb[16].mxu0 %v9623_v0  ;;  %2938 = vmatmul.mubr.bf16.gmra.mrb[16].mxu1 %v9623_v0 }
 0x458   :  { %2255 = vmatprep.mubr.bf16.mxu0 %v9641_v25  ;;  %2947 = vmatprep.mubr.bf16.mxu1 %v9641_v25 }
 0x459   :  { %2271 = vmatpush1.bf16.msra.mxu0 %v7999_v36  ;;  %2963 = vmatpush1.bf16.msra.mxu1 %v8002_v49  ;;  %v8053_v36 = vld [vmem:[%s11812_s5 + $0x2f0] ss:$8 sps:$4 sm:$0xff]  }
 0x45a   :  { %2272 = vmatprep.subr.bf16.mxu0 %v8007_v23  ;;  %2964 = vmatprep.subr.bf16.mxu1 %v8010_v33  ;;  %v8056_v49 = vld [vmem:[%s11813_s6 + $0x2f0] ss:$8 sps:$4 sm:$0xff]   ;;  %v8061_v23 = vld [vmem:[%s11812_s5 + $0x304] ss:$8 sps:$4 sm:$0xff]  }
 0x45b   :  { %v8064_v33 = vld [vmem:[%s11813_s6 + $0x304] ss:$8 sps:$4 sm:$0xff]  }
 0x45d   :  { %2273 = vmatpush1.bf16.msra.mxu0 %v8005_v62  ;;  %2965 = vmatpush1.bf16.msra.mxu1 %v8008_v40  ;;  %v8059_v62 = vld [vmem:[%s11812_s5 + $0x300] ss:$8 sps:$4 sm:$0xff]  }
 0x45e   :  { %3322 = vmatprep.subr.bf16.mxu0 %v8013_v11  ;;  %3700 = vmatprep.subr.bf16.mxu1 %v8016_v55  ;;  %v8062_v40 = vld [vmem:[%s11813_s6 + $0x300] ss:$8 sps:$4 sm:$0xff]   ;;  %v8067_v11 = vld [vmem:[%s11812_s5 + $0x314] ss:$8 sps:$4 sm:$0xff]  }
 0x45f   :  { %2256 = vmatmul.mubr.bf16.gmra.mrb[20].mxu0 %v9645_v22  ;;  %2948 = vmatmul.mubr.bf16.gmra.mrb[20].mxu1 %v9645_v22  ;;  %v8070_v55 = vld [vmem:[%s11813_s6 + $0x314] ss:$8 sps:$4 sm:$0xff]  }
 0x460   :  { %2298 = vmatprep.mubr.bf16.mxu0 %v8637_v6  ;;  %2990 = vmatprep.mubr.bf16.mxu1 %v8637_v6 }
 0x467   :  { %6808 = vmatmul.mubr.msk.bf16.vlgmr.msra.gmra.mrb[12].mxu0 %vm97_vm0, %v1431_v16  ;;  %6894 = vmatmul.mubr.msk.bf16.vlgmr.msra.gmra.mrb[12].mxu1 %vm97_vm0, %v1431_v16  ;;  %v8076_v16 = vld [vmem:[%s11813_s6 + $0x324] ss:$8 sps:$4 sm:$0xff]  }
 0x468   :  { %3323 = vmatpush1.bf16.msra.mxu0 %v8011_v50  ;;  %3701 = vmatpush1.bf16.msra.mxu1 %v8014_v32  ;;  %v8068_v50 = vld [vmem:[%s11813_s6 + $0x310] ss:$8 sps:$4 sm:$0xff]   ;;  %v8073_v32 = vld [vmem:[%s11812_s5 + $0x324] ss:$8 sps:$4 sm:$0xff]  }
 0x469   :  { %3324 = vmatprep.subr.bf16.mxu0 %v8019_v60  ;;  %3702 = vmatprep.subr.bf16.mxu1 %v8022_v47  ;;  %v8071_v60 = vld [vmem:[%s11812_s5 + $0x320] ss:$8 sps:$4 sm:$0xff]  }
 0x46a   :  { %2308 = vmatprep.mubr.bf16.mxu0 %v8637_v6  ;;  %3000 = vmatprep.mubr.bf16.mxu1 %v8637_v6  ;;  %v8074_v47 = vld [vmem:[%s11813_s6 + $0x320] ss:$8 sps:$4 sm:$0xff]  }
 0x46c   :  { %3325 = vmatpush1.bf16.msra.mxu0 %v8017_v1  ;;  %3703 = vmatpush1.bf16.msra.mxu1 %v8020_v61  ;;  %v8079_v1 = vld [vmem:[%s11812_s5 + $0x334] ss:$8 sps:$4 sm:$0xff]  }
 0x46d   :  { %3326 = vmatprep.subr.bf16.mxu0 %v8025_v3  ;;  %3704 = vmatprep.subr.bf16.mxu1 %v8028_v58  ;;  %v8082_v61 = vld [vmem:[%s11813_s6 + $0x334] ss:$8 sps:$4 sm:$0xff]   ;;  %v8077_v3 = vld [vmem:[%s11812_s5 + $0x330] ss:$8 sps:$4 sm:$0xff]  }
 0x46e   :  { %v8080_v58 = vld [vmem:[%s11813_s6 + $0x330] ss:$8 sps:$4 sm:$0xff]  }
 0x46f   :  { %6809 = vmatmul.mubr.msk.bf16.gmra.mrb[16].mxu0 %vm97_vm0, %v9726_v37  ;;  %6895 = vmatmul.mubr.msk.bf16.gmra.mrb[16].mxu1 %vm97_vm0, %v9726_v37  ;;  %v8157_v37 = vld [vmem:[%s11812_s5 + $0x184] ss:$8 sps:$4 sm:$0xff]  }
 0x470   :  { %3327 = vmatpush1.bf16.msra.mxu0 %v8023_v57  ;;  %3705 = vmatpush1.bf16.msra.mxu1 %v8026_v59  ;;  %v8085_v57 = vld [vmem:[%s11812_s5 + $0x344] ss:$8 sps:$4 sm:$0xff]  }
 0x471   :  { %3328 = vmatprep.subr.bf16.mxu0 %v8031_v29  ;;  %3706 = vmatprep.subr.bf16.mxu1 %v8034_v51  ;;  %v8088_v59 = vld [vmem:[%s11813_s6 + $0x344] ss:$8 sps:$4 sm:$0xff]   ;;  %v8083_v29 = vld [vmem:[%s11812_s5 + $0x340] ss:$8 sps:$4 sm:$0xff]  }
 0x472   :  { %2318 = vmatprep.mubr.bf16.mxu0 %v8637_v6  ;;  %3010 = vmatprep.mubr.bf16.mxu1 %v8637_v6  ;;  %v8086_v51 = vld [vmem:[%s11813_s6 + $0x340] ss:$8 sps:$4 sm:$0xff]  }
 0x474   :  { %3329 = vmatpush1.bf16.msra.mxu0 %v8029_v56  ;;  %3707 = vmatpush1.bf16.msra.mxu1 %v8032_v38  ;;  %v8094_v56 = vld [vmem:[%s11813_s6 + $0x354] ss:$8 sps:$4 sm:$0xff]   ;;  %v8089_v38 = vld [vmem:[%s11812_s5 + $0x350] ss:$8 sps:$4 sm:$0xff]  }
 0x475   :  { %3330 = vmatprep.subr.bf16.mxu0 %v8037_v45  ;;  %3708 = vmatprep.subr.bf16.mxu1 %v8040_v10  ;;  %v8100_v45 = vld [vmem:[%s11813_s6 + $0x364] ss:$8 sps:$4 sm:$0xff]  }
 0x476   :  { %v3021_v10 = vld [vmem:[#allocation2] sm:$0xfc] }
 0x477   :  { %6810 = vmatmul.mubr.msk.bf16.gmra.mrb[20].mxu0 %vm97_vm0, %v9802_v42  ;;  %6896 = vmatmul.mubr.msk.bf16.gmra.mrb[20].mxu1 %vm97_vm0, %v9802_v42 }
 0x478   :  { %3331 = vmatpush1.bf16.msra.mxu0 %v8035_v24  ;;  %3709 = vmatpush1.bf16.msra.mxu1 %v8038_v63  ;;  %v8095_v24 = vld [vmem:[%s11812_s5 + $0x360] ss:$8 sps:$4 sm:$0xff]  }
 0x479   :  { %3354 = vmatprep.mubr.bf16.mxu0 %v3091_v4  ;;  %3732 = vmatprep.mubr.bf16.mxu1 %v3091_v4  ;;  %v8098_v63 = vld [vmem:[%s11813_s6 + $0x360] ss:$8 sps:$4 sm:$0xff]  }
 0x47a   :  { %3332 = vmatprep.subr.bf16.mxu0 %v8043_v5  ;;  %3710 = vmatprep.subr.bf16.mxu1 %v8046_v15  ;;  %v8106_v5 = vld [vmem:[%s11813_s6 + $0x374] ss:$8 sps:$4 sm:$0xff]  }
 0x47b   :  { %v8630_v15 = vld [vmem:[#allocation2 + $0x18] sm:$0xff] }
 0x47c   :  { %3333 = vmatpush1.bf16.msra.mxu0 %v8041_v35  ;;  %3711 = vmatpush1.bf16.msra.mxu1 %v8044_v30  ;;  %v3027_v4 = vpack.c.bf16 %v8630_v15, %v3021_v10  ;;  %v8101_v35 = vld [vmem:[%s11812_s5 + $0x370] ss:$8 sps:$4 sm:$0xff]   ;;  %v3026_v15 = vld [vmem:[#allocation2 + $0xa0] sm:$0x3] }
 0x47d   :  { %3334 = vmatprep.subr.bf16.mxu0 %v8049_v48  ;;  %3712 = vmatprep.subr.bf16.mxu1 %v8052_v9  ;;  %v8104_v30 = vld [vmem:[%s11813_s6 + $0x370] ss:$8 sps:$4 sm:$0xff]   ;;  %v8109_v48 = vld [vmem:[%s11812_s5 + $0x384] ss:$8 sps:$4 sm:$0xff]  }
 0x47e   :  { %v8112_v9 = vld [vmem:[%s11813_s6 + $0x384] ss:$8 sps:$4 sm:$0xff]   ;;  %v8140_v10 = vld [vmem:[%s11813_s6 + $0x150] ss:$8 sps:$4 sm:$0xff]  }
 0x480   :  { %3335 = vmatpush1.bf16.msra.mxu0 %v8047_v41  ;;  %3713 = vmatpush1.bf16.msra.mxu1 %v8050_v53  ;;  %v3086_v41 = vrot.slane %v3027_v4, 1  ;;  %v3097_v53 = vrot.slane %v9641_v25, 1  ;;  %v8115_v25 = vld [vmem:[%s11812_s5 + $0x394] ss:$8 sps:$4 sm:$0xff]   ;;  %v8143_v4 = vld [vmem:[%s11812_s5 + $0x160] ss:$8 sps:$4 sm:$0xff]  }
 0x481   :  { %3336 = vmatprep.subr.bf16.mxu0 %v8055_v2  ;;  %3714 = vmatprep.subr.bf16.mxu1 %v8058_v13  ;;  %v3087_v2 = vrot.slane %v9623_v0, 1  ;;  %v8107_v13 = vld [vmem:[%s11812_s5 + $0x380] ss:$8 sps:$4 sm:$0xff]   ;;  %v8118_v0 = vld [vmem:[%s11813_s6 + $0x394] ss:$8 sps:$4 sm:$0xff]  }
 0x483   :  { %v3096_v22 = vsel %vm3085_vm8, %v3087_v2, %v3095_v34 }
 0x484   :  { %3337 = vmatpush1.bf16.msra.mxu0 %v8053_v36  ;;  %3715 = vmatpush1.bf16.msra.mxu1 %v8056_v49  ;;  %v3025_v36 = vld [vmem:[#allocation2 + $0x98] sm:$0x3]  ;;  %v8110_v49 = vld [vmem:[%s11813_s6 + $0x380] ss:$8 sps:$4 sm:$0xff]  }
 0x485   :  { %3338 = vmatprep.subr.bf16.mxu0 %v8061_v23  ;;  %3716 = vmatprep.subr.bf16.mxu1 %v8064_v33  ;;  %v3088_v23 = vsel %vm3085_vm8, %v3086_v41, %v3087_v2  ;;  %v3098_v33 = vsel %vm3085_vm8, %v3090_v31, %v3097_v53  ;;  %v8124_v31 = vld [vmem:[%s11813_s6 + $0x3a4] ss:$8 sps:$4 sm:$0xff]   ;;  %v3032_v41 = vpack.c.bf16 %v3026_v15, %v3026_v15  ;;  %v8152_v2 = vld [vmem:[%s11813_s6 + $0x170] ss:$8 sps:$4 sm:$0xff]  }
 0x486   :  { %v8208_v15 = vld [vmem:[%s11813_s6 + $0x204] ss:$8 sps:$4 sm:$0xff]  }
 0x488   :  { %3339 = vmatpush1.bf16.msra.mxu0 %v8059_v62  ;;  %3717 = vmatpush1.bf16.msra.mxu1 %v8062_v40  ;;  %v3031_v62 = vpack.c.bf16 %v3025_v36, %v3025_v36  ;;  %v8113_v40 = vld [vmem:[%s11812_s5 + $0x390] ss:$8 sps:$4 sm:$0xff]   ;;  %v3105_v36 = vrot.slane %v3032_v41, 1 }
 0x489   :  { %3340 = vmatprep.subr.bf16.mxu0 %v8067_v11  ;;  %3718 = vmatprep.subr.bf16.mxu1 %v8070_v55  ;;  %v8116_v11 = vld [vmem:[%s11813_s6 + $0x390] ss:$8 sps:$4 sm:$0xff]   ;;  %v8121_v55 = vld [vmem:[%s11812_s5 + $0x3a4] ss:$8 sps:$4 sm:$0xff]  }
 0x48c   :  { %3341 = vmatpush1.bf16.msra.mxu0 %v8065_v46  ;;  %3719 = vmatpush1.bf16.msra.mxu1 %v8068_v50  ;;  %v3103_v46 = vrot.slane %v3031_v62, 1  ;;  %v3024_v50 = vld [vmem:[#allocation2 + $0x90] sm:$0x3] }
 0x48d   :  { %3342 = vmatprep.subr.bf16.mxu0 %v8073_v32  ;;  %3720 = vmatprep.subr.bf16.mxu1 %v8076_v16  ;;  %v8119_v32 = vld [vmem:[%s11812_s5 + $0x3a0] ss:$8 sps:$4 sm:$0xff]  }
 0x48e   :  { %v8122_v16 = vld [vmem:[%s11813_s6 + $0x3a0] ss:$8 sps:$4 sm:$0xff]  }
 0x490   :  { %3343 = vmatpush1.bf16.msra.mxu0 %v8071_v60  ;;  %3721 = vmatpush1.bf16.msra.mxu1 %v8074_v47  ;;  %v3030_v60 = vpack.c.bf16 %v3024_v50, %v3024_v50  ;;  %v8127_v47 = vld [vmem:[%s11812_s5 + $0x3b4] ss:$8 sps:$4 sm:$0xff]   ;;  %v8169_v50 = vld [vmem:[%s11812_s5 + $0x1a4] ss:$8 sps:$4 sm:$0xff]  }
 0x491   :  { %3344 = vmatprep.subr.bf16.mxu0 %v8079_v1  ;;  %3722 = vmatprep.subr.bf16.mxu1 %v8082_v61  ;;  %v8130_v1 = vld [vmem:[%s11813_s6 + $0x3b4] ss:$8 sps:$4 sm:$0xff]   ;;  %v3104_v61 = vsel %vm3085_vm8, %v3097_v53, %v3103_v46  ;;  %v8149_v53 = vld [vmem:[%s11812_s5 + $0x170] ss:$8 sps:$4 sm:$0xff]  }
 0x492   :  { %v8164_v46 = vld [vmem:[%s11813_s6 + $0x190] ss:$8 sps:$4 sm:$0xff]  }
 0x494   :  { %3345 = vmatpush1.bf16.msra.mxu0 %v8077_v3  ;;  %3723 = vmatpush1.bf16.msra.mxu1 %v8080_v58  ;;  %v8125_v3 = vld [vmem:[%s11812_s5 + $0x3b0] ss:$8 sps:$4 sm:$0xff]  }
 0x495   :  { %3346 = vmatprep.subr.bf16.mxu0 %v8085_v57  ;;  %3724 = vmatprep.subr.bf16.mxu1 %v8088_v59  ;;  %v8128_v58 = vld [vmem:[%s11813_s6 + $0x3b0] ss:$8 sps:$4 sm:$0xff]   ;;  %v3101_v57 = vrot.slane %v3030_v60, 1  ;;  %v8133_v59 = vld [vmem:[%s11812_s5 + $0x144] ss:$8 sps:$4 sm:$0xff]  }
 0x496   :  { %v8175_v60 = vld [vmem:[%s11812_s5 + $0x1b4] ss:$8 sps:$4 sm:$0xff]  }
 0x498   :  { %3347 = vmatpush1.bf16.msra.mxu0 %v8083_v29  ;;  %3725 = vmatpush1.bf16.msra.mxu1 %v8086_v51  ;;  %v8136_v29 = vld [vmem:[%s11813_s6 + $0x144] ss:$8 sps:$4 sm:$0xff]   ;;  %v3102_v51 = vsel %vm3085_vm8, %v3095_v34, %v3101_v57  ;;  %v8179_v57 = vld [vmem:[%s11812_s5 + $0x1c0] ss:$8 sps:$4 sm:$0xff]  }
 0x499   :  { %3348 = vmatprep.subr.bf16.mxu0 %v8091_v54  ;;  %3726 = vmatprep.subr.bf16.mxu1 %v8094_v56  ;;  %v8131_v54 = vld [vmem:[%s11812_s5 + $0x140] ss:$8 sps:$4 sm:$0xff]  }
 0x49a   :  { %v8134_v56 = vld [vmem:[%s11813_s6 + $0x140] ss:$8 sps:$4 sm:$0xff]  }
 0x49c   :  { %3349 = vmatpush1.bf16.msra.mxu0 %v8089_v38  ;;  %3727 = vmatpush1.bf16.msra.mxu1 %v8092_v28  ;;  %v8139_v38 = vld [vmem:[%s11812_s5 + $0x154] ss:$8 sps:$4 sm:$0xff]  }
 0x49d   :  { %3350 = vmatprep.subr.bf16.mxu0 %v8097_v7  ;;  %3728 = vmatprep.subr.bf16.mxu1 %v8100_v45  ;;  %v8142_v28 = vld [vmem:[%s11813_s6 + $0x154] ss:$8 sps:$4 sm:$0xff]   ;;  %v8137_v45 = vld [vmem:[%s11812_s5 + $0x150] ss:$8 sps:$4 sm:$0xff]  }
 0x49e   :  { %v4173_v7 = vld [vmem:[#allocation2 + $0xb0] sm:$0xfe] }
 0x4a0   :  { %3351 = vmatpush1.bf16.msra.mxu0 %v8095_v24  ;;  %3729 = vmatpush1.bf16.msra.mxu1 %v8098_v63  ;;  %v10456_v24 = vld [vmem:[#allocation2 + $0xc8] sm:$0xff] }
 0x4a1   :  { %3352 = vmatprep.subr.bf16.mxu0 %v8103_v14  ;;  %3730 = vmatprep.subr.bf16.mxu1 %v8106_v5  ;;  %v4179_v63 = vpack.c.bf16 %v10456_v24, %v4173_v7  ;;  %v8148_v14 = vld [vmem:[%s11813_s6 + $0x164] ss:$8 sps:$4 sm:$0xff]   ;;  %v3099_v5 = vrot.slane %v9802_v42, 1  ;;  %v8154_v42 = vld [vmem:[%s11813_s6 + $0x174] ss:$8 sps:$4 sm:$0xff]  }
 0x4a2   :  { %v8191_v7 = vld [vmem:[%s11812_s5 + $0x1e0] ss:$8 sps:$4 sm:$0xff]  }
 0x4a3   :  { %v3106_v62 = vsel %vm3085_vm8, %v3099_v5, %v3105_v36  ;;  %v8215_v36 = vld [vmem:[%s11812_s5 + $0x220] ss:$8 sps:$4 sm:$0xff]  }
 0x4a4   :  { %3353 = vmatpush1.bf16.msra.mxu0 %v8101_v35  ;;  %3731 = vmatpush1.bf16.msra.mxu1 %v8104_v30  ;;  %v8146_v35 = vld [vmem:[%s11813_s6 + $0x160] ss:$8 sps:$4 sm:$0xff]   ;;  %v4239_v30 = vshll.u32 %v4179_v63, 16 }
 0x4a5   :  { %3385 = vmatprep.subr.bf16.mxu0 %v8109_v48  ;;  %3763 = vmatprep.subr.bf16.mxu1 %v8112_v9  ;;  %v8151_v48 = vld [vmem:[%s11812_s5 + $0x174] ss:$8 sps:$4 sm:$0xff]   ;;  %v3100_v9 = vsel %vm3085_vm8, %v3093_v17, %v3099_v5  ;;  %v8160_v17 = vld [vmem:[%s11813_s6 + $0x184] ss:$8 sps:$4 sm:$0xff]  }
 0x4a6   :  { %v8205_v5 = vld [vmem:[%s11812_s5 + $0x204] ss:$8 sps:$4 sm:$0xff]  }
 0x4a7   :  { %3355 = vmatmul.mubr.bf16.vlgmr.msra.gmra.mrb[12].mxu0 %v3088_v23  ;;  %3733 = vmatmul.mubr.bf16.vlgmr.msra.gmra.mrb[12].mxu1 %v3088_v23  ;;  %v4244_v23 = vshll.u32 %v9792_v20, 16 }
 0x4a8   :  { %3364 = vmatprep.mubr.bf16.mxu0 %v3098_v33  ;;  %3386 = vmatpush1.bf16.msra.mxu0 %v8107_v13  ;;  %v4241_v13 = vrot.slane %v4239_v30, 1  ;;  %v8206_v30 = vld [vmem:[%s11813_s6 + $0x200] ss:$8 sps:$4 sm:$0xff]  }
 0x4a9   :  { %3742 = vmatprep.mubr.bf16.mxu1 %v3098_v33  ;;  %3764 = vmatpush1.bf16.msra.mxu1 %v8110_v49  ;;  %v4237_v49 = vshrl.u32 %v4179_v63, 16  ;;  %v8202_v63 = vld [vmem:[%s11813_s6 + $0x1f4] ss:$8 sps:$4 sm:$0xff]  }
 0x4aa   :  { %3387 = vmatprep.subr.bf16.mxu0 %v8115_v25  ;;  %3765 = vmatprep.subr.bf16.mxu1 %v8118_v0  ;;  %v8155_v25 = vld [vmem:[%s11812_s5 + $0x180] ss:$8 sps:$4 sm:$0xff]  }
 0x4ab   :  { %v8158_v0 = vld [vmem:[%s11813_s6 + $0x180] ss:$8 sps:$4 sm:$0xff]   ;;  %v4242_v33 = vor.u32 %v4241_v13, %v4237_v49  ;;  %v8217_v13 = vld [vmem:[%s11812_s5 + $0x224] ss:$8 sps:$4 sm:$0xff]  }
 0x4ac   :  { %3388 = vmatpush1.bf16.msra.mxu0 %v8113_v40  ;;  %v10507_v40 = vrot.slane %v4244_v23, 1  ;;  %v8218_v49 = vld [vmem:[%s11813_s6 + $0x220] ss:$8 sps:$4 sm:$0xff]   ;;  %v8223_v23 = vld [vmem:[%s11812_s5 + $0x234] ss:$8 sps:$4 sm:$0xff]  }
 0x4ad   :  { %3766 = vmatpush1.bf16.msra.mxu1 %v8116_v11  ;;  %3389 = vmatprep.subr.bf16.mxu0 %v8121_v55  ;;  %v8163_v11 = vld [vmem:[%s11812_s5 + $0x194] ss:$8 sps:$4 sm:$0xff]  }
 0x4ae   :  { %3767 = vmatprep.subr.bf16.mxu1 %v8124_v31  ;;  %v8166_v55 = vld [vmem:[%s11813_s6 + $0x194] ss:$8 sps:$4 sm:$0xff]   ;;  %v4247_v34 = vsel %vm1570_vm6, %v4242_v33, %v10507_v40  ;;  %v8161_v31 = vld [vmem:[%s11812_s5 + $0x190] ss:$8 sps:$4 sm:$0xff]  }
 0x4af   :  { %3365 = vmatmul.mubr.bf16.gmra.mrb[16].mxu0 %v3096_v22  ;;  %3743 = vmatmul.mubr.bf16.gmra.mrb[16].mxu1 %v3096_v22  ;;  %v8170_v22 = vld [vmem:[%s11813_s6 + $0x1a0] ss:$8 sps:$4 sm:$0xff]  }
 0x4b0   :  { %3374 = vmatprep.mubr.bf16.mxu0 %v3104_v61  ;;  %3752 = vmatprep.mubr.bf16.mxu1 %v3104_v61  ;;  %v8176_v61 = vld [vmem:[%s11813_s6 + $0x1b0] ss:$8 sps:$4 sm:$0xff]  }
 0x4b1   :  { %3390 = vmatpush1.bf16.msra.mxu0 %v8119_v32  ;;  %3768 = vmatpush1.bf16.msra.mxu1 %v8122_v16  ;;  %v8172_v32 = vld [vmem:[%s11813_s6 + $0x1a4] ss:$8 sps:$4 sm:$0xff]   ;;  %v8167_v16 = vld [vmem:[%s11812_s5 + $0x1a0] ss:$8 sps:$4 sm:$0xff]  }
 0x4b2   :  { %3391 = vmatprep.subr.bf16.mxu0 %v8127_v47  ;;  %3769 = vmatprep.subr.bf16.mxu1 %v8130_v1  ;;  %v8178_v47 = vld [vmem:[%s11813_s6 + $0x1b4] ss:$8 sps:$4 sm:$0xff]   ;;  %v8173_v1 = vld [vmem:[%s11812_s5 + $0x1b0] ss:$8 sps:$4 sm:$0xff]  }
 0x4b5   :  { %3392 = vmatpush1.bf16.msra.mxu0 %v8125_v3  ;;  %3770 = vmatpush1.bf16.msra.mxu1 %v8128_v58  ;;  %v8181_v3 = vld [vmem:[%s11812_s5 + $0x1c4] ss:$8 sps:$4 sm:$0xff]  }
 0x4b6   :  { %4523 = vmatprep.subr.bf16.mxu0 %v8133_v59  ;;  %5222 = vmatprep.subr.bf16.mxu1 %v8136_v29  ;;  %v8184_v58 = vld [vmem:[%s11813_s6 + $0x1c4] ss:$8 sps:$4 sm:$0xff]   ;;  %v8182_v59 = vld [vmem:[%s11813_s6 + $0x1c0] ss:$8 sps:$4 sm:$0xff]   ;;  %v8187_v29 = vld [vmem:[%s11812_s5 + $0x1d4] ss:$8 sps:$4 sm:$0xff]  }
 0x4b7   :  { %3375 = vmatmul.mubr.bf16.gmra.mrb[20].mxu0 %v3102_v51  ;;  %3753 = vmatmul.mubr.bf16.gmra.mrb[20].mxu1 %v3102_v51  ;;  %v8190_v51 = vld [vmem:[%s11813_s6 + $0x1d4] ss:$8 sps:$4 sm:$0xff]  }
 0x4b8   :  { %3417 = vmatprep.mubr.bf16.mxu0 %v8637_v6  ;;  %3795 = vmatprep.mubr.bf16.mxu1 %v8637_v6 }
 0x4bf   :  { %6937 = vmatmul.mubr.msk.bf16.vlgmr.msra.gmra.mrb[12].mxu0 %vm97_vm0, %v9754_v8  ;;  %6980 = vmatmul.mubr.msk.bf16.vlgmr.msra.gmra.mrb[12].mxu1 %vm97_vm0, %v9754_v8  ;;  %v8145_v8 = vld [vmem:[%s11812_s5 + $0x164] ss:$8 sps:$4 sm:$0xff]  }
 0x4c0   :  { %4524 = vmatpush1.bf16.msra.mxu0 %v8131_v54  ;;  %5223 = vmatpush1.bf16.msra.mxu1 %v8134_v56  ;;  %v8185_v54 = vld [vmem:[%s11812_s5 + $0x1d0] ss:$8 sps:$4 sm:$0xff]  }
 0x4c1   :  { %4525 = vmatprep.subr.bf16.mxu0 %v8139_v38  ;;  %5224 = vmatprep.subr.bf16.mxu1 %v8142_v28  ;;  %v8188_v56 = vld [vmem:[%s11813_s6 + $0x1d0] ss:$8 sps:$4 sm:$0xff]   ;;  %v8193_v38 = vld [vmem:[%s11812_s5 + $0x1e4] ss:$8 sps:$4 sm:$0xff]  }
 0x4c2   :  { %3427 = vmatprep.mubr.bf16.mxu0 %v8637_v6  ;;  %3805 = vmatprep.mubr.bf16.mxu1 %v8637_v6  ;;  %v8196_v28 = vld [vmem:[%s11813_s6 + $0x1e4] ss:$8 sps:$4 sm:$0xff]  }
 0x4c4   :  { %4526 = vmatpush1.bf16.msra.mxu0 %v8137_v45  ;;  %5225 = vmatpush1.bf16.msra.mxu1 %v8140_v10  ;;  %v8194_v45 = vld [vmem:[%s11813_s6 + $0x1e0] ss:$8 sps:$4 sm:$0xff]   ;;  %v8199_v10 = vld [vmem:[%s11812_s5 + $0x1f4] ss:$8 sps:$4 sm:$0xff]  }
 0x4c5   :  { %4527 = vmatprep.subr.bf16.mxu0 %v8145_v8  ;;  %5226 = vmatprep.subr.bf16.mxu1 %v8148_v14  ;;  %v8197_v8 = vld [vmem:[%s11812_s5 + $0x1f0] ss:$8 sps:$4 sm:$0xff]  }
 0x4c6   :  { %v8200_v14 = vld [vmem:[%s11813_s6 + $0x1f0] ss:$8 sps:$4 sm:$0xff]  }
 0x4c7   :  { %6938 = vmatmul.mubr.msk.bf16.gmra.mrb[16].mxu0 %vm97_vm0, %v3100_v9  ;;  %6981 = vmatmul.mubr.msk.bf16.gmra.mrb[16].mxu1 %vm97_vm0, %v3100_v9  ;;  %v10615_v9 = vld [vmem:[#allocation2 + $0xc0] sm:$0xff] }
 0x4c8   :  { %4528 = vmatpush1.bf16.msra.mxu0 %v8143_v4  ;;  %5227 = vmatpush1.bf16.msra.mxu1 %v8146_v35  ;;  %v4172_v4 = vld [vmem:[#allocation2 + $0xa8] sm:$0xfe] }
 0x4c9   :  { %4529 = vmatprep.subr.bf16.mxu0 %v8151_v48  ;;  %5228 = vmatprep.subr.bf16.mxu1 %v8154_v42  ;;  %v8203_v35 = vld [vmem:[%s11812_s5 + $0x200] ss:$8 sps:$4 sm:$0xff]   ;;  %v8211_v48 = vld [vmem:[%s11812_s5 + $0x214] ss:$8 sps:$4 sm:$0xff]   ;;  %v4178_v41 = vpack.c.bf16 %v10615_v9, %v4172_v4 }
 0x4ca   :  { %3437 = vmatprep.mubr.bf16.mxu0 %v8637_v6  ;;  %3815 = vmatprep.mubr.bf16.mxu1 %v8637_v6  ;;  %v8214_v42 = vld [vmem:[%s11813_s6 + $0x214] ss:$8 sps:$4 sm:$0xff]  }
 0x4cb   :  { %v4225_v33 = vshrl.u32 %v4178_v41, 16 }
 0x4cc   :  { %4530 = vmatpush1.bf16.msra.mxu0 %v8149_v53  ;;  %5229 = vmatpush1.bf16.msra.mxu1 %v8152_v2  ;;  %v8209_v53 = vld [vmem:[%s11812_s5 + $0x210] ss:$8 sps:$4 sm:$0xff]  }
 0x4cd   :  { %4531 = vmatprep.subr.bf16.mxu0 %v8157_v37  ;;  %5230 = vmatprep.subr.bf16.mxu1 %v8160_v17  ;;  %v8212_v2 = vld [vmem:[%s11813_s6 + $0x210] ss:$8 sps:$4 sm:$0xff]   ;;  %v8220_v37 = vld [vmem:[%s11813_s6 + $0x224] ss:$8 sps:$4 sm:$0xff]   ;;  %v4227_v17 = vshll.u32 %v4178_v41, 16 }
 0x4ce   :  { %v8247_v41 = vld [vmem:[%s11812_s5 + $0x274] ss:$8 sps:$4 sm:$0xff]  }
 0x4cf   :  { %6939 = vmatmul.mubr.msk.bf16.gmra.mrb[20].mxu0 %vm97_vm0, %v3106_v62  ;;  %6982 = vmatmul.mubr.msk.bf16.gmra.mrb[20].mxu1 %vm97_vm0, %v3106_v62  ;;  %v4232_v62 = vshll.u32 %v9854_v12, 16 }
 0x4d0   :  { %4532 = vmatpush1.bf16.msra.mxu0 %v8155_v25  ;;  %5231 = vmatpush1.bf16.msra.mxu1 %v8158_v0  ;;  %v8226_v25 = vld [vmem:[%s11813_s6 + $0x234] ss:$8 sps:$4 sm:$0xff]   ;;  %v4229_v0 = vrot.slane %v4227_v17, 1  ;;  %v4284_v17 = vshrl.u32 %v9908_v18, 16 }
 0x4d1   :  { %4555 = vmatprep.mubr.bf16.mxu0 %v4247_v34  ;;  %5254 = vmatprep.mubr.bf16.mxu1 %v4247_v34  ;;  %v4176_v34 = vld [vmem:[#allocation2 + $0x140] sm:$0x1] }
 0x4d2   :  { %4533 = vmatprep.subr.bf16.mxu0 %v8163_v11  ;;  %5232 = vmatprep.subr.bf16.mxu1 %v8166_v55  ;;  %v8221_v11 = vld [vmem:[%s11812_s5 + $0x230] ss:$8 sps:$4 sm:$0xff]  }
 0x4d3   :  { %v8224_v55 = vld [vmem:[%s11813_s6 + $0x230] ss:$8 sps:$4 sm:$0xff]  }
 0x4d4   :  { %4534 = vmatpush1.bf16.msra.mxu0 %v8161_v31  ;;  %5233 = vmatpush1.bf16.msra.mxu1 %v8164_v46  ;;  %v8229_v31 = vld [vmem:[%s11812_s5 + $0x244] ss:$8 sps:$4 sm:$0xff]   ;;  %v4268_v46 = vshrl.u32 %v9792_v20, 16 }
 0x4d5   :  { %4535 = vmatprep.subr.bf16.mxu0 %v8169_v50  ;;  %5234 = vmatprep.subr.bf16.mxu1 %v8172_v32  ;;  %v4272_v50 = vshll.u32 %v9872_v39, 16  ;;  %v8232_v32 = vld [vmem:[%s11813_s6 + $0x244] ss:$8 sps:$4 sm:$0xff]  }
 0x4d8   :  { %4536 = vmatpush1.bf16.msra.mxu0 %v8167_v16  ;;  %5235 = vmatpush1.bf16.msra.mxu1 %v8170_v22  ;;  %v4230_v16 = vor.u32 %v4229_v0, %v4225_v33  ;;  %v4270_v22 = vor.u32 %v4268_v46, %v10507_v40  ;;  %v8235_v40 = vld [vmem:[%s11812_s5 + $0x254] ss:$8 sps:$4 sm:$0xff]   ;;  %v8256_v0 = vld [vmem:[%s11813_s6 + $0x4] ss:$8 sps:$4 sm:$0xff]  }
 0x4d9   :  { %4537 = vmatprep.subr.bf16.mxu0 %v8175_v60  ;;  %5236 = vmatprep.subr.bf16.mxu1 %v8178_v47  ;;  %v4182_v60 = vpack.c.bf16 %v4176_v34, %v4176_v34  ;;  %v4234_v47 = vrot.slane %v4232_v62, 1  ;;  %v4079_v46 = vld [vmem:[#allocation2 + $0x118] sm:$0xff] }
 0x4dc   :  { %4538 = vmatpush1.bf16.msra.mxu0 %v8173_v1  ;;  %5237 = vmatpush1.bf16.msra.mxu1 %v8176_v61  ;;  %v8227_v1 = vld [vmem:[%s11812_s5 + $0x240] ss:$8 sps:$4 sm:$0xff]   ;;  %v4274_v61 = vrot.slane %v4272_v50, 1  ;;  %v4082_v50 = vld [vmem:[#allocation2 + $0x130] sm:$0xff] }
 0x4dd   :  { %4539 = vmatprep.subr.bf16.mxu0 %v8181_v3  ;;  %5238 = vmatprep.subr.bf16.mxu1 %v8184_v58  ;;  %v8230_v3 = vld [vmem:[%s11813_s6 + $0x240] ss:$8 sps:$4 sm:$0xff]   ;;  %v4235_v58 = vsel %vm1570_vm6, %v4230_v16, %v4234_v47 }
 0x4de   :  { %v8251_v16 = vld [vmem:[%s11812_s5] ss:$8 sps:$4 sm:$0xff]  }
 0x4e0   :  { %4540 = vmatpush1.bf16.msra.mxu0 %v8179_v57  ;;  %5239 = vmatpush1.bf16.msra.mxu1 %v8182_v59  ;;  %v8238_v57 = vld [vmem:[%s11813_s6 + $0x254] ss:$8 sps:$4 sm:$0xff]   ;;  %v4275_v59 = vsel %vm1570_vm6, %v4270_v22, %v4274_v61  ;;  %v8254_v22 = vld [vmem:[%s11813_s6] ss:$8 sps:$4 sm:$0xff]  }
 0x4e1   :  { %4541 = vmatprep.subr.bf16.mxu0 %v8187_v29  ;;  %5240 = vmatprep.subr.bf16.mxu1 %v8190_v51  ;;  %v4296_v29 = vshll.u32 %v4182_v60, 16  ;;  %v4175_v51 = vld [vmem:[#allocation2 + $0x138] sm:$0x1] }
 0x4e4   :  { %4542 = vmatpush1.bf16.msra.mxu0 %v8185_v54  ;;  %5241 = vmatpush1.bf16.msra.mxu1 %v8188_v56  ;;  %v8233_v54 = vld [vmem:[%s11812_s5 + $0x250] ss:$8 sps:$4 sm:$0xff]   ;;  %v4260_v56 = vshrl.u32 %v9854_v12, 16 }
 0x4e5   :  { %4543 = vmatprep.subr.bf16.mxu0 %v8193_v38  ;;  %5242 = vmatprep.subr.bf16.mxu1 %v8196_v28  ;;  %v4264_v38 = vshll.u32 %v9908_v18, 16  ;;  %v8236_v28 = vld [vmem:[%s11813_s6 + $0x250] ss:$8 sps:$4 sm:$0xff]  }
 0x4e8   :  { %4544 = vmatpush1.bf16.msra.mxu0 %v8191_v7  ;;  %5243 = vmatpush1.bf16.msra.mxu1 %v8194_v45  ;;  %v8241_v7 = vld [vmem:[%s11812_s5 + $0x264] ss:$8 sps:$4 sm:$0xff]   ;;  %v4262_v45 = vor.u32 %v4260_v56, %v4234_v47  ;;  %v10727_v47 = vpack.c.bf16 %v4082_v50, %v4079_v46 }
 0x4e9   :  { %4545 = vmatprep.subr.bf16.mxu0 %v8199_v10  ;;  %5244 = vmatprep.subr.bf16.mxu1 %v8202_v63  ;;  %v8244_v10 = vld [vmem:[%s11813_s6 + $0x264] ss:$8 sps:$4 sm:$0xff]   ;;  %v4181_v63 = vpack.c.bf16 %v4175_v51, %v4175_v51 }
 0x4ea   :  { %v8268_v51 = vld [vmem:[%s11813_s6 + $0x24] ss:$8 sps:$4 sm:$0xff]  }
 0x4eb   :  { %v8301_v46 = vld [vmem:[%s11812_s5 + $0x84] ss:$8 sps:$4 sm:$0xff]  }
 0x4ec   :  { %4546 = vmatpush1.bf16.msra.mxu0 %v8197_v8  ;;  %5245 = vmatpush1.bf16.msra.mxu1 %v8200_v14  ;;  %v4292_v8 = vshrl.u32 %v9872_v39, 16  ;;  %v4298_v14 = vrot.slane %v4296_v29, 1  ;;  %v8265_v29 = vld [vmem:[%s11812_s5 + $0x24] ss:$8 sps:$4 sm:$0xff]  }
 0x4ed   :  { %4547 = vmatprep.subr.bf16.mxu0 %v8205_v5  ;;  %5246 = vmatprep.subr.bf16.mxu1 %v8208_v15  ;;  %v4174_v5 = vld [vmem:[#allocation2 + $0xb8] sm:$0xfe]  ;;  %v4266_v15 = vrot.slane %v4264_v38, 1  ;;  %v8263_v38 = vld [vmem:[%s11812_s5 + $0x20] ss:$8 sps:$4 sm:$0xff]  }
 0x4ee   :  { %v4294_v4 = vor.u32 %v4292_v8, %v4274_v61  ;;  %v8262_v61 = vld [vmem:[%s11813_s6 + $0x14] ss:$8 sps:$4 sm:$0xff]   ;;  %v8304_v50 = vld [vmem:[%s11813_s6 + $0x84] ss:$8 sps:$4 sm:$0xff]  }
 0x4ef   :  { %v4286_v62 = vor.u32 %v4284_v17, %v4266_v15  ;;  %v8283_v17 = vld [vmem:[%s11812_s5 + $0x54] ss:$8 sps:$4 sm:$0xff]  }
 0x4f0   :  { %4548 = vmatpush1.bf16.msra.mxu0 %v8203_v35  ;;  %5247 = vmatpush1.bf16.msra.mxu1 %v8206_v30  ;;  %v8239_v35 = vld [vmem:[%s11812_s5 + $0x260] ss:$8 sps:$4 sm:$0xff]  }
 0x4f1   :  { %4549 = vmatprep.subr.bf16.mxu0 %v8211_v48  ;;  %5248 = vmatprep.subr.bf16.mxu1 %v8214_v42  ;;  %v8242_v30 = vld [vmem:[%s11813_s6 + $0x260] ss:$8 sps:$4 sm:$0xff]   ;;  %v4267_v48 = vsel %vm1570_vm6, %v4262_v45, %v4266_v15  ;;  %v4288_v42 = vshll.u32 %v4181_v63, 16  ;;  %v8274_v63 = vld [vmem:[%s11813_s6 + $0x34] ss:$8 sps:$4 sm:$0xff]   ;;  %v4300_v15 = vshrl.u32 %v10727_v47, 16 }
 0x4f4   :  { %4550 = vmatpush1.bf16.msra.mxu0 %v8209_v53  ;;  %5249 = vmatpush1.bf16.msra.mxu1 %v8212_v2  ;;  %v8250_v53 = vld [vmem:[%s11813_s6 + $0x274] ss:$8 sps:$4 sm:$0xff]  }
 0x4f5   :  { %4551 = vmatprep.subr.bf16.mxu0 %v8217_v13  ;;  %5250 = vmatprep.subr.bf16.mxu1 %v8220_v37  ;;  %v10700_v2 = vld [vmem:[#allocation2 + $0xd0] sm:$0xff]  ;;  %v4299_v37 = vsel %vm1570_vm6, %v4294_v4, %v4298_v14 }
 0x4f6   :  { %v4180_v13 = vpack.c.bf16 %v10700_v2, %v4174_v5  ;;  %v8269_v14 = vld [vmem:[%s11812_s5 + $0x30] ss:$8 sps:$4 sm:$0xff]  }
 0x4f7   :  { %v8272_v5 = vld [vmem:[%s11813_s6 + $0x30] ss:$8 sps:$4 sm:$0xff]  }
 0x4f8   :  { %4552 = vmatpush1.bf16.msra.mxu0 %v8215_v36  ;;  %5251 = vmatpush1.bf16.msra.mxu1 %v8218_v49  ;;  %v8245_v36 = vld [vmem:[%s11812_s5 + $0x270] ss:$8 sps:$4 sm:$0xff]   ;;  %v4251_v33 = vshll.u32 %v4180_v13, 16  ;;  %v4249_v34 = vshrl.u32 %v4180_v13, 16 }
 0x4f9   :  { %4553 = vmatprep.subr.bf16.mxu0 %v8223_v23  ;;  %5252 = vmatprep.subr.bf16.mxu1 %v8226_v25  ;;  %v8248_v49 = vld [vmem:[%s11813_s6 + $0x270] ss:$8 sps:$4 sm:$0xff]   ;;  %v4290_v23 = vrot.slane %v4288_v42, 1  ;;  %v8253_v25 = vld [vmem:[%s11812_s5 + $0x4] ss:$8 sps:$4 sm:$0xff]  }
 0x4fa   :  { %v8275_v42 = vld [vmem:[%s11812_s5 + $0x40] ss:$8 sps:$4 sm:$0xff]   ;;  %v4066_v13 = vld [vmem:[#allocation2 + $0xb0] sm:$0xff] }
 0x4fc   :  { %4554 = vmatpush1.bf16.msra.mxu0 %v8221_v11  ;;  %5253 = vmatpush1.bf16.msra.mxu1 %v8224_v55  ;;  %v4291_v11 = vsel %vm1570_vm6, %v4286_v62, %v4290_v23  ;;  %v4253_v55 = vrot.slane %v4251_v33, 1  ;;  %v8281_v23 = vld [vmem:[%s11812_s5 + $0x50] ss:$8 sps:$4 sm:$0xff]   ;;  %v8287_v33 = vld [vmem:[%s11812_s5 + $0x60] ss:$8 sps:$4 sm:$0xff]  }
 0x4fd   :  { %4586 = vmatprep.subr.bf16.mxu0 %v8229_v31  ;;  %5285 = vmatprep.subr.bf16.mxu1 %v8232_v32  ;;  %v4256_v31 = vshll.u32 %v10012_v19, 16  ;;  %v8290_v62 = vld [vmem:[%s11813_s6 + $0x60] ss:$8 sps:$4 sm:$0xff]  }
 0x4fe   :  { %v4254_v32 = vor.u32 %v4253_v55, %v4249_v34  ;;  %v8298_v55 = vld [vmem:[%s11813_s6 + $0x74] ss:$8 sps:$4 sm:$0xff]   ;;  %v8293_v34 = vld [vmem:[%s11812_s5 + $0x70] ss:$8 sps:$4 sm:$0xff]  }
 0x4ff   :  { %4556 = vmatmul.mubr.bf16.vlgmr.msra.gmra.mrb[24].mxu0 %v4235_v58  ;;  %5255 = vmatmul.mubr.bf16.vlgmr.msra.gmra.mrb[24].mxu1 %v4235_v58  ;;  %v4258_v60 = vrot.slane %v4256_v31, 1  ;;  %v8257_v58 = vld [vmem:[%s11812_s5 + $0x10] ss:$8 sps:$4 sm:$0xff]  }
 0x500   :  { %4565 = vmatprep.mubr.bf16.mxu0 %v4275_v59  ;;  %4587 = vmatpush1.bf16.msra.mxu0 %v8227_v1  ;;  %v8259_v1 = vld [vmem:[%s11812_s5 + $0x14] ss:$8 sps:$4 sm:$0xff]   ;;  %v8296_v31 = vld [vmem:[%s11813_s6 + $0x70] ss:$8 sps:$4 sm:$0xff]  }
 0x501   :  { %5264 = vmatprep.mubr.bf16.mxu1 %v4275_v59  ;;  %5286 = vmatpush1.bf16.msra.mxu1 %v8230_v3  ;;  %v4259_v3 = vsel %vm1570_vm6, %v4254_v32, %v4258_v60  ;;  %v4280_v59 = vshll.u32 %v10727_v47, 16  ;;  %v8299_v32 = vld [vmem:[%s11812_s5 + $0x80] ss:$8 sps:$4 sm:$0xff]  }
 0x502   :  { %4588 = vmatprep.subr.bf16.mxu0 %v8235_v40  ;;  %5287 = vmatprep.subr.bf16.mxu1 %v8238_v57  ;;  %v8260_v40 = vld [vmem:[%s11813_s6 + $0x10] ss:$8 sps:$4 sm:$0xff]   ;;  %v4276_v57 = vshrl.u32 %v10012_v19, 16 }
 0x504   :  { %4589 = vmatpush1.bf16.msra.mxu0 %v8233_v54  ;;  %v4177_v54 = vld [vmem:[#allocation2 + $0x148] sm:$0x1]  ;;  %v4278_v56 = vor.u32 %v4276_v57, %v4258_v60  ;;  %v8310_v60 = vld [vmem:[%s11813_s6 + $0x94] ss:$8 sps:$4 sm:$0xff]  }
 0x505   :  { %5288 = vmatpush1.bf16.msra.mxu1 %v8236_v28  ;;  %4590 = vmatprep.subr.bf16.mxu0 %v8241_v7  ;;  %v8266_v28 = vld [vmem:[%s11813_s6 + $0x20] ss:$8 sps:$4 sm:$0xff]   ;;  %v4282_v7 = vrot.slane %v4280_v59, 1  ;;  %v4183_v45 = vpack.c.bf16 %v4177_v54, %v4177_v54  ;;  %v8319_v59 = vld [vmem:[%s11812_s5 + $0xb4] ss:$8 sps:$4 sm:$0xff]  }
 0x506   :  { %5289 = vmatprep.subr.bf16.mxu1 %v8244_v10  ;;  %v8271_v10 = vld [vmem:[%s11812_s5 + $0x34] ss:$8 sps:$4 sm:$0xff]   ;;  %v8314_v57 = vld [vmem:[%s11813_s6 + $0xa0] ss:$8 sps:$4 sm:$0xff]   ;;  %v8320_v54 = vld [vmem:[%s11813_s6 + $0xb0] ss:$8 sps:$4 sm:$0xff]  }
 0x507   :  { %4566 = vmatmul.mubr.bf16.gmra.mrb[28].mxu0 %v4267_v48  ;;  %5265 = vmatmul.mubr.bf16.gmra.mrb[28].mxu1 %v4267_v48  ;;  %v4283_v8 = vsel %vm1570_vm6, %v4278_v56, %v4282_v7  ;;  %v4304_v4 = vshll.u32 %v4183_v45, 16  ;;  %v4302_v48 = vor.u32 %v4300_v15, %v4282_v7  ;;  %v8325_v56 = vld [vmem:[%s11812_s5 + $0xc4] ss:$8 sps:$4 sm:$0xff]   ;;  %v8326_v7 = vld [vmem:[%s11813_s6 + $0xc0] ss:$8 sps:$4 sm:$0xff]  }
 0x508   :  { %4575 = vmatprep.mubr.bf16.mxu0 %v4299_v37  ;;  %5274 = vmatprep.mubr.bf16.mxu1 %v4299_v37  ;;  %v8331_v45 = vld [vmem:[%s11812_s5 + $0xd4] ss:$8 sps:$4 sm:$0xff]   ;;  %v8335_v15 = vld [vmem:[%s11812_s5 + $0xe0] ss:$8 sps:$4 sm:$0xff]  }
 0x509   :  { %4591 = vmatpush1.bf16.msra.mxu0 %v8239_v35  ;;  %5290 = vmatpush1.bf16.msra.mxu1 %v8242_v30  ;;  %v8277_v35 = vld [vmem:[%s11812_s5 + $0x44] ss:$8 sps:$4 sm:$0xff]  }
 0x50a   :  { %4592 = vmatprep.subr.bf16.mxu0 %v8247_v41  ;;  %5291 = vmatprep.subr.bf16.mxu1 %v8250_v53  ;;  %v8280_v30 = vld [vmem:[%s11813_s6 + $0x44] ss:$8 sps:$4 sm:$0xff]   ;;  %v8278_v41 = vld [vmem:[%s11813_s6 + $0x40] ss:$8 sps:$4 sm:$0xff]   ;;  %v4306_v53 = vrot.slane %v4304_v4, 1 }
 0x50b   :  { %v8338_v4 = vld [vmem:[%s11813_s6 + $0xe0] ss:$8 sps:$4 sm:$0xff]  }
 0x50c   :  { %v4307_v37 = vsel %vm1570_vm6, %v4302_v48, %v4306_v53  ;;  %v8341_v48 = vld [vmem:[%s11812_s5 + $0xf0] ss:$8 sps:$4 sm:$0xff]   ;;  %v8352_v53 = vld [vmem:[%s11813_s6 + $0x104] ss:$8 sps:$4 sm:$0xff]  }
 0x50d   :  { %4593 = vmatpush1.bf16.msra.mxu0 %v8245_v36  ;;  %5292 = vmatpush1.bf16.msra.mxu1 %v8248_v49  ;;  %v8286_v36 = vld [vmem:[%s11813_s6 + $0x54] ss:$8 sps:$4 sm:$0xff]   ;;  %v4084_v49 = vpack.c.bf16 %v10456_v24, %v4066_v13  ;;  %v8292_v24 = vld [vmem:[%s11813_s6 + $0x64] ss:$8 sps:$4 sm:$0xff]  }
 0x50e   :  { %4856 = vmatprep.subr.bf16.mxu0 %v8253_v25  ;;  %5548 = vmatprep.subr.bf16.mxu1 %v8256_v0  ;;  %v8284_v25 = vld [vmem:[%s11813_s6 + $0x50] ss:$8 sps:$4 sm:$0xff]   ;;  %v8289_v0 = vld [vmem:[%s11812_s5 + $0x64] ss:$8 sps:$4 sm:$0xff]  }
 0x50f   :  { %4576 = vmatmul.mubr.bf16.gmra.mrb[32].mxu0 %v4291_v11  ;;  %5275 = vmatmul.mubr.bf16.gmra.mrb[32].mxu1 %v4291_v11  ;;  %v8295_v11 = vld [vmem:[%s11812_s5 + $0x74] ss:$8 sps:$4 sm:$0xff]   ;;  %v4065_v13 = vld [vmem:[#allocation2 + $0xa8] sm:$0xff] }
 0x510   :  { %4618 = vmatprep.mubr.bf16.mxu0 %v8637_v6  ;;  %5317 = vmatprep.mubr.bf16.mxu1 %v8637_v6 }
 0x517   :  { %7023 = vmatmul.mubr.msk.bf16.vlgmr.msra.gmra.mrb[24].mxu0 %vm97_vm0, %v4259_v3  ;;  %7109 = vmatmul.mubr.msk.bf16.vlgmr.msra.gmra.mrb[24].mxu1 %vm97_vm0, %v4259_v3  ;;  %v8313_v3 = vld [vmem:[%s11812_s5 + $0xa4] ss:$8 sps:$4 sm:$0xff]  }
 0x518   :  { %4857 = vmatpush1.bf16.msra.mxu0 %v8251_v16  ;;  %5549 = vmatpush1.bf16.msra.mxu1 %v8254_v22  ;;  %v8302_v16 = vld [vmem:[%s11813_s6 + $0x80] ss:$8 sps:$4 sm:$0xff]   ;;  %v8307_v22 = vld [vmem:[%s11812_s5 + $0x94] ss:$8 sps:$4 sm:$0xff]  }
 0x519   :  { %4858 = vmatprep.subr.bf16.mxu0 %v8259_v1  ;;  %5550 = vmatprep.subr.bf16.mxu1 %v8262_v61  ;;  %v8305_v1 = vld [vmem:[%s11812_s5 + $0x90] ss:$8 sps:$4 sm:$0xff]  }
 0x51a   :  { %4628 = vmatprep.mubr.bf16.mxu0 %v8637_v6  ;;  %5327 = vmatprep.mubr.bf16.mxu1 %v8637_v6  ;;  %v8308_v61 = vld [vmem:[%s11813_s6 + $0x90] ss:$8 sps:$4 sm:$0xff]  }
 0x51c   :  { %4859 = vmatpush1.bf16.msra.mxu0 %v8257_v58  ;;  %5551 = vmatpush1.bf16.msra.mxu1 %v8260_v40  ;;  %v8316_v58 = vld [vmem:[%s11813_s6 + $0xa4] ss:$8 sps:$4 sm:$0xff]   ;;  %v8311_v40 = vld [vmem:[%s11812_s5 + $0xa0] ss:$8 sps:$4 sm:$0xff]  }
 0x51d   :  { %4860 = vmatprep.subr.bf16.mxu0 %v8265_v29  ;;  %5552 = vmatprep.subr.bf16.mxu1 %v8268_v51  ;;  %v8322_v29 = vld [vmem:[%s11813_s6 + $0xb4] ss:$8 sps:$4 sm:$0xff]   ;;  %v8317_v51 = vld [vmem:[%s11812_s5 + $0xb0] ss:$8 sps:$4 sm:$0xff]  }
 0x51f   :  { %7024 = vmatmul.mubr.msk.bf16.gmra.mrb[28].mxu0 %vm97_vm0, %v4283_v8  ;;  %7110 = vmatmul.mubr.msk.bf16.gmra.mrb[28].mxu1 %vm97_vm0, %v4283_v8  ;;  %v8332_v8 = vld [vmem:[%s11813_s6 + $0xd0] ss:$8 sps:$4 sm:$0xff]  }
 0x520   :  { %4861 = vmatpush1.bf16.msra.mxu0 %v8263_v38  ;;  %5553 = vmatpush1.bf16.msra.mxu1 %v8266_v28  ;;  %v8328_v38 = vld [vmem:[%s11813_s6 + $0xc4] ss:$8 sps:$4 sm:$0xff]   ;;  %v8323_v28 = vld [vmem:[%s11812_s5 + $0xc0] ss:$8 sps:$4 sm:$0xff]  }
 0x521   :  { %4862 = vmatprep.subr.bf16.mxu0 %v8271_v10  ;;  %5554 = vmatprep.subr.bf16.mxu1 %v8274_v63  ;;  %v8334_v10 = vld [vmem:[%s11813_s6 + $0xd4] ss:$8 sps:$4 sm:$0xff]   ;;  %v8329_v63 = vld [vmem:[%s11812_s5 + $0xd0] ss:$8 sps:$4 sm:$0xff]  }
 0x522   :  { %4638 = vmatprep.mubr.bf16.mxu0 %v8637_v6  ;;  %5337 = vmatprep.mubr.bf16.mxu1 %v8637_v6 }
 0x524   :  { %4863 = vmatpush1.bf16.msra.mxu0 %v8269_v14  ;;  %5555 = vmatpush1.bf16.msra.mxu1 %v8272_v5  ;;  %v8337_v14 = vld [vmem:[%s11812_s5 + $0xe4] ss:$8 sps:$4 sm:$0xff]  }
 0x525   :  { %4864 = vmatprep.subr.bf16.mxu0 %v8277_v35  ;;  %5556 = vmatprep.subr.bf16.mxu1 %v8280_v30  ;;  %v8340_v5 = vld [vmem:[%s11813_s6 + $0xe4] ss:$8 sps:$4 sm:$0xff]   ;;  %v8343_v35 = vld [vmem:[%s11812_s5 + $0xf4] ss:$8 sps:$4 sm:$0xff]  }
 0x526   :  { %v8346_v30 = vld [vmem:[%s11813_s6 + $0xf4] ss:$8 sps:$4 sm:$0xff]  }
 0x527   :  { %7025 = vmatmul.mubr.msk.bf16.gmra.mrb[32].mxu0 %vm97_vm0, %v4307_v37  ;;  %7111 = vmatmul.mubr.msk.bf16.gmra.mrb[32].mxu1 %vm97_vm0, %v4307_v37  ;;  %v8347_v37 = vld [vmem:[%s11812_s5 + $0x100] ss:$8 sps:$4 sm:$0xff]  }
 0x528   :  { %4865 = vmatpush1.bf16.msra.mxu0 %v8275_v42  ;;  %5557 = vmatpush1.bf16.msra.mxu1 %v8278_v41  ;;  %v8344_v42 = vld [vmem:[%s11813_s6 + $0xf0] ss:$8 sps:$4 sm:$0xff]   ;;  %v8349_v41 = vld [vmem:[%s11812_s5 + $0x104] ss:$8 sps:$4 sm:$0xff]  }
 0x529   :  { %4888 = vmatprep.mubr.bf16.mxu0 %v4084_v49  ;;  %5580 = vmatprep.mubr.bf16.mxu1 %v4084_v49  ;;  %v8355_v49 = vld [vmem:[%s11812_s5 + $0x114] ss:$8 sps:$4 sm:$0xff]  }
 0x52a   :  { %4866 = vmatprep.subr.bf16.mxu0 %v8283_v17  ;;  %5558 = vmatprep.subr.bf16.mxu1 %v8286_v36  ;;  %v4083_v17 = vpack.c.bf16 %v10615_v9, %v4065_v13  ;;  %v8350_v36 = vld [vmem:[%s11813_s6 + $0x100] ss:$8 sps:$4 sm:$0xff]   ;;  %v8353_v9 = vld [vmem:[%s11812_s5 + $0x110] ss:$8 sps:$4 sm:$0xff]  }
 0x52b   :  { %v8419_v13 = vld [vmem:[%s11812_s5 + $0x300] ss:$8 sps:$4 sm:$0xff]  }
 0x52c   :  { %4867 = vmatpush1.bf16.msra.mxu0 %v8281_v23  ;;  %5559 = vmatpush1.bf16.msra.mxu1 %v8284_v25  ;;  %v8358_v23 = vld [vmem:[%s11813_s6 + $0x114] ss:$8 sps:$4 sm:$0xff]   ;;  %v8356_v25 = vld [vmem:[%s11813_s6 + $0x110] ss:$8 sps:$4 sm:$0xff]  }
 0x52d   :  { %4868 = vmatprep.subr.bf16.mxu0 %v8289_v0  ;;  %5560 = vmatprep.subr.bf16.mxu1 %v8292_v24  ;;  %v8361_v0 = vld [vmem:[%s11812_s5 + $0x124] ss:$8 sps:$4 sm:$0xff]  }
 0x52e   :  { %v8364_v24 = vld [vmem:[%s11813_s6 + $0x124] ss:$8 sps:$4 sm:$0xff]  }
 0x530   :  { %4869 = vmatpush1.bf16.msra.mxu0 %v8287_v33  ;;  %5561 = vmatpush1.bf16.msra.mxu1 %v8290_v62  ;;  %v8359_v33 = vld [vmem:[%s11812_s5 + $0x120] ss:$8 sps:$4 sm:$0xff]  }
 0x531   :  { %4870 = vmatprep.subr.bf16.mxu0 %v8295_v11  ;;  %5562 = vmatprep.subr.bf16.mxu1 %v8298_v55  ;;  %v8362_v62 = vld [vmem:[%s11813_s6 + $0x120] ss:$8 sps:$4 sm:$0xff]   ;;  %v8367_v11 = vld [vmem:[%s11812_s5 + $0x134] ss:$8 sps:$4 sm:$0xff]  }
 0x532   :  { %v8370_v55 = vld [vmem:[%s11813_s6 + $0x134] ss:$8 sps:$4 sm:$0xff]  }
 0x534   :  { %4871 = vmatpush1.bf16.msra.mxu0 %v8293_v34  ;;  %5563 = vmatpush1.bf16.msra.mxu1 %v8296_v31  ;;  %v8365_v34 = vld [vmem:[%s11812_s5 + $0x130] ss:$8 sps:$4 sm:$0xff]  }
 0x535   :  { %4872 = vmatprep.subr.bf16.mxu0 %v8301_v46  ;;  %5564 = vmatprep.subr.bf16.mxu1 %v8304_v50  ;;  %v8368_v31 = vld [vmem:[%s11813_s6 + $0x130] ss:$8 sps:$4 sm:$0xff]   ;;  %v8373_v46 = vld [vmem:[%s11812_s5 + $0x284] ss:$8 sps:$4 sm:$0xff]  }
 0x536   :  { %v8376_v50 = vld [vmem:[%s11813_s6 + $0x284] ss:$8 sps:$4 sm:$0xff]  }
 0x538   :  { %4873 = vmatpush1.bf16.msra.mxu0 %v8299_v32  ;;  %5565 = vmatpush1.bf16.msra.mxu1 %v8302_v16  ;;  %v4067_v32 = vld [vmem:[#allocation2 + $0xb8] sm:$0xff]  ;;  %v8371_v16 = vld [vmem:[%s11812_s5 + $0x280] ss:$8 sps:$4 sm:$0xff]  }
 0x539   :  { %4874 = vmatprep.subr.bf16.mxu0 %v8307_v22  ;;  %5566 = vmatprep.subr.bf16.mxu1 %v8310_v60  ;;  %v8374_v22 = vld [vmem:[%s11813_s6 + $0x280] ss:$8 sps:$4 sm:$0xff]   ;;  %v4085_v60 = vpack.c.bf16 %v10700_v2, %v4067_v32  ;;  %v8380_v2 = vld [vmem:[%s11813_s6 + $0x290] ss:$8 sps:$4 sm:$0xff]   ;;  %v8439_v32 = vld [vmem:[%s11812_s5 + $0x334] ss:$8 sps:$4 sm:$0xff]  }
 0x53c   :  { %4875 = vmatpush1.bf16.msra.mxu0 %v8305_v1  ;;  %5567 = vmatpush1.bf16.msra.mxu1 %v8308_v61  ;;  %v8379_v1 = vld [vmem:[%s11812_s5 + $0x294] ss:$8 sps:$4 sm:$0xff]  }
 0x53d   :  { %4876 = vmatprep.subr.bf16.mxu0 %v8313_v3  ;;  %5568 = vmatprep.subr.bf16.mxu1 %v8316_v58  ;;  %v8382_v61 = vld [vmem:[%s11813_s6 + $0x294] ss:$8 sps:$4 sm:$0xff]   ;;  %v8377_v3 = vld [vmem:[%s11812_s5 + $0x290] ss:$8 sps:$4 sm:$0xff]   ;;  %v8385_v58 = vld [vmem:[%s11812_s5 + $0x2a4] ss:$8 sps:$4 sm:$0xff]  }
 0x540   :  { %4877 = vmatpush1.bf16.msra.mxu0 %v8311_v40  ;;  %5569 = vmatpush1.bf16.msra.mxu1 %v8314_v57  ;;  %v8388_v40 = vld [vmem:[%s11813_s6 + $0x2a4] ss:$8 sps:$4 sm:$0xff]   ;;  %v8383_v57 = vld [vmem:[%s11812_s5 + $0x2a0] ss:$8 sps:$4 sm:$0xff]  }
 0x541   :  { %4878 = vmatprep.subr.bf16.mxu0 %v8319_v59  ;;  %5570 = vmatprep.subr.bf16.mxu1 %v8322_v29  ;;  %v8386_v59 = vld [vmem:[%s11813_s6 + $0x2a0] ss:$8 sps:$4 sm:$0xff]   ;;  %v8391_v29 = vld [vmem:[%s11812_s5 + $0x2b4] ss:$8 sps:$4 sm:$0xff]  }
 0x544   :  { %4879 = vmatpush1.bf16.msra.mxu0 %v8317_v51  ;;  %5571 = vmatpush1.bf16.msra.mxu1 %v8320_v54  ;;  %v8394_v51 = vld [vmem:[%s11813_s6 + $0x2b4] ss:$8 sps:$4 sm:$0xff]   ;;  %v8389_v54 = vld [vmem:[%s11812_s5 + $0x2b0] ss:$8 sps:$4 sm:$0xff]  }
 0x545   :  { %4880 = vmatprep.subr.bf16.mxu0 %v8325_v56  ;;  %5572 = vmatprep.subr.bf16.mxu1 %v8328_v38  ;;  %v8392_v56 = vld [vmem:[%s11813_s6 + $0x2b0] ss:$8 sps:$4 sm:$0xff]   ;;  %v8397_v38 = vld [vmem:[%s11812_s5 + $0x2c4] ss:$8 sps:$4 sm:$0xff]  }
 0x548   :  { %4881 = vmatpush1.bf16.msra.mxu0 %v8323_v28  ;;  %5573 = vmatpush1.bf16.msra.mxu1 %v8326_v7  ;;  %v8400_v28 = vld [vmem:[%s11813_s6 + $0x2c4] ss:$8 sps:$4 sm:$0xff]   ;;  %v8395_v7 = vld [vmem:[%s11812_s5 + $0x2c0] ss:$8 sps:$4 sm:$0xff]  }
 0x549   :  { %4882 = vmatprep.subr.bf16.mxu0 %v8331_v45  ;;  %5574 = vmatprep.subr.bf16.mxu1 %v8334_v10  ;;  %v8398_v45 = vld [vmem:[%s11813_s6 + $0x2c0] ss:$8 sps:$4 sm:$0xff]   ;;  %v8403_v10 = vld [vmem:[%s11812_s5 + $0x2d4] ss:$8 sps:$4 sm:$0xff]  }
 0x54c   :  { %4883 = vmatpush1.bf16.msra.mxu0 %v8329_v63  ;;  %5575 = vmatpush1.bf16.msra.mxu1 %v8332_v8  ;;  %v8406_v63 = vld [vmem:[%s11813_s6 + $0x2d4] ss:$8 sps:$4 sm:$0xff]   ;;  %v8401_v8 = vld [vmem:[%s11812_s5 + $0x2d0] ss:$8 sps:$4 sm:$0xff]  }
 0x54d   :  { %4884 = vmatprep.subr.bf16.mxu0 %v8337_v14  ;;  %5576 = vmatprep.subr.bf16.mxu1 %v8340_v5  ;;  %v8404_v14 = vld [vmem:[%s11813_s6 + $0x2d0] ss:$8 sps:$4 sm:$0xff]   ;;  %v8409_v5 = vld [vmem:[%s11812_s5 + $0x2e4] ss:$8 sps:$4 sm:$0xff]  }
 0x550   :  { %4885 = vmatpush1.bf16.msra.mxu0 %v8335_v15  ;;  %5577 = vmatpush1.bf16.msra.mxu1 %v8338_v4  ;;  %v8412_v15 = vld [vmem:[%s11813_s6 + $0x2e4] ss:$8 sps:$4 sm:$0xff]   ;;  %v8407_v4 = vld [vmem:[%s11812_s5 + $0x2e0] ss:$8 sps:$4 sm:$0xff]  }
 0x551   :  { %4886 = vmatprep.subr.bf16.mxu0 %v8343_v35  ;;  %5578 = vmatprep.subr.bf16.mxu1 %v8346_v30  ;;  %v8415_v35 = vld [vmem:[%s11812_s5 + $0x2f4] ss:$8 sps:$4 sm:$0xff]  }
 0x552   :  { %v8418_v30 = vld [vmem:[%s11813_s6 + $0x2f4] ss:$8 sps:$4 sm:$0xff]  }
 0x554   :  { %4887 = vmatpush1.bf16.msra.mxu0 %v8341_v48  ;;  %5579 = vmatpush1.bf16.msra.mxu1 %v8344_v42  ;;  %v8413_v48 = vld [vmem:[%s11812_s5 + $0x2f0] ss:$8 sps:$4 sm:$0xff]  }
 0x555   :  { %4919 = vmatprep.subr.bf16.mxu0 %v8349_v41  ;;  %5611 = vmatprep.subr.bf16.mxu1 %v8352_v53  ;;  %v8416_v42 = vld [vmem:[%s11813_s6 + $0x2f0] ss:$8 sps:$4 sm:$0xff]   ;;  %v8421_v41 = vld [vmem:[%s11812_s5 + $0x304] ss:$8 sps:$4 sm:$0xff]  }
 0x556   :  { %v8424_v53 = vld [vmem:[%s11813_s6 + $0x304] ss:$8 sps:$4 sm:$0xff]  }
 0x557   :  { %4889 = vmatmul.mubr.bf16.vlgmr.msra.gmra.mrb[24].mxu0 %v4083_v17  ;;  %5581 = vmatmul.mubr.bf16.vlgmr.msra.gmra.mrb[24].mxu1 %v4083_v17  ;;  %v8427_v17 = vld [vmem:[%s11812_s5 + $0x314] ss:$8 sps:$4 sm:$0xff]  }
 0x558   :  { %4898 = vmatprep.mubr.bf16.mxu0 %v9792_v20  ;;  %4920 = vmatpush1.bf16.msra.mxu0 %v8347_v37  ;;  %v8422_v37 = vld [vmem:[%s11813_s6 + $0x300] ss:$8 sps:$4 sm:$0xff]  }
 0x559   :  { %5590 = vmatprep.mubr.bf16.mxu1 %v9792_v20  ;;  %5612 = vmatpush1.bf16.msra.mxu1 %v8350_v36  ;;  %v8430_v36 = vld [vmem:[%s11813_s6 + $0x314] ss:$8 sps:$4 sm:$0xff]  }
 0x55a   :  { %4921 = vmatprep.subr.bf16.mxu0 %v8355_v49  ;;  %5613 = vmatprep.subr.bf16.mxu1 %v8358_v23  ;;  %v8425_v49 = vld [vmem:[%s11812_s5 + $0x310] ss:$8 sps:$4 sm:$0xff]  }
 0x55b   :  { %v8428_v23 = vld [vmem:[%s11813_s6 + $0x310] ss:$8 sps:$4 sm:$0xff]  }
 0x55c   :  { %4922 = vmatpush1.bf16.msra.mxu0 %v8353_v9  ;;  %v8433_v9 = vld [vmem:[%s11812_s5 + $0x324] ss:$8 sps:$4 sm:$0xff]  }
 0x55d   :  { %5614 = vmatpush1.bf16.msra.mxu1 %v8356_v25  ;;  %4923 = vmatprep.subr.bf16.mxu0 %v8361_v0  ;;  %v8436_v25 = vld [vmem:[%s11813_s6 + $0x324] ss:$8 sps:$4 sm:$0xff]  }
 0x55e   :  { %5615 = vmatprep.subr.bf16.mxu1 %v8364_v24 }
 0x55f   :  { %4899 = vmatmul.mubr.bf16.gmra.mrb[28].mxu0 %v9854_v12  ;;  %5591 = vmatmul.mubr.bf16.gmra.mrb[28].mxu1 %v9854_v12  ;;  %v8482_v12 = vld [vmem:[%s11813_s6 + $0x3a0] ss:$8 sps:$4 sm:$0xff]  }
 0x560   :  { %4908 = vmatprep.mubr.bf16.mxu0 %v9872_v39  ;;  %5600 = vmatprep.mubr.bf16.mxu1 %v9872_v39 }
 0x561   :  { %4924 = vmatpush1.bf16.msra.mxu0 %v8359_v33  ;;  %5616 = vmatpush1.bf16.msra.mxu1 %v8362_v62 }
 0x562   :  { %4925 = vmatprep.subr.bf16.mxu0 %v8367_v11  ;;  %5617 = vmatprep.subr.bf16.mxu1 %v8370_v55 }
 0x565   :  { %4926 = vmatpush1.bf16.msra.mxu0 %v8365_v34  ;;  %5618 = vmatpush1.bf16.msra.mxu1 %v8368_v31  ;;  %v8431_v34 = vld [vmem:[%s11812_s5 + $0x320] ss:$8 sps:$4 sm:$0xff]  }
 0x566   :  { %5974 = vmatprep.subr.bf16.mxu0 %v8373_v46  ;;  %6352 = vmatprep.subr.bf16.mxu1 %v8376_v50  ;;  %v8434_v31 = vld [vmem:[%s11813_s6 + $0x320] ss:$8 sps:$4 sm:$0xff]  }
 0x567   :  { %4909 = vmatmul.mubr.bf16.gmra.mrb[32].mxu0 %v9908_v18  ;;  %5601 = vmatmul.mubr.bf16.gmra.mrb[32].mxu1 %v9908_v18 }
 0x568   :  { %4951 = vmatprep.mubr.bf16.mxu0 %v8637_v6  ;;  %5643 = vmatprep.mubr.bf16.mxu1 %v8637_v6 }
 0x56f   :  { %7066 = vmatmul.mubr.msk.bf16.vlgmr.msra.gmra.mrb[24].mxu0 %vm97_vm0, %v4085_v60  ;;  %7152 = vmatmul.mubr.msk.bf16.vlgmr.msra.gmra.mrb[24].mxu1 %vm97_vm0, %v4085_v60  ;;  %v8440_v60 = vld [vmem:[%s11813_s6 + $0x330] ss:$8 sps:$4 sm:$0xff]  }
 0x570   :  { %5975 = vmatpush1.bf16.msra.mxu0 %v8371_v16  ;;  %6353 = vmatpush1.bf16.msra.mxu1 %v8374_v22  ;;  %v8442_v16 = vld [vmem:[%s11813_s6 + $0x334] ss:$8 sps:$4 sm:$0xff]   ;;  %v8437_v22 = vld [vmem:[%s11812_s5 + $0x330] ss:$8 sps:$4 sm:$0xff]  }
 0x571   :  { %5976 = vmatprep.subr.bf16.mxu0 %v8379_v1  ;;  %6354 = vmatprep.subr.bf16.mxu1 %v8382_v61  ;;  %v8445_v1 = vld [vmem:[%s11812_s5 + $0x344] ss:$8 sps:$4 sm:$0xff]  }
 0x572   :  { %4961 = vmatprep.mubr.bf16.mxu0 %v8637_v6  ;;  %5653 = vmatprep.mubr.bf16.mxu1 %v8637_v6  ;;  %v8448_v61 = vld [vmem:[%s11813_s6 + $0x344] ss:$8 sps:$4 sm:$0xff]  }
 0x574   :  { %5977 = vmatpush1.bf16.msra.mxu0 %v8377_v3  ;;  %6355 = vmatpush1.bf16.msra.mxu1 %v8380_v2 }
 0x575   :  { %5978 = vmatprep.subr.bf16.mxu0 %v8385_v58  ;;  %6356 = vmatprep.subr.bf16.mxu1 %v8388_v40 }
 0x577   :  { %7067 = vmatmul.mubr.msk.bf16.gmra.mrb[28].mxu0 %vm97_vm0, %v10012_v19  ;;  %7153 = vmatmul.mubr.msk.bf16.gmra.mrb[28].mxu1 %vm97_vm0, %v10012_v19 }
 0x578   :  { %5979 = vmatpush1.bf16.msra.mxu0 %v8383_v57  ;;  %6357 = vmatpush1.bf16.msra.mxu1 %v8386_v59 }
 0x579   :  { %5980 = vmatprep.subr.bf16.mxu0 %v8391_v29  ;;  %6358 = vmatprep.subr.bf16.mxu1 %v8394_v51  ;;  %v8443_v29 = vld [vmem:[%s11812_s5 + $0x340] ss:$8 sps:$4 sm:$0xff]  }
 0x57a   :  { %4971 = vmatprep.mubr.bf16.mxu0 %v8637_v6  ;;  %5663 = vmatprep.mubr.bf16.mxu1 %v8637_v6  ;;  %v8446_v51 = vld [vmem:[%s11813_s6 + $0x340] ss:$8 sps:$4 sm:$0xff]  }
 0x57c   :  { %5981 = vmatpush1.bf16.msra.mxu0 %v8389_v54  ;;  %6359 = vmatpush1.bf16.msra.mxu1 %v8392_v56 }
 0x57d   :  { %5982 = vmatprep.subr.bf16.mxu0 %v8397_v38  ;;  %6360 = vmatprep.subr.bf16.mxu1 %v8400_v28  ;;  %v8451_v28 = vld [vmem:[%s11812_s5 + $0x354] ss:$8 sps:$4 sm:$0xff]  }
 0x57f   :  { %7068 = vmatmul.mubr.msk.bf16.gmra.mrb[32].mxu0 %vm97_vm0, %v10727_v47  ;;  %7154 = vmatmul.mubr.msk.bf16.gmra.mrb[32].mxu1 %vm97_vm0, %v10727_v47 }
 0x580   :  { %5983 = vmatpush1.bf16.msra.mxu0 %v8395_v7  ;;  %6361 = vmatpush1.bf16.msra.mxu1 %v8398_v45  ;;  %v8454_v45 = vld [vmem:[%s11813_s6 + $0x354] ss:$8 sps:$4 sm:$0xff]  }
 0x581   :  { %6006 = vmatprep.mubr.bf16.mxu0 %v9980_v52  ;;  %6384 = vmatprep.mubr.bf16.mxu1 %v9980_v52  ;;  %v8410_v52 = vld [vmem:[%s11813_s6 + $0x2e0] ss:$8 sps:$4 sm:$0xff]  }
 0x582   :  { %5984 = vmatprep.subr.bf16.mxu0 %v8403_v10  ;;  %6362 = vmatprep.subr.bf16.mxu1 %v8406_v63 }
 0x584   :  { %5985 = vmatpush1.bf16.msra.mxu0 %v8401_v8  ;;  %6363 = vmatpush1.bf16.msra.mxu1 %v8404_v14  ;;  %v8449_v8 = vld [vmem:[%s11812_s5 + $0x350] ss:$8 sps:$4 sm:$0xff]  }
 0x585   :  { %5986 = vmatprep.subr.bf16.mxu0 %v8409_v5  ;;  %6364 = vmatprep.subr.bf16.mxu1 %v8412_v15  ;;  %v8452_v14 = vld [vmem:[%s11813_s6 + $0x350] ss:$8 sps:$4 sm:$0xff]   ;;  %v8457_v15 = vld [vmem:[%s11812_s5 + $0x364] ss:$8 sps:$4 sm:$0xff]  }
 0x588   :  { %5987 = vmatpush1.bf16.msra.mxu0 %v8407_v4  ;;  %6365 = vmatpush1.bf16.msra.mxu1 %v8410_v52 }
 0x589   :  { %5988 = vmatprep.subr.bf16.mxu0 %v8415_v35  ;;  %6366 = vmatprep.subr.bf16.mxu1 %v8418_v30  ;;  %v8460_v35 = vld [vmem:[%s11813_s6 + $0x364] ss:$8 sps:$4 sm:$0xff]  }
 0x58c   :  { %5989 = vmatpush1.bf16.msra.mxu0 %v8413_v48  ;;  %6367 = vmatpush1.bf16.msra.mxu1 %v8416_v42 }
 0x58d   :  { %5990 = vmatprep.subr.bf16.mxu0 %v8421_v41  ;;  %6368 = vmatprep.subr.bf16.mxu1 %v8424_v53 }
 0x590   :  { %5991 = vmatpush1.bf16.msra.mxu0 %v8419_v13  ;;  %6369 = vmatpush1.bf16.msra.mxu1 %v8422_v37  ;;  %v8455_v13 = vld [vmem:[%s11812_s5 + $0x360] ss:$8 sps:$4 sm:$0xff]  }
 0x591   :  { %5992 = vmatprep.subr.bf16.mxu0 %v8427_v17  ;;  %6370 = vmatprep.subr.bf16.mxu1 %v8430_v36  ;;  %v8458_v37 = vld [vmem:[%s11813_s6 + $0x360] ss:$8 sps:$4 sm:$0xff]  }
 0x592   :  { %v3419_v0 = vpop.f32.mrb[12].mxu0  ;;  %v3797_v24 = vpop.f32.mrb[12].mxu1 }
 0x593   :  { %8493 = vtanh.f32 %v3419_v0  ;;  %v3421_v33 = vpop.f32.mrb[13].mxu0  ;;  %v3799_v62 = vpop.f32.mrb[13].mxu1  ;;  %v8461_v0 = vld [vmem:[%s11812_s5 + $0x370] ss:$8 sps:$4 sm:$0xff]  }
 0x594   :  { %5993 = vmatpush1.bf16.msra.mxu0 %v8425_v49  ;;  %6371 = vmatpush1.bf16.msra.mxu1 %v8428_v23  ;;  %8495 = vtanh.f32 %v3797_v24  ;;  %v3423_v11 = vpop.f32.mrb[14].mxu0  ;;  %v11128_v55 = vpop.f32.mrb[14].mxu1  ;;  %v8463_v23 = vld [vmem:[%s11812_s5 + $0x374] ss:$8 sps:$4 sm:$0xff]   ;;  %v8464_v24 = vld [vmem:[%s11813_s6 + $0x370] ss:$8 sps:$4 sm:$0xff]  }
 0x595   :  { %8497 = vtanh.f32 %v3421_v33  ;;  %5994 = vmatprep.subr.bf16.mxu0 %v8433_v9  ;;  %6372 = vmatprep.subr.bf16.mxu1 %v8436_v25  ;;  %v3425_v46 = vpop.f32.mrb[15].mxu0  ;;  %v11136_v50 = vpop.f32.mrb[15].mxu1  ;;  %v8466_v9 = vld [vmem:[%s11813_s6 + $0x374] ss:$8 sps:$4 sm:$0xff]  }
 0x596   :  { %8499 = vtanh.f32 %v3799_v62  ;;  %v8469_v62 = vld [vmem:[%s11812_s5 + $0x384] ss:$8 sps:$4 sm:$0xff]  }
 0x597   :  { %8501 = vtanh.f32 %v3423_v11  ;;  %v8472_v11 = vld [vmem:[%s11813_s6 + $0x384] ss:$8 sps:$4 sm:$0xff]  }
 0x598   :  { %5995 = vmatpush1.bf16.msra.mxu0 %v8431_v34  ;;  %6373 = vmatpush1.bf16.msra.mxu1 %v8434_v31  ;;  %8503 = vtanh.f32 %v3425_v46  ;;  %v5749_v34 = vrot.slane %v9872_v39, 1  ;;  %v8467_v31 = vld [vmem:[%s11812_s5 + $0x380] ss:$8 sps:$4 sm:$0xff]  }
 0x599   :  { %5996 = vmatprep.subr.bf16.mxu0 %v8439_v32  ;;  %6374 = vmatprep.subr.bf16.mxu1 %v8442_v16  ;;  %v5678_v46 = vld [vmem:[#allocation2 + $0x140] sm:$0x3]  ;;  %v8475_v16 = vld [vmem:[%s11812_s5 + $0x394] ss:$8 sps:$4 sm:$0xff]  }
 0x59a   :  { %v3429_v3 = vpop.f32.mrb[16].mxu0  ;;  %v11156_v2 = vpop.f32.mrb[16].mxu1  ;;  %v8470_v39 = vld [vmem:[%s11813_s6 + $0x380] ss:$8 sps:$4 sm:$0xff]  }
 0x59b   :  { %8505 = vtanh.f32 %v3429_v3  ;;  %v3431_v58 = vpop.f32.mrb[17].mxu0  ;;  %v11158_v40 = vpop.f32.mrb[17].mxu1 }
 0x59c   :  { %5997 = vmatpush1.bf16.msra.mxu0 %v8437_v22  ;;  %6375 = vmatpush1.bf16.msra.mxu1 %v8440_v60  ;;  %v3433_v57 = vpop.f32.mrb[18].mxu0  ;;  %v11160_v59 = vpop.f32.mrb[18].mxu1  ;;  %8507 = vtanh.f32 %v3431_v58  ;;  %v5750_v60 = vsel %vm3085_vm8, %v5742_v27, %v5749_v34  ;;  %v8473_v58 = vld [vmem:[%s11812_s5 + $0x390] ss:$8 sps:$4 sm:$0xff]   ;;  %v8481_v27 = vld [vmem:[%s11812_s5 + $0x3a4] ss:$8 sps:$4 sm:$0xff]  }
 0x59d   :  { %v8494_v54 = vpop.eup %8493  ;;  %5998 = vmatprep.subr.bf16.mxu0 %v8445_v1  ;;  %6376 = vmatprep.subr.bf16.mxu1 %v8448_v61  ;;  %v3435_v56 = vpop.f32.mrb[19].mxu0  ;;  %8509 = vtanh.f32 %v3433_v57  ;;  %v5684_v1 = vpack.c.bf16 %v5678_v46, %v5678_v46  ;;  %v8478_v61 = vld [vmem:[%s11813_s6 + $0x394] ss:$8 sps:$4 sm:$0xff]  }
 0x59e   :  { %v11168_v38 = vpop.f32.mrb[19].mxu1  ;;  %v8496_v7 = vpop.eup %8495  ;;  %3862 = vst [vmem:[%s11816_s7] sm:$0xff] %v8494_v54  ;;  %3887 = vrot.lane.b32.xlu0 %v8494_v54, %s8638_s12  ;;  %8511 = vtanh.f32 %v3435_v56  ;;  %v8484_v56 = vld [vmem:[%s11813_s6 + $0x3a4] ss:$8 sps:$4 sm:$0xff]  }
 0x59f   :  { %v8498_v10 = vpop.eup %8497  ;;  %8513 = vtanh.f32 %v11128_v55 }
 0x5a0   :  { %v8500_v63 = vpop.eup %8499  ;;  %5999 = vmatpush1.bf16.msra.mxu0 %v8443_v29  ;;  %6377 = vmatpush1.bf16.msra.mxu1 %v8446_v51  ;;  %3864 = vst.msk [vmem:[%s11816_s7 + $0x8] sm:$0xff] %vm3863_vm9, %v8498_v10  ;;  %v5755_v29 = vrot.slane %v5684_v1, 1  ;;  %v8479_v51 = vld [vmem:[%s11812_s5 + $0x3a0] ss:$8 sps:$4 sm:$0xff]  }
 0x5a1   :  { %v8502_v5 = vpop.eup %8501  ;;  %3956 = vrot.lane.b32.xlu1 %v8500_v63, %s8639_s21  ;;  %6000 = vmatprep.subr.bf16.mxu0 %v8451_v28 }
 0x5a2   :  { %3865 = vst [vmem:[%s11816_s7 + $0x28] sm:$0xff] %v8502_v5  ;;  %6378 = vmatprep.subr.bf16.mxu1 %v8454_v45  ;;  %v11197_v4 = vpop.f32.mrb[20].mxu1  ;;  %3954 = vrot.lane.b32.xlu0 %v8496_v7, %s8639_s21  ;;  %v3439_v52 = vpop.f32.mrb[20].mxu0  ;;  %v5756_v28 = vsel %vm3085_vm8, %v5749_v34, %v5755_v29 }
 0x5a3   :  { %v8504_v30 = vpop.eup %8503  ;;  %v3441_v48 = vpop.f32.mrb[21].mxu0  ;;  %8515 = vtanh.f32 %v3439_v52  ;;  %v5679_v52 = vld [vmem:[#allocation2 + $0x148] sm:$0x3] }
 0x5a4   :  { %v11204_v42 = vpop.f32.mrb[21].mxu1  ;;  %6001 = vmatpush1.bf16.msra.mxu0 %v8449_v8  ;;  %6379 = vmatpush1.bf16.msra.mxu1 %v8452_v14  ;;  %v3443_v41 = vpop.f32.mrb[22].mxu0  ;;  %3866 = vst.msk [vmem:[%s11816_s7 + $0x30] sm:$0xff] %vm3863_vm9, %v8504_v30  ;;  %8517 = vtanh.f32 %v3441_v48  ;;  %v8488_v14 = vld [vmem:[%s11813_s6 + $0x3b0] ss:$8 sps:$4 sm:$0xff]  }
 0x5a5   :  { %v11206_v53 = vpop.f32.mrb[22].mxu1  ;;  %v11218_v17 = vpop.eup %8505  ;;  %4012 = vrot.lane.b32.xlu1 %v8500_v63, %s8640_s3  ;;  %6002 = vmatprep.subr.bf16.mxu0 %v8457_v15  ;;  %8519 = vtanh.f32 %v11136_v50  ;;  %v5751_v15 = vrot.slane %v10727_v47, 1 }
 0x5a6   :  { %v3445_v36 = vpop.f32.mrb[23].mxu0  ;;  %v11221_v49 = vpop.f32.mrb[23].mxu1  ;;  %3867 = vst [vmem:[%s11816_s7 + $0x50] sm:$0xff] %v11218_v17  ;;  %6380 = vmatprep.subr.bf16.mxu1 %v8460_v35  ;;  %4010 = vrot.lane.b32.xlu0 %v8496_v7, %s8640_s3  ;;  %8521 = vtanh.f32 %v3443_v41  ;;  %v8490_v7 = vld [vmem:[%s11813_s6 + $0x3b4] ss:$8 sps:$4 sm:$0xff]   ;;  %v5685_v35 = vpack.c.bf16 %v5679_v52, %v5679_v52 }
 0x5a7   :  { %v11235_v25 = vpop.eup %8507  ;;  %8523 = vtanh.f32 %v3445_v36 }
 0x5a8   :  { %6003 = vmatpush1.bf16.msra.mxu0 %v8455_v13  ;;  %6381 = vmatpush1.bf16.msra.mxu1 %v8458_v37  ;;  %3868 = vst.msk [vmem:[%s11816_s7 + $0x58] sm:$0xff] %vm3863_vm9, %v11235_v25  ;;  %v11248_v33 = vpop.eup %8509  ;;  %8525 = vtanh.f32 %v11156_v2  ;;  %v8476_v2 = vld [vmem:[%s11813_s6 + $0x390] ss:$8 sps:$4 sm:$0xff]   ;;  %v5757_v47 = vrot.slane %v5685_v35, 1 }
 0x5a9   :  { %3891 = vrot.lane.b32.xlu1 %v8502_v5, %s8638_s12  ;;  %6004 = vmatprep.subr.bf16.mxu0 %v8463_v23  ;;  %3869 = vst [vmem:[%s11816_s7 + $0x78] sm:$0xff] %v11248_v33  ;;  %v11262_v55 = vpop.eup %8511  ;;  %8527 = vtanh.f32 %v11158_v40  ;;  %v5677_v40 = vld [vmem:[#allocation2 + $0x138] sm:$0x3] }
 0x5aa   :  { %6382 = vmatprep.subr.bf16.mxu1 %v8466_v9  ;;  %3889 = vrot.lane.b32.xlu0 %v8498_v10, %s8638_s12  ;;  %3870 = vst.msk [vmem:[%s11816_s7 + $0x80] sm:$0xff] %vm3863_vm9, %v11262_v55  ;;  %v8514_v50 = vpop.eup %8513  ;;  %v5683_v54 = vpack.c.bf16 %v5677_v40, %v5677_v40  ;;  %v8485_v10 = vld [vmem:[%s11812_s5 + $0x3b0] ss:$8 sps:$4 sm:$0xff]   ;;  %8529 = vtanh.f32 %v11160_v59 }
 0x5ab   :  { %8531 = vtanh.f32 %v11168_v38 }
 0x5ac   :  { %6005 = vmatpush1.bf16.msra.mxu0 %v8461_v0  ;;  %6383 = vmatpush1.bf16.msra.mxu1 %v8464_v24  ;;  %v5753_v45 = vrot.slane %v5683_v54, 1  ;;  %8533 = vtanh.f32 %v11197_v4 }
 0x5ad   :  { %3893 = vrot.lane.b32.xlu1 %v8504_v30, %s8638_s12  ;;  %6037 = vmatprep.subr.bf16.mxu0 %v8469_v62  ;;  %v11274_v32 = vpop.eup %8515  ;;  %8535 = vtanh.f32 %v11204_v42 }
 0x5ae   :  { %3958 = vrot.lane.b32.xlu0 %v8514_v50, %s8639_s21  ;;  %6415 = vmatprep.subr.bf16.mxu1 %v8472_v11  ;;  %v11283_v22 = vpop.eup %8517  ;;  %3871 = vst [vmem:[%s11816_s7 + $0xa0] sm:$0xff] %v11274_v32  ;;  %8537 = vtanh.f32 %v11206_v53 }
 0x5af   :  { %6007 = vmatmul.mubr.bf16.vlgmr.msra.gmra.mrb[24].mxu0 %v9992_v26  ;;  %6385 = vmatmul.mubr.bf16.vlgmr.msra.gmra.mrb[24].mxu1 %v9992_v26  ;;  %v8520_v3 = vpop.eup %8519  ;;  %3872 = vst.msk [vmem:[%s11816_s7 + $0xa8] sm:$0xff] %vm3863_vm9, %v11283_v22  ;;  %v5747_v26 = vrot.slane %v9908_v18, 1  ;;  %8539 = vtanh.f32 %v11221_v49 }
 0x5b0   :  { %6016 = vmatprep.mubr.bf16.mxu0 %v5750_v60  ;;  %6038 = vmatpush1.bf16.msra.mxu0 %v8467_v31  ;;  %v11305_v20 = vpop.eup %8521 }
 0x5b1   :  { %6394 = vmatprep.mubr.bf16.mxu1 %v5750_v60  ;;  %3960 = vrot.lane.b32.xlu1 %v8520_v3, %s8639_s21  ;;  %3873 = vst [vmem:[%s11816_s7 + $0xc8] sm:$0xff] %v11305_v20  ;;  %v11321_v57 = vpop.eup %8523  ;;  %v5748_v18 = vsel %vm3085_vm8, %v5739_v44, %v5747_v26  ;;  %v8487_v44 = vld [vmem:[%s11812_s5 + $0x3b4] ss:$8 sps:$4 sm:$0xff]   ;;  %v5754_v5 = vsel %vm3085_vm8, %v5747_v26, %v5753_v45 }
 0x5b2   :  { %6416 = vmatpush1.bf16.msra.mxu1 %v8470_v39  ;;  %6039 = vmatprep.subr.bf16.mxu0 %v8475_v16  ;;  %3874 = vst.msk [vmem:[%s11816_s7 + $0xd0] sm:$0xff] %vm3863_vm9, %v11321_v57  ;;  %v8526_v63 = vpop.eup %8525 }
 0x5b3   :  { %4014 = vrot.lane.b32.xlu0 %v8514_v50, %s8640_s3  ;;  %6417 = vmatprep.subr.bf16.mxu1 %v8478_v61  ;;  %v8528_v8 = vpop.eup %8527 }
 0x5b4   :  { %6040 = vmatpush1.bf16.msra.mxu0 %v8473_v58  ;;  %v8530_v59 = vpop.eup %8529 }
 0x5b5   :  { %4016 = vrot.lane.b32.xlu1 %v8520_v3, %s8640_s3  ;;  %6041 = vmatprep.subr.bf16.mxu0 %v8481_v27  ;;  %v8532_v38 = vpop.eup %8531 }
 0x5b6   :  { %6418 = vmatpush1.bf16.msra.mxu1 %v8476_v2  ;;  %v8534_v4 = vpop.eup %8533 }
 0x5b7   :  { %6017 = vmatmul.mubr.bf16.gmra.mrb[28].mxu0 %v5748_v18  ;;  %6395 = vmatmul.mubr.bf16.gmra.mrb[28].mxu1 %v5748_v18  ;;  %v8536_v19 = vpop.eup %8535 }
 0x5b8   :  { %6026 = vmatprep.mubr.bf16.mxu0 %v5756_v28  ;;  %6404 = vmatprep.mubr.bf16.mxu1 %v5756_v28 }
 0x5b9   :  { %3895 = vrot.lane.b32.xlu0 %v11218_v17, %s8638_s12  ;;  %3897 = vrot.lane.b32.xlu1 %v11235_v25, %s8638_s12 }
 0x5ba   :  { %6042 = vmatpush1.bf16.msra.mxu0 %v8479_v51  ;;  %6419 = vmatprep.subr.bf16.mxu1 %v8484_v56 }
 0x5bb   :  { %6420 = vmatpush1.bf16.msra.mxu1 %v8482_v12  ;;  %6043 = vmatprep.subr.bf16.mxu0 %v8487_v44 }
 0x5bc   :  { %6421 = vmatprep.subr.bf16.mxu1 %v8490_v7 }
 0x5bd   :  { %3962 = vrot.lane.b32.xlu0 %v8526_v63, %s8639_s21  ;;  %3964 = vrot.lane.b32.xlu1 %v8528_v8, %s8639_s21 }
 0x5be   :  { %6044 = vmatpush1.bf16.msra.mxu0 %v8485_v10 }
 0x5bf   :  { %6027 = vmatmul.mubr.bf16.gmra.mrb[32].mxu0 %v5754_v5  ;;  %6405 = vmatmul.mubr.bf16.gmra.mrb[32].mxu1 %v5754_v5 }
 0x5c0   :  { %6422 = vmatpush1.bf16.msra.mxu1 %v8488_v14  ;;  %6069 = vmatprep.mubr.bf16.mxu0 %v8637_v6 }
 0x5c1   :  { %4018 = vrot.lane.b32.xlu0 %v8526_v63, %s8640_s3  ;;  %4020 = vrot.lane.b32.xlu1 %v8528_v8, %s8640_s3 }
 0x5c2   :  { %6447 = vmatprep.mubr.bf16.mxu1 %v8637_v6 }
 0x5c5   :  { %3899 = vrot.lane.b32.xlu0 %v11248_v33, %s8638_s12  ;;  %3901 = vrot.lane.b32.xlu1 %v11262_v55, %s8638_s12 }
 0x5c7   :  { %7195 = vmatmul.mubr.msk.bf16.vlgmr.msra.gmra.mrb[24].mxu0 %vm97_vm0, %v10042_v43  ;;  %7238 = vmatmul.mubr.msk.bf16.vlgmr.msra.gmra.mrb[24].mxu1 %vm97_vm0, %v10042_v43  ;;  %v5752_v43 = vsel %vm3085_vm8, %v5745_v21, %v5751_v15  ;;  %v5758_v21 = vsel %vm3085_vm8, %v5751_v15, %v5757_v47 }
 0x5c8   :  { %6079 = vmatprep.mubr.bf16.mxu0 %v8637_v6  ;;  %6457 = vmatprep.mubr.bf16.mxu1 %v8637_v6 }
 0x5c9   :  { %3966 = vrot.lane.b32.xlu0 %v8530_v59, %s8639_s21  ;;  %3968 = vrot.lane.b32.xlu1 %v8532_v38, %s8639_s21 }
 0x5cd   :  { %4022 = vrot.lane.b32.xlu0 %v8530_v59, %s8640_s3  ;;  %4024 = vrot.lane.b32.xlu1 %v8532_v38, %s8640_s3 }
 0x5cf   :  { %7196 = vmatmul.mubr.msk.bf16.gmra.mrb[28].mxu0 %vm97_vm0, %v5752_v43  ;;  %7239 = vmatmul.mubr.msk.bf16.gmra.mrb[28].mxu1 %vm97_vm0, %v5752_v43 }
 0x5d0   :  { %6089 = vmatprep.mubr.bf16.mxu0 %v8637_v6  ;;  %6467 = vmatprep.mubr.bf16.mxu1 %v8637_v6  ;;  %v8538_v6 = vpop.eup %8537 }
 0x5d1   :  { %3903 = vrot.lane.b32.xlu0 %v11274_v32, %s8638_s12  ;;  %3905 = vrot.lane.b32.xlu1 %v11283_v22, %s8638_s12  ;;  %v8540_v30 = vpop.eup %8539 }
 0x5d5   :  { %3970 = vrot.lane.b32.xlu0 %v8534_v4, %s8639_s21  ;;  %3972 = vrot.lane.b32.xlu1 %v8536_v19, %s8639_s21 }
 0x5d7   :  { %7197 = vmatmul.mubr.msk.bf16.gmra.mrb[32].mxu0 %vm97_vm0, %v5758_v21  ;;  %7240 = vmatmul.mubr.msk.bf16.gmra.mrb[32].mxu1 %vm97_vm0, %v5758_v21 }
 0x5d9   :  { %4026 = vrot.lane.b32.xlu0 %v8534_v4, %s8640_s3  ;;  %4028 = vrot.lane.b32.xlu1 %v8536_v19, %s8640_s3 }
 0x5dd   :  { %3907 = vrot.lane.b32.xlu0 %v11305_v20, %s8638_s12  ;;  %3909 = vrot.lane.b32.xlu1 %v11321_v57, %s8638_s12 }
 0x5e1   :  { %3974 = vrot.lane.b32.xlu0 %v8538_v6, %s8639_s21  ;;  %3976 = vrot.lane.b32.xlu1 %v8540_v30, %s8639_s21 }
 0x5e5   :  { %4030 = vrot.lane.b32.xlu0 %v8538_v6, %s8640_s3  ;;  %4032 = vrot.lane.b32.xlu1 %v8540_v30, %s8640_s3 }
 0x610   :  { %v3888_v48 = vpop.permute.xlu0 %3887 }
 0x611   :  { %3930 = vst.msk [vmem:[%s11816_s7 + $0x8] sm:$0xff] %vm3929_vm10, %v3888_v48 }
 0x613   :  { %v3957_v42 = vpop.permute.xlu1 %3956 }
 0x614   :  { %v3955_v41 = vpop.permute.xlu0 %3954 }
 0x615   :  { %v3978_v53 = vsel %vm97_vm0, %v3955_v41, %v3957_v42 }
 0x616   :  { %3999 = vst.msk [vmem:[%s11816_s7 + $0x18] sm:$0xff] %vm3998_vm11, %v3978_v53 }
 0x617   :  { %v4013_v13 = vpop.permute.xlu1 %4012 }
 0x618   :  { %v4011_v37 = vpop.permute.xlu0 %4010 }
 0x619   :  { %v4034_v17 = vsel %vm3998_vm11, %v4011_v37, %v4013_v13  ;;  %4053 = vst.msk [vmem:[%s11816_s7 + $0x18] sm:$0xff] %vm4052_vm12, %v4011_v37 }
 0x61a   :  { %4054 = vst [vmem:[%s11816_s7 + $0x20] sm:$0xff] %v4034_v17 }
 0x61b   :  { %v3892_v36 = vpop.permute.xlu1 %3891 }
 0x61c   :  { %3932 = vst.msk [vmem:[%s11816_s7 + $0x30] sm:$0xff] %vm3929_vm10, %v3892_v36  ;;  %v3890_v49 = vpop.permute.xlu0 %3889 }
 0x61d   :  { %v3911_v23 = vsel %vm3863_vm9, %v3888_v48, %v3890_v49 }
 0x61e   :  { %3931 = vst.msk [vmem:[%s11816_s7 + $0x10] sm:$0xff] %vm97_vm0, %v3911_v23 }
 0x61f   :  { %3997 = vst.msk [vmem:[%s11816_s7 + $0x10] sm:$0xff] %vm3996_vm13, %v3955_v41  ;;  %v3894_v9 = vpop.permute.xlu1 %3893 }
 0x620   :  { %v3912_v25 = vsel %vm3863_vm9, %v3892_v36, %v3894_v9  ;;  %v3959_v0 = vpop.permute.xlu0 %3958 }
 0x621   :  { %3933 = vst.msk [vmem:[%s11816_s7 + $0x38] sm:$0xff] %vm97_vm0, %v3912_v25 }
 0x622   :  { %4000 = vst.msk [vmem:[%s11816_s7 + $0x38] sm:$0xff] %vm3996_vm13, %v3959_v0 }
 0x623   :  { %v3961_v24 = vpop.permute.xlu1 %3960 }
 0x624   :  { %v3979_v33 = vsel %vm97_vm0, %v3959_v0, %v3961_v24 }
 0x625   :  { %4001 = vst.msk [vmem:[%s11816_s7 + $0x40] sm:$0xff] %vm3998_vm11, %v3979_v33  ;;  %v4015_v62 = vpop.permute.xlu0 %4014 }
 0x626   :  { %4055 = vst.msk [vmem:[%s11816_s7 + $0x40] sm:$0xff] %vm4052_vm12, %v4015_v62 }
 0x627   :  { %v4017_v11 = vpop.permute.xlu1 %4016 }
 0x628   :  { %v4035_v55 = vsel %vm3998_vm11, %v4015_v62, %v4017_v11 }
 0x629   :  { %4056 = vst [vmem:[%s11816_s7 + $0x48] sm:$0xff] %v4035_v55 }
 0x62b   :  { %v3896_v34 = vpop.permute.xlu0 %3895  ;;  %v3898_v31 = vpop.permute.xlu1 %3897 }
 0x62c   :  { %3934 = vst.msk [vmem:[%s11816_s7 + $0x58] sm:$0xff] %vm3929_vm10, %v3896_v34  ;;  %v3913_v46 = vsel %vm3863_vm9, %v3896_v34, %v3898_v31 }
 0x62d   :  { %3935 = vst.msk [vmem:[%s11816_s7 + $0x60] sm:$0xff] %vm97_vm0, %v3913_v46 }
 0x62f   :  { %v3963_v50 = vpop.permute.xlu0 %3962  ;;  %v3965_v32 = vpop.permute.xlu1 %3964 }
 0x630   :  { %4002 = vst.msk [vmem:[%s11816_s7 + $0x60] sm:$0xff] %vm3996_vm13, %v3963_v50  ;;  %v3980_v39 = vsel %vm97_vm0, %v3963_v50, %v3965_v32 }
 0x631   :  { %4003 = vst.msk [vmem:[%s11816_s7 + $0x68] sm:$0xff] %vm3998_vm11, %v3980_v39 }
 0x633   :  { %v4019_v16 = vpop.permute.xlu0 %4018  ;;  %v4021_v22 = vpop.permute.xlu1 %4020 }
 0x634   :  { %4057 = vst.msk [vmem:[%s11816_s7 + $0x68] sm:$0xff] %vm4052_vm12, %v4019_v16  ;;  %v4036_v60 = vsel %vm3998_vm11, %v4019_v16, %v4021_v22 }
 0x635   :  { %4058 = vst [vmem:[%s11816_s7 + $0x70] sm:$0xff] %v4036_v60 }
 0x637   :  { %v3900_v1 = vpop.permute.xlu0 %3899  ;;  %v3902_v61 = vpop.permute.xlu1 %3901 }
 0x638   :  { %3936 = vst.msk [vmem:[%s11816_s7 + $0x80] sm:$0xff] %vm3929_vm10, %v3900_v1  ;;  %v3914_v3 = vsel %vm3863_vm9, %v3900_v1, %v3902_v61 }
 0x639   :  { %3937 = vst.msk [vmem:[%s11816_s7 + $0x88] sm:$0xff] %vm97_vm0, %v3914_v3 }
 0x63b   :  { %v3967_v58 = vpop.permute.xlu0 %3966  ;;  %v3969_v20 = vpop.permute.xlu1 %3968 }
 0x63c   :  { %4004 = vst.msk [vmem:[%s11816_s7 + $0x88] sm:$0xff] %vm3996_vm13, %v3967_v58  ;;  %v3981_v27 = vsel %vm97_vm0, %v3967_v58, %v3969_v20 }
 0x63d   :  { %4005 = vst.msk [vmem:[%s11816_s7 + $0x90] sm:$0xff] %vm3998_vm11, %v3981_v27 }
 0x63f   :  { %v4023_v26 = vpop.permute.xlu0 %4022  ;;  %v4025_v2 = vpop.permute.xlu1 %4024 }
 0x640   :  { %4059 = vst.msk [vmem:[%s11816_s7 + $0x90] sm:$0xff] %vm4052_vm12, %v4023_v26  ;;  %v4037_v57 = vsel %vm3998_vm11, %v4023_v26, %v4025_v2 }
 0x641   :  { %4060 = vst [vmem:[%s11816_s7 + $0x98] sm:$0xff] %v4037_v57 }
 0x643   :  { %v3904_v29 = vpop.permute.xlu0 %3903  ;;  %v3906_v40 = vpop.permute.xlu1 %3905 }
 0x644   :  { %3938 = vst.msk [vmem:[%s11816_s7 + $0xa8] sm:$0xff] %vm3929_vm10, %v3904_v29  ;;  %v3915_v18 = vsel %vm3863_vm9, %v3904_v29, %v3906_v40 }
 0x645   :  { %3939 = vst.msk [vmem:[%s11816_s7 + $0xb0] sm:$0xff] %vm97_vm0, %v3915_v18 }
 0x647   :  { %v3971_v51 = vpop.permute.xlu0 %3970  ;;  %v3973_v54 = vpop.permute.xlu1 %3972 }
 0x648   :  { %4006 = vst.msk [vmem:[%s11816_s7 + $0xb0] sm:$0xff] %vm3996_vm13, %v3971_v51  ;;  %v3982_v56 = vsel %vm97_vm0, %v3971_v51, %v3973_v54 }
 0x649   :  { %4007 = vst.msk [vmem:[%s11816_s7 + $0xb8] sm:$0xff] %vm3998_vm11, %v3982_v56 }
 0x64b   :  { %v4027_v28 = vpop.permute.xlu0 %4026  ;;  %v4029_v12 = vpop.permute.xlu1 %4028 }
 0x64c   :  { %4061 = vst.msk [vmem:[%s11816_s7 + $0xb8] sm:$0xff] %vm4052_vm12, %v4027_v28  ;;  %v4038_v44 = vsel %vm3998_vm11, %v4027_v28, %v4029_v12 }
 0x64d   :  { %4062 = vst [vmem:[%s11816_s7 + $0xc0] sm:$0xff] %v4038_v44 }
 0x64f   :  { %v3908_v7 = vpop.permute.xlu0 %3907  ;;  %v3910_v45 = vpop.permute.xlu1 %3909 }
 0x650   :  { %3940 = vst.msk [vmem:[%s11816_s7 + $0xd0] sm:$0xff] %vm3929_vm10, %v3908_v7  ;;  %v3916_v10 = vsel %vm3863_vm9, %v3908_v7, %v3910_v45 }
 0x651   :  { %3941 = vst.msk [vmem:[%s11816_s7 + $0xd8] sm:$0xff] %vm97_vm0, %v3916_v10 }
 0x653   :  { %v3975_v63 = vpop.permute.xlu0 %3974  ;;  %v3977_v8 = vpop.permute.xlu1 %3976 }
 0x654   :  { %4008 = vst.msk [vmem:[%s11816_s7 + $0xd8] sm:$0xff] %vm3996_vm13, %v3975_v63  ;;  %v3983_v14 = vsel %vm97_vm0, %v3975_v63, %v3977_v8 }
 0x655   :  { %4009 = vst.msk [vmem:[%s11816_s7 + $0xe0] sm:$0xff] %vm3998_vm11, %v3983_v14 }
 0x657   :  { %v4031_v5 = vpop.permute.xlu0 %4030  ;;  %v4033_v59 = vpop.permute.xlu1 %4032 }
 0x658   :  { %4063 = vst.msk [vmem:[%s11816_s7 + $0xe0] sm:$0xff] %vm4052_vm12, %v4031_v5  ;;  %v4039_v38 = vsel %vm3998_vm11, %v4031_v5, %v4033_v59 }
 0x659   :  { %4064 = vst [vmem:[%s11816_s7 + $0xe8] sm:$0xff] %v4039_v38 }
 0x69a   :  { %v6071_v15 = vpop.f32.mrb[24].mxu0  ;;  %v6449_v52 = vpop.f32.mrb[24].mxu1 }
 0x69b   :  { %8541 = vtanh.f32 %v6071_v15  ;;  %v6073_v43 = vpop.f32.mrb[25].mxu0  ;;  %v6451_v35 = vpop.f32.mrb[25].mxu1 }
 0x69c   :  { %v6075_v47 = vpop.f32.mrb[26].mxu0  ;;  %v6453_v4 = vpop.f32.mrb[26].mxu1  ;;  %8543 = vtanh.f32 %v6073_v43 }
 0x69d   :  { %v6077_v19 = vpop.f32.mrb[27].mxu0  ;;  %v6455_v21 = vpop.f32.mrb[27].mxu1  ;;  %8545 = vtanh.f32 %v6449_v52 }
 0x69e   :  { %8547 = vtanh.f32 %v6075_v47 }
 0x69f   :  { %8549 = vtanh.f32 %v6451_v35 }
 0x6a0   :  { %8551 = vtanh.f32 %v6077_v19 }
 0x6a2   :  { %v6081_v6 = vpop.f32.mrb[28].mxu0  ;;  %v6459_v30 = vpop.f32.mrb[28].mxu1 }
 0x6a3   :  { %8553 = vtanh.f32 %v6081_v6  ;;  %v6083_v48 = vpop.f32.mrb[29].mxu0  ;;  %v6461_v42 = vpop.f32.mrb[29].mxu1 }
 0x6a4   :  { %v6085_v41 = vpop.f32.mrb[30].mxu0  ;;  %v11569_v53 = vpop.f32.mrb[30].mxu1  ;;  %8555 = vtanh.f32 %v6083_v48 }
 0x6a5   :  { %v8542_v13 = vpop.eup %8541  ;;  %v6087_v37 = vpop.f32.mrb[31].mxu0  ;;  %8557 = vtanh.f32 %v6085_v41 }
 0x6a6   :  { %v11571_v17 = vpop.f32.mrb[31].mxu1  ;;  %7241 = vst [vmem:[%s11816_s7 + $0xf0] sm:$0xff] %v8542_v13  ;;  %6539 = vrot.lane.b32.xlu0 %v8542_v13, %s8638_s12  ;;  %v8544_v36 = vpop.eup %8543  ;;  %8559 = vtanh.f32 %v6087_v37 }
 0x6a7   :  { %v8546_v49 = vpop.eup %8545  ;;  %7242 = vst.msk [vmem:[%s11816_s7 + $0xf8] sm:$0xff] %vm3863_vm9, %v8544_v36  ;;  %6541 = vrot.lane.b32.xlu1 %v8544_v36, %s8638_s12  ;;  %8561 = vtanh.f32 %v6453_v4 }
 0x6a8   :  { %v8548_v23 = vpop.eup %8547  ;;  %8563 = vtanh.f32 %v6455_v21 }
 0x6a9   :  { %v8550_v9 = vpop.eup %8549  ;;  %7243 = vst [vmem:[%s11816_s7 + $0x118] sm:$0xff] %v8548_v23 }
 0x6aa   :  { %v6469_v25 = vpop.f32.mrb[32].mxu1  ;;  %6605 = vrot.lane.b32.xlu0 %v8546_v49, %s8639_s21  ;;  %v6091_v0 = vpop.f32.mrb[32].mxu0 }
 0x6ab   :  { %v8552_v24 = vpop.eup %8551  ;;  %v6093_v33 = vpop.f32.mrb[33].mxu0  ;;  %8565 = vtanh.f32 %v6091_v0  ;;  %6607 = vrot.lane.b32.xlu1 %v8550_v9, %s8639_s21 }
 0x6ac   :  { %v6471_v62 = vpop.f32.mrb[33].mxu1  ;;  %7244 = vst.msk [vmem:[%s11816_s7 + $0x120] sm:$0xff] %vm3863_vm9, %v8552_v24  ;;  %v6095_v11 = vpop.f32.mrb[34].mxu0  ;;  %8567 = vtanh.f32 %v6093_v33 }
 0x6ad   :  { %v6473_v55 = vpop.f32.mrb[34].mxu1  ;;  %v8554_v34 = vpop.eup %8553  ;;  %8569 = vtanh.f32 %v6095_v11 }
 0x6ae   :  { %v6097_v31 = vpop.f32.mrb[35].mxu0  ;;  %v6475_v46 = vpop.f32.mrb[35].mxu1  ;;  %7245 = vst [vmem:[%s11816_s7 + $0x140] sm:$0xff] %v8554_v34  ;;  %6659 = vrot.lane.b32.xlu0 %v8546_v49, %s8640_s3 }
 0x6af   :  { %v8556_v50 = vpop.eup %8555  ;;  %6661 = vrot.lane.b32.xlu1 %v8550_v9, %s8640_s3  ;;  %8571 = vtanh.f32 %v6097_v31 }
 0x6b0   :  { %7246 = vst.msk [vmem:[%s11816_s7 + $0x148] sm:$0xff] %vm3863_vm9, %v8556_v50  ;;  %v8558_v32 = vpop.eup %8557  ;;  %8573 = vtanh.f32 %v6459_v30 }
 0x6b1   :  { %7247 = vst [vmem:[%s11816_s7 + $0x168] sm:$0xff] %v8558_v32  ;;  %v8560_v39 = vpop.eup %8559  ;;  %8575 = vtanh.f32 %v6461_v42 }
 0x6b2   :  { %6543 = vrot.lane.b32.xlu0 %v8548_v23, %s8638_s12  ;;  %v8562_v16 = vpop.eup %8561  ;;  %7248 = vst.msk [vmem:[%s11816_s7 + $0x170] sm:$0xff] %vm3863_vm9, %v8560_v39  ;;  %8577 = vtanh.f32 %v11569_v53 }
 0x6b3   :  { %6545 = vrot.lane.b32.xlu1 %v8552_v24, %s8638_s12  ;;  %v8564_v22 = vpop.eup %8563  ;;  %8579 = vtanh.f32 %v11571_v17 }
 0x6b4   :  { %8581 = vtanh.f32 %v6469_v25 }
 0x6b5   :  { %v8566_v60 = vpop.eup %8565  ;;  %8583 = vtanh.f32 %v6471_v62 }
 0x6b6   :  { %6609 = vrot.lane.b32.xlu0 %v8562_v16, %s8639_s21  ;;  %v8568_v1 = vpop.eup %8567  ;;  %7249 = vst [vmem:[%s11816_s7 + $0x190] sm:$0xff] %v8566_v60  ;;  %8585 = vtanh.f32 %v6473_v55 }
 0x6b7   :  { %7250 = vst.msk [vmem:[%s11816_s7 + $0x198] sm:$0xff] %vm3863_vm9, %v8568_v1  ;;  %6611 = vrot.lane.b32.xlu1 %v8564_v22, %s8639_s21  ;;  %v8570_v61 = vpop.eup %8569  ;;  %8587 = vtanh.f32 %v6475_v46 }
 0x6b8   :  { %7251 = vst [vmem:[%s11816_s7 + $0x1b8] sm:$0xff] %v8570_v61 }
 0x6b9   :  { %v8572_v3 = vpop.eup %8571 }
 0x6ba   :  { %6663 = vrot.lane.b32.xlu0 %v8562_v16, %s8640_s3  ;;  %7252 = vst.msk [vmem:[%s11816_s7 + $0x1c0] sm:$0xff] %vm3863_vm9, %v8572_v3  ;;  %v8574_v58 = vpop.eup %8573 }
 0x6bb   :  { %6665 = vrot.lane.b32.xlu1 %v8564_v22, %s8640_s3  ;;  %v8576_v20 = vpop.eup %8575 }
 0x6bc   :  { %v8578_v27 = vpop.eup %8577 }
 0x6bd   :  { %v8580_v26 = vpop.eup %8579 }
 0x6be   :  { %6547 = vrot.lane.b32.xlu0 %v8554_v34, %s8638_s12  ;;  %v8582_v2 = vpop.eup %8581 }
 0x6bf   :  { %6549 = vrot.lane.b32.xlu1 %v8556_v50, %s8638_s12  ;;  %v8584_v57 = vpop.eup %8583 }
 0x6c0   :  { %v8586_v29 = vpop.eup %8585 }
 0x6c1   :  { %v8588_v40 = vpop.eup %8587 }
 0x6c2   :  { %6613 = vrot.lane.b32.xlu0 %v8574_v58, %s8639_s21 }
 0x6c3   :  { %6615 = vrot.lane.b32.xlu1 %v8576_v20, %s8639_s21 }
 0x6c6   :  { %6667 = vrot.lane.b32.xlu0 %v8574_v58, %s8640_s3 }
 0x6c7   :  { %6669 = vrot.lane.b32.xlu1 %v8576_v20, %s8640_s3 }
 0x6ca   :  { %6551 = vrot.lane.b32.xlu0 %v8558_v32, %s8638_s12 }
 0x6cb   :  { %6553 = vrot.lane.b32.xlu1 %v8560_v39, %s8638_s12 }
 0x6ce   :  { %6617 = vrot.lane.b32.xlu0 %v8578_v27, %s8639_s21 }
 0x6cf   :  { %6619 = vrot.lane.b32.xlu1 %v8580_v26, %s8639_s21 }
 0x6d2   :  { %6671 = vrot.lane.b32.xlu0 %v8578_v27, %s8640_s3 }
 0x6d3   :  { %6673 = vrot.lane.b32.xlu1 %v8580_v26, %s8640_s3 }
 0x6d6   :  { %6555 = vrot.lane.b32.xlu0 %v8566_v60, %s8638_s12 }
 0x6d7   :  { %6557 = vrot.lane.b32.xlu1 %v8568_v1, %s8638_s12 }
 0x6da   :  { %6621 = vrot.lane.b32.xlu0 %v8582_v2, %s8639_s21 }
 0x6db   :  { %6623 = vrot.lane.b32.xlu1 %v8584_v57, %s8639_s21 }
 0x6de   :  { %6675 = vrot.lane.b32.xlu0 %v8582_v2, %s8640_s3 }
 0x6df   :  { %6677 = vrot.lane.b32.xlu1 %v8584_v57, %s8640_s3 }
 0x6e2   :  { %6559 = vrot.lane.b32.xlu0 %v8570_v61, %s8638_s12 }
 0x6e3   :  { %6561 = vrot.lane.b32.xlu1 %v8572_v3, %s8638_s12 }
 0x6e6   :  { %6625 = vrot.lane.b32.xlu0 %v8586_v29, %s8639_s21 }
 0x6e7   :  { %6627 = vrot.lane.b32.xlu1 %v8588_v40, %s8639_s21 }
 0x6ea   :  { %6679 = vrot.lane.b32.xlu0 %v8586_v29, %s8640_s3 }
 0x6eb   :  { %6681 = vrot.lane.b32.xlu1 %v8588_v40, %s8640_s3 }
 0x718   :  { %v6540_v18 = vpop.permute.xlu0 %6539 }
 0x719   :  { %7253 = vst.msk [vmem:[%s11816_s7 + $0xf8] sm:$0xff] %vm3929_vm10, %v6540_v18  ;;  %v6542_v51 = vpop.permute.xlu1 %6541 }
 0x71a   :  { %v6563_v54 = vsel %vm3863_vm9, %v6540_v18, %v6542_v51 }
 0x71b   :  { %7254 = vst.msk [vmem:[%s11816_s7 + $0x100] sm:$0xff] %vm97_vm0, %v6563_v54 }
 0x71c   :  { %v6606_v56 = vpop.permute.xlu0 %6605 }
 0x71d   :  { %7265 = vst.msk [vmem:[%s11816_s7 + $0x100] sm:$0xff] %vm3996_vm13, %v6606_v56  ;;  %v6608_v28 = vpop.permute.xlu1 %6607 }
 0x71e   :  { %v6629_v12 = vsel %vm97_vm0, %v6606_v56, %v6608_v28 }
 0x71f   :  { %7266 = vst.msk [vmem:[%s11816_s7 + $0x108] sm:$0xff] %vm3998_vm11, %v6629_v12 }
 0x720   :  { %v6660_v44 = vpop.permute.xlu0 %6659 }
 0x721   :  { %7277 = vst.msk [vmem:[%s11816_s7 + $0x108] sm:$0xff] %vm4052_vm12, %v6660_v44  ;;  %v6662_v7 = vpop.permute.xlu1 %6661 }
 0x722   :  { %v6683_v45 = vsel %vm3998_vm11, %v6660_v44, %v6662_v7 }
 0x723   :  { %7278 = vst [vmem:[%s11816_s7 + $0x110] sm:$0xff] %v6683_v45 }
 0x724   :  { %v6544_v10 = vpop.permute.xlu0 %6543 }
 0x725   :  { %7255 = vst.msk [vmem:[%s11816_s7 + $0x120] sm:$0xff] %vm3929_vm10, %v6544_v10  ;;  %v6546_v63 = vpop.permute.xlu1 %6545 }
 0x726   :  { %v6564_v8 = vsel %vm3863_vm9, %v6544_v10, %v6546_v63 }
 0x727   :  { %7256 = vst.msk [vmem:[%s11816_s7 + $0x128] sm:$0xff] %vm97_vm0, %v6564_v8 }
 0x728   :  { %v6610_v14 = vpop.permute.xlu0 %6609 }
 0x729   :  { %7267 = vst.msk [vmem:[%s11816_s7 + $0x128] sm:$0xff] %vm3996_vm13, %v6610_v14  ;;  %v6612_v5 = vpop.permute.xlu1 %6611 }
 0x72a   :  { %v6630_v59 = vsel %vm97_vm0, %v6610_v14, %v6612_v5 }
 0x72b   :  { %7268 = vst.msk [vmem:[%s11816_s7 + $0x130] sm:$0xff] %vm3998_vm11, %v6630_v59 }
 0x72c   :  { %v6664_v38 = vpop.permute.xlu0 %6663 }
 0x72d   :  { %7279 = vst.msk [vmem:[%s11816_s7 + $0x130] sm:$0xff] %vm4052_vm12, %v6664_v38  ;;  %v6666_v15 = vpop.permute.xlu1 %6665 }
 0x72e   :  { %v6684_v52 = vsel %vm3998_vm11, %v6664_v38, %v6666_v15 }
 0x72f   :  { %7280 = vst [vmem:[%s11816_s7 + $0x138] sm:$0xff] %v6684_v52 }
 0x730   :  { %v6548_v43 = vpop.permute.xlu0 %6547 }
 0x731   :  { %7257 = vst.msk [vmem:[%s11816_s7 + $0x148] sm:$0xff] %vm3929_vm10, %v6548_v43  ;;  %v6550_v35 = vpop.permute.xlu1 %6549 }
 0x732   :  { %v6565_v47 = vsel %vm3863_vm9, %v6548_v43, %v6550_v35 }
 0x733   :  { %7258 = vst.msk [vmem:[%s11816_s7 + $0x150] sm:$0xff] %vm97_vm0, %v6565_v47 }
 0x734   :  { %v6614_v4 = vpop.permute.xlu0 %6613 }
 0x735   :  { %7269 = vst.msk [vmem:[%s11816_s7 + $0x150] sm:$0xff] %vm3996_vm13, %v6614_v4  ;;  %v6616_v19 = vpop.permute.xlu1 %6615 }
 0x736   :  { %v6631_v21 = vsel %vm97_vm0, %v6614_v4, %v6616_v19 }
 0x737   :  { %7270 = vst.msk [vmem:[%s11816_s7 + $0x158] sm:$0xff] %vm3998_vm11, %v6631_v21 }
 0x738   :  { %v6668_v6 = vpop.permute.xlu0 %6667 }
 0x739   :  { %7281 = vst.msk [vmem:[%s11816_s7 + $0x158] sm:$0xff] %vm4052_vm12, %v6668_v6  ;;  %v6670_v30 = vpop.permute.xlu1 %6669 }
 0x73a   :  { %v6685_v48 = vsel %vm3998_vm11, %v6668_v6, %v6670_v30 }
 0x73b   :  { %7282 = vst [vmem:[%s11816_s7 + $0x160] sm:$0xff] %v6685_v48 }
 0x73c   :  { %v6552_v42 = vpop.permute.xlu0 %6551 }
 0x73d   :  { %7259 = vst.msk [vmem:[%s11816_s7 + $0x170] sm:$0xff] %vm3929_vm10, %v6552_v42  ;;  %v6554_v41 = vpop.permute.xlu1 %6553 }
 0x73e   :  { %v6566_v53 = vsel %vm3863_vm9, %v6552_v42, %v6554_v41 }
 0x73f   :  { %7260 = vst.msk [vmem:[%s11816_s7 + $0x178] sm:$0xff] %vm97_vm0, %v6566_v53 }
 0x740   :  { %v6618_v13 = vpop.permute.xlu0 %6617 }
 0x741   :  { %7271 = vst.msk [vmem:[%s11816_s7 + $0x178] sm:$0xff] %vm3996_vm13, %v6618_v13  ;;  %v6620_v37 = vpop.permute.xlu1 %6619 }
 0x742   :  { %v6632_v17 = vsel %vm97_vm0, %v6618_v13, %v6620_v37 }
 0x743   :  { %7272 = vst.msk [vmem:[%s11816_s7 + $0x180] sm:$0xff] %vm3998_vm11, %v6632_v17 }
 0x744   :  { %v6672_v36 = vpop.permute.xlu0 %6671 }
 0x745   :  { %7283 = vst.msk [vmem:[%s11816_s7 + $0x180] sm:$0xff] %vm4052_vm12, %v6672_v36  ;;  %v6674_v49 = vpop.permute.xlu1 %6673 }
 0x746   :  { %v6686_v23 = vsel %vm3998_vm11, %v6672_v36, %v6674_v49 }
 0x747   :  { %7284 = vst [vmem:[%s11816_s7 + $0x188] sm:$0xff] %v6686_v23 }
 0x748   :  { %v6556_v9 = vpop.permute.xlu0 %6555 }
 0x749   :  { %7261 = vst.msk [vmem:[%s11816_s7 + $0x198] sm:$0xff] %vm3929_vm10, %v6556_v9  ;;  %v6558_v25 = vpop.permute.xlu1 %6557 }
 0x74a   :  { %v6567_v0 = vsel %vm3863_vm9, %v6556_v9, %v6558_v25 }
 0x74b   :  { %7262 = vst.msk [vmem:[%s11816_s7 + $0x1a0] sm:$0xff] %vm97_vm0, %v6567_v0 }
 0x74c   :  { %v6622_v24 = vpop.permute.xlu0 %6621 }
 0x74d   :  { %7273 = vst.msk [vmem:[%s11816_s7 + $0x1a0] sm:$0xff] %vm3996_vm13, %v6622_v24  ;;  %v6624_v33 = vpop.permute.xlu1 %6623 }
 0x74e   :  { %v6633_v62 = vsel %vm97_vm0, %v6622_v24, %v6624_v33 }
 0x74f   :  { %7274 = vst.msk [vmem:[%s11816_s7 + $0x1a8] sm:$0xff] %vm3998_vm11, %v6633_v62 }
 0x750   :  { %v6676_v11 = vpop.permute.xlu0 %6675 }
 0x751   :  { %7285 = vst.msk [vmem:[%s11816_s7 + $0x1a8] sm:$0xff] %vm4052_vm12, %v6676_v11  ;;  %v6678_v55 = vpop.permute.xlu1 %6677 }
 0x752   :  { %v6687_v34 = vsel %vm3998_vm11, %v6676_v11, %v6678_v55 }
 0x753   :  { %7286 = vst [vmem:[%s11816_s7 + $0x1b0] sm:$0xff] %v6687_v34 }
 0x754   :  { %v6560_v31 = vpop.permute.xlu0 %6559 }
 0x755   :  { %7263 = vst.msk [vmem:[%s11816_s7 + $0x1c0] sm:$0xff] %vm3929_vm10, %v6560_v31  ;;  %v6562_v46 = vpop.permute.xlu1 %6561 }
 0x756   :  { %v6568_v50 = vsel %vm3863_vm9, %v6560_v31, %v6562_v46 }
 0x757   :  { %7264 = vst.msk [vmem:[%s11816_s7 + $0x1c8] sm:$0xff] %vm97_vm0, %v6568_v50 }
 0x758   :  { %v6626_v32 = vpop.permute.xlu0 %6625 }
 0x759   :  { %7275 = vst.msk [vmem:[%s11816_s7 + $0x1c8] sm:$0xff] %vm3996_vm13, %v6626_v32  ;;  %v6628_v39 = vpop.permute.xlu1 %6627 }
 0x75a   :  { %v6634_v16 = vsel %vm97_vm0, %v6626_v32, %v6628_v39 }
 0x75b   :  { %7276 = vst.msk [vmem:[%s11816_s7 + $0x1d0] sm:$0xff] %vm3998_vm11, %v6634_v16 }
 0x75c   :  { %v6680_v22 = vpop.permute.xlu0 %6679 }
 0x75d   :  { %7287 = vst.msk [vmem:[%s11816_s7 + $0x1d0] sm:$0xff] %vm4052_vm12, %v6680_v22  ;;  %v6682_v60 = vpop.permute.xlu1 %6681 }
 0x75e   :  { %v6688_v1 = vsel %vm3998_vm11, %v6680_v22, %v6682_v60 }
 0x75f   :  { %7288 = vst [vmem:[%s11816_s7 + $0x1d8] sm:$0xff] %v6688_v1 }

</bundles_post_ra>
